<compile_context>
chip_gen: v5e
topology: v5e:2x2
jax: 0.10.0
libtpu: 0.0.40
codegen_flags: <defaults>
</compile_context>

<pallas_src>
import functools

import jax
import jax.numpy as jnp
from jax.experimental import pallas as pl
from jax.experimental.pallas import tpu as pltpu


# ----------------------------------------------------------------------------
# Pallas kernel: lane-folded partial sums of softmax cross-entropy
# ----------------------------------------------------------------------------
def _ce_partial_kernel(tgt_ref, logits_ref, out_ref):
    """Accumulate per-position CE contributions, folded into a lane-dense block.

    logits_ref : (bb, C, tile_n)   native dtype (bf16/f32), cast per tile
    tgt_ref    : (bb, 1, tile_n)   int32 target codes
    out_ref    : (bb, 1, tile_n)   f32 accumulator, VMEM-resident across the
                 n grid axis (same block index every n step); the wrapper sums
                 it to a scalar afterwards.
    """
    n_idx = pl.program_id(1)

    @pl.when(n_idx == 0)
    def _init():
        out_ref[...] = jnp.zeros_like(out_ref)

    # Per-tile upcast in VMEM: no extra HBM round trip for bf16 inputs.
    x = logits_ref[...].astype(jnp.float32)          # (bb, C, tile_n)
    t = tgt_ref[...]                                 # (bb, 1, tile_n) int32

    # Hoisted class iota (C elements only); the compare broadcasts it across
    # batch and lane dims.  Target codes are assumed in [0, C) (out-of-range
    # codes would silently contribute a 0 target logit, unlike torch).
    cls = jax.lax.broadcasted_iota(jnp.int32, (1, x.shape[1], 1), 1)
    mask = cls == t                                  # (bb, C, tile_n)

    # Fused stable pass:  CE = lse - x[target]
    #   = (log(sum exp(x - m)) + m) - ((x[target] - m) + m)
    #   = log(sum exp(xm)) - sum(where(mask, xm, 0)),   xm = x - m
    m = jnp.max(x, axis=1, keepdims=True)            # (bb, 1, tile_n)
    xm = x - m
    # TODO(synk): on v6e/v7x the exp could run in bf16 (~2x EUP throughput);
    # kept in f32 so the identical kernel is exact and legal on v5e.
    sum_exp = jnp.sum(jnp.exp(xm), axis=1, keepdims=True)
    tgt_xm = jnp.sum(jnp.where(mask, xm, 0.0), axis=1, keepdims=True)

    out_ref[...] += jnp.log(sum_exp) - tgt_xm        # cheap (bb,1,tile_n) add


def _pick_tiles(B, C, N, itemsize, block_bytes_budget):
    """Pick (bb, tile_n).

    tile_n: largest lane-dense (multiple-of-128) divisor of N whose logits
    block fits the per-buffer budget; falls back to the full extent for small
    or awkward N.  When the position axis fits in a single tile, grow the
    batch block bb to amortize per-grid-step overhead.
    """
    tile_n = None
    for cand in (4096, 2048, 1024, 512, 256, 128):
        if N % cand == 0 and C * cand * itemsize <= block_bytes_budget:
            tile_n = cand
            break
    if tile_n is None:
        tile_n = N   # full-extent fallback (always a legal block size)

    bb = 1
    if tile_n == N:  # single n-tile: block batches together to amortize overhead
        for cand in range(B, 0, -1):
            if B % cand == 0 and cand * C * tile_n * itemsize <= block_bytes_budget:
                bb = cand
                break
    return bb, tile_n


@functools.partial(jax.jit, static_argnames=("block_bytes_budget",))
def pallas_softmax_cross_entropy_mean(logits, targets, *,
                                      block_bytes_budget=12 * 1024 * 1024):
    """mean_{b,n} CE(logits[b, :, n], targets[b, n]);  logits: (B, C, N), targets: (B, N)."""
    B, C, N = logits.shape
    targets = targets.reshape(B, 1, N).astype(jnp.int32)

    itemsize = jnp.dtype(logits.dtype).itemsize
    bb, tile_n = _pick_tiles(B, C, N, itemsize, block_bytes_budget)
    grid = (B // bb, N // tile_n)

    # VMEM budget from the actual (double-buffered) block sizes, plus headroom.
    logits_block = bb * C * tile_n * itemsize
    side_blocks = 2 * bb * tile_n * 4          # targets block + output block
    vmem_limit = int(min(max(2 * (logits_block + side_blocks) + (4 << 20),
                             8 << 20), 64 << 20))

    partial = pl.pallas_call(
        _ce_partial_kernel,
        out_shape=jax.ShapeDtypeStruct((B, 1, tile_n), jnp.float32),
        grid=grid,
        in_specs=[
            pl.BlockSpec((bb, 1, tile_n), lambda b, n: (b, 0, n)),   # target codes
            pl.BlockSpec((bb, C, tile_n), lambda b, n: (b, 0, n)),   # logits (native dtype)
        ],
        # Output block resident across the n (reduction) axis → VMEM accumulator.
        out_specs=pl.BlockSpec((bb, 1, tile_n), lambda b, n: (b, 0, 0)),
        compiler_params=pltpu.CompilerParams(
            # TODO(synk): on v7x, pltpu.CORE_PARALLEL on the batch axis would pin
            # both TensorCores explicitly; "parallel" kept for cross-chip safety.
            dimension_semantics=("parallel", "arbitrary"),
            vmem_limit_bytes=vmem_limit,
        ),
    )(targets, logits)

    # Tiny finalize reduce (B * tile_n elements) done by XLA.
    return jnp.sum(partial) / jnp.float32(B * N)


# ----------------------------------------------------------------------------
# ReconstructionLoss_Stage1 forward
# ----------------------------------------------------------------------------
class ReconstructionLossStage1:
    """JAX/Pallas port of ReconstructionLoss_Stage1 (forward pass)."""

    def __init__(self, config):
        loss_config = config["losses"] if isinstance(config, dict) else config.losses
        self.quantizer_weight = (loss_config["quantizer_weight"]
                                 if isinstance(loss_config, dict)
                                 else loss_config.quantizer_weight)
        self.target_codebook_size = 1024

    def forward(self, target_codes, reconstructions, quantizer_loss):
        return self._forward_generator(target_codes, reconstructions, quantizer_loss)

    __call__ = forward

    def _forward_generator(self, target_codes, reconstructions, quantizer_loss):
        batch_size = reconstructions.shape[0]
        logits = reconstructions.reshape(batch_size, self.target_codebook_size, -1)
        targets = target_codes.reshape(batch_size, -1)

        # TODO(synk): pl.pallas_call has no autodiff rule; for training, wrap the
        # CE in jax.custom_vjp with a (softmax - one_hot) backward kernel.
        reconstruction_loss = pallas_softmax_cross_entropy_mean(logits, targets)

        weighted_quantizer = self.quantizer_weight * quantizer_loss["quantizer_loss"]
        total_loss = reconstruction_loss + weighted_quantizer

        sg = jax.lax.stop_gradient  # mirrors torch's .detach()
        loss_dict = dict(
            total_loss=sg(total_loss),
            reconstruction_loss=sg(reconstruction_loss),
            quantizer_loss=sg(weighted_quantizer),
            commitment_loss=sg(quantizer_loss["commitment_loss"]),
            codebook_loss=sg(quantizer_loss["codebook_loss"]),
        )
        return total_loss, loss_dict


# ----------------------------------------------------------------------------
def _ref_ce_mean(logits, targets):
    logp = jax.nn.log_softmax(logits.astype(jnp.float32), axis=1)
    return -jnp.mean(jnp.take_along_axis(logp, targets[:, None, :], axis=1))


if __name__ == "__main__":
    key = jax.random.PRNGKey(0)
    k_rec, k_tgt, k2, k3 = jax.random.split(key, 4)

    # --- Test 1: module forward, tiny 4x4 token grid, f32 (small-N path) -----
    B, C, H, W = 2, 1024, 4, 4
    reconstructions = jax.random.normal(k_rec, (B, C, H, W), jnp.float32)
    target_codes = jax.random.randint(k_tgt, (B, H, W), 0, C, dtype=jnp.int32)
    quantizer_loss = dict(
        quantizer_loss=jnp.float32(0.05),
        commitment_loss=jnp.float32(0.02),
        codebook_loss=jnp.float32(0.03),
    )
    config = dict(losses=dict(quantizer_weight=1.0))

    loss_mod = ReconstructionLossStage1(config)
    total_loss, loss_dict = loss_mod.forward(target_codes, reconstructions, quantizer_loss)
    jax.block_until_ready(total_loss)

    ref_ce = _ref_ce_mean(reconstructions.reshape(B, C, -1), target_codes.reshape(B, -1))
    ref_total = ref_ce + 1.0 * quantizer_loss["quantizer_loss"]
    assert jnp.allclose(total_loss, ref_total, rtol=1e-4, atol=1e-5), (total_loss, ref_total)
    assert jnp.allclose(loss_dict["reconstruction_loss"], ref_ce, rtol=1e-4, atol=1e-5)

    # --- Test 2: bf16 ingest, lane-dense 16x16 grid (single-tile path) -------
    N2 = 256
    logits_bf16 = jax.random.normal(k2, (B, C, N2), jnp.bfloat16)
    tgt2 = jax.random.randint(k_tgt, (B, N2), 0, C, dtype=jnp.int32)
    out2 = pallas_softmax_cross_entropy_mean(logits_bf16, tgt2)
    jax.block_until_ready(out2)
    ref2 = _ref_ce_mean(logits_bf16, tgt2)
    assert jnp.allclose(out2, ref2, rtol=1e-4, atol=1e-5), (out2, ref2)

    # --- Test 3: multi-tile reduction path (small budget forces 2 n-tiles) ---
    N3 = 512
    logits3 = jax.random.normal(k3, (B, C, N3), jnp.float32)
    tgt3 = jax.random.randint(k2, (B, N3), 0, C, dtype=jnp.int32)
    out3 = pallas_softmax_cross_entropy_mean(logits3, tgt3,
                                             block_bytes_budget=1 * 1024 * 1024)
    jax.block_until_ready(out3)
    ref3 = _ref_ce_mean(logits3, tgt3)
    assert jnp.allclose(out3, ref3, rtol=1e-4, atol=1e-5), (out3, ref3)

    print("KERNEL_OK")
</pallas_src>

<mosaic_0001>
module attributes {stable_mosaic.version = 11 : i64} {
  func.func @_ce_partial_kernel(%arg0: i32, %arg1: i32, %arg2: memref<2x1x16xi32, #tpu.memory_space<vmem>>, %arg3: memref<2x1024x16xf32, #tpu.memory_space<vmem>>, %arg4: memref<2x1x16xf32, #tpu.memory_space<vmem>>) attributes {dimension_semantics = [#tpu.dimension_semantics<parallel>, #tpu.dimension_semantics<arbitrary>], iteration_bounds = array<i64: 1, 1>, scalar_prefetch = 0 : i64, scratch_operands = 0 : i64, tpu.core_type = #tpu.core_type<tc>, window_params = [{transform_indices = @transform_0, window_bounds = array<i64: 2, 1, 16>}, {transform_indices = @transform_1, window_bounds = array<i64: 2, 1024, 16>}, {transform_indices = @transform_2, window_bounds = array<i64: 2, 1, 16>}]} {
    %c0_i32 = arith.constant 0 : i32
    %0 = arith.cmpi eq, %arg1, %c0_i32 : i32
    %1 = arith.extui %0 : i1 to i32
    %c0_i32_0 = arith.constant 0 : i32
    %2 = arith.cmpi ne, %1, %c0_i32_0 : i32
    scf.if %2 {
      %cst_15 = arith.constant 0.000000e+00 : f32
      %25 = vector.broadcast %cst_15 : f32 to vector<2x1x16xf32>
      %c0_16 = arith.constant 0 : index
      %c0_17 = arith.constant 0 : index
      %c0_18 = arith.constant 0 : index
      %26 = vector.load %arg4[%c0_16, %c0_17, %c0_18] : memref<2x1x16xf32, #tpu.memory_space<vmem>>, vector<2x1x16xf32>
      tpu.vector_store %arg4[%c0_16, %c0_17, %c0_18], %25 {strides = array<i32>} : memref<2x1x16xf32, #tpu.memory_space<vmem>>, vector<2x1x16xf32>,
    } else {
    }
    %c0 = arith.constant 0 : index
    %c0_1 = arith.constant 0 : index
    %c0_2 = arith.constant 0 : index
    %3 = vector.load %arg3[%c0, %c0_1, %c0_2] : memref<2x1024x16xf32, #tpu.memory_space<vmem>>, vector<2x1024x16xf32>
    %c0_3 = arith.constant 0 : index
    %c0_4 = arith.constant 0 : index
    %c0_5 = arith.constant 0 : index
    %4 = vector.load %arg2[%c0_3, %c0_4, %c0_5] : memref<2x1x16xi32, #tpu.memory_space<vmem>>, vector<2x1x16xi32>
    %5 = tpu.iota {dimensions = array<i32: 1>} : vector<1x1024x1xi32>
    %6 = vector.broadcast %5 : vector<1x1024x1xi32> to vector<2x1024x16xi32>
    %7 = vector.broadcast %4 : vector<2x1x16xi32> to vector<2x1024x16xi32>
    %8 = arith.cmpi eq, %6, %7 : vector<2x1024x16xi32>
    %cst = arith.constant dense<0xFF800000> : vector<2x16xf32>
    %9 = vector.multi_reduction <maximumf>, %3, %cst [1] : vector<2x1024x16xf32> to vector<2x16xf32>
    %10 = vector.shape_cast %9 : vector<2x16xf32> to vector<2x1x16xf32>
    %11 = vector.broadcast %10 : vector<2x1x16xf32> to vector<2x1024x16xf32>
    %12 = arith.subf %3, %11 : vector<2x1024x16xf32>
    %13 = math.exp %12 : vector<2x1024x16xf32>
    %cst_6 = arith.constant dense<0.000000e+00> : vector<2x16xf32>
    %14 = vector.multi_reduction <add>, %13, %cst_6 [1] : vector<2x1024x16xf32> to vector<2x16xf32>
    %15 = vector.shape_cast %14 : vector<2x16xf32> to vector<2x1x16xf32>
    %cst_7 = arith.constant 0.000000e+00 : f32
    %16 = vector.broadcast %cst_7 : f32 to vector<2x1024x16xf32>
    %17 = arith.select %8, %12, %16 : vector<2x1024x16xi1>, vector<2x1024x16xf32>
    %cst_8 = arith.constant dense<0.000000e+00> : vector<2x16xf32>
    %18 = vector.multi_reduction <add>, %17, %cst_8 [1] : vector<2x1024x16xf32> to vector<2x16xf32>
    %19 = vector.shape_cast %18 : vector<2x16xf32> to vector<2x1x16xf32>
    %c0_9 = arith.constant 0 : index
    %c0_10 = arith.constant 0 : index
    %c0_11 = arith.constant 0 : index
    %20 = vector.load %arg4[%c0_9, %c0_10, %c0_11] : memref<2x1x16xf32, #tpu.memory_space<vmem>>, vector<2x1x16xf32>
    %21 = math.log %15 : vector<2x1x16xf32>
    %22 = arith.subf %21, %19 : vector<2x1x16xf32>
    %23 = arith.addf %20, %22 : vector<2x1x16xf32>
    %c0_12 = arith.constant 0 : index
    %c0_13 = arith.constant 0 : index
    %c0_14 = arith.constant 0 : index
    %24 = vector.load %arg4[%c0_12, %c0_13, %c0_14] : memref<2x1x16xf32, #tpu.memory_space<vmem>>, vector<2x1x16xf32>
    tpu.vector_store %arg4[%c0_12, %c0_13, %c0_14], %23 {strides = array<i32>} : memref<2x1x16xf32, #tpu.memory_space<vmem>>, vector<2x1x16xf32>,
    return
  }
  func.func @transform_0(%arg0: i32, %arg1: i32) -> (i32, i32, i32) {
    %c0_i32 = arith.constant 0 : i32
    %c0_i32_0 = arith.constant 0 : i32
    return %arg0, %c0_i32, %arg1 : i32, i32, i32
  }
  func.func @transform_1(%arg0: i32, %arg1: i32) -> (i32, i32, i32) {
    %c0_i32 = arith.constant 0 : i32
    %c0_i32_0 = arith.constant 0 : i32
    return %arg0, %c0_i32, %arg1 : i32, i32, i32
  }
  func.func @transform_2(%arg0: i32, %arg1: i32) -> (i32, i32, i32) {
    %c0_i32 = arith.constant 0 : i32
    %c0_i32_0 = arith.constant 0 : i32
    %c0_i32_1 = arith.constant 0 : i32
    return %arg0, %c0_i32, %c0_i32_0 : i32, i32, i32
  }
}

</mosaic_0001>

<bundles_post_ra>
// kernel: pallas_softmax_cross_entropy_mean.1
= control target key start
LH: loop header
LB: loop body
LE: loop exit
PB: predicated region body
PF: predicated region fallthrough
CT: control target
= control target key end

     0   :  { %vm10564_vm0 = vcmask 122880   ;;  %v4048_v0 = vmov 0.0   ;;  %vm663_vm1 = vcmask 130048   ;;  %s10204_s2 = inlined_call_operand.vmem [shape: f32[2,1,16], index: 2, kind: output, shape index: {}]   ;;  %s10205_s0 = inlined_call_operand.vmem [shape: s32[2,1,16], index: 0, kind: input, shape index: {}]   ;;  %s10206_s1 = inlined_call_operand.vmem [shape: f32[2,1024,16], index: 1, kind: input, shape index: {}]  }
   0x1   :  { %16 = vst.msk [vmem:[%s10204_s2] sm:$0x1] %vm10564_vm0, %v4048_v0  ;;  %v18_v1 = vld [vmem:[%s10206_s1] sm:$0xff]  ;;  %v19_v2 = vld [vmem:[%s10206_s1 + $0x8] sm:$0xff]  ;;  %v20_v3 = vld [vmem:[%s10206_s1 + $0x10] sm:$0xff] }
   0x2   :  { %17 = vst.msk [vmem:[%s10204_s2 + $0x1] sm:$0x1] %vm10564_vm0, %v4048_v0  ;;  %v21_v4 = vld [vmem:[%s10206_s1 + $0x18] sm:$0xff]  ;;  %v664_v5 = vsel %vm663_vm1, %v18_v1, -inf  ;;  %v665_v6 = vsel %vm663_vm1, %v19_v2, -inf  ;;  %v666_v7 = vsel %vm663_vm1, %v20_v3, -inf }
   0x3   :  { %v668_v8 = vsel %vm663_vm1, %v21_v4, -inf  ;;  %v22_v9 = vld [vmem:[%s10206_s1 + $0x20] sm:$0xff]  ;;  %v23_v10 = vld [vmem:[%s10206_s1 + $0x28] sm:$0xff]  ;;  %v667_v11 = vmax.f32 %v664_v5, %v666_v7  ;;  %v24_v15 = vld [vmem:[%s10206_s1 + $0x30] sm:$0xff] }
   0x4   :  { %v669_v12 = vmax.f32 %v665_v6, %v668_v8  ;;  %v670_v13 = vsel %vm663_vm1, %v22_v9, -inf  ;;  %v672_v14 = vsel %vm663_vm1, %v23_v10, -inf  ;;  %v25_v16 = vld [vmem:[%s10206_s1 + $0x38] sm:$0xff]  ;;  %v674_v19 = vsel %vm663_vm1, %v24_v15, -inf  ;;  %v26_v21 = vld [vmem:[%s10206_s1 + $0x40] sm:$0xff]  ;;  %v27_v22 = vld [vmem:[%s10206_s1 + $0x48] sm:$0xff] }
   0x5   :  { %v671_v17 = vmax.f32 %v667_v11, %v670_v13  ;;  %v676_v20 = vsel %vm663_vm1, %v25_v16, -inf  ;;  %v678_v25 = vsel %vm663_vm1, %v26_v21, -inf  ;;  %v680_v26 = vsel %vm663_vm1, %v27_v22, -inf  ;;  %v28_v27 = vld [vmem:[%s10206_s1 + $0x50] sm:$0xff]  ;;  %v29_v28 = vld [vmem:[%s10206_s1 + $0x58] sm:$0xff]  ;;  %v30_v33 = vld [vmem:[%s10206_s1 + $0x60] sm:$0xff] }
   0x6   :  { %v673_v18 = vmax.f32 %v669_v12, %v672_v14  ;;  %v682_v31 = vsel %vm663_vm1, %v28_v27, -inf  ;;  %v684_v32 = vsel %vm663_vm1, %v29_v28, -inf  ;;  %v31_v34 = vld [vmem:[%s10206_s1 + $0x68] sm:$0xff]  ;;  %v686_v37 = vsel %vm663_vm1, %v30_v33, -inf  ;;  %v32_v39 = vld [vmem:[%s10206_s1 + $0x70] sm:$0xff]  ;;  %v33_v40 = vld [vmem:[%s10206_s1 + $0x78] sm:$0xff] }
   0x7   :  { %v675_v23 = vmax.f32 %v671_v17, %v674_v19  ;;  %v688_v38 = vsel %vm663_vm1, %v31_v34, -inf  ;;  %v690_v43 = vsel %vm663_vm1, %v32_v39, -inf  ;;  %v692_v44 = vsel %vm663_vm1, %v33_v40, -inf  ;;  %v34_v45 = vld [vmem:[%s10206_s1 + $0x80] sm:$0xff]  ;;  %v35_v46 = vld [vmem:[%s10206_s1 + $0x88] sm:$0xff]  ;;  %v36_v51 = vld [vmem:[%s10206_s1 + $0x90] sm:$0xff] }
   0x8   :  { %v677_v24 = vmax.f32 %v673_v18, %v676_v20  ;;  %v694_v49 = vsel %vm663_vm1, %v34_v45, -inf  ;;  %v696_v50 = vsel %vm663_vm1, %v35_v46, -inf  ;;  %v37_v52 = vld [vmem:[%s10206_s1 + $0x98] sm:$0xff]  ;;  %v698_v55 = vsel %vm663_vm1, %v36_v51, -inf  ;;  %v38_v57 = vld [vmem:[%s10206_s1 + $0xa0] sm:$0xff]  ;;  %v39_v58 = vld [vmem:[%s10206_s1 + $0xa8] sm:$0xff] }
   0x9   :  { %v679_v29 = vmax.f32 %v675_v23, %v678_v25  ;;  %v700_v56 = vsel %vm663_vm1, %v37_v52, -inf  ;;  %v146_v59 = vld [vmem:[%s10206_s1 + $0x400] sm:$0xff]  ;;  %v147_v60 = vld [vmem:[%s10206_s1 + $0x408] sm:$0xff]  ;;  %v148_v61 = vld [vmem:[%s10206_s1 + $0x410] sm:$0xff]  ;;  %v702_v1 = vsel %vm663_vm1, %v38_v57, -inf  ;;  %v704_v2 = vsel %vm663_vm1, %v39_v58, -inf }
   0xa   :  { %v681_v30 = vmax.f32 %v677_v24, %v680_v26  ;;  %v149_v62 = vld [vmem:[%s10206_s1 + $0x418] sm:$0xff]  ;;  %v40_v3 = vld [vmem:[%s10206_s1 + $0xb0] sm:$0xff]  ;;  %v925_v5 = vsel %vm663_vm1, %v146_v59, -inf  ;;  %v926_v6 = vsel %vm663_vm1, %v147_v60, -inf  ;;  %v927_v7 = vsel %vm663_vm1, %v148_v61, -inf  ;;  %v150_v9 = vld [vmem:[%s10206_s1 + $0x420] sm:$0xff] }
   0xb   :  { %v683_v35 = vmax.f32 %v679_v29, %v682_v31  ;;  %v41_v4 = vld [vmem:[%s10206_s1 + $0xb8] sm:$0xff]  ;;  %v929_v8 = vsel %vm663_vm1, %v149_v62, -inf  ;;  %v151_v10 = vld [vmem:[%s10206_s1 + $0x428] sm:$0xff]  ;;  %v706_v13 = vsel %vm663_vm1, %v40_v3, -inf  ;;  %v42_v15 = vld [vmem:[%s10206_s1 + $0xc0] sm:$0xff]  ;;  %v928_v17 = vmax.f32 %v925_v5, %v927_v7 }
   0xc   :  { %v685_v36 = vmax.f32 %v681_v30, %v684_v32  ;;  %v708_v14 = vsel %vm663_vm1, %v41_v4, -inf  ;;  %v43_v16 = vld [vmem:[%s10206_s1 + $0xc8] sm:$0xff]  ;;  %v930_v18 = vmax.f32 %v926_v6, %v929_v8  ;;  %v931_v19 = vsel %vm663_vm1, %v150_v9, -inf  ;;  %v152_v21 = vld [vmem:[%s10206_s1 + $0x430] sm:$0xff]  ;;  %v153_v22 = vld [vmem:[%s10206_s1 + $0x438] sm:$0xff] }
   0xd   :  { %v687_v41 = vmax.f32 %v683_v35, %v686_v37  ;;  %v933_v20 = vsel %vm663_vm1, %v151_v10, -inf  ;;  %v710_v25 = vsel %vm663_vm1, %v42_v15, -inf  ;;  %v712_v26 = vsel %vm663_vm1, %v43_v16, -inf  ;;  %v44_v27 = vld [vmem:[%s10206_s1 + $0xd0] sm:$0xff]  ;;  %v45_v28 = vld [vmem:[%s10206_s1 + $0xd8] sm:$0xff]  ;;  %v154_v33 = vld [vmem:[%s10206_s1 + $0x440] sm:$0xff] }
   0xe   :  { %v689_v42 = vmax.f32 %v685_v36, %v688_v38  ;;  %v932_v29 = vmax.f32 %v928_v17, %v931_v19  ;;  %v934_v30 = vmax.f32 %v930_v18, %v933_v20  ;;  %v935_v31 = vsel %vm663_vm1, %v152_v21, -inf  ;;  %v155_v34 = vld [vmem:[%s10206_s1 + $0x448] sm:$0xff]  ;;  %v46_v39 = vld [vmem:[%s10206_s1 + $0xe0] sm:$0xff]  ;;  %v156_v45 = vld [vmem:[%s10206_s1 + $0x450] sm:$0xff] }
   0xf   :  { %v691_v47 = vmax.f32 %v687_v41, %v690_v43  ;;  %v937_v32 = vsel %vm663_vm1, %v153_v22, -inf  ;;  %v714_v37 = vsel %vm663_vm1, %v44_v27, -inf  ;;  %v716_v38 = vsel %vm663_vm1, %v45_v28, -inf  ;;  %v47_v40 = vld [vmem:[%s10206_s1 + $0xe8] sm:$0xff]  ;;  %v157_v46 = vld [vmem:[%s10206_s1 + $0x458] sm:$0xff]  ;;  %v48_v51 = vld [vmem:[%s10206_s1 + $0xf0] sm:$0xff] }
  0x10   :  { %v693_v48 = vmax.f32 %v689_v42, %v692_v44  ;;  %v936_v41 = vmax.f32 %v932_v29, %v935_v31  ;;  %v938_v42 = vmax.f32 %v934_v30, %v937_v32  ;;  %v939_v43 = vsel %vm663_vm1, %v154_v33, -inf  ;;  %v49_v52 = vld [vmem:[%s10206_s1 + $0xf8] sm:$0xff]  ;;  %v158_v57 = vld [vmem:[%s10206_s1 + $0x460] sm:$0xff]  ;;  %v159_v58 = vld [vmem:[%s10206_s1 + $0x468] sm:$0xff] }
  0x11   :  { %v695_v53 = vmax.f32 %v691_v47, %v694_v49  ;;  %v941_v44 = vsel %vm663_vm1, %v155_v34, -inf  ;;  %v718_v49 = vsel %vm663_vm1, %v46_v39, -inf  ;;  %v722_v61 = vsel %vm663_vm1, %v48_v51, -inf  ;;  %v160_v5 = vld [vmem:[%s10206_s1 + $0x470] sm:$0xff]  ;;  %v161_v6 = vld [vmem:[%s10206_s1 + $0x478] sm:$0xff]  ;;  %v162_v17 = vld [vmem:[%s10206_s1 + $0x480] sm:$0xff] }
  0x12   :  { %v697_v54 = vmax.f32 %v693_v48, %v696_v50  ;;  %v720_v50 = vsel %vm663_vm1, %v47_v40, -inf  ;;  %v724_v62 = vsel %vm663_vm1, %v49_v52, -inf  ;;  %v947_v3 = vsel %vm663_vm1, %v158_v57, -inf  ;;  %v163_v18 = vld [vmem:[%s10206_s1 + $0x488] sm:$0xff]  ;;  %v164_v29 = vld [vmem:[%s10206_s1 + $0x490] sm:$0xff]  ;;  %v165_v30 = vld [vmem:[%s10206_s1 + $0x498] sm:$0xff] }
  0x13   :  { %v699_v63 = vmax.f32 %v695_v53, %v698_v55  ;;  %v940_v53 = vmax.f32 %v936_v41, %v939_v43  ;;  %v943_v55 = vsel %vm663_vm1, %v156_v45, -inf  ;;  %v949_v4 = vsel %vm663_vm1, %v159_v58, -inf  ;;  %v166_v41 = vld [vmem:[%s10206_s1 + $0x4a0] sm:$0xff] }
  0x14   :  { %v701_v0 = vmax.f32 %v697_v54, %v700_v56  ;;  %v942_v54 = vmax.f32 %v938_v42, %v941_v44  ;;  %v945_v56 = vsel %vm663_vm1, %v157_v46, -inf  ;;  %v951_v15 = vsel %vm663_vm1, %v160_v5, -inf  ;;  %v167_v42 = vld [vmem:[%s10206_s1 + $0x4a8] sm:$0xff] }
  0x15   :  { %v703_v11 = vmax.f32 %v699_v63, %v702_v1  ;;  %v50_v63 = vld [vmem:[%s10206_s1 + $0x100] sm:$0xff]  ;;  %v944_v1 = vmax.f32 %v940_v53, %v943_v55  ;;  %v953_v16 = vsel %vm663_vm1, %v161_v6, -inf  ;;  %v955_v27 = vsel %vm663_vm1, %v162_v17, -inf  ;;  %v168_v53 = vld [vmem:[%s10206_s1 + $0x4b0] sm:$0xff] }
  0x16   :  { %v705_v12 = vmax.f32 %v701_v0, %v704_v2  ;;  %v51_v0 = vld [vmem:[%s10206_s1 + $0x108] sm:$0xff]  ;;  %v946_v2 = vmax.f32 %v942_v54, %v945_v56  ;;  %v726_v9 = vsel %vm663_vm1, %v50_v63, -inf  ;;  %v957_v28 = vsel %vm663_vm1, %v163_v18, -inf  ;;  %v169_v54 = vld [vmem:[%s10206_s1 + $0x4b8] sm:$0xff] }
  0x17   :  { %v707_v23 = vmax.f32 %v703_v11, %v706_v13  ;;  %v728_v10 = vsel %vm663_vm1, %v51_v0, -inf  ;;  %v52_v11 = vld [vmem:[%s10206_s1 + $0x110] sm:$0xff]  ;;  %v948_v13 = vmax.f32 %v944_v1, %v947_v3  ;;  %v959_v39 = vsel %vm663_vm1, %v164_v29, -inf  ;;  %v170_v1 = vld [vmem:[%s10206_s1 + $0x4c0] sm:$0xff] }
  0x18   :  { %v709_v24 = vmax.f32 %v705_v12, %v708_v14  ;;  %v53_v12 = vld [vmem:[%s10206_s1 + $0x118] sm:$0xff]  ;;  %v950_v14 = vmax.f32 %v946_v2, %v949_v4  ;;  %v730_v21 = vsel %vm663_vm1, %v52_v11, -inf  ;;  %v961_v40 = vsel %vm663_vm1, %v165_v30, -inf  ;;  %v171_v2 = vld [vmem:[%s10206_s1 + $0x4c8] sm:$0xff] }
  0x19   :  { %v711_v35 = vmax.f32 %v707_v23, %v710_v25  ;;  %v732_v22 = vsel %vm663_vm1, %v53_v12, -inf  ;;  %v54_v23 = vld [vmem:[%s10206_s1 + $0x120] sm:$0xff]  ;;  %v952_v25 = vmax.f32 %v948_v13, %v951_v15  ;;  %v963_v51 = vsel %vm663_vm1, %v166_v41, -inf  ;;  %v172_v13 = vld [vmem:[%s10206_s1 + $0x4d0] sm:$0xff] }
  0x1a   :  { %v713_v36 = vmax.f32 %v709_v24, %v712_v26  ;;  %v55_v24 = vld [vmem:[%s10206_s1 + $0x128] sm:$0xff]  ;;  %v954_v26 = vmax.f32 %v950_v14, %v953_v16  ;;  %v734_v33 = vsel %vm663_vm1, %v54_v23, -inf  ;;  %v965_v52 = vsel %vm663_vm1, %v167_v42, -inf  ;;  %v173_v14 = vld [vmem:[%s10206_s1 + $0x4d8] sm:$0xff] }
  0x1b   :  { %v715_v47 = vmax.f32 %v711_v35, %v714_v37  ;;  %v736_v34 = vsel %vm663_vm1, %v55_v24, -inf  ;;  %v56_v35 = vld [vmem:[%s10206_s1 + $0x130] sm:$0xff]  ;;  %v956_v37 = vmax.f32 %v952_v25, %v955_v27  ;;  %v967_v63 = vsel %vm663_vm1, %v168_v53, -inf  ;;  %v174_v25 = vld [vmem:[%s10206_s1 + $0x4e0] sm:$0xff] }
  0x1c   :  { %v717_v48 = vmax.f32 %v713_v36, %v716_v38  ;;  %v57_v36 = vld [vmem:[%s10206_s1 + $0x138] sm:$0xff]  ;;  %v958_v38 = vmax.f32 %v954_v26, %v957_v28  ;;  %v738_v45 = vsel %vm663_vm1, %v56_v35, -inf  ;;  %v969_v0 = vsel %vm663_vm1, %v169_v54, -inf  ;;  %v175_v26 = vld [vmem:[%s10206_s1 + $0x4e8] sm:$0xff] }
  0x1d   :  { %v719_v59 = vmax.f32 %v715_v47, %v718_v49  ;;  %v740_v46 = vsel %vm663_vm1, %v57_v36, -inf  ;;  %v58_v47 = vld [vmem:[%s10206_s1 + $0x140] sm:$0xff]  ;;  %v960_v49 = vmax.f32 %v956_v37, %v959_v39  ;;  %v971_v11 = vsel %vm663_vm1, %v170_v1, -inf  ;;  %v176_v37 = vld [vmem:[%s10206_s1 + $0x4f0] sm:$0xff] }
  0x1e   :  { %v721_v60 = vmax.f32 %v717_v48, %v720_v50  ;;  %v59_v48 = vld [vmem:[%s10206_s1 + $0x148] sm:$0xff]  ;;  %v962_v50 = vmax.f32 %v958_v38, %v961_v40  ;;  %v742_v57 = vsel %vm663_vm1, %v58_v47, -inf  ;;  %v973_v12 = vsel %vm663_vm1, %v171_v2, -inf  ;;  %v177_v38 = vld [vmem:[%s10206_s1 + $0x4f8] sm:$0xff] }
  0x1f   :  { %v723_v7 = vmax.f32 %v719_v59, %v722_v61  ;;  %v744_v58 = vsel %vm663_vm1, %v59_v48, -inf  ;;  %v60_v59 = vld [vmem:[%s10206_s1 + $0x150] sm:$0xff]  ;;  %v964_v61 = vmax.f32 %v960_v49, %v963_v51  ;;  %v975_v23 = vsel %vm663_vm1, %v172_v13, -inf  ;;  %v178_v49 = vld [vmem:[%s10206_s1 + $0x500] sm:$0xff] }
  0x20   :  { %v725_v8 = vmax.f32 %v721_v60, %v724_v62  ;;  %v61_v60 = vld [vmem:[%s10206_s1 + $0x158] sm:$0xff]  ;;  %v966_v62 = vmax.f32 %v962_v50, %v965_v52  ;;  %v746_v5 = vsel %vm663_vm1, %v60_v59, -inf  ;;  %v977_v24 = vsel %vm663_vm1, %v173_v14, -inf  ;;  %v179_v50 = vld [vmem:[%s10206_s1 + $0x508] sm:$0xff] }
  0x21   :  { %v727_v19 = vmax.f32 %v723_v7, %v726_v9  ;;  %v748_v6 = vsel %vm663_vm1, %v61_v60, -inf  ;;  %v62_v7 = vld [vmem:[%s10206_s1 + $0x160] sm:$0xff]  ;;  %v968_v9 = vmax.f32 %v964_v61, %v967_v63  ;;  %v979_v35 = vsel %vm663_vm1, %v174_v25, -inf  ;;  %v180_v61 = vld [vmem:[%s10206_s1 + $0x510] sm:$0xff] }
  0x22   :  { %v729_v20 = vmax.f32 %v725_v8, %v728_v10  ;;  %v63_v8 = vld [vmem:[%s10206_s1 + $0x168] sm:$0xff]  ;;  %v970_v10 = vmax.f32 %v966_v62, %v969_v0  ;;  %v750_v17 = vsel %vm663_vm1, %v62_v7, -inf  ;;  %v981_v36 = vsel %vm663_vm1, %v175_v26, -inf  ;;  %v181_v62 = vld [vmem:[%s10206_s1 + $0x518] sm:$0xff] }
  0x23   :  { %v731_v31 = vmax.f32 %v727_v19, %v730_v21  ;;  %v752_v18 = vsel %vm663_vm1, %v63_v8, -inf  ;;  %v64_v19 = vld [vmem:[%s10206_s1 + $0x170] sm:$0xff]  ;;  %v972_v21 = vmax.f32 %v968_v9, %v971_v11  ;;  %v983_v47 = vsel %vm663_vm1, %v176_v37, -inf  ;;  %v182_v9 = vld [vmem:[%s10206_s1 + $0x520] sm:$0xff] }
  0x24   :  { %v733_v32 = vmax.f32 %v729_v20, %v732_v22  ;;  %v65_v20 = vld [vmem:[%s10206_s1 + $0x178] sm:$0xff]  ;;  %v974_v22 = vmax.f32 %v970_v10, %v973_v12  ;;  %v754_v29 = vsel %vm663_vm1, %v64_v19, -inf  ;;  %v985_v48 = vsel %vm663_vm1, %v177_v38, -inf  ;;  %v183_v10 = vld [vmem:[%s10206_s1 + $0x528] sm:$0xff] }
  0x25   :  { %v735_v43 = vmax.f32 %v731_v31, %v734_v33  ;;  %v756_v30 = vsel %vm663_vm1, %v65_v20, -inf  ;;  %v66_v31 = vld [vmem:[%s10206_s1 + $0x180] sm:$0xff]  ;;  %v976_v33 = vmax.f32 %v972_v21, %v975_v23  ;;  %v987_v59 = vsel %vm663_vm1, %v178_v49, -inf  ;;  %v184_v21 = vld [vmem:[%s10206_s1 + $0x530] sm:$0xff] }
  0x26   :  { %v737_v44 = vmax.f32 %v733_v32, %v736_v34  ;;  %v67_v32 = vld [vmem:[%s10206_s1 + $0x188] sm:$0xff]  ;;  %v978_v34 = vmax.f32 %v974_v22, %v977_v24  ;;  %v758_v41 = vsel %vm663_vm1, %v66_v31, -inf  ;;  %v989_v60 = vsel %vm663_vm1, %v179_v50, -inf  ;;  %v185_v22 = vld [vmem:[%s10206_s1 + $0x538] sm:$0xff] }
  0x27   :  { %v739_v55 = vmax.f32 %v735_v43, %v738_v45  ;;  %v760_v42 = vsel %vm663_vm1, %v67_v32, -inf  ;;  %v68_v43 = vld [vmem:[%s10206_s1 + $0x190] sm:$0xff]  ;;  %v980_v45 = vmax.f32 %v976_v33, %v979_v35  ;;  %v991_v7 = vsel %vm663_vm1, %v180_v61, -inf  ;;  %v186_v33 = vld [vmem:[%s10206_s1 + $0x540] sm:$0xff] }
  0x28   :  { %v741_v56 = vmax.f32 %v737_v44, %v740_v46  ;;  %v69_v44 = vld [vmem:[%s10206_s1 + $0x198] sm:$0xff]  ;;  %v982_v46 = vmax.f32 %v978_v34, %v981_v36  ;;  %v762_v53 = vsel %vm663_vm1, %v68_v43, -inf  ;;  %v993_v8 = vsel %vm663_vm1, %v181_v62, -inf  ;;  %v187_v34 = vld [vmem:[%s10206_s1 + $0x548] sm:$0xff] }
  0x29   :  { %v743_v3 = vmax.f32 %v739_v55, %v742_v57  ;;  %v764_v54 = vsel %vm663_vm1, %v69_v44, -inf  ;;  %v70_v55 = vld [vmem:[%s10206_s1 + $0x1a0] sm:$0xff]  ;;  %v984_v57 = vmax.f32 %v980_v45, %v983_v47  ;;  %v995_v19 = vsel %vm663_vm1, %v182_v9, -inf  ;;  %v188_v45 = vld [vmem:[%s10206_s1 + $0x550] sm:$0xff] }
  0x2a   :  { %v745_v4 = vmax.f32 %v741_v56, %v744_v58  ;;  %v71_v56 = vld [vmem:[%s10206_s1 + $0x1a8] sm:$0xff]  ;;  %v986_v58 = vmax.f32 %v982_v46, %v985_v48  ;;  %v766_v1 = vsel %vm663_vm1, %v70_v55, -inf  ;;  %v997_v20 = vsel %vm663_vm1, %v183_v10, -inf  ;;  %v189_v46 = vld [vmem:[%s10206_s1 + $0x558] sm:$0xff] }
  0x2b   :  { %v747_v15 = vmax.f32 %v743_v3, %v746_v5  ;;  %v768_v2 = vsel %vm663_vm1, %v71_v56, -inf  ;;  %v72_v3 = vld [vmem:[%s10206_s1 + $0x1b0] sm:$0xff]  ;;  %v988_v5 = vmax.f32 %v984_v57, %v987_v59  ;;  %v999_v31 = vsel %vm663_vm1, %v184_v21, -inf  ;;  %v190_v57 = vld [vmem:[%s10206_s1 + $0x560] sm:$0xff] }
  0x2c   :  { %v749_v16 = vmax.f32 %v745_v4, %v748_v6  ;;  %v73_v4 = vld [vmem:[%s10206_s1 + $0x1b8] sm:$0xff]  ;;  %v990_v6 = vmax.f32 %v986_v58, %v989_v60  ;;  %v770_v13 = vsel %vm663_vm1, %v72_v3, -inf  ;;  %v1001_v32 = vsel %vm663_vm1, %v185_v22, -inf  ;;  %v191_v58 = vld [vmem:[%s10206_s1 + $0x568] sm:$0xff] }
  0x2d   :  { %v751_v27 = vmax.f32 %v747_v15, %v750_v17  ;;  %v772_v14 = vsel %vm663_vm1, %v73_v4, -inf  ;;  %v74_v15 = vld [vmem:[%s10206_s1 + $0x1c0] sm:$0xff]  ;;  %v992_v17 = vmax.f32 %v988_v5, %v991_v7  ;;  %v1003_v43 = vsel %vm663_vm1, %v186_v33, -inf  ;;  %v192_v5 = vld [vmem:[%s10206_s1 + $0x570] sm:$0xff] }
  0x2e   :  { %v753_v28 = vmax.f32 %v749_v16, %v752_v18  ;;  %v75_v16 = vld [vmem:[%s10206_s1 + $0x1c8] sm:$0xff]  ;;  %v994_v18 = vmax.f32 %v990_v6, %v993_v8  ;;  %v774_v25 = vsel %vm663_vm1, %v74_v15, -inf  ;;  %v1005_v44 = vsel %vm663_vm1, %v187_v34, -inf  ;;  %v193_v6 = vld [vmem:[%s10206_s1 + $0x578] sm:$0xff] }
  0x2f   :  { %v755_v39 = vmax.f32 %v751_v27, %v754_v29  ;;  %v776_v26 = vsel %vm663_vm1, %v75_v16, -inf  ;;  %v76_v27 = vld [vmem:[%s10206_s1 + $0x1d0] sm:$0xff]  ;;  %v996_v29 = vmax.f32 %v992_v17, %v995_v19  ;;  %v1007_v55 = vsel %vm663_vm1, %v188_v45, -inf  ;;  %v194_v17 = vld [vmem:[%s10206_s1 + $0x580] sm:$0xff] }
  0x30   :  { %v757_v40 = vmax.f32 %v753_v28, %v756_v30  ;;  %v77_v28 = vld [vmem:[%s10206_s1 + $0x1d8] sm:$0xff]  ;;  %v998_v30 = vmax.f32 %v994_v18, %v997_v20  ;;  %v778_v37 = vsel %vm663_vm1, %v76_v27, -inf  ;;  %v1009_v56 = vsel %vm663_vm1, %v189_v46, -inf  ;;  %v195_v18 = vld [vmem:[%s10206_s1 + $0x588] sm:$0xff] }
  0x31   :  { %v759_v51 = vmax.f32 %v755_v39, %v758_v41  ;;  %v780_v38 = vsel %vm663_vm1, %v77_v28, -inf  ;;  %v78_v39 = vld [vmem:[%s10206_s1 + $0x1e0] sm:$0xff]  ;;  %v1000_v41 = vmax.f32 %v996_v29, %v999_v31  ;;  %v1011_v3 = vsel %vm663_vm1, %v190_v57, -inf  ;;  %v196_v29 = vld [vmem:[%s10206_s1 + $0x590] sm:$0xff] }
  0x32   :  { %v761_v52 = vmax.f32 %v757_v40, %v760_v42  ;;  %v79_v40 = vld [vmem:[%s10206_s1 + $0x1e8] sm:$0xff]  ;;  %v1002_v42 = vmax.f32 %v998_v30, %v1001_v32  ;;  %v782_v49 = vsel %vm663_vm1, %v78_v39, -inf  ;;  %v1013_v4 = vsel %vm663_vm1, %v191_v58, -inf  ;;  %v197_v30 = vld [vmem:[%s10206_s1 + $0x598] sm:$0xff] }
  0x33   :  { %v763_v63 = vmax.f32 %v759_v51, %v762_v53  ;;  %v784_v50 = vsel %vm663_vm1, %v79_v40, -inf  ;;  %v80_v51 = vld [vmem:[%s10206_s1 + $0x1f0] sm:$0xff]  ;;  %v1004_v53 = vmax.f32 %v1000_v41, %v1003_v43  ;;  %v1015_v15 = vsel %vm663_vm1, %v192_v5, -inf  ;;  %v198_v41 = vld [vmem:[%s10206_s1 + $0x5a0] sm:$0xff] }
  0x34   :  { %v765_v0 = vmax.f32 %v761_v52, %v764_v54  ;;  %v81_v52 = vld [vmem:[%s10206_s1 + $0x1f8] sm:$0xff]  ;;  %v1006_v54 = vmax.f32 %v1002_v42, %v1005_v44  ;;  %v786_v61 = vsel %vm663_vm1, %v80_v51, -inf  ;;  %v1017_v16 = vsel %vm663_vm1, %v193_v6, -inf  ;;  %v199_v42 = vld [vmem:[%s10206_s1 + $0x5a8] sm:$0xff] }
  0x35   :  { %v767_v11 = vmax.f32 %v763_v63, %v766_v1  ;;  %v788_v62 = vsel %vm663_vm1, %v81_v52, -inf  ;;  %v82_v63 = vld [vmem:[%s10206_s1 + $0x200] sm:$0xff]  ;;  %v1008_v1 = vmax.f32 %v1004_v53, %v1007_v55  ;;  %v1019_v27 = vsel %vm663_vm1, %v194_v17, -inf  ;;  %v200_v53 = vld [vmem:[%s10206_s1 + $0x5b0] sm:$0xff] }
  0x36   :  { %v769_v12 = vmax.f32 %v765_v0, %v768_v2  ;;  %v83_v0 = vld [vmem:[%s10206_s1 + $0x208] sm:$0xff]  ;;  %v1010_v2 = vmax.f32 %v1006_v54, %v1009_v56  ;;  %v790_v9 = vsel %vm663_vm1, %v82_v63, -inf  ;;  %v1021_v28 = vsel %vm663_vm1, %v195_v18, -inf  ;;  %v201_v54 = vld [vmem:[%s10206_s1 + $0x5b8] sm:$0xff] }
  0x37   :  { %v771_v23 = vmax.f32 %v767_v11, %v770_v13  ;;  %v792_v10 = vsel %vm663_vm1, %v83_v0, -inf  ;;  %v84_v11 = vld [vmem:[%s10206_s1 + $0x210] sm:$0xff]  ;;  %v1012_v13 = vmax.f32 %v1008_v1, %v1011_v3  ;;  %v1023_v39 = vsel %vm663_vm1, %v196_v29, -inf  ;;  %v202_v1 = vld [vmem:[%s10206_s1 + $0x5c0] sm:$0xff] }
  0x38   :  { %v773_v24 = vmax.f32 %v769_v12, %v772_v14  ;;  %v85_v12 = vld [vmem:[%s10206_s1 + $0x218] sm:$0xff]  ;;  %v1014_v14 = vmax.f32 %v1010_v2, %v1013_v4  ;;  %v794_v21 = vsel %vm663_vm1, %v84_v11, -inf  ;;  %v1025_v40 = vsel %vm663_vm1, %v197_v30, -inf  ;;  %v203_v2 = vld [vmem:[%s10206_s1 + $0x5c8] sm:$0xff] }
  0x39   :  { %v775_v35 = vmax.f32 %v771_v23, %v774_v25  ;;  %v796_v22 = vsel %vm663_vm1, %v85_v12, -inf  ;;  %v86_v23 = vld [vmem:[%s10206_s1 + $0x220] sm:$0xff]  ;;  %v1016_v25 = vmax.f32 %v1012_v13, %v1015_v15  ;;  %v1027_v51 = vsel %vm663_vm1, %v198_v41, -inf  ;;  %v204_v13 = vld [vmem:[%s10206_s1 + $0x5d0] sm:$0xff] }
  0x3a   :  { %v777_v36 = vmax.f32 %v773_v24, %v776_v26  ;;  %v87_v24 = vld [vmem:[%s10206_s1 + $0x228] sm:$0xff]  ;;  %v1018_v26 = vmax.f32 %v1014_v14, %v1017_v16  ;;  %v798_v33 = vsel %vm663_vm1, %v86_v23, -inf  ;;  %v1029_v52 = vsel %vm663_vm1, %v199_v42, -inf  ;;  %v205_v14 = vld [vmem:[%s10206_s1 + $0x5d8] sm:$0xff] }
  0x3b   :  { %v779_v47 = vmax.f32 %v775_v35, %v778_v37  ;;  %v800_v34 = vsel %vm663_vm1, %v87_v24, -inf  ;;  %v88_v35 = vld [vmem:[%s10206_s1 + $0x230] sm:$0xff]  ;;  %v1020_v37 = vmax.f32 %v1016_v25, %v1019_v27  ;;  %v1031_v63 = vsel %vm663_vm1, %v200_v53, -inf  ;;  %v206_v25 = vld [vmem:[%s10206_s1 + $0x5e0] sm:$0xff] }
  0x3c   :  { %v781_v48 = vmax.f32 %v777_v36, %v780_v38  ;;  %v89_v36 = vld [vmem:[%s10206_s1 + $0x238] sm:$0xff]  ;;  %v1022_v38 = vmax.f32 %v1018_v26, %v1021_v28  ;;  %v802_v45 = vsel %vm663_vm1, %v88_v35, -inf  ;;  %v1033_v0 = vsel %vm663_vm1, %v201_v54, -inf  ;;  %v207_v26 = vld [vmem:[%s10206_s1 + $0x5e8] sm:$0xff] }
  0x3d   :  { %v783_v59 = vmax.f32 %v779_v47, %v782_v49  ;;  %v804_v46 = vsel %vm663_vm1, %v89_v36, -inf  ;;  %v90_v47 = vld [vmem:[%s10206_s1 + $0x240] sm:$0xff]  ;;  %v1024_v49 = vmax.f32 %v1020_v37, %v1023_v39  ;;  %v1035_v11 = vsel %vm663_vm1, %v202_v1, -inf  ;;  %v208_v37 = vld [vmem:[%s10206_s1 + $0x5f0] sm:$0xff] }
  0x3e   :  { %v785_v60 = vmax.f32 %v781_v48, %v784_v50  ;;  %v91_v48 = vld [vmem:[%s10206_s1 + $0x248] sm:$0xff]  ;;  %v1026_v50 = vmax.f32 %v1022_v38, %v1025_v40  ;;  %v806_v57 = vsel %vm663_vm1, %v90_v47, -inf  ;;  %v1037_v12 = vsel %vm663_vm1, %v203_v2, -inf  ;;  %v209_v38 = vld [vmem:[%s10206_s1 + $0x5f8] sm:$0xff] }
  0x3f   :  { %v787_v7 = vmax.f32 %v783_v59, %v786_v61  ;;  %v808_v58 = vsel %vm663_vm1, %v91_v48, -inf  ;;  %v92_v59 = vld [vmem:[%s10206_s1 + $0x250] sm:$0xff]  ;;  %v1028_v61 = vmax.f32 %v1024_v49, %v1027_v51  ;;  %v1039_v23 = vsel %vm663_vm1, %v204_v13, -inf  ;;  %v210_v49 = vld [vmem:[%s10206_s1 + $0x600] sm:$0xff] }
  0x40   :  { %v789_v8 = vmax.f32 %v785_v60, %v788_v62  ;;  %v93_v60 = vld [vmem:[%s10206_s1 + $0x258] sm:$0xff]  ;;  %v1030_v62 = vmax.f32 %v1026_v50, %v1029_v52  ;;  %v810_v5 = vsel %vm663_vm1, %v92_v59, -inf  ;;  %v1041_v24 = vsel %vm663_vm1, %v205_v14, -inf  ;;  %v211_v50 = vld [vmem:[%s10206_s1 + $0x608] sm:$0xff] }
  0x41   :  { %v791_v19 = vmax.f32 %v787_v7, %v790_v9  ;;  %v812_v6 = vsel %vm663_vm1, %v93_v60, -inf  ;;  %v94_v7 = vld [vmem:[%s10206_s1 + $0x260] sm:$0xff]  ;;  %v1032_v9 = vmax.f32 %v1028_v61, %v1031_v63  ;;  %v1043_v35 = vsel %vm663_vm1, %v206_v25, -inf  ;;  %v212_v61 = vld [vmem:[%s10206_s1 + $0x610] sm:$0xff] }
  0x42   :  { %v793_v20 = vmax.f32 %v789_v8, %v792_v10  ;;  %v95_v8 = vld [vmem:[%s10206_s1 + $0x268] sm:$0xff]  ;;  %v1034_v10 = vmax.f32 %v1030_v62, %v1033_v0  ;;  %v814_v17 = vsel %vm663_vm1, %v94_v7, -inf  ;;  %v1045_v36 = vsel %vm663_vm1, %v207_v26, -inf  ;;  %v213_v62 = vld [vmem:[%s10206_s1 + $0x618] sm:$0xff] }
  0x43   :  { %v795_v31 = vmax.f32 %v791_v19, %v794_v21  ;;  %v816_v18 = vsel %vm663_vm1, %v95_v8, -inf  ;;  %v96_v19 = vld [vmem:[%s10206_s1 + $0x270] sm:$0xff]  ;;  %v1036_v21 = vmax.f32 %v1032_v9, %v1035_v11  ;;  %v1047_v47 = vsel %vm663_vm1, %v208_v37, -inf  ;;  %v214_v9 = vld [vmem:[%s10206_s1 + $0x620] sm:$0xff] }
  0x44   :  { %v797_v32 = vmax.f32 %v793_v20, %v796_v22  ;;  %v97_v20 = vld [vmem:[%s10206_s1 + $0x278] sm:$0xff]  ;;  %v1038_v22 = vmax.f32 %v1034_v10, %v1037_v12  ;;  %v818_v29 = vsel %vm663_vm1, %v96_v19, -inf  ;;  %v1049_v48 = vsel %vm663_vm1, %v209_v38, -inf  ;;  %v215_v10 = vld [vmem:[%s10206_s1 + $0x628] sm:$0xff] }
  0x45   :  { %v799_v43 = vmax.f32 %v795_v31, %v798_v33  ;;  %v820_v30 = vsel %vm663_vm1, %v97_v20, -inf  ;;  %v98_v31 = vld [vmem:[%s10206_s1 + $0x280] sm:$0xff]  ;;  %v1040_v33 = vmax.f32 %v1036_v21, %v1039_v23  ;;  %v1051_v59 = vsel %vm663_vm1, %v210_v49, -inf  ;;  %v216_v21 = vld [vmem:[%s10206_s1 + $0x630] sm:$0xff] }
  0x46   :  { %v801_v44 = vmax.f32 %v797_v32, %v800_v34  ;;  %v99_v32 = vld [vmem:[%s10206_s1 + $0x288] sm:$0xff]  ;;  %v1042_v34 = vmax.f32 %v1038_v22, %v1041_v24  ;;  %v822_v41 = vsel %vm663_vm1, %v98_v31, -inf  ;;  %v1053_v60 = vsel %vm663_vm1, %v211_v50, -inf  ;;  %v217_v22 = vld [vmem:[%s10206_s1 + $0x638] sm:$0xff] }
  0x47   :  { %v803_v55 = vmax.f32 %v799_v43, %v802_v45  ;;  %v824_v42 = vsel %vm663_vm1, %v99_v32, -inf  ;;  %v100_v43 = vld [vmem:[%s10206_s1 + $0x290] sm:$0xff]  ;;  %v1044_v45 = vmax.f32 %v1040_v33, %v1043_v35  ;;  %v1055_v7 = vsel %vm663_vm1, %v212_v61, -inf  ;;  %v218_v33 = vld [vmem:[%s10206_s1 + $0x640] sm:$0xff] }
  0x48   :  { %v805_v56 = vmax.f32 %v801_v44, %v804_v46  ;;  %v101_v44 = vld [vmem:[%s10206_s1 + $0x298] sm:$0xff]  ;;  %v1046_v46 = vmax.f32 %v1042_v34, %v1045_v36  ;;  %v826_v53 = vsel %vm663_vm1, %v100_v43, -inf  ;;  %v1057_v8 = vsel %vm663_vm1, %v213_v62, -inf  ;;  %v219_v34 = vld [vmem:[%s10206_s1 + $0x648] sm:$0xff] }
  0x49   :  { %v807_v3 = vmax.f32 %v803_v55, %v806_v57  ;;  %v828_v54 = vsel %vm663_vm1, %v101_v44, -inf  ;;  %v102_v55 = vld [vmem:[%s10206_s1 + $0x2a0] sm:$0xff]  ;;  %v1048_v57 = vmax.f32 %v1044_v45, %v1047_v47  ;;  %v1059_v19 = vsel %vm663_vm1, %v214_v9, -inf  ;;  %v220_v45 = vld [vmem:[%s10206_s1 + $0x650] sm:$0xff] }
  0x4a   :  { %v809_v4 = vmax.f32 %v805_v56, %v808_v58  ;;  %v103_v56 = vld [vmem:[%s10206_s1 + $0x2a8] sm:$0xff]  ;;  %v1050_v58 = vmax.f32 %v1046_v46, %v1049_v48  ;;  %v830_v1 = vsel %vm663_vm1, %v102_v55, -inf  ;;  %v1061_v20 = vsel %vm663_vm1, %v215_v10, -inf  ;;  %v221_v46 = vld [vmem:[%s10206_s1 + $0x658] sm:$0xff] }
  0x4b   :  { %v811_v15 = vmax.f32 %v807_v3, %v810_v5  ;;  %v832_v2 = vsel %vm663_vm1, %v103_v56, -inf  ;;  %v104_v3 = vld [vmem:[%s10206_s1 + $0x2b0] sm:$0xff]  ;;  %v1052_v5 = vmax.f32 %v1048_v57, %v1051_v59  ;;  %v1063_v31 = vsel %vm663_vm1, %v216_v21, -inf  ;;  %v222_v57 = vld [vmem:[%s10206_s1 + $0x660] sm:$0xff] }
  0x4c   :  { %v813_v16 = vmax.f32 %v809_v4, %v812_v6  ;;  %v105_v4 = vld [vmem:[%s10206_s1 + $0x2b8] sm:$0xff]  ;;  %v1054_v6 = vmax.f32 %v1050_v58, %v1053_v60  ;;  %v834_v13 = vsel %vm663_vm1, %v104_v3, -inf  ;;  %v1065_v32 = vsel %vm663_vm1, %v217_v22, -inf  ;;  %v223_v58 = vld [vmem:[%s10206_s1 + $0x668] sm:$0xff] }
  0x4d   :  { %v815_v27 = vmax.f32 %v811_v15, %v814_v17  ;;  %v836_v14 = vsel %vm663_vm1, %v105_v4, -inf  ;;  %v106_v15 = vld [vmem:[%s10206_s1 + $0x2c0] sm:$0xff]  ;;  %v1056_v17 = vmax.f32 %v1052_v5, %v1055_v7  ;;  %v1067_v43 = vsel %vm663_vm1, %v218_v33, -inf  ;;  %v224_v5 = vld [vmem:[%s10206_s1 + $0x670] sm:$0xff] }
  0x4e   :  { %v817_v28 = vmax.f32 %v813_v16, %v816_v18  ;;  %v107_v16 = vld [vmem:[%s10206_s1 + $0x2c8] sm:$0xff]  ;;  %v1058_v18 = vmax.f32 %v1054_v6, %v1057_v8  ;;  %v838_v25 = vsel %vm663_vm1, %v106_v15, -inf  ;;  %v1069_v44 = vsel %vm663_vm1, %v219_v34, -inf  ;;  %v225_v6 = vld [vmem:[%s10206_s1 + $0x678] sm:$0xff] }
  0x4f   :  { %v819_v39 = vmax.f32 %v815_v27, %v818_v29  ;;  %v840_v26 = vsel %vm663_vm1, %v107_v16, -inf  ;;  %v108_v27 = vld [vmem:[%s10206_s1 + $0x2d0] sm:$0xff]  ;;  %v1060_v29 = vmax.f32 %v1056_v17, %v1059_v19  ;;  %v1071_v55 = vsel %vm663_vm1, %v220_v45, -inf  ;;  %v226_v17 = vld [vmem:[%s10206_s1 + $0x680] sm:$0xff] }
  0x50   :  { %v821_v40 = vmax.f32 %v817_v28, %v820_v30  ;;  %v109_v28 = vld [vmem:[%s10206_s1 + $0x2d8] sm:$0xff]  ;;  %v1062_v30 = vmax.f32 %v1058_v18, %v1061_v20  ;;  %v842_v37 = vsel %vm663_vm1, %v108_v27, -inf  ;;  %v1073_v56 = vsel %vm663_vm1, %v221_v46, -inf  ;;  %v227_v18 = vld [vmem:[%s10206_s1 + $0x688] sm:$0xff] }
  0x51   :  { %v823_v51 = vmax.f32 %v819_v39, %v822_v41  ;;  %v844_v38 = vsel %vm663_vm1, %v109_v28, -inf  ;;  %v110_v39 = vld [vmem:[%s10206_s1 + $0x2e0] sm:$0xff]  ;;  %v1064_v41 = vmax.f32 %v1060_v29, %v1063_v31  ;;  %v1075_v3 = vsel %vm663_vm1, %v222_v57, -inf  ;;  %v228_v29 = vld [vmem:[%s10206_s1 + $0x690] sm:$0xff] }
  0x52   :  { %v825_v52 = vmax.f32 %v821_v40, %v824_v42  ;;  %v111_v40 = vld [vmem:[%s10206_s1 + $0x2e8] sm:$0xff]  ;;  %v1066_v42 = vmax.f32 %v1062_v30, %v1065_v32  ;;  %v846_v49 = vsel %vm663_vm1, %v110_v39, -inf  ;;  %v1077_v4 = vsel %vm663_vm1, %v223_v58, -inf  ;;  %v229_v30 = vld [vmem:[%s10206_s1 + $0x698] sm:$0xff] }
  0x53   :  { %v827_v63 = vmax.f32 %v823_v51, %v826_v53  ;;  %v848_v50 = vsel %vm663_vm1, %v111_v40, -inf  ;;  %v112_v51 = vld [vmem:[%s10206_s1 + $0x2f0] sm:$0xff]  ;;  %v1068_v53 = vmax.f32 %v1064_v41, %v1067_v43  ;;  %v1079_v15 = vsel %vm663_vm1, %v224_v5, -inf  ;;  %v230_v41 = vld [vmem:[%s10206_s1 + $0x6a0] sm:$0xff] }
  0x54   :  { %v829_v0 = vmax.f32 %v825_v52, %v828_v54  ;;  %v113_v52 = vld [vmem:[%s10206_s1 + $0x2f8] sm:$0xff]  ;;  %v1070_v54 = vmax.f32 %v1066_v42, %v1069_v44  ;;  %v850_v61 = vsel %vm663_vm1, %v112_v51, -inf  ;;  %v1081_v16 = vsel %vm663_vm1, %v225_v6, -inf  ;;  %v231_v42 = vld [vmem:[%s10206_s1 + $0x6a8] sm:$0xff] }
  0x55   :  { %v831_v11 = vmax.f32 %v827_v63, %v830_v1  ;;  %v852_v62 = vsel %vm663_vm1, %v113_v52, -inf  ;;  %v114_v63 = vld [vmem:[%s10206_s1 + $0x300] sm:$0xff]  ;;  %v1072_v1 = vmax.f32 %v1068_v53, %v1071_v55  ;;  %v1083_v27 = vsel %vm663_vm1, %v226_v17, -inf  ;;  %v232_v53 = vld [vmem:[%s10206_s1 + $0x6b0] sm:$0xff] }
  0x56   :  { %v833_v12 = vmax.f32 %v829_v0, %v832_v2  ;;  %v115_v0 = vld [vmem:[%s10206_s1 + $0x308] sm:$0xff]  ;;  %v1074_v2 = vmax.f32 %v1070_v54, %v1073_v56  ;;  %v854_v9 = vsel %vm663_vm1, %v114_v63, -inf  ;;  %v1085_v28 = vsel %vm663_vm1, %v227_v18, -inf  ;;  %v233_v54 = vld [vmem:[%s10206_s1 + $0x6b8] sm:$0xff] }
  0x57   :  { %v835_v23 = vmax.f32 %v831_v11, %v834_v13  ;;  %v856_v10 = vsel %vm663_vm1, %v115_v0, -inf  ;;  %v116_v11 = vld [vmem:[%s10206_s1 + $0x310] sm:$0xff]  ;;  %v1076_v13 = vmax.f32 %v1072_v1, %v1075_v3  ;;  %v1087_v39 = vsel %vm663_vm1, %v228_v29, -inf  ;;  %v234_v1 = vld [vmem:[%s10206_s1 + $0x6c0] sm:$0xff] }
  0x58   :  { %v837_v24 = vmax.f32 %v833_v12, %v836_v14  ;;  %v117_v12 = vld [vmem:[%s10206_s1 + $0x318] sm:$0xff]  ;;  %v1078_v14 = vmax.f32 %v1074_v2, %v1077_v4  ;;  %v858_v21 = vsel %vm663_vm1, %v116_v11, -inf  ;;  %v1089_v40 = vsel %vm663_vm1, %v229_v30, -inf  ;;  %v235_v2 = vld [vmem:[%s10206_s1 + $0x6c8] sm:$0xff] }
  0x59   :  { %v839_v35 = vmax.f32 %v835_v23, %v838_v25  ;;  %v860_v22 = vsel %vm663_vm1, %v117_v12, -inf  ;;  %v118_v23 = vld [vmem:[%s10206_s1 + $0x320] sm:$0xff]  ;;  %v1080_v25 = vmax.f32 %v1076_v13, %v1079_v15  ;;  %v1091_v51 = vsel %vm663_vm1, %v230_v41, -inf  ;;  %v236_v13 = vld [vmem:[%s10206_s1 + $0x6d0] sm:$0xff] }
  0x5a   :  { %v841_v36 = vmax.f32 %v837_v24, %v840_v26  ;;  %v119_v24 = vld [vmem:[%s10206_s1 + $0x328] sm:$0xff]  ;;  %v1082_v26 = vmax.f32 %v1078_v14, %v1081_v16  ;;  %v862_v33 = vsel %vm663_vm1, %v118_v23, -inf  ;;  %v1093_v52 = vsel %vm663_vm1, %v231_v42, -inf  ;;  %v237_v14 = vld [vmem:[%s10206_s1 + $0x6d8] sm:$0xff] }
  0x5b   :  { %v843_v47 = vmax.f32 %v839_v35, %v842_v37  ;;  %v864_v34 = vsel %vm663_vm1, %v119_v24, -inf  ;;  %v120_v35 = vld [vmem:[%s10206_s1 + $0x330] sm:$0xff]  ;;  %v1084_v37 = vmax.f32 %v1080_v25, %v1083_v27  ;;  %v1095_v63 = vsel %vm663_vm1, %v232_v53, -inf  ;;  %v238_v25 = vld [vmem:[%s10206_s1 + $0x6e0] sm:$0xff] }
  0x5c   :  { %v845_v48 = vmax.f32 %v841_v36, %v844_v38  ;;  %v121_v36 = vld [vmem:[%s10206_s1 + $0x338] sm:$0xff]  ;;  %v1086_v38 = vmax.f32 %v1082_v26, %v1085_v28  ;;  %v866_v45 = vsel %vm663_vm1, %v120_v35, -inf  ;;  %v1097_v0 = vsel %vm663_vm1, %v233_v54, -inf  ;;  %v239_v26 = vld [vmem:[%s10206_s1 + $0x6e8] sm:$0xff] }
  0x5d   :  { %v847_v59 = vmax.f32 %v843_v47, %v846_v49  ;;  %v868_v46 = vsel %vm663_vm1, %v121_v36, -inf  ;;  %v122_v47 = vld [vmem:[%s10206_s1 + $0x340] sm:$0xff]  ;;  %v1088_v49 = vmax.f32 %v1084_v37, %v1087_v39  ;;  %v1099_v11 = vsel %vm663_vm1, %v234_v1, -inf  ;;  %v240_v37 = vld [vmem:[%s10206_s1 + $0x6f0] sm:$0xff] }
  0x5e   :  { %v849_v60 = vmax.f32 %v845_v48, %v848_v50  ;;  %v123_v48 = vld [vmem:[%s10206_s1 + $0x348] sm:$0xff]  ;;  %v1090_v50 = vmax.f32 %v1086_v38, %v1089_v40  ;;  %v870_v57 = vsel %vm663_vm1, %v122_v47, -inf  ;;  %v1101_v12 = vsel %vm663_vm1, %v235_v2, -inf  ;;  %v241_v38 = vld [vmem:[%s10206_s1 + $0x6f8] sm:$0xff] }
  0x5f   :  { %v851_v7 = vmax.f32 %v847_v59, %v850_v61  ;;  %v872_v58 = vsel %vm663_vm1, %v123_v48, -inf  ;;  %v124_v59 = vld [vmem:[%s10206_s1 + $0x350] sm:$0xff]  ;;  %v1092_v61 = vmax.f32 %v1088_v49, %v1091_v51  ;;  %v1103_v23 = vsel %vm663_vm1, %v236_v13, -inf  ;;  %v243_v51 = vld [vmem:[%s10206_s1 + $0x708] sm:$0xff]  ;;  %v246_v13 = vld [vmem:[%s10206_s1 + $0x720] sm:$0xff] }
  0x60   :  { %v853_v8 = vmax.f32 %v849_v60, %v852_v62  ;;  %v125_v60 = vld [vmem:[%s10206_s1 + $0x358] sm:$0xff]  ;;  %v1094_v62 = vmax.f32 %v1090_v50, %v1093_v52  ;;  %v874_v5 = vsel %vm663_vm1, %v124_v59, -inf  ;;  %v1105_v24 = vsel %vm663_vm1, %v237_v14, -inf  ;;  %v242_v50 = vld [vmem:[%s10206_s1 + $0x700] sm:$0xff]  ;;  %v247_v14 = vld [vmem:[%s10206_s1 + $0x728] sm:$0xff] }
  0x61   :  { %v855_v19 = vmax.f32 %v851_v7, %v854_v9  ;;  %v876_v6 = vsel %vm663_vm1, %v125_v60, -inf  ;;  %v126_v7 = vld [vmem:[%s10206_s1 + $0x360] sm:$0xff]  ;;  %v1096_v9 = vmax.f32 %v1092_v61, %v1095_v63  ;;  %v1107_v35 = vsel %vm663_vm1, %v238_v25, -inf  ;;  %v244_v63 = vld [vmem:[%s10206_s1 + $0x710] sm:$0xff] }
  0x62   :  { %v857_v20 = vmax.f32 %v853_v8, %v856_v10  ;;  %v127_v8 = vld [vmem:[%s10206_s1 + $0x368] sm:$0xff]  ;;  %v1098_v10 = vmax.f32 %v1094_v62, %v1097_v0  ;;  %v878_v17 = vsel %vm663_vm1, %v126_v7, -inf  ;;  %v1109_v36 = vsel %vm663_vm1, %v239_v26, -inf  ;;  %v245_v0 = vld [vmem:[%s10206_s1 + $0x718] sm:$0xff] }
  0x63   :  { %v859_v31 = vmax.f32 %v855_v19, %v858_v21  ;;  %v880_v18 = vsel %vm663_vm1, %v127_v8, -inf  ;;  %v128_v19 = vld [vmem:[%s10206_s1 + $0x370] sm:$0xff]  ;;  %v1100_v21 = vmax.f32 %v1096_v9, %v1099_v11  ;;  %v276_v47 = vlaneseq }
  0x64   :  { %v861_v32 = vmax.f32 %v857_v20, %v860_v22  ;;  %v129_v20 = vld [vmem:[%s10206_s1 + $0x378] sm:$0xff]  ;;  %v1102_v22 = vmax.f32 %v1098_v10, %v1101_v12  ;;  %v882_v29 = vsel %vm663_vm1, %v128_v19, -inf  ;;  %v1111_v48 = vsel %vm663_vm1, %v240_v37, -inf }
  0x65   :  { %v863_v43 = vmax.f32 %v859_v31, %v862_v33  ;;  %v884_v30 = vsel %vm663_vm1, %v129_v20, -inf  ;;  %v130_v31 = vld [vmem:[%s10206_s1 + $0x380] sm:$0xff]  ;;  %v1104_v33 = vmax.f32 %v1100_v21, %v1103_v23  ;;  %v1113_v49 = vsel %vm663_vm1, %v241_v38, -inf }
  0x66   :  { %v865_v44 = vmax.f32 %v861_v32, %v864_v34  ;;  %v131_v32 = vld [vmem:[%s10206_s1 + $0x388] sm:$0xff]  ;;  %v1106_v34 = vmax.f32 %v1102_v22, %v1105_v24  ;;  %v886_v41 = vsel %vm663_vm1, %v130_v31, -inf  ;;  %v4932_v60 = vshrl.u32 %v276_v47, 7  ;;  %v138_v23 = vld [vmem:[%s10206_s1 + $0x3c0] sm:$0xff] }
  0x67   :  { %v867_v55 = vmax.f32 %v863_v43, %v866_v45  ;;  %v888_v42 = vsel %vm663_vm1, %v131_v32, -inf  ;;  %v132_v43 = vld [vmem:[%s10206_s1 + $0x390] sm:$0xff]  ;;  %v1108_v45 = vmax.f32 %v1104_v33, %v1107_v35  ;;  %v1115_v61 = vsel %vm663_vm1, %v242_v50, -inf  ;;  %v139_v24 = vld [vmem:[%s10206_s1 + $0x3c8] sm:$0xff] }
  0x68   :  { %v869_v56 = vmax.f32 %v865_v44, %v868_v46  ;;  %v133_v44 = vld [vmem:[%s10206_s1 + $0x398] sm:$0xff]  ;;  %v1110_v46 = vmax.f32 %v1106_v34, %v1109_v36  ;;  %v890_v54 = vsel %vm663_vm1, %v132_v43, -inf  ;;  %10611 = vst [vmem:[#allocation2_spill] sm:$0xff] %v4932_v60  ;;  %v1117_v62 = vsel %vm663_vm1, %v243_v51, -inf  ;;  %v248_v33 = vld [vmem:[%s10206_s1 + $0x730] sm:$0xff] }
  0x69   :  { %v871_v3 = vmax.f32 %v867_v55, %v870_v57  ;;  %v892_v55 = vsel %vm663_vm1, %v133_v44, -inf  ;;  %v135_v57 = vld [vmem:[%s10206_s1 + $0x3a8] sm:$0xff]  ;;  %v4951_v9 = vadd.s32 8, %v4932_v60  ;;  %v4954_v10 = vadd.s32 16, %v4932_v60  ;;  %v249_v34 = vld [vmem:[%s10206_s1 + $0x738] sm:$0xff]  ;;  %v140_v43 = vld [vmem:[%s10206_s1 + $0x3d0] sm:$0xff] }
  0x6a   :  { %v873_v4 = vmax.f32 %v869_v56, %v872_v58  ;;  %v134_v56 = vld [vmem:[%s10206_s1 + $0x3a0] sm:$0xff]  ;;  %v1112_v58 = vmax.f32 %v1108_v45, %v1111_v48  ;;  %v1114_v59 = vmax.f32 %v1110_v46, %v1113_v49  ;;  %v1119_v11 = vsel %vm663_vm1, %v244_v63, -inf  ;;  %v141_v44 = vld [vmem:[%s10206_s1 + $0x3d8] sm:$0xff] }
  0x6b   :  { %v875_v15 = vmax.f32 %v871_v3, %v874_v5  ;;  %v894_v3 = vsel %vm663_vm1, %v134_v56, -inf  ;;  %v136_v5 = vld [vmem:[%s10206_s1 + $0x3b0] sm:$0xff]  ;;  %10612 = vst [vmem:[#allocation3_spill] sm:$0xff] %v4951_v9  ;;  %v1121_v12 = vsel %vm663_vm1, %v245_v0, -inf  ;;  %v4971_v19 = vadd.s32 40, %v4932_v60  ;;  %v142_v0 = vld [vmem:[%s10206_s1 + $0x3e0] sm:$0xff] }
  0x6c   :  { %v877_v16 = vmax.f32 %v873_v4, %v876_v6  ;;  %v896_v4 = vsel %vm663_vm1, %v135_v57, -inf  ;;  %v137_v6 = vld [vmem:[%s10206_s1 + $0x3b8] sm:$0xff]  ;;  %v1116_v7 = vmax.f32 %v1112_v58, %v1115_v61  ;;  %v1118_v8 = vmax.f32 %v1114_v59, %v1117_v62  ;;  %10613 = vst [vmem:[#allocation4_spill] sm:$0xff] %v4954_v10 }
  0x6d   :  { %v879_v27 = vmax.f32 %v875_v15, %v878_v17  ;;  %v4965_v15 = vadd.s32 24, %v4932_v60  ;;  %10616 = vst [vmem:[#allocation7_spill] sm:$0xff] %v4971_v19  ;;  %v4974_v20 = vadd.s32 48, %v4932_v60  ;;  %v898_v21 = vsel %vm663_vm1, %v136_v5, -inf  ;;  %v3834_v19 = vld [vmem:[%s10206_s1 + $0x160] sm:$0xff] }
  0x6e   :  { %v881_v28 = vmax.f32 %v877_v16, %v880_v18  ;;  %v4968_v16 = vadd.s32 32, %v4932_v60  ;;  %v900_v22 = vsel %vm663_vm1, %v137_v6, -inf  ;;  %v4985_v25 = vadd.s32 56, %v4932_v60 }
  0x6f   :  { %v883_v39 = vmax.f32 %v879_v27, %v882_v29  ;;  %10614 = vst [vmem:[#allocation5_spill] sm:$0xff] %v4965_v15  ;;  %v4988_v26 = vadd.s32 64, %v4932_v60  ;;  %v1120_v27 = vmax.f32 %v1116_v7, %v1119_v11  ;;  %v4991_v29 = vadd.s32 72, %v4932_v60  ;;  %v3836_v15 = vld [vmem:[%s10206_s1 + $0x170] sm:$0xff] }
  0x70   :  { %v885_v40 = vmax.f32 %v881_v28, %v884_v30  ;;  %10615 = vst [vmem:[#allocation6_spill] sm:$0xff] %v4968_v16  ;;  %v1122_v28 = vmax.f32 %v1118_v8, %v1121_v12  ;;  %v4994_v30 = vadd.s32 80, %v4932_v60  ;;  %v1123_v31 = vsel %vm663_vm1, %v246_v13, -inf  ;;  %v252_v12 = vld [vmem:[%s10206_s1 + $0x750] sm:$0xff]  ;;  %v253_v13 = vld [vmem:[%s10206_s1 + $0x758] sm:$0xff]  ;;  %v3835_v16 = vld [vmem:[%s10206_s1 + $0x168] sm:$0xff] }
  0x71   :  { %v887_v52 = vmax.f32 %v883_v39, %v886_v41  ;;  %10617 = vst [vmem:[#allocation8_spill] sm:$0xff] %v4974_v20  ;;  %v1125_v32 = vsel %vm663_vm1, %v247_v14, -inf  ;;  %v5005_v35 = vadd.s32 88, %v4932_v60  ;;  %v5008_v36 = vadd.s32 96, %v4932_v60 }
  0x72   :  { %v889_v53 = vmax.f32 %v885_v40, %v888_v42  ;;  %10618 = vst [vmem:[#allocation9_spill] sm:$0xff] %v4985_v25  ;;  %v5011_v39 = vadd.s32 104, %v4932_v60  ;;  %v5014_v40 = vadd.s32 112, %v4932_v60  ;;  %v902_v41 = vsel %vm663_vm1, %v138_v23, -inf }
  0x73   :  { %v891_v1 = vmax.f32 %v887_v52, %v890_v54  ;;  %10619 = vst [vmem:[#allocation10_spill] sm:$0xff] %v4988_v26  ;;  %v904_v42 = vsel %vm663_vm1, %v139_v24, -inf  ;;  %v5025_v45 = vadd.s32 120, %v4932_v60  ;;  %v5028_v46 = vadd.s32 128, %v4932_v60  ;;  %v251_v54 = vld [vmem:[%s10206_s1 + $0x748] sm:$0xff] }
  0x74   :  { %v893_v2 = vmax.f32 %v889_v53, %v892_v55  ;;  %10620 = vst [vmem:[#allocation11_spill] sm:$0xff] %v4991_v29  ;;  %v1124_v47 = vmax.f32 %v1120_v27, %v1123_v31  ;;  %v1126_v48 = vmax.f32 %v1122_v28, %v1125_v32  ;;  %v5031_v49 = vadd.s32 136, %v4932_v60  ;;  %v250_v53 = vld [vmem:[%s10206_s1 + $0x740] sm:$0xff]  ;;  %v144_v28 = vld [vmem:[%s10206_s1 + $0x3f0] sm:$0xff]  ;;  %v145_v31 = vld [vmem:[%s10206_s1 + $0x3f8] sm:$0xff] }
  0x75   :  { %v895_v17 = vmax.f32 %v891_v1, %v894_v3  ;;  %10621 = vst [vmem:[#allocation12_spill] sm:$0xff] %v4994_v30  ;;  %v5034_v50 = vadd.s32 144, %v4932_v60  ;;  %v1127_v51 = vsel %vm663_vm1, %v248_v33, -inf  ;;  %v1129_v52 = vsel %vm663_vm1, %v249_v34, -inf  ;;  %v143_v1 = vld [vmem:[%s10206_s1 + $0x3e8] sm:$0xff]  ;;  %v3820_v30 = vld [vmem:[%s10206_s1 + $0xf0] sm:$0xff] }
  0x76   :  { %v897_v18 = vmax.f32 %v893_v2, %v896_v4  ;;  %10622 = vst [vmem:[#allocation13_spill] sm:$0xff] %v5005_v35  ;;  %v5045_v55 = vadd.s32 152, %v4932_v60  ;;  %v5048_v56 = vadd.s32 160, %v4932_v60  ;;  %v5051_v59 = vadd.s32 168, %v4932_v60  ;;  %v3818_v35 = vld [vmem:[%s10206_s1 + $0xe0] sm:$0xff] }
  0x77   :  { %10623 = vst [vmem:[#allocation14_spill] sm:$0xff] %v5008_v36  ;;  %v899_v37 = vmax.f32 %v895_v17, %v898_v21  ;;  %v5054_v61 = vadd.s32 176, %v4932_v60  ;;  %v906_v62 = vsel %vm663_vm1, %v140_v43, -inf  ;;  %v908_v63 = vsel %vm663_vm1, %v141_v44, -inf  ;;  %v254_v44 = vld [vmem:[%s10206_s1 + $0x760] sm:$0xff] }
  0x78   :  { %v901_v38 = vmax.f32 %v897_v18, %v900_v22  ;;  %10624 = vst [vmem:[#allocation15_spill] sm:$0xff] %v5011_v39  ;;  %v5065_v2 = vadd.s32 184, %v4932_v60  ;;  %v5068_v3 = vadd.s32 192, %v4932_v60  ;;  %v1128_v4 = vmax.f32 %v1124_v47, %v1127_v51  ;;  %v255_v47 = vld [vmem:[%s10206_s1 + $0x768] sm:$0xff]  ;;  %v3822_v29 = vld [vmem:[%s10206_s1 + $0x100] sm:$0xff] }
  0x79   :  { %10625 = vst [vmem:[#allocation16_spill] sm:$0xff] %v5014_v40  ;;  %v903_v57 = vmax.f32 %v899_v37, %v902_v41  ;;  %v1130_v5 = vmax.f32 %v1126_v48, %v1129_v52  ;;  %v5071_v6 = vadd.s32 200, %v4932_v60  ;;  %v5074_v7 = vadd.s32 208, %v4932_v60  ;;  %v3810_v40 = vld [vmem:[%s10206_s1 + $0xa0] sm:$0xff] }
  0x7a   :  { %10626 = vst [vmem:[#allocation17_spill] sm:$0xff] %v5025_v45  ;;  %v905_v58 = vmax.f32 %v901_v38, %v904_v42  ;;  %v1131_v8 = vsel %vm663_vm1, %v250_v53, -inf  ;;  %v1133_v11 = vsel %vm663_vm1, %v251_v54, -inf  ;;  %v5085_v14 = vadd.s32 216, %v4932_v60  ;;  %v3808_v45 = vld [vmem:[%s10206_s1 + $0x90] sm:$0xff] }
  0x7b   :  { %10627 = vst [vmem:[#allocation18_spill] sm:$0xff] %v5028_v46  ;;  %v5088_v17 = vadd.s32 224, %v4932_v60  ;;  %v907_v18 = vmax.f32 %v903_v57, %v906_v62  ;;  %v5091_v22 = vadd.s32 232, %v4932_v60  ;;  %v5094_v23 = vadd.s32 240, %v4932_v60  ;;  %v3806_v46 = vld [vmem:[%s10206_s1 + $0x80] sm:$0xff] }
  0x7c   :  { %10628 = vst [vmem:[#allocation19_spill] sm:$0xff] %v5031_v49  ;;  %v909_v21 = vmax.f32 %v905_v58, %v908_v63  ;;  %v910_v24 = vsel %vm663_vm1, %v142_v0, -inf  ;;  %v912_v27 = vsel %vm663_vm1, %v143_v1, -inf  ;;  %v5105_v32 = vadd.s32 248, %v4932_v60  ;;  %v3804_v49 = vld [vmem:[%s10206_s1 + $0x70] sm:$0xff] }
  0x7d   :  { %10629 = vst [vmem:[#allocation20_spill] sm:$0xff] %v5034_v50  ;;  %v5108_v33 = vadd.s32 256, %v4932_v60  ;;  %v1132_v34 = vmax.f32 %v1128_v4, %v1131_v8  ;;  %v1134_v37 = vmax.f32 %v1130_v5, %v1133_v11  ;;  %v5111_v38 = vadd.s32 264, %v4932_v60 }
  0x7e   :  { %10630 = vst [vmem:[#allocation21_spill] sm:$0xff] %v5045_v55  ;;  %v5114_v41 = vadd.s32 272, %v4932_v60  ;;  %v1135_v42 = vsel %vm663_vm1, %v252_v12, -inf  ;;  %v1137_v43 = vsel %vm663_vm1, %v253_v13, -inf  ;;  %v5125_v48 = vadd.s32 280, %v4932_v60  ;;  %v256_v13 = vld [vmem:[%s10206_s1 + $0x770] sm:$0xff] }
  0x7f   :  { %10631 = vst [vmem:[#allocation22_spill] sm:$0xff] %v5048_v56  ;;  %v5128_v51 = vadd.s32 288, %v4932_v60  ;;  %v911_v52 = vmax.f32 %v907_v18, %v910_v24  ;;  %v913_v53 = vmax.f32 %v909_v21, %v912_v27  ;;  %v5131_v54 = vadd.s32 296, %v4932_v60  ;;  %v257_v18 = vld [vmem:[%s10206_s1 + $0x778] sm:$0xff] }
  0x80   :  { %10632 = vst [vmem:[#allocation23_spill] sm:$0xff] %v5051_v59  ;;  %v5134_v57 = vadd.s32 304, %v4932_v60  ;;  %v914_v58 = vsel %vm663_vm1, %v144_v28, -inf  ;;  %v916_v62 = vsel %vm663_vm1, %v145_v31, -inf  ;;  %v5139_v63 = vadd.s32 312, %v4932_v60  ;;  %v260_v59 = vld [vmem:[%s10206_s1 + $0x790] sm:$0xff] }
  0x81   :  { %10633 = vst [vmem:[#allocation24_spill] sm:$0xff] %v5054_v61  ;;  %v5142_v0 = vadd.s32 320, %v4932_v60  ;;  %v1136_v1 = vmax.f32 %v1132_v34, %v1135_v42  ;;  %v1138_v4 = vmax.f32 %v1134_v37, %v1137_v43  ;;  %v5145_v5 = vadd.s32 328, %v4932_v60 }
  0x82   :  { %10634 = vst [vmem:[#allocation25_spill] sm:$0xff] %v5065_v2  ;;  %v5148_v8 = vadd.s32 336, %v4932_v60  ;;  %v1139_v11 = vsel %vm663_vm1, %v254_v44, -inf  ;;  %v1141_v12 = vsel %vm663_vm1, %v255_v47, -inf  ;;  %v5159_v21 = vadd.s32 344, %v4932_v60 }
  0x83   :  { %10635 = vst [vmem:[#allocation26_spill] sm:$0xff] %v5068_v3  ;;  %v5162_v24 = vadd.s32 352, %v4932_v60  ;;  %v915_v27 = vmax.f32 %v911_v52, %v914_v58  ;;  %v917_v28 = vmax.f32 %v913_v53, %v916_v62  ;;  %v5165_v31 = vadd.s32 360, %v4932_v60 }
  0x84   :  { %10636 = vst [vmem:[#allocation27_spill] sm:$0xff] %v5071_v6  ;;  %v5168_v34 = vadd.s32 368, %v4932_v60  ;;  %v5171_v37 = vadd.s32 376, %v4932_v60  ;;  %v5174_v42 = vadd.s32 384, %v4932_v60  ;;  %v5177_v43 = vadd.s32 392, %v4932_v60 }
  0x85   :  { %10637 = vst [vmem:[#allocation28_spill] sm:$0xff] %v5074_v7  ;;  %v5180_v44 = vadd.s32 400, %v4932_v60  ;;  %v1140_v47 = vmax.f32 %v1136_v1, %v1139_v11  ;;  %v1142_v52 = vmax.f32 %v1138_v4, %v1141_v12  ;;  %v5183_v53 = vadd.s32 408, %v4932_v60 }
  0x86   :  { %10638 = vst [vmem:[#allocation29_spill] sm:$0xff] %v5085_v14  ;;  %v5186_v58 = vadd.s32 416, %v4932_v60  ;;  %v1143_v62 = vsel %vm663_vm1, %v256_v13, -inf  ;;  %v5197_v1 = vadd.s32 424, %v4932_v60  ;;  %v5200_v4 = vadd.s32 432, %v4932_v60 }
  0x87   :  { %10639 = vst [vmem:[#allocation30_spill] sm:$0xff] %v5088_v17  ;;  %v5203_v11 = vadd.s32 440, %v4932_v60  ;;  %v918_v12 = vmax.f32 %v915_v27, %v917_v28  ;;  %v5206_v13 = vadd.s32 448, %v4932_v60  ;;  %v5215_v17 = vadd.s32 472, %v4932_v60 }
  0x88   :  { %10640 = vst [vmem:[#allocation31_spill] sm:$0xff] %v5091_v22  ;;  %v5212_v22 = vadd.s32 464, %v4932_v60  ;;  %v5218_v14 = vadd.s32 480, %v4932_v60  ;;  %v5221_v7 = vadd.s32 488, %v4932_v60  ;;  %v1144_v6 = vmax.f32 %v1140_v47, %v1143_v62 }
  0x89   :  { %10641 = vst [vmem:[#allocation32_spill] sm:$0xff] %v5094_v23  ;;  %v259_v23 = vld [vmem:[%s10206_s1 + $0x788] sm:$0xff]  ;;  %v5224_v28 = vadd.s32 496, %v4932_v60  ;;  %v5227_v3 = vadd.s32 504, %v4932_v60  ;;  %v5241_v47 = vadd.s32 520, %v4932_v60  ;;  %v5250_v62 = vadd.s32 544, %v4932_v60 }
  0x8a   :  { %10642 = vst [vmem:[#allocation33_spill] sm:$0xff] %v5105_v32  ;;  %v258_v32 = vld [vmem:[%s10206_s1 + $0x780] sm:$0xff]  ;;  %v1149_v61 = vsel %vm663_vm1, %v259_v23, -inf  ;;  %v5247_v23 = vadd.s32 536, %v4932_v60  ;;  %v5265_v56 = vadd.s32 584, %v4932_v60 }
  0x8b   :  { %10643 = vst [vmem:[#allocation34_spill] sm:$0xff] %v5108_v33  ;;  %v1145_v33 = vsel %vm663_vm1, %v257_v18, -inf  ;;  %v5209_v18 = vadd.s32 456, %v4932_v60  ;;  %v1147_v2 = vsel %vm663_vm1, %v258_v32, -inf  ;;  %v919_v32 = vrot.slane %v918_v12, 4 }
  0x8c   :  { %10644 = vst [vmem:[#allocation35_spill] sm:$0xff] %v5111_v38  ;;  %v1146_v27 = vmax.f32 %v1142_v52, %v1145_v33  ;;  %v5238_v33 = vadd.s32 512, %v4932_v60  ;;  %v5244_v52 = vadd.s32 528, %v4932_v60 }
  0x8d   :  { %10645 = vst [vmem:[#allocation36_spill] sm:$0xff] %v5114_v41 }
  0x8e   :  { %10646 = vst [vmem:[#allocation37_spill] sm:$0xff] %v5125_v48  ;;  %v3847_v48 = vld [vmem:[%s10206_s1 + $0x1c8] sm:$0xff] }
  0x8f   :  { %10647 = vst [vmem:[#allocation38_spill] sm:$0xff] %v5128_v51  ;;  %v3846_v51 = vld [vmem:[%s10206_s1 + $0x1c0] sm:$0xff] }
  0x90   :  { %10648 = vst [vmem:[#allocation39_spill] sm:$0xff] %v5131_v54 }
  0x91   :  { %10649 = vst [vmem:[#allocation40_spill] sm:$0xff] %v5134_v57 }
  0x92   :  { %10650 = vst [vmem:[#allocation41_spill] sm:$0xff] %v5139_v63 }
  0x93   :  { %10651 = vst [vmem:[#allocation42_spill] sm:$0xff] %v5142_v0 }
  0x94   :  { %10652 = vst [vmem:[#allocation43_spill] sm:$0xff] %v5145_v5  ;;  %v3837_v5 = vld [vmem:[%s10206_s1 + $0x178] sm:$0xff] }
  0x95   :  { %10653 = vst [vmem:[#allocation44_spill] sm:$0xff] %v5148_v8 }
  0x96   :  { %10654 = vst [vmem:[#allocation45_spill] sm:$0xff] %v5159_v21 }
  0x97   :  { %10655 = vst [vmem:[#allocation46_spill] sm:$0xff] %v5162_v24 }
  0x98   :  { %10656 = vst [vmem:[#allocation47_spill] sm:$0xff] %v5165_v31 }
  0x99   :  { %10657 = vst [vmem:[#allocation48_spill] sm:$0xff] %v5168_v34  ;;  %v3825_v34 = vld [vmem:[%s10206_s1 + $0x118] sm:$0xff] }
  0x9a   :  { %10658 = vst [vmem:[#allocation49_spill] sm:$0xff] %v5171_v37  ;;  %v3824_v37 = vld [vmem:[%s10206_s1 + $0x110] sm:$0xff] }
  0x9b   :  { %10659 = vst [vmem:[#allocation50_spill] sm:$0xff] %v5174_v42  ;;  %v3823_v42 = vld [vmem:[%s10206_s1 + $0x108] sm:$0xff] }
  0x9c   :  { %10660 = vst [vmem:[#allocation51_spill] sm:$0xff] %v5177_v43  ;;  %v3821_v43 = vld [vmem:[%s10206_s1 + $0xf8] sm:$0xff] }
  0x9d   :  { %10661 = vst [vmem:[#allocation52_spill] sm:$0xff] %v5180_v44  ;;  %v3819_v44 = vld [vmem:[%s10206_s1 + $0xe8] sm:$0xff] }
  0x9e   :  { %10662 = vst [vmem:[#allocation53_spill] sm:$0xff] %v5183_v53 }
  0x9f   :  { %10663 = vst [vmem:[#allocation54_spill] sm:$0xff] %v5186_v58 }
  0xa0   :  { %10664 = vst [vmem:[#allocation55_spill] sm:$0xff] %v5197_v1  ;;  %v3811_v1 = vld [vmem:[%s10206_s1 + $0xa8] sm:$0xff] }
  0xa1   :  { %10665 = vst [vmem:[#allocation56_spill] sm:$0xff] %v5200_v4  ;;  %v3809_v4 = vld [vmem:[%s10206_s1 + $0x98] sm:$0xff] }
  0xa2   :  { %10666 = vst [vmem:[#allocation57_spill] sm:$0xff] %v5203_v11  ;;  %v3807_v11 = vld [vmem:[%s10206_s1 + $0x88] sm:$0xff] }
  0xa3   :  { %10667 = vst [vmem:[#allocation58_spill] sm:$0xff] %v5206_v13  ;;  %v3805_v13 = vld [vmem:[%s10206_s1 + $0x78] sm:$0xff] }
  0xa4   :  { %10668 = vst [vmem:[#allocation59_spill] sm:$0xff] %v5209_v18 }
  0xa5   :  { %10669 = vst [vmem:[#allocation60_spill] sm:$0xff] %v5212_v22 }
  0xa6   :  { %10670 = vst [vmem:[#allocation61_spill] sm:$0xff] %v5215_v17  ;;  %v5469_v17 = vadd.s32 1000, %v4932_v60 }
  0xa7   :  { %10671 = vst [vmem:[#allocation62_spill] sm:$0xff] %v5218_v14  ;;  %v1150_v14 = vmax.f32 %v1146_v27, %v1149_v61  ;;  %v5279_v61 = vadd.s32 600, %v4932_v60  ;;  %v5291_v27 = vadd.s32 632, %v4932_v60 }
  0xa8   :  { %10672 = vst [vmem:[#allocation63_spill] sm:$0xff] %v5221_v7  ;;  %v261_v7 = vld [vmem:[%s10206_s1 + $0x798] sm:$0xff] }
  0xa9   :  { %10673 = vst [vmem:[#allocation64_spill] sm:$0xff] %v5224_v28  ;;  %v5256_v28 = vadd.s32 560, %v4932_v60 }
  0xaa   :  { %10674 = vst [vmem:[#allocation65_spill] sm:$0xff] %v5227_v3  ;;  %v5253_v3 = vadd.s32 552, %v4932_v60 }
  0xab   :  { %10675 = vst [vmem:[#allocation66_spill] sm:$0xff] %v5238_v33  ;;  %v5259_v33 = vadd.s32 568, %v4932_v60 }
  0xac   :  { %10676 = vst [vmem:[#allocation67_spill] sm:$0xff] %v5241_v47  ;;  %v5262_v47 = vadd.s32 576, %v4932_v60 }
  0xad   :  { %10677 = vst [vmem:[#allocation68_spill] sm:$0xff] %v5244_v52  ;;  %v1148_v52 = vmax.f32 %v1144_v6, %v1147_v2  ;;  %v5282_v2 = vadd.s32 608, %v4932_v60  ;;  %v5285_v6 = vadd.s32 616, %v4932_v60 }
  0xae   :  { %10678 = vst [vmem:[#allocation69_spill] sm:$0xff] %v5247_v23  ;;  %v5268_v23 = vadd.s32 592, %v4932_v60 }
  0xaf   :  { %10679 = vst [vmem:[#allocation70_spill] sm:$0xff] %v5250_v62  ;;  %v1151_v62 = vsel %vm663_vm1, %v260_v59, -inf  ;;  %v920_v59 = vmax.f32 %v918_v12, %v919_v32  ;;  %v5306_v32 = vadd.s32 672, %v4932_v60 }
  0xb0   :  { %10680 = vst [vmem:[#allocation71_spill] sm:$0xff] %v5253_v3  ;;  %v1153_v3 = vsel %vm663_vm1, %v261_v7, -inf  ;;  %v5288_v7 = vadd.s32 624, %v4932_v60 }
  0xb1   :  { %10681 = vst [vmem:[#allocation72_spill] sm:$0xff] %v5256_v28  ;;  %v262_v28 = vld [vmem:[%s10206_s1 + $0x7a0] sm:$0xff]  ;;  %v1154_v12 = vmax.f32 %v1150_v14, %v1153_v3  ;;  %v5320_v3 = vadd.s32 688, %v4932_v60  ;;  %v5323_v14 = vadd.s32 696, %v4932_v60 }
  0xb2   :  { %10682 = vst [vmem:[#allocation73_spill] sm:$0xff] %v5259_v33  ;;  %v5347_v33 = vadd.s32 760, %v4932_v60 }
  0xb3   :  { %10683 = vst [vmem:[#allocation74_spill] sm:$0xff] %v5262_v47  ;;  %v263_v47 = vld [vmem:[%s10206_s1 + $0x7a8] sm:$0xff] }
  0xb4   :  { %10684 = vst [vmem:[#allocation75_spill] sm:$0xff] %v5265_v56  ;;  %v5297_v56 = vadd.s32 648, %v4932_v60 }
  0xb5   :  { %10685 = vst [vmem:[#allocation76_spill] sm:$0xff] %v5268_v23  ;;  %v5294_v23 = vadd.s32 640, %v4932_v60 }
  0xb6   :  { %10686 = vst [vmem:[#allocation77_spill] sm:$0xff] %v5279_v61  ;;  %v5300_v61 = vadd.s32 656, %v4932_v60 }
  0xb7   :  { %10687 = vst [vmem:[#allocation78_spill] sm:$0xff] %v5282_v2  ;;  %v5303_v2 = vadd.s32 664, %v4932_v60 }
  0xb8   :  { %10688 = vst [vmem:[#allocation79_spill] sm:$0xff] %v5285_v6  ;;  %v1152_v6 = vmax.f32 %v1148_v52, %v1151_v62  ;;  %v5326_v52 = vadd.s32 704, %v4932_v60  ;;  %v5332_v62 = vadd.s32 720, %v4932_v60 }
  0xb9   :  { %10689 = vst [vmem:[#allocation80_spill] sm:$0xff] %v5288_v7  ;;  %v5309_v7 = vadd.s32 680, %v4932_v60 }
  0xba   :  { %10690 = vst [vmem:[#allocation81_spill] sm:$0xff] %v5291_v27  ;;  %v1155_v27 = vsel %vm663_vm1, %v262_v28, -inf  ;;  %v921_v28 = vrot.slane %v920_v59, 2 }
  0xbb   :  { %10691 = vst [vmem:[#allocation82_spill] sm:$0xff] %v5294_v23  ;;  %v1157_v23 = vsel %vm663_vm1, %v263_v47, -inf  ;;  %v5329_v47 = vadd.s32 712, %v4932_v60 }
  0xbc   :  { %10692 = vst [vmem:[#allocation83_spill] sm:$0xff] %v5297_v56  ;;  %v264_v56 = vld [vmem:[%s10206_s1 + $0x7b0] sm:$0xff] }
  0xbd   :  { %10693 = vst [vmem:[#allocation84_spill] sm:$0xff] %v5300_v61  ;;  %v1158_v61 = vmax.f32 %v1154_v12, %v1157_v23  ;;  %v5361_v23 = vadd.s32 776, %v4932_v60  ;;  %v5373_v12 = vadd.s32 808, %v4932_v60 }
  0xbe   :  { %10694 = vst [vmem:[#allocation85_spill] sm:$0xff] %v5303_v2  ;;  %v265_v2 = vld [vmem:[%s10206_s1 + $0x7b8] sm:$0xff] }
  0xbf   :  { %10695 = vst [vmem:[#allocation86_spill] sm:$0xff] %v5306_v32  ;;  %v5338_v32 = vadd.s32 736, %v4932_v60 }
  0xc0   :  { %10696 = vst [vmem:[#allocation87_spill] sm:$0xff] %v5309_v7  ;;  %v5335_v7 = vadd.s32 728, %v4932_v60 }
  0xc1   :  { %10697 = vst [vmem:[#allocation88_spill] sm:$0xff] %v5320_v3  ;;  %v5341_v3 = vadd.s32 744, %v4932_v60 }
  0xc2   :  { %10698 = vst [vmem:[#allocation89_spill] sm:$0xff] %v5323_v14  ;;  %v5344_v14 = vadd.s32 752, %v4932_v60 }
  0xc3   :  { %10699 = vst [vmem:[#allocation90_spill] sm:$0xff] %v5326_v52  ;;  %v1156_v52 = vmax.f32 %v1152_v6, %v1155_v27  ;;  %v5364_v6 = vadd.s32 784, %v4932_v60  ;;  %v5367_v27 = vadd.s32 792, %v4932_v60 }
  0xc4   :  { %10700 = vst [vmem:[#allocation91_spill] sm:$0xff] %v5329_v47  ;;  %v5350_v47 = vadd.s32 768, %v4932_v60 }
  0xc5   :  { %10701 = vst [vmem:[#allocation92_spill] sm:$0xff] %v5332_v62  ;;  %v1159_v62 = vsel %vm663_vm1, %v264_v56, -inf  ;;  %v922_v56 = vmax.f32 %v920_v59, %v921_v28  ;;  %v5388_v28 = vadd.s32 848, %v4932_v60 }
  0xc6   :  { %10702 = vst [vmem:[#allocation93_spill] sm:$0xff] %v5335_v7  ;;  %v1161_v7 = vsel %vm663_vm1, %v265_v2, -inf  ;;  %v5370_v2 = vadd.s32 800, %v4932_v60 }
  0xc7   :  { %10703 = vst [vmem:[#allocation94_spill] sm:$0xff] %v5338_v32  ;;  %v266_v32 = vld [vmem:[%s10206_s1 + $0x7c0] sm:$0xff]  ;;  %v1162_v59 = vmax.f32 %v1158_v61, %v1161_v7  ;;  %v5402_v61 = vadd.s32 864, %v4932_v60  ;;  %v5405_v7 = vadd.s32 872, %v4932_v60 }
  0xc8   :  { %10704 = vst [vmem:[#allocation95_spill] sm:$0xff] %v5341_v3 }
  0xc9   :  { %10705 = vst [vmem:[#allocation96_spill] sm:$0xff] %v5344_v14  ;;  %v267_v14 = vld [vmem:[%s10206_s1 + $0x7c8] sm:$0xff] }
  0xca   :  { %10706 = vst [vmem:[#allocation97_spill] sm:$0xff] %v5347_v33  ;;  %v5379_v33 = vadd.s32 824, %v4932_v60 }
  0xcb   :  { %10707 = vst [vmem:[#allocation98_spill] sm:$0xff] %v5350_v47  ;;  %v5376_v47 = vadd.s32 816, %v4932_v60 }
  0xcc   :  { %10708 = vst [vmem:[#allocation99_spill] sm:$0xff] %v5361_v23  ;;  %v5382_v23 = vadd.s32 832, %v4932_v60 }
  0xcd   :  { %10709 = vst [vmem:[#allocation100_spill] sm:$0xff] %v5364_v6  ;;  %v5385_v6 = vadd.s32 840, %v4932_v60 }
  0xce   :  { %10710 = vst [vmem:[#allocation101_spill] sm:$0xff] %v5367_v27  ;;  %v1160_v27 = vmax.f32 %v1156_v52, %v1159_v62  ;;  %v5408_v52 = vadd.s32 880, %v4932_v60  ;;  %v5414_v62 = vadd.s32 896, %v4932_v60 }
  0xcf   :  { %10711 = vst [vmem:[#allocation102_spill] sm:$0xff] %v5370_v2  ;;  %v5391_v2 = vadd.s32 856, %v4932_v60 }
  0xd0   :  { %10712 = vst [vmem:[#allocation103_spill] sm:$0xff] %v5373_v12  ;;  %v1163_v12 = vsel %vm663_vm1, %v266_v32, -inf  ;;  %v923_v32 = vrot.slane %v922_v56, 1 }
  0xd1   :  { %10713 = vst [vmem:[#allocation104_spill] sm:$0xff] %v5376_v47  ;;  %v1165_v47 = vsel %vm663_vm1, %v267_v14, -inf  ;;  %v5411_v14 = vadd.s32 888, %v4932_v60 }
  0xd2   :  { %10714 = vst [vmem:[#allocation105_spill] sm:$0xff] %v5379_v33  ;;  %v268_v33 = vld [vmem:[%s10206_s1 + $0x7d0] sm:$0xff] }
  0xd3   :  { %10715 = vst [vmem:[#allocation106_spill] sm:$0xff] %v5382_v23  ;;  %v1166_v23 = vmax.f32 %v1162_v59, %v1165_v47  ;;  %v272_v47 = vld [vmem:[%s10206_s1 + $0x7f0] sm:$0xff]  ;;  %v5452_v59 = vadd.s32 960, %v4932_v60 }
  0xd4   :  { %10716 = vst [vmem:[#allocation107_spill] sm:$0xff] %v5385_v6  ;;  %v269_v6 = vld [vmem:[%s10206_s1 + $0x7d8] sm:$0xff] }
  0xd5   :  { %10717 = vst [vmem:[#allocation108_spill] sm:$0xff] %v5388_v28  ;;  %v5420_v28 = vadd.s32 912, %v4932_v60  ;;  %v1169_v3 = vsel %vm663_vm1, %v269_v6, -inf  ;;  %v5457_v6 = vmax.f32 %v922_v56, %v923_v32 }
  0xd6   :  { %10718 = vst [vmem:[#allocation109_spill] sm:$0xff] %v5391_v2  ;;  %v5417_v2 = vadd.s32 904, %v4932_v60  ;;  %v1170_v32 = vmax.f32 %v1166_v23, %v1169_v3  ;;  %v3791_v3 = vld [vmem:[%s10206_s1 + $0x8] sm:$0xff] }
  0xd7   :  { %10719 = vst [vmem:[#allocation110_spill] sm:$0xff] %v5402_v61  ;;  %v5423_v61 = vadd.s32 920, %v4932_v60  ;;  %v5495_v23 = vsub.f32 %v3791_v3, %v5457_v6 }
  0xd8   :  { %10720 = vst [vmem:[#allocation111_spill] sm:$0xff] %v5405_v7  ;;  %v5426_v7 = vadd.s32 928, %v4932_v60 }
  0xd9   :  { %10721 = vst [vmem:[#allocation112_spill] sm:$0xff] %v5408_v52  ;;  %v1164_v52 = vmax.f32 %v1160_v27, %v1163_v12  ;;  %v273_v27 = vld [vmem:[%s10206_s1 + $0x7f8] sm:$0xff]  ;;  %v5449_v12 = vadd.s32 952, %v4932_v60  ;;  %v1444_v21 = vmul.f32 1.442695, %v5495_v23 }
  0xda   :  { %10722 = vst [vmem:[#allocation113_spill] sm:$0xff] %v5411_v14  ;;  %v270_v14 = vld [vmem:[%s10206_s1 + $0x7e0] sm:$0xff] }
  0xdb   :  { %10723 = vst [vmem:[#allocation114_spill] sm:$0xff] %v5414_v62  ;;  %v5432_v62 = vadd.s32 936, %v4932_v60 }
  0xdc   :  { %10724 = vst [vmem:[#allocation115_spill] sm:$0xff] %v5417_v2  ;;  %v5435_v2 = vadd.s32 944, %v4932_v60 }
  0xdd   :  { %10725 = vst [vmem:[#allocation116_spill] sm:$0xff] %v5420_v28  ;;  %v1167_v28 = vsel %vm663_vm1, %v268_v33, -inf  ;;  %v5455_v33 = vadd.s32 968, %v4932_v60 }
  0xde   :  { %10726 = vst [vmem:[#allocation117_spill] sm:$0xff] %v5423_v61  ;;  %v5466_v61 = vadd.s32 992, %v4932_v60  ;;  %v1168_v56 = vmax.f32 %v1164_v52, %v1167_v28  ;;  %v3792_v28 = vld [vmem:[%s10206_s1 + $0x10] sm:$0xff]  ;;  %v3793_v52 = vld [vmem:[%s10206_s1 + $0x18] sm:$0xff] }
  0xdf   :  { %10727 = vst [vmem:[#allocation118_spill] sm:$0xff] %v5426_v7  ;;  %v271_v7 = vld [vmem:[%s10206_s1 + $0x7e8] sm:$0xff] }
  0xe0   :  { %10728 = vst [vmem:[#allocation119_spill] sm:$0xff] %v5432_v62  ;;  %v5463_v62 = vadd.s32 984, %v4932_v60 }
  0xe1   :  { %10729 = vst [vmem:[#allocation120_spill] sm:$0xff] %v5435_v2  ;;  %v5460_v2 = vadd.s32 976, %v4932_v60 }
  0xe2   :  { %10730 = vst [vmem:[#allocation121_spill] sm:$0xff] %v5449_v12  ;;  %v5472_v12 = vadd.s32 1008, %v4932_v60 }
  0xe3   :  { %10731 = vst [vmem:[#allocation122_spill] sm:$0xff] %v5452_v59  ;;  %v5475_v59 = vadd.s32 1016, %v4932_v60 }
  0xe4   :  { %10732 = vst [vmem:[#allocation123_spill] sm:$0xff] %v5455_v33  ;;  %v1171_v33 = vsel %vm663_vm1, %v270_v14, -inf  ;;  %v3794_v14 = vld [vmem:[%s10206_s1 + $0x20] sm:$0xff] }
  0xe5   :  { %10733 = vst [vmem:[#allocation124_spill] sm:$0xff] %v5460_v2  ;;  %v1173_v2 = vsel %vm663_vm1, %v271_v7, -inf  ;;  %v5501_v7 = vsub.f32 %v3792_v28, %v5457_v6  ;;  %v3796_v28 = vld [vmem:[%s10206_s1 + $0x30] sm:$0xff]  ;;  %v1172_v55 = vmax.f32 %v1168_v56, %v1171_v33  ;;  %v3801_v33 = vld [vmem:[%s10206_s1 + $0x58] sm:$0xff] }
  0xe6   :  { %10734 = vst [vmem:[#allocation125_spill] sm:$0xff] %v5463_v62  ;;  %v5480_v62 = vsel %vm663_vm1, %v272_v47, -inf  ;;  %v5513_v47 = vsub.f32 %v3794_v14, %v5457_v6  ;;  %v1174_v22 = vmax.f32 %v1170_v32, %v1173_v2  ;;  %v5555_v56 = vsub.f32 %v3801_v33, %v5457_v6  ;;  %v3802_v32 = vld [vmem:[%s10206_s1 + $0x60] sm:$0xff] }
  0xe7   :  { %10735 = vst [vmem:[#allocation126_spill] sm:$0xff] %v5466_v61  ;;  %v5483_v61 = vsel %vm663_vm1, %v273_v27, -inf  ;;  %v3795_v27 = vld [vmem:[%s10206_s1 + $0x28] sm:$0xff]  ;;  %v5573_v33 = vsub.f32 %v3804_v49, %v5457_v6  ;;  %v5591_v49 = vsub.f32 %v3807_v11, %v5457_v6  ;;  %v5609_v11 = vsub.f32 %v3810_v40, %v5457_v6  ;;  %v3813_v40 = vld [vmem:[%s10206_s1 + $0xb8] sm:$0xff] }
  0xe8   :  { %10736 = vst [vmem:[#allocation127_spill] sm:$0xff] %v5469_v17  ;;  %v3790_v17 = vld [vmem:[%s10206_s1] sm:$0xff]  ;;  %v5519_v3 = vsub.f32 %v3795_v27, %v5457_v6  ;;  %v1176_v39 = vmax.f32 %v1172_v55, %v5480_v62  ;;  %v1178_v58 = vmax.f32 %v1174_v22, %v5483_v61  ;;  %v5629_v53 = vsub.f32 %v3813_v40, %v5457_v6  ;;  %v3816_v62 = vld [vmem:[%s10206_s1 + $0xd0] sm:$0xff]  ;;  %v3817_v40 = vld [vmem:[%s10206_s1 + $0xd8] sm:$0xff] }
  0xe9   :  { %10737 = vst [vmem:[#allocation128_spill] sm:$0xff] %v5472_v12  ;;  %v5489_v12 = vsub.f32 %v3790_v17, %v5457_v6  ;;  %v5507_v17 = vsub.f32 %v3793_v52, %v5457_v6  ;;  %v5525_v52 = vsub.f32 %v3796_v28, %v5457_v6  ;;  %v3798_v27 = vld [vmem:[%s10206_s1 + $0x40] sm:$0xff]  ;;  %v3799_v28 = vld [vmem:[%s10206_s1 + $0x48] sm:$0xff]  ;;  %v1446_v10 = vmul.f32 1.442695, %v5501_v7 }
  0xea   :  { %10738 = vst [vmem:[#allocation129_spill] sm:$0xff] %v5475_v59  ;;  %v3797_v59 = vld [vmem:[%s10206_s1 + $0x38] sm:$0xff]  ;;  %v5537_v50 = vsub.f32 %v3798_v27, %v5457_v6  ;;  %v5543_v18 = vsub.f32 %v3799_v28, %v5457_v6  ;;  %v5561_v27 = vsub.f32 %v3802_v32, %v5457_v6  ;;  %v3803_v28 = vld [vmem:[%s10206_s1 + $0x68] sm:$0xff]  ;;  %v5579_v32 = vsub.f32 %v3805_v13, %v5457_v6  ;;  %v3814_v55 = vld [vmem:[%s10206_s1 + $0xc0] sm:$0xff] }
  0xeb   :  { %10739 = vst [vmem:[#allocation130_spill] sm:$0xff] %v5489_v12  ;;  %v5531_v14 = vsub.f32 %v3797_v59, %v5457_v6  ;;  %v3800_v59 = vld [vmem:[%s10206_s1 + $0x50] sm:$0xff]  ;;  %v5597_v13 = vsub.f32 %v3808_v45, %v5457_v6  ;;  %v5615_v45 = vsub.f32 %v3811_v1, %v5457_v6  ;;  %v5635_v22 = vsub.f32 %v3814_v55, %v5457_v6  ;;  %v3815_v1 = vld [vmem:[%s10206_s1 + $0xc8] sm:$0xff] }
  0xec   :  { %10740 = vst [vmem:[#allocation131_spill] sm:$0xff] %v5495_v23  ;;  %v5549_v2 = vsub.f32 %v3800_v59, %v5457_v6  ;;  %v5567_v59 = vsub.f32 %v3803_v28, %v5457_v6  ;;  %v5585_v28 = vsub.f32 %v3806_v46, %v5457_v6  ;;  %v5603_v46 = vsub.f32 %v3809_v4, %v5457_v6  ;;  %v3812_v4 = vld [vmem:[%s10206_s1 + $0xb0] sm:$0xff] }
  0xed   :  { %10741 = vst [vmem:[#allocation132_spill] sm:$0xff] %v5501_v7  ;;  %v5623_v36 = vsub.f32 %v3812_v4, %v5457_v6  ;;  %v5641_v61 = vsub.f32 %v3815_v1, %v5457_v6  ;;  %v5647_v4 = vsub.f32 %v3816_v62, %v5457_v6  ;;  %v5653_v55 = vsub.f32 %v3817_v40, %v5457_v6 }
  0xee   :  { %10742 = vst [vmem:[#allocation133_spill] sm:$0xff] %v5507_v17  ;;  %v5659_v1 = vsub.f32 %v3818_v35, %v5457_v6  ;;  %v5665_v62 = vsub.f32 %v3819_v44, %v5457_v6  ;;  %v5671_v40 = vsub.f32 %v3820_v30, %v5457_v6  ;;  %v5677_v35 = vsub.f32 %v3821_v43, %v5457_v6 }
  0xef   :  { %10743 = vst [vmem:[#allocation134_spill] sm:$0xff] %v5513_v47  ;;  %v5683_v44 = vsub.f32 %v3822_v29, %v5457_v6  ;;  %v5689_v30 = vsub.f32 %v3823_v42, %v5457_v6  ;;  %v5695_v43 = vsub.f32 %v3824_v37, %v5457_v6  ;;  %v5701_v29 = vsub.f32 %v3825_v34, %v5457_v6  ;;  %v3826_v42 = vld [vmem:[%s10206_s1 + $0x120] sm:$0xff]  ;;  %v3827_v37 = vld [vmem:[%s10206_s1 + $0x128] sm:$0xff] }
  0xf0   :  { %10744 = vst [vmem:[#allocation135_spill] sm:$0xff] %v5519_v3  ;;  %v1179_v31 = vmax.f32 %v1176_v39, %v1178_v58  ;;  %v5707_v24 = vsub.f32 %v3826_v42, %v5457_v6  ;;  %v5713_v26 = vsub.f32 %v3827_v37, %v5457_v6  ;;  %v1442_v25 = vmul.f32 1.442695, %v5489_v12  ;;  %v3828_v39 = vld [vmem:[%s10206_s1 + $0x130] sm:$0xff]  ;;  %v3829_v58 = vld [vmem:[%s10206_s1 + $0x138] sm:$0xff]  ;;  %v3830_v37 = vld [vmem:[%s10206_s1 + $0x140] sm:$0xff] }
  0xf1   :  { %10745 = vst [vmem:[#allocation136_spill] sm:$0xff] %v5525_v52  ;;  %v5720_v34 = vsub.f32 %v3828_v39, %v5457_v6  ;;  %v5726_v42 = vsub.f32 %v3829_v58, %v5457_v6  ;;  %v5732_v12 = vsub.f32 %v3830_v37, %v5457_v6  ;;  %v3831_v39 = vld [vmem:[%s10206_s1 + $0x148] sm:$0xff]  ;;  %v3832_v58 = vld [vmem:[%s10206_s1 + $0x150] sm:$0xff]  ;;  %v3833_v37 = vld [vmem:[%s10206_s1 + $0x158] sm:$0xff]  ;;  %v1448_v57 = vmul.f32 1.442695, %v5507_v17 }
  0xf2   :  { %10746 = vst [vmem:[#allocation137_spill] sm:$0xff] %v5531_v14  ;;  %v5739_v8 = vsub.f32 %v3831_v39, %v5457_v6  ;;  %v5745_v20 = vsub.f32 %v3832_v58, %v5457_v6  ;;  %v5751_v23 = vsub.f32 %v3833_v37, %v5457_v6  ;;  %v5757_v39 = vsub.f32 %v3834_v19, %v5457_v6  ;;  %v3845_v17 = vld [vmem:[%s10206_s1 + $0x1b8] sm:$0xff] }
  0xf3   :  { %10747 = vst [vmem:[#allocation138_spill] sm:$0xff] %v5537_v50  ;;  %v5763_v58 = vsub.f32 %v3835_v16, %v5457_v6  ;;  %v5769_v37 = vsub.f32 %v3836_v15, %v5457_v6  ;;  %v5775_v19 = vsub.f32 %v3837_v5, %v5457_v6  ;;  %v1180_v9 = vrot.slane %v1179_v31, 4  ;;  %v3838_v16 = vld [vmem:[%s10206_s1 + $0x180] sm:$0xff]  ;;  %v3839_v15 = vld [vmem:[%s10206_s1 + $0x188] sm:$0xff]  ;;  %v3840_v5 = vld [vmem:[%s10206_s1 + $0x190] sm:$0xff] }
  0xf4   :  { %10748 = vst [vmem:[#allocation139_spill] sm:$0xff] %v5543_v18  ;;  %v5782_v0 = vsub.f32 %v3838_v16, %v5457_v6  ;;  %v5788_v60 = vsub.f32 %v3839_v15, %v5457_v6  ;;  %3274 = vpow2.f32 %v1442_v25  ;;  %v5794_v7 = vsub.f32 %v3840_v5, %v5457_v6  ;;  %v3841_v16 = vld [vmem:[%s10206_s1 + $0x198] sm:$0xff]  ;;  %v3842_v25 = vld [vmem:[%s10206_s1 + $0x1a0] sm:$0xff]  ;;  %v3843_v5 = vld [vmem:[%s10206_s1 + $0x1a8] sm:$0xff] }
  0xf5   :  { %10749 = vst [vmem:[#allocation140_spill] sm:$0xff] %v5549_v2  ;;  %v5800_v63 = vsub.f32 %v3841_v16, %v5457_v6  ;;  %3276 = vpow2.f32 %v1444_v21  ;;  %v5807_v15 = vsub.f32 %v3842_v25, %v5457_v6  ;;  %v5813_v54 = vsub.f32 %v3843_v5, %v5457_v6  ;;  %v3844_v21 = vld [vmem:[%s10206_s1 + $0x1b0] sm:$0xff] }
  0xf6   :  { %10750 = vst [vmem:[#allocation141_spill] sm:$0xff] %v5555_v56  ;;  %v5819_v16 = vsub.f32 %v3844_v21, %v5457_v6  ;;  %v5825_v25 = vsub.f32 %v3845_v17, %v5457_v6  ;;  %v5831_v5 = vsub.f32 %v3846_v51, %v5457_v6  ;;  %v5837_v21 = vsub.f32 %v3847_v48, %v5457_v6  ;;  %v3848_v17 = vld [vmem:[%s10206_s1 + $0x1d0] sm:$0xff]  ;;  %v3849_v51 = vld [vmem:[%s10206_s1 + $0x1d8] sm:$0xff]  ;;  %v3851_v48 = vld [vmem:[%s10206_s1 + $0x1e8] sm:$0xff] }
  0xf7   :  { %10751 = vst [vmem:[#allocation142_spill] sm:$0xff] %v5561_v27  ;;  %3278 = vpow2.f32 %v1446_v10  ;;  %v1450_v41 = vmul.f32 1.442695, %v5513_v47  ;;  %v1181_v38 = vmax.f32 %v1179_v31, %v1180_v9  ;;  %v3850_v10 = vld [vmem:[%s10206_s1 + $0x1e0] sm:$0xff]  ;;  %v5862_v31 = vsub.f32 %v3851_v48, %v5457_v6 }
  0xf8   :  { %10752 = vst [vmem:[#allocation143_spill] sm:$0xff] %v5567_v59  ;;  %v5856_v9 = vsub.f32 %v3850_v10, %v5457_v6  ;;  %3280 = vpow2.f32 %v1448_v57  ;;  %v1452_v47 = vmul.f32 1.442695, %v5519_v3  ;;  %v3853_v10 = vld [vmem:[%s10206_s1 + $0x1f8] sm:$0xff]  ;;  %v3854_v48 = vld [vmem:[%s10206_s1 + $0x200] sm:$0xff]  ;;  %v3855_v57 = vld [vmem:[%s10206_s1 + $0x208] sm:$0xff] }
  0xf9   :  { %10753 = vst [vmem:[#allocation144_spill] sm:$0xff] %v5573_v33  ;;  %v3856_v3 = vld [vmem:[%s10206_s1 + $0x210] sm:$0xff]  ;;  %3282 = vpow2.f32 %v1450_v41  ;;  %v3861_v41 = vld [vmem:[%s10206_s1 + $0x238] sm:$0xff] }
  0xfa   :  { %10754 = vst [vmem:[#allocation145_spill] sm:$0xff] %v5579_v32  ;;  %3284 = vpow2.f32 %v1452_v47 }
  0xfb   :  { %10755 = vst [vmem:[#allocation146_spill] sm:$0xff] %v5585_v28 }
  0xfc   :  { %10756 = vst [vmem:[#allocation147_spill] sm:$0xff] %v5591_v49 }
  0xfd   :  { %10757 = vst [vmem:[#allocation148_spill] sm:$0xff] %v5597_v13 }
  0xfe   :  { %10758 = vst [vmem:[#allocation149_spill] sm:$0xff] %v5603_v46 }
  0xff   :  { %10759 = vst [vmem:[#allocation150_spill] sm:$0xff] %v5609_v11 }
 0x100   :  { %10760 = vst [vmem:[#allocation151_spill] sm:$0xff] %v5615_v45 }
 0x101   :  { %10761 = vst [vmem:[#allocation152_spill] sm:$0xff] %v5623_v36 }
 0x102   :  { %10762 = vst [vmem:[#allocation153_spill] sm:$0xff] %v5629_v53 }
 0x103   :  { %10763 = vst [vmem:[#allocation154_spill] sm:$0xff] %v5635_v22 }
 0x104   :  { %10764 = vst [vmem:[#allocation155_spill] sm:$0xff] %v5641_v61 }
 0x105   :  { %10765 = vst [vmem:[#allocation156_spill] sm:$0xff] %v5647_v4 }
 0x106   :  { %10766 = vst [vmem:[#allocation157_spill] sm:$0xff] %v5653_v55 }
 0x107   :  { %10767 = vst [vmem:[#allocation158_spill] sm:$0xff] %v5659_v1 }
 0x108   :  { %10768 = vst [vmem:[#allocation159_spill] sm:$0xff] %v5665_v62 }
 0x109   :  { %10769 = vst [vmem:[#allocation160_spill] sm:$0xff] %v5671_v40 }
 0x10a   :  { %10770 = vst [vmem:[#allocation161_spill] sm:$0xff] %v5677_v35 }
 0x10b   :  { %10771 = vst [vmem:[#allocation162_spill] sm:$0xff] %v5683_v44 }
 0x10c   :  { %10772 = vst [vmem:[#allocation163_spill] sm:$0xff] %v5775_v19 }
 0x10d   :  { %10773 = vst [vmem:[#allocation164_spill] sm:$0xff] %v5782_v0 }
 0x10e   :  { %10774 = vst [vmem:[#allocation165_spill] sm:$0xff] %v5788_v60 }
 0x10f   :  { %10775 = vst [vmem:[#allocation166_spill] sm:$0xff] %v5794_v7 }
 0x110   :  { %10776 = vst [vmem:[#allocation167_spill] sm:$0xff] %v5800_v63 }
 0x111   :  { %10777 = vst [vmem:[#allocation168_spill] sm:$0xff] %v5807_v15 }
 0x112   :  { %10778 = vst [vmem:[#allocation169_spill] sm:$0xff] %v5813_v54 }
 0x113   :  { %10779 = vst [vmem:[#allocation170_spill] sm:$0xff] %v5819_v16 }
 0x114   :  { %10780 = vst [vmem:[#allocation171_spill] sm:$0xff] %v5825_v25  ;;  %v5844_v25 = vsub.f32 %v3848_v17, %v5457_v6  ;;  %v3852_v17 = vld [vmem:[%s10206_s1 + $0x1f0] sm:$0xff] }
 0x115   :  { %10781 = vst [vmem:[#allocation172_spill] sm:$0xff] %v5831_v5  ;;  %v5850_v5 = vsub.f32 %v3849_v51, %v5457_v6  ;;  %v5868_v51 = vsub.f32 %v3852_v17, %v5457_v6  ;;  %v5887_v17 = vsub.f32 %v3855_v57, %v5457_v6  ;;  %v3858_v57 = vld [vmem:[%s10206_s1 + $0x220] sm:$0xff] }
 0x116   :  { %10782 = vst [vmem:[#allocation173_spill] sm:$0xff] %v5837_v21 }
 0x117   :  { %10783 = vst [vmem:[#allocation174_spill] sm:$0xff] %v5844_v25 }
 0x118   :  { %10784 = vst [vmem:[#allocation175_spill] sm:$0xff] %v5850_v5  ;;  %v3275_v5 = vpop.eup %3274 }
 0x119   :  { %10785 = vst [vmem:[#allocation176_spill] sm:$0xff] %v5856_v9  ;;  %v5875_v9 = vsub.f32 %v3853_v10, %v5457_v6  ;;  %v5893_v10 = vsub.f32 %v3856_v3, %v5457_v6  ;;  %v1182_v3 = vrot.slane %v1181_v38, 2 }
 0x11a   :  { %10786 = vst [vmem:[#allocation177_spill] sm:$0xff] %v5862_v31  ;;  %v5881_v31 = vsub.f32 %v3854_v48, %v5457_v6  ;;  %v3857_v48 = vld [vmem:[%s10206_s1 + $0x218] sm:$0xff] }
 0x11b   :  { %10787 = vst [vmem:[#allocation178_spill] sm:$0xff] %v5868_v51  ;;  %v1454_v51 = vmul.f32 1.442695, %v5525_v52  ;;  %v1183_v16 = vmax.f32 %v1181_v38, %v1182_v3  ;;  %v3869_v38 = vld [vmem:[%s10206_s1 + $0x278] sm:$0xff] }
 0x11c   :  { %10788 = vst [vmem:[#allocation179_spill] sm:$0xff] %v5875_v9  ;;  %v3277_v9 = vpop.eup %3276  ;;  %v5977_v3 = vsub.f32 %v3869_v38, %v5457_v6 }
 0x11d   :  { %10789 = vst [vmem:[#allocation180_spill] sm:$0xff] %v5881_v31  ;;  %v5899_v31 = vsub.f32 %v3857_v48, %v5457_v6  ;;  %v3860_v48 = vld [vmem:[%s10206_s1 + $0x230] sm:$0xff]  ;;  %v3279_v52 = vpop.eup %3278  ;;  %v1955_v47 = vsel %vm663_vm1, %v3277_v9, 0.0  ;;  %3286 = vpow2.f32 %v1454_v51 }
 0x11e   :  { %10790 = vst [vmem:[#allocation181_spill] sm:$0xff] %v5887_v17  ;;  %v5905_v17 = vsub.f32 %v3858_v57, %v5457_v6  ;;  %v5924_v57 = vsub.f32 %v3861_v41, %v5457_v6  ;;  %v3864_v41 = vld [vmem:[%s10206_s1 + $0x250] sm:$0xff] }
 0x11f   :  { %10791 = vst [vmem:[#allocation182_spill] sm:$0xff] %v5893_v10  ;;  %v3859_v10 = vld [vmem:[%s10206_s1 + $0x228] sm:$0xff]  ;;  %v3868_v9 = vld [vmem:[%s10206_s1 + $0x270] sm:$0xff] }
 0x120   :  { %10792 = vst [vmem:[#allocation183_spill] sm:$0xff] %v5899_v31  ;;  %v5912_v25 = vsub.f32 %v3859_v10, %v5457_v6  ;;  %v5918_v31 = vsub.f32 %v3860_v48, %v5457_v6  ;;  %v3862_v10 = vld [vmem:[%s10206_s1 + $0x240] sm:$0xff]  ;;  %v3863_v48 = vld [vmem:[%s10206_s1 + $0x248] sm:$0xff] }
 0x121   :  { %10793 = vst [vmem:[#allocation184_spill] sm:$0xff] %v5905_v17  ;;  %v1456_v17 = vmul.f32 1.442695, %v5531_v14  ;;  %v3866_v14 = vld [vmem:[%s10206_s1 + $0x260] sm:$0xff] }
 0x122   :  { %10794 = vst [vmem:[#allocation185_spill] sm:$0xff] %v5912_v25  ;;  %v5930_v25 = vsub.f32 %v3862_v10, %v5457_v6  ;;  %v3865_v10 = vld [vmem:[%s10206_s1 + $0x258] sm:$0xff]  ;;  %v5957_v21 = vsub.f32 %v3866_v14, %v5457_v6  ;;  %v1957_v14 = vsel %vm663_vm1, %v3279_v52, 0.0  ;;  %v3871_v52 = vld [vmem:[%s10206_s1 + $0x288] sm:$0xff] }
 0x123   :  { %10795 = vst [vmem:[#allocation186_spill] sm:$0xff] %v5918_v31  ;;  %v5936_v31 = vsub.f32 %v3863_v48, %v5457_v6  ;;  %v1954_v48 = vsel %vm663_vm1, %v3275_v5, 0.0  ;;  %3288 = vpow2.f32 %v1456_v17  ;;  %v3872_v17 = vld [vmem:[%s10206_s1 + $0x290] sm:$0xff] }
 0x124   :  { %10796 = vst [vmem:[#allocation187_spill] sm:$0xff] %v5924_v57  ;;  %v5943_v57 = vsub.f32 %v3864_v41, %v5457_v6  ;;  %v1458_v41 = vmul.f32 1.442695, %v5537_v50  ;;  %v5990_v50 = vsub.f32 %v3871_v52, %v5457_v6  ;;  %v1462_v52 = vmul.f32 1.442695, %v5549_v2 }
 0x125   :  { %10797 = vst [vmem:[#allocation188_spill] sm:$0xff] %v5930_v25  ;;  %v5949_v25 = vsub.f32 %v3865_v10, %v5457_v6  ;;  %v3867_v10 = vld [vmem:[%s10206_s1 + $0x268] sm:$0xff] }
 0x126   :  { %10798 = vst [vmem:[#allocation189_spill] sm:$0xff] %v5936_v31  ;;  %v3281_v31 = vpop.eup %3280  ;;  %v5964_v5 = vsub.f32 %v3867_v10, %v5457_v6  ;;  %v3870_v10 = vld [vmem:[%s10206_s1 + $0x280] sm:$0xff]  ;;  %3290 = vpow2.f32 %v1458_v41 }
 0x127   :  { %10799 = vst [vmem:[#allocation190_spill] sm:$0xff] %v5943_v57  ;;  %v1956_v57 = vadd.f32 %v1955_v47, %v1954_v48  ;;  %v3283_v51 = vpop.eup %3282  ;;  %v1460_v48 = vmul.f32 1.442695, %v5543_v18 }
 0x128   :  { %10800 = vst [vmem:[#allocation191_spill] sm:$0xff] %v5949_v25  ;;  %v5970_v25 = vsub.f32 %v3868_v9, %v5457_v6  ;;  %v5984_v9 = vsub.f32 %v3870_v10, %v5457_v6  ;;  %v3285_v38 = vpop.eup %3284  ;;  %v3873_v10 = vld [vmem:[%s10206_s1 + $0x298] sm:$0xff]  ;;  %v1961_v41 = vsel %vm663_vm1, %v3283_v51, 0.0  ;;  %v3878_v51 = vld [vmem:[%s10206_s1 + $0x2c0] sm:$0xff] }
 0x129   :  { %10801 = vst [vmem:[#allocation192_spill] sm:$0xff] %v5957_v21  ;;  %v1958_v47 = vadd.f32 %v1957_v14, %v1956_v57  ;;  %v5996_v57 = vsub.f32 %v3872_v17, %v5457_v6  ;;  %v1959_v14 = vsel %vm663_vm1, %v3281_v31, 0.0  ;;  %v6003_v18 = vsub.f32 %v3873_v10, %v5457_v6  ;;  %v3874_v17 = vld [vmem:[%s10206_s1 + $0x2a0] sm:$0xff]  ;;  %v3875_v31 = vld [vmem:[%s10206_s1 + $0x2a8] sm:$0xff]  ;;  %v3287_v10 = vpop.eup %3286 }
 0x12a   :  { %10802 = vst [vmem:[#allocation193_spill] sm:$0xff] %v5964_v5  ;;  %3292 = vpow2.f32 %v1460_v48  ;;  %v3879_v48 = vld [vmem:[%s10206_s1 + $0x2c8] sm:$0xff] }
 0x12b   :  { %10803 = vst [vmem:[#allocation194_spill] sm:$0xff] %v5970_v25  ;;  %3294 = vpow2.f32 %v1462_v52  ;;  %v1965_v52 = vsel %vm663_vm1, %v3287_v10, 0.0  ;;  %v3885_v10 = vld [vmem:[%s10206_s1 + $0x2f8] sm:$0xff] }
 0x12c   :  { %10804 = vst [vmem:[#allocation195_spill] sm:$0xff] %v5977_v3  ;;  %v6016_v3 = vsub.f32 %v3875_v31, %v5457_v6 }
 0x12d   :  { %10805 = vst [vmem:[#allocation196_spill] sm:$0xff] %v5984_v9  ;;  %v1184_v9 = vrot.slane %v1183_v16, 1 }
 0x12e   :  { %10806 = vst [vmem:[#allocation197_spill] sm:$0xff] %v5990_v50  ;;  %v1960_v50 = vadd.f32 %v1959_v14, %v1958_v47  ;;  %v3876_v47 = vld [vmem:[%s10206_s1 + $0x2b0] sm:$0xff] }
 0x12f   :  { %10807 = vst [vmem:[#allocation198_spill] sm:$0xff] %v5996_v57  ;;  %v6010_v57 = vsub.f32 %v3874_v17, %v5457_v6  ;;  %v6023_v14 = vsub.f32 %v3876_v47, %v5457_v6  ;;  %v1464_v17 = vmul.f32 1.442695, %v5555_v56  ;;  %v3289_v47 = vpop.eup %3288 }
 0x130   :  { %10808 = vst [vmem:[#allocation199_spill] sm:$0xff] %v6003_v18  ;;  %v1962_v2 = vadd.f32 %v1961_v41, %v1960_v50  ;;  %v6042_v50 = vsub.f32 %v3879_v48, %v5457_v6  ;;  %v1963_v41 = vsel %vm663_vm1, %v3285_v38, 0.0  ;;  %v3881_v48 = vld [vmem:[%s10206_s1 + $0x2d8] sm:$0xff] }
 0x131   :  { %10809 = vst [vmem:[#allocation200_spill] sm:$0xff] %v6010_v57  ;;  %v3877_v57 = vld [vmem:[%s10206_s1 + $0x2b8] sm:$0xff]  ;;  %v6058_v38 = vsub.f32 %v3881_v48, %v5457_v6  ;;  %3296 = vpow2.f32 %v1464_v17  ;;  %v3884_v48 = vld [vmem:[%s10206_s1 + $0x2f0] sm:$0xff]  ;;  %v3886_v17 = vld [vmem:[%s10206_s1 + $0x300] sm:$0xff] }
 0x132   :  { %10810 = vst [vmem:[#allocation201_spill] sm:$0xff] %v6016_v3  ;;  %v6030_v31 = vsub.f32 %v3877_v57, %v5457_v6  ;;  %v6036_v3 = vsub.f32 %v3878_v51, %v5457_v6  ;;  %v3880_v57 = vld [vmem:[%s10206_s1 + $0x2d0] sm:$0xff]  ;;  %v1466_v51 = vmul.f32 1.442695, %v5561_v27  ;;  %v3291_v27 = vpop.eup %3290 }
 0x133   :  { %10811 = vst [vmem:[#allocation202_spill] sm:$0xff] %v6023_v14  ;;  %v6049_v56 = vsub.f32 %v3880_v57, %v5457_v6 }
 0x134   :  { %10812 = vst [vmem:[#allocation203_spill] sm:$0xff] %v6030_v31  ;;  %v6052_v31 = vmax.f32 %v1183_v16, %v1184_v9  ;;  %v1468_v9 = vmul.f32 1.442695, %v5567_v59  ;;  %3298 = vpow2.f32 %v1466_v51  ;;  %v3890_v51 = vld [vmem:[%s10206_s1 + $0x400] sm:$0xff] }
 0x135   :  { %10813 = vst [vmem:[#allocation204_spill] sm:$0xff] %v6036_v3  ;;  %v1964_v3 = vadd.f32 %v1963_v41, %v1962_v2  ;;  %v3883_v2 = vld [vmem:[%s10206_s1 + $0x2e8] sm:$0xff] }
 0x136   :  { %10814 = vst [vmem:[#allocation205_spill] sm:$0xff] %v6042_v50  ;;  %v3882_v50 = vld [vmem:[%s10206_s1 + $0x2e0] sm:$0xff]  ;;  %v6071_v16 = vsub.f32 %v3883_v2, %v5457_v6  ;;  %v3293_v2 = vpop.eup %3292  ;;  %3300 = vpow2.f32 %v1468_v9 }
 0x137   :  { %10815 = vst [vmem:[#allocation206_spill] sm:$0xff] %v6049_v56  ;;  %v6064_v57 = vsub.f32 %v3882_v50, %v5457_v6  ;;  %v1966_v41 = vadd.f32 %v1965_v52, %v1964_v3  ;;  %v6078_v50 = vsub.f32 %v3884_v48, %v5457_v6  ;;  %v6090_v3 = vsub.f32 %v3886_v17, %v5457_v6  ;;  %v3887_v48 = vld [vmem:[%s10206_s1 + $0x308] sm:$0xff] }
 0x138   :  { %10816 = vst [vmem:[#allocation207_spill] sm:$0xff] %v6058_v38  ;;  %v1967_v52 = vsel %vm663_vm1, %v3289_v47, 0.0  ;;  %v6097_v59 = vsub.f32 %v3887_v48, %v5457_v6  ;;  %v3889_v47 = vld [vmem:[%s10206_s1 + $0x318] sm:$0xff]  ;;  %v3295_v48 = vpop.eup %3294  ;;  %v1971_v9 = vsel %vm663_vm1, %v3293_v2, 0.0  ;;  %v3896_v2 = vld [vmem:[%s10206_s1 + $0x430] sm:$0xff] }
 0x139   :  { %10817 = vst [vmem:[#allocation208_spill] sm:$0xff] %v6064_v57  ;;  %v6084_v57 = vsub.f32 %v3885_v10, %v5457_v6  ;;  %v1470_v10 = vmul.f32 1.442695, %v5573_v33  ;;  %v6157_v38 = vsub.f32 %v3896_v2, %v6052_v31  ;;  %v3898_v2 = vld [vmem:[%s10206_s1 + $0x440] sm:$0xff] }
 0x13a   :  { %10818 = vst [vmem:[#allocation209_spill] sm:$0xff] %v6071_v16 }
 0x13b   :  { %10819 = vst [vmem:[#allocation210_spill] sm:$0xff] %v6078_v50  ;;  %v3888_v50 = vld [vmem:[%s10206_s1 + $0x310] sm:$0xff]  ;;  %3302 = vpow2.f32 %v1470_v10  ;;  %v1973_v10 = vsel %vm663_vm1, %v3295_v48, 0.0 }
 0x13c   :  { %10820 = vst [vmem:[#allocation211_spill] sm:$0xff] %v6084_v57  ;;  %v1968_v57 = vadd.f32 %v1967_v52, %v1966_v41  ;;  %v6104_v17 = vsub.f32 %v3888_v50, %v5457_v6  ;;  %v6116_v41 = vsub.f32 %v3890_v51, %v6052_v31  ;;  %v1969_v52 = vsel %vm663_vm1, %v3291_v27, 0.0  ;;  %v3891_v50 = vld [vmem:[%s10206_s1 + $0x408] sm:$0xff]  ;;  %v3893_v27 = vld [vmem:[%s10206_s1 + $0x418] sm:$0xff] }
 0x13d   :  { %10821 = vst [vmem:[#allocation212_spill] sm:$0xff] %v6090_v3  ;;  %v6110_v3 = vsub.f32 %v3889_v47, %v5457_v6  ;;  %v1472_v47 = vmul.f32 1.442695, %v5579_v32  ;;  %v6136_v33 = vsub.f32 %v3893_v27, %v6052_v31  ;;  %v3297_v32 = vpop.eup %3296  ;;  %v3895_v27 = vld [vmem:[%s10206_s1 + $0x428] sm:$0xff] }
 0x13e   :  { %10822 = vst [vmem:[#allocation213_spill] sm:$0xff] %v6097_v59  ;;  %v3892_v59 = vld [vmem:[%s10206_s1 + $0x410] sm:$0xff]  ;;  %v1698_v48 = vmul.f32 1.442695, %v6116_v41  ;;  %v1975_v14 = vsel %vm663_vm1, %v3297_v32, 0.0 }
 0x13f   :  { %10823 = vst [vmem:[#allocation214_spill] sm:$0xff] %v6104_v17  ;;  %v6123_v17 = vsub.f32 %v3891_v50, %v6052_v31  ;;  %v6130_v51 = vsub.f32 %v3892_v59, %v6052_v31  ;;  %v1474_v50 = vmul.f32 1.442695, %v5585_v28  ;;  %v1476_v59 = vmul.f32 1.442695, %v5591_v49  ;;  %v3299_v49 = vpop.eup %3298 }
 0x140   :  { %10824 = vst [vmem:[#allocation215_spill] sm:$0xff] %v6110_v3  ;;  %v1970_v3 = vadd.f32 %v1969_v52, %v1968_v57  ;;  %v3894_v57 = vld [vmem:[%s10206_s1 + $0x420] sm:$0xff]  ;;  %v6151_v28 = vsub.f32 %v3895_v27, %v6052_v31  ;;  %3304 = vpow2.f32 %v1472_v47  ;;  %v1480_v27 = vmul.f32 1.442695, %v5603_v46  ;;  %v3301_v18 = vpop.eup %3300  ;;  %v3899_v47 = vld [vmem:[%s10206_s1 + $0x448] sm:$0xff] }
 0x141   :  { %10825 = vst [vmem:[#allocation216_spill] sm:$0xff] %v6116_v41  ;;  %v6144_v52 = vsub.f32 %v3894_v57, %v6052_v31  ;;  %v1478_v57 = vmul.f32 1.442695, %v5597_v13  ;;  %v6172_v13 = vsub.f32 %v3898_v2, %v6052_v31  ;;  %3306 = vpow2.f32 %v1474_v50  ;;  %v3900_v50 = vld [vmem:[%s10206_s1 + $0x450] sm:$0xff]  ;;  %v3303_v46 = vpop.eup %3302 }
 0x142   :  { %10826 = vst [vmem:[#allocation217_spill] sm:$0xff] %v6123_v17  ;;  %v1972_v16 = vadd.f32 %v1971_v9, %v1970_v3  ;;  %v3897_v3 = vld [vmem:[%s10206_s1 + $0x438] sm:$0xff]  ;;  %3308 = vpow2.f32 %v1476_v59  ;;  %v6187_v2 = vsub.f32 %v3900_v50, %v6052_v31  ;;  %v1702_v32 = vmul.f32 1.442695, %v6130_v51 }
 0x143   :  { %10827 = vst [vmem:[#allocation218_spill] sm:$0xff] %v6130_v51  ;;  %v6165_v9 = vsub.f32 %v3897_v3, %v6052_v31  ;;  %v6180_v3 = vsub.f32 %v3899_v47, %v6052_v31  ;;  %3310 = vpow2.f32 %v1478_v57  ;;  %v1977_v41 = vsel %vm663_vm1, %v3299_v49, 0.0  ;;  %v3901_v59 = vld [vmem:[%s10206_s1 + $0x458] sm:$0xff]  ;;  %v3902_v57 = vld [vmem:[%s10206_s1 + $0x460] sm:$0xff] }
 0x144   :  { %10828 = vst [vmem:[#allocation219_spill] sm:$0xff] %v6136_v33  ;;  %v1974_v56 = vadd.f32 %v1973_v10, %v1972_v16  ;;  %v1700_v16 = vmul.f32 1.442695, %v6123_v17  ;;  %v6195_v47 = vsub.f32 %v3901_v59, %v6052_v31  ;;  %3312 = vpow2.f32 %v1480_v27  ;;  %v3903_v27 = vld [vmem:[%s10206_s1 + $0x468] sm:$0xff] }
 0x145   :  { %10829 = vst [vmem:[#allocation220_spill] sm:$0xff] %v6144_v52  ;;  %v6202_v50 = vsub.f32 %v3902_v57, %v6052_v31  ;;  %v1482_v49 = vmul.f32 1.442695, %v5609_v11  ;;  %3314 = vpow2.f32 %v1698_v48  ;;  %v1979_v51 = vsel %vm663_vm1, %v3301_v18, 0.0  ;;  %v3904_v57 = vld [vmem:[%s10206_s1 + $0x470] sm:$0xff] }
 0x146   :  { %10830 = vst [vmem:[#allocation221_spill] sm:$0xff] %v6151_v28  ;;  %v1976_v10 = vadd.f32 %v1975_v14, %v1974_v56  ;;  %v1704_v56 = vmul.f32 1.442695, %v6136_v33  ;;  %v3305_v17 = vpop.eup %3304  ;;  %v6210_v59 = vsub.f32 %v3903_v27, %v6052_v31  ;;  %3316 = vpow2.f32 %v1700_v16  ;;  %v3905_v16 = vld [vmem:[%s10206_s1 + $0x478] sm:$0xff] }
 0x147   :  { %10831 = vst [vmem:[#allocation222_spill] sm:$0xff] %v6157_v38  ;;  %v3307_v33 = vpop.eup %3306  ;;  %v6217_v48 = vsub.f32 %v3904_v57, %v6052_v31  ;;  %v1484_v18 = vmul.f32 1.442695, %v5615_v45  ;;  %3318 = vpow2.f32 %v1702_v32  ;;  %v1981_v11 = vsel %vm663_vm1, %v3303_v46, 0.0  ;;  %v3906_v57 = vld [vmem:[%s10206_s1 + $0x480] sm:$0xff] }
 0x148   :  { %10832 = vst [vmem:[#allocation223_spill] sm:$0xff] %v6165_v9  ;;  %v1978_v14 = vadd.f32 %v1977_v41, %v1976_v10  ;;  %v1706_v41 = vmul.f32 1.442695, %v6144_v52  ;;  %v3309_v25 = vpop.eup %3308  ;;  %3320 = vpow2.f32 %v1704_v56  ;;  %v6232_v32 = vsub.f32 %v3906_v57, %v6052_v31  ;;  %v3907_v56 = vld [vmem:[%s10206_s1 + $0x488] sm:$0xff] }
 0x149   :  { %10833 = vst [vmem:[#allocation224_spill] sm:$0xff] %v6172_v13  ;;  %v3311_v52 = vpop.eup %3310  ;;  %3322 = vpow2.f32 %v1482_v49  ;;  %v1486_v46 = vmul.f32 1.442695, %v5623_v36  ;;  %v1983_v45 = vsel %vm663_vm1, %v3305_v17, 0.0  ;;  %v3908_v49 = vld [vmem:[%s10206_s1 + $0x490] sm:$0xff]  ;;  %v1985_v36 = vsel %vm663_vm1, %v3307_v33, 0.0 }
 0x14a   :  { %10834 = vst [vmem:[#allocation225_spill] sm:$0xff] %v6180_v3  ;;  %v1980_v10 = vadd.f32 %v1979_v51, %v1978_v14  ;;  %v6225_v51 = vsub.f32 %v3905_v16, %v6052_v31  ;;  %v1708_v14 = vmul.f32 1.442695, %v6151_v28  ;;  %v3313_v5 = vpop.eup %3312  ;;  %3324 = vpow2.f32 %v1706_v41 }
 0x14b   :  { %10835 = vst [vmem:[#allocation226_spill] sm:$0xff] %v6187_v2  ;;  %v3315_v28 = vpop.eup %3314  ;;  %v6247_v57 = vsub.f32 %v3908_v49, %v6052_v31  ;;  %3326 = vpow2.f32 %v1484_v18  ;;  %v1488_v17 = vmul.f32 1.442695, %v5629_v53  ;;  %v1712_v41 = vmul.f32 1.442695, %v6165_v9 }
 0x14c   :  { %10836 = vst [vmem:[#allocation227_spill] sm:$0xff] %v6195_v47  ;;  %v1982_v27 = vadd.f32 %v1981_v11, %v1980_v10  ;;  %v6240_v11 = vsub.f32 %v3907_v56, %v6052_v31  ;;  %v1710_v10 = vmul.f32 1.442695, %v6157_v38  ;;  %v3317_v21 = vpop.eup %3316  ;;  %3328 = vpow2.f32 %v1708_v14 }
 0x14d   :  { %10837 = vst [vmem:[#allocation228_spill] sm:$0xff] %v6202_v50  ;;  %3330 = vpow2.f32 %v1486_v46  ;;  %v1490_v38 = vmul.f32 1.442695, %v5635_v22  ;;  %v1987_v54 = vsel %vm663_vm1, %v3309_v25, 0.0  ;;  %v2216_v49 = vsel %vm663_vm1, %v3317_v21, 0.0 }
 0x14e   :  { %10838 = vst [vmem:[#allocation229_spill] sm:$0xff] %v6210_v59  ;;  %v1984_v16 = vadd.f32 %v1983_v45, %v1982_v27  ;;  %v2215_v45 = vsel %vm663_vm1, %v3315_v28, 0.0  ;;  %v3319_v27 = vpop.eup %3318  ;;  %3332 = vpow2.f32 %v1710_v10  ;;  %v1714_v53 = vmul.f32 1.442695, %v6172_v13 }
 0x14f   :  { %10839 = vst [vmem:[#allocation230_spill] sm:$0xff] %v6217_v48  ;;  %v3321_v18 = vpop.eup %3320  ;;  %v2217_v15 = vadd.f32 %v2216_v49, %v2215_v45  ;;  %3334 = vpow2.f32 %v1488_v17  ;;  %v1989_v28 = vsel %vm663_vm1, %v3311_v52, 0.0  ;;  %v2218_v46 = vsel %vm663_vm1, %v3319_v27, 0.0 }
 0x150   :  { %10840 = vst [vmem:[#allocation231_spill] sm:$0xff] %v6225_v51  ;;  %v1986_v56 = vadd.f32 %v1985_v36, %v1984_v16  ;;  %v3323_v14 = vpop.eup %3322  ;;  %v1492_v36 = vmul.f32 1.442695, %v5641_v61  ;;  %3336 = vpow2.f32 %v1712_v41  ;;  %v1716_v25 = vmul.f32 1.442695, %v6180_v3 }
 0x151   :  { %10841 = vst [vmem:[#allocation232_spill] sm:$0xff] %v6232_v32  ;;  %v3325_v16 = vpop.eup %3324  ;;  %v2219_v21 = vadd.f32 %v2218_v46, %v2217_v15  ;;  %3338 = vpow2.f32 %v1490_v38  ;;  %v1494_v10 = vmul.f32 1.442695, %v5647_v4  ;;  %v2220_v17 = vsel %vm663_vm1, %v3321_v18, 0.0 }
 0x152   :  { %10842 = vst [vmem:[#allocation233_spill] sm:$0xff] %v6240_v11  ;;  %v1988_v33 = vadd.f32 %v1987_v54, %v1986_v56  ;;  %v3327_v22 = vpop.eup %3326  ;;  %v1991_v54 = vsel %vm663_vm1, %v3313_v5, 0.0  ;;  %3340 = vpow2.f32 %v1714_v53  ;;  %v1718_v52 = vmul.f32 1.442695, %v6187_v2 }
 0x153   :  { %10843 = vst [vmem:[#allocation234_spill] sm:$0xff] %v6247_v57  ;;  %v3329_v56 = vpop.eup %3328  ;;  %v2221_v27 = vadd.f32 %v2220_v17, %v2219_v21  ;;  %3342 = vpow2.f32 %v1492_v36  ;;  %v1496_v41 = vmul.f32 1.442695, %v5653_v55  ;;  %v1993_v15 = vsel %vm663_vm1, %v3323_v14, 0.0 }
 0x154   :  { %v1990_v9 = vadd.f32 %v1989_v28, %v1988_v33  ;;  %v3331_v49 = vpop.eup %3330  ;;  %v2222_v38 = vsel %vm663_vm1, %v3325_v16, 0.0  ;;  %3344 = vpow2.f32 %v1716_v25  ;;  %v1720_v5 = vmul.f32 1.442695, %v6195_v47 }
 0x155   :  { %v3333_v33 = vpop.eup %3332  ;;  %v2223_v18 = vadd.f32 %v2222_v38, %v2221_v27  ;;  %3346 = vpow2.f32 %v1494_v10  ;;  %v1498_v53 = vmul.f32 1.442695, %v5659_v1  ;;  %v2224_v36 = vsel %vm663_vm1, %v3329_v56, 0.0 }
 0x156   :  { %v1992_v45 = vadd.f32 %v1991_v54, %v1990_v9  ;;  %v3335_v46 = vpop.eup %3334  ;;  %v1995_v9 = vsel %vm663_vm1, %v3327_v22, 0.0  ;;  %3348 = vpow2.f32 %v1718_v52  ;;  %v1722_v14 = vmul.f32 1.442695, %v6202_v50 }
 0x157   :  { %v3337_v21 = vpop.eup %3336  ;;  %v2225_v16 = vadd.f32 %v2224_v36, %v2223_v18  ;;  %3350 = vpow2.f32 %v1496_v41  ;;  %v1500_v25 = vmul.f32 1.442695, %v5665_v62  ;;  %v2226_v10 = vsel %vm663_vm1, %v3333_v33, 0.0 }
 0x158   :  { %v1994_v28 = vadd.f32 %v1993_v15, %v1992_v45  ;;  %v3339_v17 = vpop.eup %3338  ;;  %v1997_v45 = vsel %vm663_vm1, %v3331_v49, 0.0  ;;  %3352 = vpow2.f32 %v1720_v5  ;;  %v1724_v22 = vmul.f32 1.442695, %v6210_v59 }
 0x159   :  { %v3341_v27 = vpop.eup %3340  ;;  %v2227_v56 = vadd.f32 %v2226_v10, %v2225_v16  ;;  %3354 = vpow2.f32 %v1498_v53  ;;  %v1502_v52 = vmul.f32 1.442695, %v5671_v40  ;;  %v2228_v41 = vsel %vm663_vm1, %v3337_v21, 0.0 }
 0x15a   :  { %v1996_v54 = vadd.f32 %v1995_v9, %v1994_v28  ;;  %v3343_v38 = vpop.eup %3342  ;;  %v1999_v28 = vsel %vm663_vm1, %v3335_v46, 0.0  ;;  %3356 = vpow2.f32 %v1722_v14  ;;  %v1726_v49 = vmul.f32 1.442695, %v6217_v48  ;;  %v3909_v14 = vld [vmem:[%s10206_s1 + $0x498] sm:$0xff] }
 0x15b   :  { %v3345_v18 = vpop.eup %3344  ;;  %v2229_v33 = vadd.f32 %v2228_v41, %v2227_v56  ;;  %3358 = vpow2.f32 %v1500_v25  ;;  %v1504_v5 = vmul.f32 1.442695, %v5677_v35  ;;  %v2230_v53 = vsel %vm663_vm1, %v3341_v27, 0.0  ;;  %v3977_v35 = vld [vmem:[%s10206_s1 + $0x5d8] sm:$0xff] }
 0x15c   :  { %v1998_v15 = vadd.f32 %v1997_v45, %v1996_v54  ;;  %v3347_v36 = vpop.eup %3346  ;;  %v2001_v54 = vsel %vm663_vm1, %v3339_v17, 0.0  ;;  %3360 = vpow2.f32 %v1724_v22  ;;  %v1728_v46 = vmul.f32 1.442695, %v6225_v51 }
 0x15d   :  { %v3349_v16 = vpop.eup %3348  ;;  %v2231_v21 = vadd.f32 %v2230_v53, %v2229_v33  ;;  %3362 = vpow2.f32 %v1502_v52  ;;  %v2003_v25 = vsel %vm663_vm1, %v3343_v38, 0.0  ;;  %v2232_v17 = vsel %vm663_vm1, %v3345_v18, 0.0 }
 0x15e   :  { %v2000_v9 = vadd.f32 %v1999_v28, %v1998_v15  ;;  %v3351_v10 = vpop.eup %3350  ;;  %v6289_v15 = vsub.f32 %v3909_v14, %v6052_v31  ;;  %3364 = vpow2.f32 %v1726_v49  ;;  %v1730_v22 = vmul.f32 1.442695, %v6232_v32  ;;  %v3910_v49 = vld [vmem:[%s10206_s1 + $0x4a0] sm:$0xff] }
 0x15f   :  { %v3353_v27 = vpop.eup %3352  ;;  %v2233_v28 = vadd.f32 %v2232_v17, %v2231_v21  ;;  %3366 = vpow2.f32 %v1504_v5  ;;  %v2005_v33 = vsel %vm663_vm1, %v3347_v36, 0.0  ;;  %v1732_v38 = vmul.f32 1.442695, %v6240_v11  ;;  %v3911_v36 = vld [vmem:[%s10206_s1 + $0x4a8] sm:$0xff] }
 0x160   :  { %v2002_v45 = vadd.f32 %v2001_v54, %v2000_v9  ;;  %10844 = vst [vmem:[#allocation235_spill] sm:$0xff] %v6289_v15  ;;  %v3355_v41 = vpop.eup %3354  ;;  %v1506_v9 = vmul.f32 1.442695, %v5683_v44  ;;  %v2234_v54 = vsel %vm663_vm1, %v3349_v16, 0.0  ;;  %3368 = vpow2.f32 %v1728_v46  ;;  %v3976_v44 = vld [vmem:[%s10206_s1 + $0x5d0] sm:$0xff] }
 0x161   :  { %v3357_v53 = vpop.eup %3356  ;;  %v2235_v18 = vadd.f32 %v2234_v54, %v2233_v28  ;;  %v6308_v5 = vsub.f32 %v3911_v36, %v6052_v31  ;;  %v2007_v16 = vsel %vm663_vm1, %v3351_v10, 0.0  ;;  %v2236_v46 = vsel %vm663_vm1, %v3353_v27, 0.0 }
 0x162   :  { %v2004_v56 = vadd.f32 %v2003_v25, %v2002_v45  ;;  %v3359_v14 = vpop.eup %3358  ;;  %v6302_v45 = vsub.f32 %v3910_v49, %v6052_v31  ;;  %3370 = vpow2.f32 %v1730_v22  ;;  %v1734_v25 = vmul.f32 1.442695, %v6247_v57  ;;  %v3912_v22 = vld [vmem:[%s10206_s1 + $0x4b0] sm:$0xff] }
 0x163   :  { %10846 = vst [vmem:[#allocation237_spill] sm:$0xff] %v6308_v5  ;;  %v3361_v21 = vpop.eup %3360  ;;  %3372 = vpow2.f32 %v1506_v9  ;;  %v2009_v54 = vsel %vm663_vm1, %v3355_v41, 0.0  ;;  %v2238_v49 = vsel %vm663_vm1, %v3357_v53, 0.0  ;;  %v1736_v10 = vmul.f32 1.442695, %v6289_v15  ;;  %v3913_v41 = vld [vmem:[%s10206_s1 + $0x4b8] sm:$0xff] }
 0x164   :  { %v2006_v52 = vadd.f32 %v2005_v33, %v2004_v56  ;;  %10845 = vst [vmem:[#allocation236_spill] sm:$0xff] %v6302_v45  ;;  %v2237_v56 = vadd.f32 %v2236_v46, %v2235_v18  ;;  %v3363_v28 = vpop.eup %3362  ;;  %v1508_v33 = vmul.f32 1.442695, %v5689_v30  ;;  %3374 = vpow2.f32 %v1732_v38 }
 0x165   :  { %v3365_v36 = vpop.eup %3364  ;;  %v6327_v9 = vsub.f32 %v3913_v41, %v6052_v31  ;;  %v2011_v53 = vsel %vm663_vm1, %v3359_v14, 0.0  ;;  %v2240_v38 = vsel %vm663_vm1, %v3361_v21, 0.0  ;;  %3376 = vpow2.f32 %v1734_v25  ;;  %v3914_v25 = vld [vmem:[%s10206_s1 + $0x320] sm:$0xff] }
 0x166   :  { %v2008_v17 = vadd.f32 %v2007_v16, %v2006_v52  ;;  %v2239_v27 = vadd.f32 %v2238_v49, %v2237_v56  ;;  %v3367_v32 = vpop.eup %3366  ;;  %v6321_v52 = vsub.f32 %v3912_v22, %v6052_v31  ;;  %v1738_v16 = vmul.f32 1.442695, %v6302_v45 }
 0x167   :  { %10848 = vst [vmem:[#allocation239_spill] sm:$0xff] %v6327_v9  ;;  %v3369_v18 = vpop.eup %3368  ;;  %3378 = vpow2.f32 %v1508_v33  ;;  %v1510_v56 = vmul.f32 1.442695, %v5695_v43  ;;  %v2242_v49 = vsel %vm663_vm1, %v3365_v36, 0.0  ;;  %v1740_v41 = vmul.f32 1.442695, %v6308_v5 }
 0x168   :  { %v2010_v11 = vadd.f32 %v2009_v54, %v2008_v17  ;;  %10847 = vst [vmem:[#allocation238_spill] sm:$0xff] %v6321_v52  ;;  %v2241_v17 = vadd.f32 %v2240_v38, %v2239_v27  ;;  %v2013_v54 = vsel %vm663_vm1, %v3363_v28, 0.0  ;;  %v3371_v22 = vpop.eup %3370  ;;  %3380 = vpow2.f32 %v1736_v10  ;;  %v3915_v28 = vld [vmem:[%s10206_s1 + $0x328] sm:$0xff] }
 0x169   :  { %v3373_v21 = vpop.eup %3372  ;;  %v6346_v33 = vsub.f32 %v3915_v28, %v5457_v6  ;;  %v2015_v36 = vsel %vm663_vm1, %v3367_v32, 0.0  ;;  %v2244_v10 = vsel %vm663_vm1, %v3369_v18, 0.0  ;;  %3382 = vpow2.f32 %v1738_v16 }
 0x16a   :  { %v2012_v46 = vadd.f32 %v2011_v53, %v2010_v11  ;;  %v2243_v15 = vadd.f32 %v2242_v49, %v2241_v17  ;;  %v6340_v11 = vsub.f32 %v3914_v25, %v5457_v6  ;;  %v3375_v27 = vpop.eup %3374  ;;  %v3916_v53 = vld [vmem:[%s10206_s1 + $0x4c0] sm:$0xff]  ;;  %3384 = vpow2.f32 %v1510_v56  ;;  %v3919_v56 = vld [vmem:[%s10206_s1 + $0x338] sm:$0xff] }
 0x16b   :  { %10850 = vst [vmem:[#allocation241_spill] sm:$0xff] %v6346_v33  ;;  %v6354_v38 = vsub.f32 %v3916_v53, %v6052_v31  ;;  %v1512_v18 = vmul.f32 1.442695, %v5701_v29  ;;  %v2246_v49 = vsel %vm663_vm1, %v3371_v22, 0.0  ;;  %v3377_v25 = vpop.eup %3376  ;;  %3386 = vpow2.f32 %v1740_v41  ;;  %v3968_v33 = vld [vmem:[%s10206_s1 + $0x590] sm:$0xff] }
 0x16c   :  { %v2014_v14 = vadd.f32 %v2013_v54, %v2012_v46  ;;  %10849 = vst [vmem:[#allocation240_spill] sm:$0xff] %v6340_v11  ;;  %v1742_v46 = vmul.f32 1.442695, %v6321_v52  ;;  %v2245_v17 = vadd.f32 %v2244_v10, %v2243_v15  ;;  %v3917_v54 = vld [vmem:[%s10206_s1 + $0x4c8] sm:$0xff]  ;;  %v1744_v28 = vmul.f32 1.442695, %v6327_v9 }
 0x16d   :  { %10851 = vst [vmem:[#allocation242_spill] sm:$0xff] %v6354_v38  ;;  %v6361_v32 = vsub.f32 %v3917_v54, %v6052_v31  ;;  %v3379_v52 = vpop.eup %3378  ;;  %v3918_v15 = vld [vmem:[%s10206_s1 + $0x330] sm:$0xff]  ;;  %v6376_v22 = vsub.f32 %v3919_v56, %v5457_v6  ;;  %v2017_v41 = vsel %vm663_vm1, %v3373_v21, 0.0  ;;  %v3921_v56 = vld [vmem:[%s10206_s1 + $0x4d8] sm:$0xff]  ;;  %v2250_v9 = vsel %vm663_vm1, %v3377_v25, 0.0 }
 0x16e   :  { %v2016_v16 = vadd.f32 %v2015_v36, %v2014_v14  ;;  %v2247_v53 = vadd.f32 %v2246_v49, %v2245_v17  ;;  %v6370_v10 = vsub.f32 %v3918_v15, %v5457_v6  ;;  %v2248_v14 = vsel %vm663_vm1, %v3375_v27, 0.0  ;;  %v3381_v36 = vpop.eup %3380  ;;  %v3920_v17 = vld [vmem:[%s10206_s1 + $0x4d0] sm:$0xff]  ;;  %v3969_v11 = vld [vmem:[%s10206_s1 + $0x598] sm:$0xff] }
 0x16f   :  { %10852 = vst [vmem:[#allocation243_spill] sm:$0xff] %v6361_v32  ;;  %v6384_v54 = vsub.f32 %v3920_v17, %v6052_v31  ;;  %3388 = vpow2.f32 %v1742_v46  ;;  %v1746_v49 = vmul.f32 1.442695, %v6354_v38  ;;  %v6391_v21 = vsub.f32 %v3921_v56, %v6052_v31  ;;  %v3383_v5 = vpop.eup %3382 }
 0x170   :  { %10853 = vst [vmem:[#allocation244_spill] sm:$0xff] %v6370_v10  ;;  %v2249_v15 = vadd.f32 %v2248_v14, %v2247_v53  ;;  %3390 = vpow2.f32 %v1512_v18  ;;  %v1514_v27 = vmul.f32 1.442695, %v5707_v24  ;;  %v1748_v17 = vmul.f32 1.442695, %v6361_v32  ;;  %v3385_v38 = vpop.eup %3384  ;;  %v3922_v53 = vld [vmem:[%s10206_s1 + $0x340] sm:$0xff] }
 0x171   :  { %10854 = vst [vmem:[#allocation245_spill] sm:$0xff] %v6376_v22  ;;  %3392 = vpow2.f32 %v1744_v28  ;;  %v2018_v46 = vadd.f32 %v2017_v41, %v2016_v16  ;;  %v6400_v14 = vsub.f32 %v3922_v53, %v5457_v6  ;;  %v3923_v18 = vld [vmem:[%s10206_s1 + $0x348] sm:$0xff]  ;;  %v2019_v28 = vsel %vm663_vm1, %v3379_v52, 0.0  ;;  %v3924_v41 = vld [vmem:[%s10206_s1 + $0x4e0] sm:$0xff] }
 0x172   :  { %10855 = vst [vmem:[#allocation246_spill] sm:$0xff] %v6384_v54  ;;  %v2251_v45 = vadd.f32 %v2250_v9, %v2249_v15  ;;  %v6406_v25 = vsub.f32 %v3923_v18, %v5457_v6  ;;  %v2252_v16 = vsel %vm663_vm1, %v3381_v36, 0.0  ;;  %v3387_v9 = vpop.eup %3386  ;;  %v6414_v15 = vsub.f32 %v3924_v41, %v6052_v31  ;;  %v3925_v18 = vld [vmem:[%s10206_s1 + $0x4e8] sm:$0xff] }
 0x173   :  { %10856 = vst [vmem:[#allocation247_spill] sm:$0xff] %v6391_v21  ;;  %3394 = vpow2.f32 %v1746_v49  ;;  %v1750_v56 = vmul.f32 1.442695, %v6384_v54  ;;  %v6421_v52 = vsub.f32 %v3925_v18, %v6052_v31  ;;  %v1516_v36 = vmul.f32 1.442695, %v5713_v26 }
 0x174   :  { %10857 = vst [vmem:[#allocation248_spill] sm:$0xff] %v6400_v14  ;;  %v2253_v53 = vadd.f32 %v2252_v16, %v2251_v45  ;;  %3396 = vpow2.f32 %v1514_v27  ;;  %v2254_v32 = vsel %vm663_vm1, %v3383_v5, 0.0  ;;  %v1752_v41 = vmul.f32 1.442695, %v6391_v21  ;;  %v3926_v45 = vld [vmem:[%s10206_s1 + $0x350] sm:$0xff]  ;;  %v3927_v27 = vld [vmem:[%s10206_s1 + $0x358] sm:$0xff] }
 0x175   :  { %10858 = vst [vmem:[#allocation249_spill] sm:$0xff] %v6406_v25  ;;  %v3389_v57 = vpop.eup %3388  ;;  %3398 = vpow2.f32 %v1748_v17  ;;  %v2020_v49 = vadd.f32 %v2019_v28, %v2018_v46  ;;  %v6430_v16 = vsub.f32 %v3926_v45, %v5457_v6  ;;  %v6436_v5 = vsub.f32 %v3927_v27, %v5457_v6  ;;  %v3928_v28 = vld [vmem:[%s10206_s1 + $0x4f0] sm:$0xff]  ;;  %v3929_v27 = vld [vmem:[%s10206_s1 + $0x360] sm:$0xff] }
 0x176   :  { %10859 = vst [vmem:[#allocation250_spill] sm:$0xff] %v6414_v15  ;;  %v2255_v51 = vadd.f32 %v2254_v32, %v2253_v53  ;;  %v3391_v54 = vpop.eup %3390  ;;  %v2021_v17 = vsel %vm663_vm1, %v3385_v38, 0.0  ;;  %v2256_v46 = vsel %vm663_vm1, %v3387_v9, 0.0  ;;  %v6444_v53 = vsub.f32 %v3928_v28, %v6052_v31 }
 0x177   :  { %10860 = vst [vmem:[#allocation251_spill] sm:$0xff] %v6421_v52  ;;  %v3393_v32 = vpop.eup %3392  ;;  %3400 = vpow2.f32 %v1750_v56  ;;  %v1754_v18 = vmul.f32 1.442695, %v6414_v15  ;;  %v6451_v38 = vsub.f32 %v3929_v27, %v5457_v6  ;;  %v1518_v9 = vmul.f32 1.442695, %v5720_v34 }
 0x178   :  { %10861 = vst [vmem:[#allocation252_spill] sm:$0xff] %v6430_v16  ;;  %v2257_v45 = vadd.f32 %v2256_v46, %v2255_v51  ;;  %3402 = vpow2.f32 %v1516_v36  ;;  %v2258_v21 = vsel %vm663_vm1, %v3389_v57, 0.0  ;;  %v1756_v28 = vmul.f32 1.442695, %v6421_v52  ;;  %v3930_v51 = vld [vmem:[%s10206_s1 + $0x368] sm:$0xff]  ;;  %v3931_v36 = vld [vmem:[%s10206_s1 + $0x4f8] sm:$0xff] }
 0x179   :  { %10862 = vst [vmem:[#allocation253_spill] sm:$0xff] %v6436_v5  ;;  %v3395_v48 = vpop.eup %3394  ;;  %3404 = vpow2.f32 %v1752_v41  ;;  %v2022_v56 = vadd.f32 %v2021_v17, %v2020_v49  ;;  %v6460_v46 = vsub.f32 %v3930_v51, %v5457_v6  ;;  %v6466_v57 = vsub.f32 %v3931_v36, %v6052_v31  ;;  %v3932_v17 = vld [vmem:[%s10206_s1 + $0x370] sm:$0xff]  ;;  %v3933_v36 = vld [vmem:[%s10206_s1 + $0x378] sm:$0xff] }
 0x17a   :  { %10863 = vst [vmem:[#allocation254_spill] sm:$0xff] %v6444_v53  ;;  %v2259_v5 = vadd.f32 %v2258_v21, %v2257_v45  ;;  %v3397_v15 = vpop.eup %3396  ;;  %v2023_v41 = vsel %vm663_vm1, %v3391_v54, 0.0  ;;  %v2260_v49 = vsel %vm663_vm1, %v3393_v32, 0.0  ;;  %v6474_v45 = vsub.f32 %v3932_v17, %v5457_v6  ;;  %v3934_v32 = vld [vmem:[%s10206_s1 + $0x380] sm:$0xff] }
 0x17b   :  { %10864 = vst [vmem:[#allocation255_spill] sm:$0xff] %v6451_v38  ;;  %v3399_v21 = vpop.eup %3398  ;;  %3406 = vpow2.f32 %v1754_v18  ;;  %v1758_v27 = vmul.f32 1.442695, %v6444_v53  ;;  %v6481_v54 = vsub.f32 %v3933_v36, %v5457_v6  ;;  %v6487_v52 = vsub.f32 %v3934_v32, %v5457_v6  ;;  %v3935_v36 = vld [vmem:[%s10206_s1 + $0x500] sm:$0xff] }
 0x17c   :  { %10865 = vst [vmem:[#allocation256_spill] sm:$0xff] %v6460_v46  ;;  %v2261_v51 = vadd.f32 %v2260_v49, %v2259_v5  ;;  %3408 = vpow2.f32 %v1518_v9  ;;  %v2262_v18 = vsel %vm663_vm1, %v3395_v48, 0.0  ;;  %v1520_v5 = vmul.f32 1.442695, %v5726_v42 }
 0x17d   :  { %10866 = vst [vmem:[#allocation257_spill] sm:$0xff] %v6466_v57  ;;  %v3401_v17 = vpop.eup %3400  ;;  %3410 = vpow2.f32 %v1756_v28  ;;  %v2024_v49 = vadd.f32 %v2023_v41, %v2022_v56  ;;  %v1760_v32 = vmul.f32 1.442695, %v6466_v57  ;;  %v2025_v9 = vsel %vm663_vm1, %v3397_v15, 0.0  ;;  %v3936_v28 = vld [vmem:[%s10206_s1 + $0x388] sm:$0xff]  ;;  %v3937_v41 = vld [vmem:[%s10206_s1 + $0x390] sm:$0xff] }
 0x17e   :  { %10867 = vst [vmem:[#allocation258_spill] sm:$0xff] %v6474_v45  ;;  %v2263_v53 = vadd.f32 %v2262_v18, %v2261_v51  ;;  %v3403_v45 = vpop.eup %3402  ;;  %v2264_v48 = vsel %vm663_vm1, %v3399_v21, 0.0  ;;  %v6504_v56 = vsub.f32 %v3936_v28, %v5457_v6  ;;  %v6510_v51 = vsub.f32 %v3937_v41, %v5457_v6  ;;  %v3938_v15 = vld [vmem:[%s10206_s1 + $0x398] sm:$0xff]  ;;  %v3940_v41 = vld [vmem:[%s10206_s1 + $0x508] sm:$0xff] }
 0x17f   :  { %10868 = vst [vmem:[#allocation259_spill] sm:$0xff] %v6481_v54  ;;  %v6495_v54 = vsub.f32 %v3935_v36, %v6052_v31  ;;  %3412 = vpow2.f32 %v1758_v27  ;;  %v6516_v21 = vsub.f32 %v3938_v15, %v5457_v6  ;;  %v3939_v36 = vld [vmem:[%s10206_s1 + $0x3a0] sm:$0xff]  ;;  %v2266_v27 = vsel %vm663_vm1, %v3401_v17, 0.0 }
 0x180   :  { %10869 = vst [vmem:[#allocation260_spill] sm:$0xff] %v6487_v52  ;;  %v3405_v52 = vpop.eup %3404  ;;  %v2265_v18 = vadd.f32 %v2264_v48, %v2263_v53  ;;  %v6522_v28 = vsub.f32 %v3939_v36, %v5457_v6  ;;  %v6528_v53 = vsub.f32 %v3940_v41, %v6052_v31  ;;  %3414 = vpow2.f32 %v1520_v5  ;;  %v3941_v41 = vld [vmem:[%s10206_s1 + $0x3a8] sm:$0xff]  ;;  %v3942_v5 = vld [vmem:[%s10206_s1 + $0x3b0] sm:$0xff] }
 0x181   :  { %10870 = vst [vmem:[#allocation261_spill] sm:$0xff] %v6495_v54  ;;  %v3407_v48 = vpop.eup %3406  ;;  %v1522_v15 = vmul.f32 1.442695, %v5732_v12  ;;  %v2026_v57 = vadd.f32 %v2025_v9, %v2024_v49  ;;  %3416 = vpow2.f32 %v1760_v32  ;;  %v1762_v36 = vmul.f32 1.442695, %v6495_v54  ;;  %v3944_v9 = vld [vmem:[%s10206_s1 + $0x3c0] sm:$0xff] }
 0x182   :  { %10871 = vst [vmem:[#allocation262_spill] sm:$0xff] %v6504_v56  ;;  %v2268_v56 = vsel %vm663_vm1, %v3405_v52, 0.0  ;;  %v6539_v17 = vsub.f32 %v3941_v41, %v5457_v6  ;;  %v6545_v49 = vsub.f32 %v3942_v5, %v5457_v6  ;;  %v3946_v5 = vld [vmem:[%s10206_s1 + $0x510] sm:$0xff]  ;;  %v1528_v38 = vmul.f32 1.442695, %v5751_v23 }
 0x183   :  { %10872 = vst [vmem:[#allocation263_spill] sm:$0xff] %v6510_v51  ;;  %v3409_v51 = vpop.eup %3408  ;;  %3418 = vpow2.f32 %v1522_v15  ;;  %v1530_v59 = vmul.f32 1.442695, %v5757_v39  ;;  %v1532_v40 = vmul.f32 1.442695, %v5763_v58 }
 0x184   :  { %10873 = vst [vmem:[#allocation264_spill] sm:$0xff] %v6516_v21  ;;  %v2267_v21 = vadd.f32 %v2266_v27, %v2265_v18  ;;  %v3411_v46 = vpop.eup %3410  ;;  %v6557_v18 = vsub.f32 %v3944_v9, %v5457_v6  ;;  %v3945_v27 = vld [vmem:[%s10206_s1 + $0x3c8] sm:$0xff]  ;;  %v1524_v9 = vmul.f32 1.442695, %v5739_v8  ;;  %3420 = vpow2.f32 %v1762_v36 }
 0x185   :  { %10874 = vst [vmem:[#allocation265_spill] sm:$0xff] %v6522_v28  ;;  %v2027_v28 = vsel %vm663_vm1, %v3403_v45, 0.0  ;;  %v3943_v45 = vld [vmem:[%s10206_s1 + $0x3b8] sm:$0xff]  ;;  %v6563_v41 = vsub.f32 %v3945_v27, %v5457_v6  ;;  %v2029_v27 = vsel %vm663_vm1, %v3409_v51, 0.0  ;;  %v3949_v51 = vld [vmem:[%s10206_s1 + $0x3e0] sm:$0xff] }
 0x186   :  { %10875 = vst [vmem:[#allocation266_spill] sm:$0xff] %v6528_v53  ;;  %v6551_v52 = vsub.f32 %v3943_v45, %v5457_v6  ;;  %v2269_v32 = vadd.f32 %v2268_v56, %v2267_v21  ;;  %v6569_v56 = vsub.f32 %v3946_v5, %v6052_v31  ;;  %v2270_v21 = vsel %vm663_vm1, %v3407_v48, 0.0  ;;  %v3413_v45 = vpop.eup %3412  ;;  %v3947_v5 = vld [vmem:[%s10206_s1 + $0x3d0] sm:$0xff] }
 0x187   :  { %10876 = vst [vmem:[#allocation267_spill] sm:$0xff] %v6539_v17  ;;  %v2028_v54 = vadd.f32 %v2027_v28, %v2026_v57  ;;  %v6580_v48 = vsub.f32 %v3947_v5, %v5457_v6  ;;  %v3948_v57 = vld [vmem:[%s10206_s1 + $0x3d8] sm:$0xff]  ;;  %v3951_v5 = vld [vmem:[%s10206_s1 + $0x3f0] sm:$0xff]  ;;  %3422 = vpow2.f32 %v1524_v9  ;;  %v3955_v9 = vld [vmem:[%s10206_s1 + $0x528] sm:$0xff] }
 0x188   :  { %10877 = vst [vmem:[#allocation268_spill] sm:$0xff] %v6545_v49  ;;  %v3415_v49 = vpop.eup %3414  ;;  %v6586_v28 = vsub.f32 %v3948_v57, %v5457_v6  ;;  %v6604_v57 = vsub.f32 %v3951_v5, %v5457_v6  ;;  %v1526_v5 = vmul.f32 1.442695, %v5745_v20  ;;  %v3961_v17 = vld [vmem:[%s10206_s1 + $0x558] sm:$0xff] }
 0x189   :  { %10878 = vst [vmem:[#allocation269_spill] sm:$0xff] %v6551_v52  ;;  %v1764_v52 = vmul.f32 1.442695, %v6528_v53  ;;  %v3417_v36 = vpop.eup %3416 }
 0x18a   :  { %10879 = vst [vmem:[#allocation270_spill] sm:$0xff] %v6557_v18  ;;  %v2271_v18 = vadd.f32 %v2270_v21, %v2269_v32  ;;  %v3950_v32 = vld [vmem:[%s10206_s1 + $0x3e8] sm:$0xff] }
 0x18b   :  { %10880 = vst [vmem:[#allocation271_spill] sm:$0xff] %v6563_v41  ;;  %v2272_v41 = vsel %vm663_vm1, %v3411_v46, 0.0  ;;  %v6592_v46 = vsub.f32 %v3949_v51, %v5457_v6  ;;  %v6598_v21 = vsub.f32 %v3950_v32, %v5457_v6  ;;  %v3952_v51 = vld [vmem:[%s10206_s1 + $0x3f8] sm:$0xff]  ;;  %3424 = vpow2.f32 %v1764_v52 }
 0x18c   :  { %10881 = vst [vmem:[#allocation272_spill] sm:$0xff] %v6569_v56  ;;  %v2273_v15 = vadd.f32 %v2272_v41, %v2271_v18  ;;  %v6610_v18 = vsub.f32 %v3952_v51, %v5457_v6  ;;  %v2274_v41 = vsel %vm663_vm1, %v3413_v45, 0.0  ;;  %v3953_v32 = vld [vmem:[%s10206_s1 + $0x518] sm:$0xff]  ;;  %v3419_v51 = vpop.eup %3418  ;;  %v3954_v45 = vld [vmem:[%s10206_s1 + $0x520] sm:$0xff]  ;;  %3426 = vpow2.f32 %v1526_v5 }
 0x18d   :  { %10882 = vst [vmem:[#allocation273_spill] sm:$0xff] %v6580_v48  ;;  %v3960_v48 = vld [vmem:[%s10206_s1 + $0x550] sm:$0xff]  ;;  %v2033_v25 = vsel %vm663_vm1, %v3419_v51, 0.0  ;;  %v3965_v51 = vld [vmem:[%s10206_s1 + $0x578] sm:$0xff] }
 0x18e   :  { %10883 = vst [vmem:[#allocation274_spill] sm:$0xff] %v6586_v28  ;;  %v2031_v28 = vsel %vm663_vm1, %v3415_v49, 0.0  ;;  %v2275_v6 = vadd.f32 %v2274_v41, %v2273_v15  ;;  %v3956_v49 = vld [vmem:[%s10206_s1 + $0x530] sm:$0xff]  ;;  %v3421_v15 = vpop.eup %3420  ;;  %v3957_v41 = vld [vmem:[%s10206_s1 + $0x538] sm:$0xff] }
 0x18f   :  { %10884 = vst [vmem:[#allocation275_spill] sm:$0xff] %v6592_v46  ;;  %v1766_v46 = vmul.f32 1.442695, %v6569_v56  ;;  %v6638_v52 = vsub.f32 %v3956_v49, %v6052_v31  ;;  %v3959_v49 = vld [vmem:[%s10206_s1 + $0x548] sm:$0xff]  ;;  %v3423_v22 = vpop.eup %3422  ;;  %v2278_v5 = vsel %vm663_vm1, %v3421_v15, 0.0 }
 0x190   :  { %10885 = vst [vmem:[#allocation276_spill] sm:$0xff] %v6598_v21  ;;  %v6617_v21 = vsub.f32 %v3953_v32, %v6052_v31  ;;  %v6645_v32 = vsub.f32 %v3957_v41, %v6052_v31  ;;  %v6663_v41 = vsub.f32 %v3960_v48, %v6052_v31  ;;  %v3962_v48 = vld [vmem:[%s10206_s1 + $0x560] sm:$0xff]  ;;  %v2035_v47 = vsel %vm663_vm1, %v3423_v22, 0.0  ;;  %v3972_v22 = vld [vmem:[%s10206_s1 + $0x5b0] sm:$0xff] }
 0x191   :  { %10886 = vst [vmem:[#allocation277_spill] sm:$0xff] %v6604_v57  ;;  %v2030_v57 = vadd.f32 %v2029_v27, %v2028_v54  ;;  %v6632_v54 = vsub.f32 %v3955_v9, %v6052_v31  ;;  %v2276_v27 = vsel %vm663_vm1, %v3417_v36, 0.0  ;;  %v6657_v36 = vsub.f32 %v3959_v49, %v6052_v31 }
 0x192   :  { %10887 = vst [vmem:[#allocation278_spill] sm:$0xff] %v6610_v18  ;;  %v6626_v18 = vsub.f32 %v3954_v45, %v6052_v31  ;;  %v3958_v45 = vld [vmem:[%s10206_s1 + $0x540] sm:$0xff]  ;;  %3428 = vpow2.f32 %v1766_v46  ;;  %v1768_v49 = vmul.f32 1.442695, %v6617_v21  ;;  %v2277_v14 = vadd.f32 %v2276_v27, %v2275_v6  ;;  %v3964_v46 = vld [vmem:[%s10206_s1 + $0x570] sm:$0xff]  ;;  %v3425_v6 = vpop.eup %3424 }
 0x193   :  { %10888 = vst [vmem:[#allocation279_spill] sm:$0xff] %v6617_v21  ;;  %v6651_v9 = vsub.f32 %v3958_v45, %v6052_v31  ;;  %v6669_v45 = vsub.f32 %v3961_v17, %v6052_v31  ;;  %v2032_v16 = vadd.f32 %v2031_v28, %v2030_v57  ;;  %v6678_v10 = vsub.f32 %v3962_v48, %v6052_v31  ;;  %v3963_v17 = vld [vmem:[%s10206_s1 + $0x568] sm:$0xff]  ;;  %v3966_v48 = vld [vmem:[%s10206_s1 + $0x580] sm:$0xff]  ;;  %v3427_v3 = vpop.eup %3426 }
 0x194   :  { %10889 = vst [vmem:[#allocation280_spill] sm:$0xff] %v6626_v18  ;;  %v6684_v28 = vsub.f32 %v3963_v17, %v6052_v31  ;;  %v6690_v57 = vsub.f32 %v3964_v46, %v6052_v31  ;;  %v6697_v27 = vsub.f32 %v3965_v51, %v6052_v31  ;;  %v6703_v17 = vsub.f32 %v3966_v48, %v6052_v31  ;;  %v3967_v46 = vld [vmem:[%s10206_s1 + $0x588] sm:$0xff] }
 0x195   :  { %10890 = vst [vmem:[#allocation281_spill] sm:$0xff] %v6632_v54  ;;  %v6709_v15 = vsub.f32 %v3967_v46, %v6052_v31  ;;  %v6715_v51 = vsub.f32 %v3968_v33, %v6052_v31  ;;  %v6721_v48 = vsub.f32 %v3969_v11, %v6052_v31  ;;  %3430 = vpow2.f32 %v1528_v38  ;;  %v3970_v33 = vld [vmem:[%s10206_s1 + $0x5a0] sm:$0xff]  ;;  %v3971_v11 = vld [vmem:[%s10206_s1 + $0x5a8] sm:$0xff] }
 0x196   :  { %10891 = vst [vmem:[#allocation282_spill] sm:$0xff] %v6638_v52  ;;  %v2034_v50 = vadd.f32 %v2033_v25, %v2032_v16  ;;  %3432 = vpow2.f32 %v1768_v49  ;;  %v1770_v46 = vmul.f32 1.442695, %v6626_v18  ;;  %v2279_v2 = vadd.f32 %v2278_v5, %v2277_v14  ;;  %v3973_v49 = vld [vmem:[%s10206_s1 + $0x5b8] sm:$0xff] }
 0x197   :  { %10892 = vst [vmem:[#allocation283_spill] sm:$0xff] %v6645_v32  ;;  %v6730_v13 = vsub.f32 %v3970_v33, %v6052_v31  ;;  %v6736_v25 = vsub.f32 %v3971_v11, %v6052_v31  ;;  %v6742_v14 = vsub.f32 %v3972_v22, %v6052_v31  ;;  %v2280_v16 = vsel %vm663_vm1, %v3425_v6, 0.0  ;;  %v3974_v33 = vld [vmem:[%s10206_s1 + $0x5c0] sm:$0xff]  ;;  %v3975_v22 = vld [vmem:[%s10206_s1 + $0x5c8] sm:$0xff]  ;;  %v3985_v18 = vld [vmem:[%s10206_s1 + $0x618] sm:$0xff] }
 0x198   :  { %10893 = vst [vmem:[#allocation284_spill] sm:$0xff] %v6651_v9  ;;  %v3429_v38 = vpop.eup %3428  ;;  %v6749_v5 = vsub.f32 %v3973_v49, %v6052_v31  ;;  %v6755_v11 = vsub.f32 %v3974_v33, %v6052_v31  ;;  %v6761_v6 = vsub.f32 %v3975_v22, %v6052_v31  ;;  %v6767_v49 = vsub.f32 %v3976_v44, %v6052_v31  ;;  %v3978_v44 = vld [vmem:[%s10206_s1 + $0x5e0] sm:$0xff] }
 0x199   :  { %10894 = vst [vmem:[#allocation285_spill] sm:$0xff] %v6657_v36  ;;  %v6773_v33 = vsub.f32 %v3977_v35, %v6052_v31  ;;  %3434 = vpow2.f32 %v1530_v59  ;;  %v2036_v62 = vadd.f32 %v2035_v47, %v2034_v50  ;;  %v1772_v22 = vmul.f32 1.442695, %v6632_v54  ;;  %v3979_v35 = vld [vmem:[%s10206_s1 + $0x5e8] sm:$0xff]  ;;  %v3984_v54 = vld [vmem:[%s10206_s1 + $0x610] sm:$0xff] }
 0x19a   :  { %10895 = vst [vmem:[#allocation286_spill] sm:$0xff] %v6663_v41  ;;  %3436 = vpow2.f32 %v1770_v46  ;;  %v2037_v1 = vsel %vm663_vm1, %v3427_v3, 0.0  ;;  %v2281_v55 = vadd.f32 %v2280_v16, %v2279_v2  ;;  %v6782_v61 = vsub.f32 %v3978_v44, %v6052_v31  ;;  %v3980_v3 = vld [vmem:[%s10206_s1 + $0x5f0] sm:$0xff]  ;;  %v3981_v46 = vld [vmem:[%s10206_s1 + $0x5f8] sm:$0xff]  ;;  %v3982_v44 = vld [vmem:[%s10206_s1 + $0x600] sm:$0xff] }
 0x19b   :  { %10896 = vst [vmem:[#allocation287_spill] sm:$0xff] %v6669_v45  ;;  %v3431_v4 = vpop.eup %3430  ;;  %v6788_v47 = vsub.f32 %v3979_v35, %v6052_v31  ;;  %v6794_v2 = vsub.f32 %v3980_v3, %v6052_v31  ;;  %v2282_v50 = vsel %vm663_vm1, %v3429_v38, 0.0  ;;  %v6801_v16 = vsub.f32 %v3981_v46, %v6052_v31  ;;  %v3983_v3 = vld [vmem:[%s10206_s1 + $0x608] sm:$0xff] }
 0x19c   :  { %10897 = vst [vmem:[#allocation288_spill] sm:$0xff] %v6678_v10  ;;  %v3433_v59 = vpop.eup %3432  ;;  %v6807_v35 = vsub.f32 %v3982_v44, %v6052_v31  ;;  %v6813_v38 = vsub.f32 %v3983_v3, %v6052_v31  ;;  %v6819_v46 = vsub.f32 %v3984_v54, %v6052_v31  ;;  %v6825_v44 = vsub.f32 %v3985_v18, %v6052_v31  ;;  %v3986_v54 = vld [vmem:[%s10206_s1 + $0x620] sm:$0xff]  ;;  %v3988_v18 = vld [vmem:[%s10206_s1 + $0x630] sm:$0xff] }
 0x19d   :  { %10898 = vst [vmem:[#allocation289_spill] sm:$0xff] %v6684_v28  ;;  %3438 = vpow2.f32 %v1532_v40  ;;  %v1534_v21 = vmul.f32 1.442695, %v5769_v37  ;;  %v2038_v56 = vadd.f32 %v2037_v1, %v2036_v62  ;;  %v1774_v3 = vmul.f32 1.442695, %v6638_v52  ;;  %v3987_v40 = vld [vmem:[%s10206_s1 + $0x628] sm:$0xff] }
 0x19e   :  { %10899 = vst [vmem:[#allocation290_spill] sm:$0xff] %v6690_v57  ;;  %3440 = vpow2.f32 %v1772_v22  ;;  %v2039_v53 = vsel %vm663_vm1, %v3431_v4, 0.0  ;;  %v6840_v1 = vsub.f32 %v3987_v40, %v6052_v31  ;;  %v1536_v62 = vmul.f32 1.442695, %v5775_v19  ;;  %v3990_v40 = vld [vmem:[%s10206_s1 + $0x640] sm:$0xff] }
 0x19f   :  { %10900 = vst [vmem:[#allocation291_spill] sm:$0xff] %v6697_v27  ;;  %v2284_v4 = vsel %vm663_vm1, %v3433_v59, 0.0  ;;  %v6848_v22 = vsub.f32 %v3988_v18, %v6052_v31  ;;  %v6860_v59 = vsub.f32 %v3990_v40, %v6052_v31  ;;  %v1538_v52 = vmul.f32 1.442695, %v5782_v0  ;;  %v3991_v18 = vld [vmem:[%s10206_s1 + $0x648] sm:$0xff]  ;;  %v3992_v0 = vld [vmem:[%s10206_s1 + $0x650] sm:$0xff] }
 0x1a0   :  { %10901 = vst [vmem:[#allocation292_spill] sm:$0xff] %v6703_v17  ;;  %3442 = vpow2.f32 %v1534_v21  ;;  %v1542_v21 = vmul.f32 1.442695, %v5794_v7  ;;  %v4008_v7 = vld [vmem:[%s10206_s1 + $0x6d0] sm:$0xff] }
 0x1a1   :  { %10902 = vst [vmem:[#allocation293_spill] sm:$0xff] %v6709_v15  ;;  %3444 = vpow2.f32 %v1774_v3  ;;  %v1544_v3 = vmul.f32 1.442695, %v5800_v63  ;;  %v4004_v63 = vld [vmem:[%s10206_s1 + $0x6b0] sm:$0xff] }
 0x1a2   :  { %10903 = vst [vmem:[#allocation294_spill] sm:$0xff] %v6715_v51  ;;  %3446 = vpow2.f32 %v1536_v62  ;;  %v3995_v62 = vld [vmem:[%s10206_s1 + $0x668] sm:$0xff] }
 0x1a3   :  { %10904 = vst [vmem:[#allocation295_spill] sm:$0xff] %v6721_v48  ;;  %3448 = vpow2.f32 %v1538_v52 }
 0x1a4   :  { %10905 = vst [vmem:[#allocation296_spill] sm:$0xff] %v6730_v13 }
 0x1a5   :  { %10906 = vst [vmem:[#allocation297_spill] sm:$0xff] %v6736_v25 }
 0x1a6   :  { %10907 = vst [vmem:[#allocation298_spill] sm:$0xff] %v6761_v6 }
 0x1a7   :  { %10908 = vst [vmem:[#allocation299_spill] sm:$0xff] %v6767_v49 }
 0x1a8   :  { %10909 = vst [vmem:[#allocation300_spill] sm:$0xff] %v6773_v33 }
 0x1a9   :  { %10910 = vst [vmem:[#allocation301_spill] sm:$0xff] %v6782_v61 }
 0x1aa   :  { %10911 = vst [vmem:[#allocation302_spill] sm:$0xff] %v6788_v47 }
 0x1ab   :  { %10912 = vst [vmem:[#allocation303_spill] sm:$0xff] %v6794_v2 }
 0x1ac   :  { %10913 = vst [vmem:[#allocation304_spill] sm:$0xff] %v6801_v16 }
 0x1ad   :  { %10914 = vst [vmem:[#allocation305_spill] sm:$0xff] %v6807_v35  ;;  %v3435_v35 = vpop.eup %3434 }
 0x1ae   :  { %10915 = vst [vmem:[#allocation306_spill] sm:$0xff] %v6813_v38  ;;  %v2283_v38 = vadd.f32 %v2282_v50, %v2281_v55  ;;  %v3437_v55 = vpop.eup %3436  ;;  %v3989_v50 = vld [vmem:[%s10206_s1 + $0x638] sm:$0xff] }
 0x1af   :  { %10916 = vst [vmem:[#allocation307_spill] sm:$0xff] %v6819_v46  ;;  %v6834_v46 = vsub.f32 %v3986_v54, %v6052_v31  ;;  %v6854_v54 = vsub.f32 %v3989_v50, %v6052_v31  ;;  %v1540_v50 = vmul.f32 1.442695, %v5788_v60 }
 0x1b0   :  { %10917 = vst [vmem:[#allocation308_spill] sm:$0xff] %v6825_v44  ;;  %v2285_v40 = vadd.f32 %v2284_v4, %v2283_v38  ;;  %v6876_v44 = vsub.f32 %v3992_v0, %v6052_v31  ;;  %v3994_v38 = vld [vmem:[%s10206_s1 + $0x660] sm:$0xff]  ;;  %v6897_v4 = vsub.f32 %v3995_v62, %v6052_v31  ;;  %v10930_v62 = vld [vmem:[#allocation169_spill] sm:$0xff] }
 0x1b1   :  { %10918 = vst [vmem:[#allocation309_spill] sm:$0xff] %v6834_v46  ;;  %v2041_v46 = vsel %vm663_vm1, %v3435_v35, 0.0  ;;  %v6890_v0 = vsub.f32 %v3994_v38, %v6052_v31  ;;  %3450 = vpow2.f32 %v1540_v50  ;;  %v1548_v50 = vmul.f32 1.442695, %v10930_v62 }
 0x1b2   :  { %10919 = vst [vmem:[#allocation310_spill] sm:$0xff] %v6840_v1  ;;  %v1776_v1 = vmul.f32 1.442695, %v6645_v32 }
 0x1b3   :  { %10920 = vst [vmem:[#allocation311_spill] sm:$0xff] %v6848_v22  ;;  %v6867_v22 = vsub.f32 %v3991_v18, %v6052_v31  ;;  %v2286_v18 = vsel %vm663_vm1, %v3437_v55, 0.0  ;;  %v10928_v55 = vld [vmem:[#allocation168_spill] sm:$0xff] }
 0x1b4   :  { %10921 = vst [vmem:[#allocation312_spill] sm:$0xff] %v6854_v54  ;;  %v2040_v54 = vadd.f32 %v2039_v53, %v2038_v56  ;;  %v3993_v56 = vld [vmem:[%s10206_s1 + $0x658] sm:$0xff]  ;;  %3452 = vpow2.f32 %v1776_v1 }
 0x1b5   :  { %10922 = vst [vmem:[#allocation313_spill] sm:$0xff] %v6860_v59  ;;  %v3439_v59 = vpop.eup %3438  ;;  %v6884_v35 = vsub.f32 %v3993_v56, %v6052_v31  ;;  %v1546_v56 = vmul.f32 1.442695, %v10928_v55  ;;  %3454 = vpow2.f32 %v1542_v21  ;;  %v3997_v1 = vld [vmem:[%s10206_s1 + $0x678] sm:$0xff]  ;;  %v4000_v55 = vld [vmem:[%s10206_s1 + $0x690] sm:$0xff] }
 0x1b6   :  { %10923 = vst [vmem:[#allocation314_spill] sm:$0xff] %v6867_v22  ;;  %v3441_v53 = vpop.eup %3440  ;;  %v2043_v38 = vsel %vm663_vm1, %v3439_v59, 0.0  ;;  %v3996_v22 = vld [vmem:[%s10206_s1 + $0x670] sm:$0xff]  ;;  %v3998_v59 = vld [vmem:[%s10206_s1 + $0x680] sm:$0xff]  ;;  %3456 = vpow2.f32 %v1544_v3 }
 0x1b7   :  { %10924 = vst [vmem:[#allocation315_spill] sm:$0xff] %v6876_v44  ;;  %v1778_v44 = vmul.f32 1.442695, %v6651_v9  ;;  %v3443_v52 = vpop.eup %3442  ;;  %v6906_v32 = vsub.f32 %v3996_v22, %v6052_v31  ;;  %v6920_v22 = vsub.f32 %v3998_v59, %v6052_v31  ;;  %3458 = vpow2.f32 %v1546_v56  ;;  %v10937_v56 = vld [vmem:[#allocation172_spill] sm:$0xff] }
 0x1b8   :  { %10925 = vst [vmem:[#allocation316_spill] sm:$0xff] %v6884_v35  ;;  %v2042_v35 = vadd.f32 %v2041_v46, %v2040_v54  ;;  %v3445_v46 = vpop.eup %3444  ;;  %v6914_v54 = vsub.f32 %v3997_v1, %v6052_v31  ;;  %v10935_v1 = vld [vmem:[#allocation171_spill] sm:$0xff]  ;;  %v1780_v59 = vmul.f32 1.442695, %v6657_v36  ;;  %v2045_v3 = vsel %vm663_vm1, %v3443_v52, 0.0  ;;  %v10940_v52 = vld [vmem:[#allocation173_spill] sm:$0xff] }
 0x1b9   :  { %10926 = vst [vmem:[#allocation317_spill] sm:$0xff] %v6890_v0  ;;  %v2287_v0 = vadd.f32 %v2286_v18, %v2285_v40  ;;  %v10933_v40 = vld [vmem:[#allocation170_spill] sm:$0xff]  ;;  %v3447_v18 = vpop.eup %3446  ;;  %3460 = vpow2.f32 %v1778_v44 }
 0x1ba   :  { %10927 = vst [vmem:[#allocation318_spill] sm:$0xff] %v6897_v4  ;;  %v2288_v4 = vsel %vm663_vm1, %v3441_v53, 0.0  ;;  %v1550_v21 = vmul.f32 1.442695, %v10933_v40  ;;  %v3999_v53 = vld [vmem:[%s10206_s1 + $0x688] sm:$0xff]  ;;  %v2044_v9 = vadd.f32 %v2043_v38, %v2042_v35  ;;  %v3449_v62 = vpop.eup %3448  ;;  %3462 = vpow2.f32 %v1548_v50  ;;  %v4001_v38 = vld [vmem:[%s10206_s1 + $0x698] sm:$0xff] }
 0x1bb   :  { %10929 = vst [vmem:[#allocation319_spill] sm:$0xff] %v6906_v32  ;;  %v6927_v32 = vsub.f32 %v3999_v53, %v6052_v31  ;;  %v6932_v40 = vpop.eup %3450  ;;  %v6938_v53 = vsub.f32 %v4000_v55, %v6052_v31  ;;  %v2290_v35 = vsel %vm663_vm1, %v3445_v46, 0.0  ;;  %v1556_v50 = vmul.f32 1.442695, %v10940_v52  ;;  %v4003_v46 = vld [vmem:[%s10206_s1 + $0x6a8] sm:$0xff] }
 0x1bc   :  { %10931 = vst [vmem:[#allocation320_spill] sm:$0xff] %v6914_v54  ;;  %v1552_v54 = vmul.f32 1.442695, %v10935_v1  ;;  %v3453_v44 = vpop.eup %3452  ;;  %3464 = vpow2.f32 %v1550_v21  ;;  %v6961_v36 = vsub.f32 %v4003_v46, %v6052_v31  ;;  %v1782_v21 = vmul.f32 1.442695, %v6663_v41 }
 0x1bd   :  { %10932 = vst [vmem:[#allocation321_spill] sm:$0xff] %v6920_v22  ;;  %v2289_v22 = vadd.f32 %v2288_v4, %v2287_v0  ;;  %v6946_v0 = vsub.f32 %v4001_v38, %v6052_v31  ;;  %v4002_v4 = vld [vmem:[%s10206_s1 + $0x6a0] sm:$0xff]  ;;  %v6974_v46 = vsub.f32 %v4004_v63, %v6052_v31 }
 0x1be   :  { %10934 = vst [vmem:[#allocation322_spill] sm:$0xff] %v6927_v32  ;;  %v1554_v32 = vmul.f32 1.442695, %v10937_v56  ;;  %v6952_v55 = vsub.f32 %v4002_v4, %v6052_v31  ;;  %3466 = vpow2.f32 %v1552_v54  ;;  %v10942_v38 = vld [vmem:[#allocation174_spill] sm:$0xff]  ;;  %v2046_v56 = vadd.f32 %v2045_v3, %v2044_v9  ;;  %v10944_v54 = vld [vmem:[#allocation175_spill] sm:$0xff] }
 0x1bf   :  { %10936 = vst [vmem:[#allocation323_spill] sm:$0xff] %v6938_v53  ;;  %v6955_v53 = vpop.eup %3454  ;;  %3468 = vpow2.f32 %v1780_v59  ;;  %v2047_v4 = vsel %vm663_vm1, %v3447_v18, 0.0  ;;  %v1560_v9 = vmul.f32 1.442695, %v10944_v54  ;;  %v2292_v3 = vsel %vm663_vm1, %v3453_v44, 0.0  ;;  %v4005_v18 = vld [vmem:[%s10206_s1 + $0x6b8] sm:$0xff] }
 0x1c0   :  { %10938 = vst [vmem:[#allocation324_spill] sm:$0xff] %v6946_v0  ;;  %v1558_v0 = vmul.f32 1.442695, %v10942_v38  ;;  %v6964_v1 = vpop.eup %3456  ;;  %3470 = vpow2.f32 %v1554_v32  ;;  %v10947_v32 = vld [vmem:[#allocation176_spill] sm:$0xff]  ;;  %v4007_v44 = vld [vmem:[%s10206_s1 + $0x6c8] sm:$0xff]  ;;  %v2048_v41 = vadd.f32 %v2047_v4, %v2046_v56 }
 0x1c1   :  { %10939 = vst [vmem:[#allocation325_spill] sm:$0xff] %v6952_v55  ;;  %v2291_v55 = vadd.f32 %v2290_v35, %v2289_v22  ;;  %v6968_v52 = vpop.eup %3458  ;;  %v6982_v22 = vsub.f32 %v4005_v18, %v6052_v31  ;;  %v4006_v35 = vld [vmem:[%s10206_s1 + $0x6c0] sm:$0xff]  ;;  %3472 = vpow2.f32 %v1556_v50  ;;  %v6997_v54 = vsub.f32 %v4007_v44, %v6052_v31  ;;  %v10949_v18 = vld [vmem:[#allocation177_spill] sm:$0xff] }
 0x1c2   :  { %10941 = vst [vmem:[#allocation326_spill] sm:$0xff] %v6961_v36  ;;  %v3461_v59 = vpop.eup %3460  ;;  %v6988_v63 = vsub.f32 %v4006_v35, %v6052_v31  ;;  %3474 = vpow2.f32 %v1558_v0  ;;  %v1784_v50 = vmul.f32 1.442695, %v6669_v45  ;;  %v2049_v35 = vsel %vm663_vm1, %v3449_v62, 0.0  ;;  %v10951_v0 = vld [vmem:[#allocation178_spill] sm:$0xff]  ;;  %v4009_v62 = vld [vmem:[%s10206_s1 + $0x6d8] sm:$0xff] }
 0x1c3   :  { %10943 = vst [vmem:[#allocation327_spill] sm:$0xff] %v6974_v46  ;;  %v1562_v46 = vmul.f32 1.442695, %v10947_v32  ;;  %v6991_v36 = vpop.eup %3462  ;;  %3476 = vpow2.f32 %v1782_v21  ;;  %v7010_v44 = vsub.f32 %v4008_v7, %v6052_v31  ;;  %v1566_v56 = vmul.f32 1.442695, %v10951_v0 }
 0x1c4   :  { %10945 = vst [vmem:[#allocation328_spill] sm:$0xff] %v6982_v22  ;;  %v1564_v22 = vmul.f32 1.442695, %v10949_v18  ;;  %v7000_v38 = vpop.eup %3464  ;;  %3478 = vpow2.f32 %v1560_v9  ;;  %v2294_v4 = vsel %vm663_vm1, %v3461_v59, 0.0  ;;  %v10954_v9 = vld [vmem:[#allocation179_spill] sm:$0xff]  ;;  %v2050_v18 = vadd.f32 %v2049_v35, %v2048_v41  ;;  %v10958_v41 = vld [vmem:[#allocation181_spill] sm:$0xff] }
 0x1c5   :  { %10946 = vst [vmem:[#allocation329_spill] sm:$0xff] %v6988_v63  ;;  %v2293_v63 = vadd.f32 %v2292_v3, %v2291_v55  ;;  %v7004_v32 = vpop.eup %3466  ;;  %v7018_v55 = vsub.f32 %v4009_v62, %v6052_v31  ;;  %v4010_v3 = vld [vmem:[%s10206_s1 + $0x6e0] sm:$0xff]  ;;  %3480 = vpow2.f32 %v1562_v46  ;;  %v4011_v59 = vld [vmem:[%s10206_s1 + $0x6e8] sm:$0xff]  ;;  %v10956_v62 = vld [vmem:[#allocation180_spill] sm:$0xff]  ;;  %v1786_v46 = vmul.f32 1.442695, %v6678_v10 }
 0x1c6   :  { %10948 = vst [vmem:[#allocation330_spill] sm:$0xff] %v6997_v54  ;;  %v3469_v21 = vpop.eup %3468  ;;  %v7024_v7 = vsub.f32 %v4010_v3, %v6052_v31  ;;  %v7033_v0 = vsub.f32 %v4011_v59, %v6052_v31  ;;  %3482 = vpow2.f32 %v1564_v22  ;;  %v2051_v3 = vsel %vm663_vm1, %v6932_v40, 0.0  ;;  %v4012_v59 = vld [vmem:[%s10206_s1 + $0x6f0] sm:$0xff]  ;;  %v4013_v40 = vld [vmem:[%s10206_s1 + $0x6f8] sm:$0xff] }
 0x1c7   :  { %10950 = vst [vmem:[#allocation331_spill] sm:$0xff] %v7010_v44  ;;  %v1568_v44 = vmul.f32 1.442695, %v10954_v9  ;;  %v7027_v54 = vpop.eup %3470  ;;  %3484 = vpow2.f32 %v1784_v50  ;;  %v7047_v22 = vsub.f32 %v4012_v59, %v6052_v31  ;;  %v1572_v35 = vmul.f32 1.442695, %v10958_v41 }
 0x1c8   :  { %10952 = vst [vmem:[#allocation332_spill] sm:$0xff] %v7018_v55  ;;  %v1570_v55 = vmul.f32 1.442695, %v10956_v62  ;;  %v7036_v45 = vpop.eup %3472  ;;  %3486 = vpow2.f32 %v1566_v56  ;;  %v2296_v50 = vsel %vm663_vm1, %v3469_v21, 0.0  ;;  %v10961_v56 = vld [vmem:[#allocation182_spill] sm:$0xff]  ;;  %v4015_v21 = vld [vmem:[%s10206_s1 + $0x708] sm:$0xff]  ;;  %v2052_v10 = vadd.f32 %v2051_v3, %v2050_v18 }
 0x1c9   :  { %10953 = vst [vmem:[#allocation333_spill] sm:$0xff] %v7024_v7  ;;  %v2295_v7 = vadd.f32 %v2294_v4, %v2293_v63  ;;  %v7041_v9 = vpop.eup %3474  ;;  %v7055_v63 = vsub.f32 %v4013_v40, %v6052_v31  ;;  %v4014_v4 = vld [vmem:[%s10206_s1 + $0x700] sm:$0xff]  ;;  %3488 = vpow2.f32 %v1568_v44  ;;  %v7070_v62 = vsub.f32 %v4015_v21, %v6052_v31  ;;  %v10963_v40 = vld [vmem:[#allocation183_spill] sm:$0xff]  ;;  %v4016_v21 = vld [vmem:[%s10206_s1 + $0x710] sm:$0xff] }
 0x1ca   :  { %10955 = vst [vmem:[#allocation334_spill] sm:$0xff] %v7033_v0  ;;  %v3477_v0 = vpop.eup %3476  ;;  %v7061_v59 = vsub.f32 %v4014_v4, %v6052_v31  ;;  %3490 = vpow2.f32 %v1570_v55  ;;  %v1788_v44 = vmul.f32 1.442695, %v6684_v28  ;;  %v2053_v4 = vsel %vm663_vm1, %v6955_v53, 0.0  ;;  %v10965_v18 = vld [vmem:[#allocation184_spill] sm:$0xff]  ;;  %v4017_v53 = vld [vmem:[%s10206_s1 + $0x718] sm:$0xff] }
 0x1cb   :  { %10957 = vst [vmem:[#allocation335_spill] sm:$0xff] %v7047_v22  ;;  %v1574_v22 = vmul.f32 1.442695, %v10961_v56  ;;  %v7064_v41 = vpop.eup %3478  ;;  %3492 = vpow2.f32 %v1786_v46  ;;  %v7084_v55 = vsub.f32 %v4016_v21, %v6052_v31  ;;  %v1578_v3 = vmul.f32 1.442695, %v10965_v18 }
 0x1cc   :  { %10959 = vst [vmem:[#allocation336_spill] sm:$0xff] %v7055_v63  ;;  %v1576_v63 = vmul.f32 1.442695, %v10963_v40  ;;  %v7073_v60 = vpop.eup %3480  ;;  %3494 = vpow2.f32 %v1572_v35  ;;  %v2298_v46 = vsel %vm663_vm1, %v3477_v0, 0.0  ;;  %v10968_v35 = vld [vmem:[#allocation185_spill] sm:$0xff]  ;;  %v4019_v0 = vld [vmem:[%s10206_s1 + $0x728] sm:$0xff]  ;;  %v2054_v28 = vadd.f32 %v2053_v4, %v2052_v10 }
 0x1cd   :  { %10960 = vst [vmem:[#allocation337_spill] sm:$0xff] %v7061_v59  ;;  %v2297_v59 = vadd.f32 %v2296_v50, %v2295_v7  ;;  %v7078_v56 = vpop.eup %3482  ;;  %v7092_v7 = vsub.f32 %v4017_v53, %v6052_v31  ;;  %v4018_v50 = vld [vmem:[%s10206_s1 + $0x720] sm:$0xff]  ;;  %3496 = vpow2.f32 %v1574_v22  ;;  %v7107_v40 = vsub.f32 %v4019_v0, %v6052_v31  ;;  %v4020_v0 = vld [vmem:[%s10206_s1 + $0x730] sm:$0xff]  ;;  %v10973_v10 = vld [vmem:[#allocation187_spill] sm:$0xff] }
 0x1ce   :  { %10962 = vst [vmem:[#allocation338_spill] sm:$0xff] %v7070_v62  ;;  %v3485_v62 = vpop.eup %3484  ;;  %v7098_v21 = vsub.f32 %v4018_v50, %v6052_v31  ;;  %3498 = vpow2.f32 %v1576_v63  ;;  %v10970_v53 = vld [vmem:[#allocation186_spill] sm:$0xff]  ;;  %v1790_v22 = vmul.f32 1.442695, %v6690_v57  ;;  %v2055_v50 = vsel %vm663_vm1, %v6964_v1, 0.0  ;;  %v4021_v1 = vld [vmem:[%s10206_s1 + $0x738] sm:$0xff] }
 0x1cf   :  { %10964 = vst [vmem:[#allocation339_spill] sm:$0xff] %v7084_v55  ;;  %v1580_v55 = vmul.f32 1.442695, %v10968_v35  ;;  %v7101_v18 = vpop.eup %3486  ;;  %3500 = vpow2.f32 %v1788_v44  ;;  %v7121_v63 = vsub.f32 %v4020_v0, %v6052_v31  ;;  %v1584_v4 = vmul.f32 1.442695, %v10973_v10 }
 0x1d0   :  { %10966 = vst [vmem:[#allocation340_spill] sm:$0xff] %v7092_v7  ;;  %v1582_v7 = vmul.f32 1.442695, %v10970_v53  ;;  %v7110_v19 = vpop.eup %3488  ;;  %3502 = vpow2.f32 %v1578_v3  ;;  %v2300_v44 = vsel %vm663_vm1, %v3485_v62, 0.0  ;;  %v10976_v3 = vld [vmem:[#allocation188_spill] sm:$0xff]  ;;  %v4023_v62 = vld [vmem:[%s10206_s1 + $0x748] sm:$0xff]  ;;  %v2056_v57 = vadd.f32 %v2055_v50, %v2054_v28 }
 0x1d1   :  { %10967 = vst [vmem:[#allocation341_spill] sm:$0xff] %v7098_v21  ;;  %v2299_v21 = vadd.f32 %v2298_v46, %v2297_v59  ;;  %v7115_v35 = vpop.eup %3490  ;;  %v7129_v59 = vsub.f32 %v4021_v1, %v6052_v31  ;;  %v4022_v46 = vld [vmem:[%s10206_s1 + $0x740] sm:$0xff]  ;;  %3504 = vpow2.f32 %v1580_v55  ;;  %v7144_v53 = vsub.f32 %v4023_v62, %v6052_v31  ;;  %v10979_v1 = vld [vmem:[#allocation189_spill] sm:$0xff]  ;;  %v4024_v62 = vld [vmem:[%s10206_s1 + $0x750] sm:$0xff] }
 0x1d2   :  { %10969 = vst [vmem:[#allocation342_spill] sm:$0xff] %v7107_v40  ;;  %v3493_v40 = vpop.eup %3492  ;;  %v7135_v0 = vsub.f32 %v4022_v46, %v6052_v31  ;;  %3506 = vpow2.f32 %v1582_v7  ;;  %v1792_v55 = vmul.f32 1.442695, %v6697_v27  ;;  %v2057_v46 = vsel %vm663_vm1, %v6968_v52, 0.0  ;;  %v10983_v28 = vld [vmem:[#allocation190_spill] sm:$0xff]  ;;  %v4025_v52 = vld [vmem:[%s10206_s1 + $0x758] sm:$0xff] }
 0x1d3   :  { %10971 = vst [vmem:[#allocation343_spill] sm:$0xff] %v7115_v35  ;;  %v7138_v10 = vpop.eup %3494  ;;  %3508 = vpow2.f32 %v1790_v22  ;;  %v7158_v7 = vsub.f32 %v4024_v62, %v6052_v31  ;;  %v1590_v50 = vmul.f32 1.442695, %v10983_v28  ;;  %v2302_v22 = vsel %vm663_vm1, %v3493_v40, 0.0  ;;  %v7180_v40 = vld [vmem:[%s10205_s0] ss:$0 sm:$0xff] }
 0x1d4   :  { %10972 = vst [vmem:[#allocation344_spill] sm:$0xff] %v7121_v63  ;;  %v1586_v63 = vmul.f32 1.442695, %v10976_v3  ;;  %v7147_v35 = vpop.eup %3496  ;;  %3510 = vpow2.f32 %v1584_v4  ;;  %v10986_v4 = vld [vmem:[#allocation191_spill] sm:$0xff]  ;;  %v2059_v27 = vsel %vm663_vm1, %v6991_v36, 0.0  ;;  %v4029_v36 = vld [vmem:[%s10206_s1 + $0x778] sm:$0xff] }
 0x1d5   :  { %10974 = vst [vmem:[#allocation345_spill] sm:$0xff] %v7129_v59  ;;  %v1588_v59 = vmul.f32 1.442695, %v10979_v1  ;;  %v7152_v3 = vpop.eup %3498 }
 0x1d6   :  { %10975 = vst [vmem:[#allocation346_spill] sm:$0xff] %v7135_v0  ;;  %v2301_v0 = vadd.f32 %v2300_v44, %v2299_v21  ;;  %v7166_v21 = vsub.f32 %v4025_v52, %v6052_v31  ;;  %v4026_v44 = vld [vmem:[%s10206_s1 + $0x760] sm:$0xff]  ;;  %3512 = vpow2.f32 %v1586_v63  ;;  %v4027_v52 = vld [vmem:[%s10206_s1 + $0x768] sm:$0xff]  ;;  %v2058_v63 = vadd.f32 %v2057_v46, %v2056_v57 }
 0x1d7   :  { %10977 = vst [vmem:[#allocation347_spill] sm:$0xff] %v7138_v10  ;;  %v7172_v62 = vsub.f32 %v4026_v44, %v6052_v31  ;;  %3514 = vpow2.f32 %v1588_v59  ;;  %v10989_v44 = vld [vmem:[#allocation192_spill] sm:$0xff] }
 0x1d8   :  { %10978 = vst [vmem:[#allocation348_spill] sm:$0xff] %v7144_v53  ;;  %v3501_v53 = vpop.eup %3500  ;;  %3516 = vpow2.f32 %v1792_v55  ;;  %v4028_v59 = vld [vmem:[%s10206_s1 + $0x770] sm:$0xff]  ;;  %v10994_v55 = vld [vmem:[#allocation193_spill] sm:$0xff] }
 0x1d9   :  { %10980 = vst [vmem:[#allocation349_spill] sm:$0xff] %v7147_v35  ;;  %v7175_v28 = vpop.eup %3502  ;;  %v10992_v35 = vld [vmem:[#allocation35_spill] sm:$0xff]  ;;  %v7202_v57 = vsub.f32 %v4028_v59, %v6052_v31  ;;  %3518 = vpow2.f32 %v1590_v50  ;;  %v1596_v46 = vmul.f32 1.442695, %v10994_v55  ;;  %v10997_v50 = vld [vmem:[#allocation194_spill] sm:$0xff] }
 0x1da   :  { %10981 = vst [vmem:[#allocation350_spill] sm:$0xff] %v7152_v3  ;;  %v7189_v1 = vpop.eup %3504  ;;  %vm440_vm2 = vcmp.eq.s32.totalorder %v10992_v35, %v7180_v40 }
 0x1db   :  { %10982 = vst [vmem:[#allocation351_spill] sm:$0xff] %v7158_v7  ;;  %v1592_v7 = vmul.f32 1.442695, %v10986_v4  ;;  %v1794_v4 = vmul.f32 1.442695, %v6703_v17  ;;  %v7194_v3 = vpop.eup %3506 }
 0x1dc   :  { %10984 = vst [vmem:[#allocation352_spill] sm:$0xff] %v7166_v21  ;;  %v7186_v21 = vsub.f32 %v4027_v52, %v6052_v31  ;;  %v2304_v52 = vsel %vm663_vm1, %v3501_v53, 0.0  ;;  %v10999_v53 = vld [vmem:[#allocation36_spill] sm:$0xff] }
 0x1dd   :  { %10985 = vst [vmem:[#allocation353_spill] sm:$0xff] %v7172_v62  ;;  %v1594_v62 = vmul.f32 1.442695, %v10989_v44  ;;  %3520 = vpow2.f32 %v1592_v7  ;;  %vm441_vm3 = vcmp.eq.s32.totalorder %v10999_v53, %v7180_v40  ;;  %v11001_v44 = vld [vmem:[#allocation195_spill] sm:$0xff]  ;;  %v1796_v7 = vmul.f32 1.442695, %v6709_v15 }
 0x1de   :  { %10987 = vst [vmem:[#allocation354_spill] sm:$0xff] %v7175_v28  ;;  %v2303_v28 = vadd.f32 %v2302_v22, %v2301_v0  ;;  %v7210_v0 = vsub.f32 %v4029_v36, %v6052_v31  ;;  %v4030_v22 = vld [vmem:[%s10206_s1 + $0x780] sm:$0xff]  ;;  %v4031_v36 = vld [vmem:[%s10206_s1 + $0x788] sm:$0xff]  ;;  %v1600_v17 = vmul.f32 1.442695, %v11001_v44 }
 0x1df   :  { %10988 = vst [vmem:[#allocation355_spill] sm:$0xff] %v7186_v21  ;;  %v3509_v21 = vpop.eup %3508  ;;  %v7216_v59 = vsub.f32 %v4030_v22, %v6052_v31  ;;  %3522 = vpow2.f32 %v1594_v62  ;;  %v2060_v22 = vadd.f32 %v2059_v27, %v2058_v63  ;;  %v4032_v62 = vld [vmem:[%s10206_s1 + $0x790] sm:$0xff]  ;;  %v11013_v44 = vld [vmem:[#allocation198_spill] sm:$0xff] }
 0x1e0   :  { %10990 = vst [vmem:[#allocation356_spill] sm:$0xff] %v7189_v1  ;;  %v7219_v55 = vpop.eup %3510  ;;  %3524 = vpow2.f32 %v1794_v4  ;;  %v11004_v1 = vld [vmem:[#allocation37_spill] sm:$0xff]  ;;  %v7243_v27 = vsub.f32 %v4032_v62, %v6052_v31  ;;  %v11006_v4 = vld [vmem:[#allocation196_spill] sm:$0xff] }
 0x1e1   :  { %10991 = vst [vmem:[#allocation357_spill] sm:$0xff] %v7194_v3  ;;  %vm442_vm4 = vcmp.eq.s32.totalorder %v11004_v1, %v7180_v40  ;;  %3526 = vpow2.f32 %v1596_v46  ;;  %v1602_v63 = vmul.f32 1.442695, %v11006_v4  ;;  %v11009_v46 = vld [vmem:[#allocation197_spill] sm:$0xff] }
 0x1e2   :  { %10993 = vst [vmem:[#allocation35_spill] sm:$0xff] %v7202_v57  ;;  %v1598_v57 = vmul.f32 1.442695, %v10997_v50  ;;  %v2061_v50 = vsel %vm663_vm1, %v7000_v38, 0.0  ;;  %v4033_v38 = vld [vmem:[%s10206_s1 + $0x798] sm:$0xff] }
 0x1e3   :  { %10995 = vst [vmem:[#allocation358_spill] sm:$0xff] %v7210_v0  ;;  %v7227_v0 = vsub.f32 %v4031_v36, %v6052_v31  ;;  %v2306_v36 = vsel %vm663_vm1, %v3509_v21, 0.0  ;;  %v11011_v21 = vld [vmem:[#allocation38_spill] sm:$0xff] }
 0x1e4   :  { %10996 = vst [vmem:[#allocation359_spill] sm:$0xff] %v7216_v59  ;;  %v7230_v59 = vpop.eup %3512  ;;  %3528 = vpow2.f32 %v1598_v57  ;;  %vm443_vm5 = vcmp.eq.s32.totalorder %v11011_v21, %v7180_v40  ;;  %v1798_v57 = vmul.f32 1.442695, %v6715_v51 }
 0x1e5   :  { %10998 = vst [vmem:[#allocation360_spill] sm:$0xff] %v7219_v55  ;;  %v2305_v55 = vadd.f32 %v2304_v52, %v2303_v28  ;;  %v7235_v3 = vpop.eup %3514  ;;  %v7251_v28 = vsub.f32 %v4033_v38, %v6052_v31  ;;  %v4034_v52 = vld [vmem:[%s10206_s1 + $0x7a0] sm:$0xff]  ;;  %v4035_v38 = vld [vmem:[%s10206_s1 + $0x7a8] sm:$0xff]  ;;  %3530 = vpow2.f32 %v1600_v17  ;;  %v4036_v17 = vld [vmem:[%s10206_s1 + $0x7b0] sm:$0xff] }
 0x1e6   :  { %11000 = vst [vmem:[#allocation36_spill] sm:$0xff] %v7227_v0  ;;  %v3517_v0 = vpop.eup %3516  ;;  %v7257_v62 = vsub.f32 %v4034_v52, %v6052_v31  ;;  %v2062_v52 = vadd.f32 %v2061_v50, %v2060_v22  ;;  %3532 = vpow2.f32 %v1796_v7  ;;  %v7284_v50 = vsub.f32 %v4036_v17, %v6052_v31  ;;  %v11018_v22 = vld [vmem:[#allocation199_spill] sm:$0xff] }
 0x1e7   :  { %11002 = vst [vmem:[#allocation361_spill] sm:$0xff] %v7230_v59  ;;  %v7260_v4 = vpop.eup %3518  ;;  %v11016_v59 = vld [vmem:[#allocation39_spill] sm:$0xff]  ;;  %3534 = vpow2.f32 %v1602_v63  ;;  %v1608_v7 = vmul.f32 1.442695, %v11018_v22  ;;  %v11021_v63 = vld [vmem:[#allocation200_spill] sm:$0xff] }
 0x1e8   :  { %11003 = vst [vmem:[#allocation362_spill] sm:$0xff] %v7235_v3  ;;  %v1606_v3 = vmul.f32 1.442695, %v11013_v44  ;;  %vm444_vm6 = vcmp.eq.s32.totalorder %v11016_v59, %v7180_v40  ;;  %v11024_v44 = vld [vmem:[#allocation201_spill] sm:$0xff] }
 0x1e9   :  { %11005 = vst [vmem:[#allocation37_spill] sm:$0xff] %v7243_v27  ;;  %v1604_v27 = vmul.f32 1.442695, %v11009_v46  ;;  %v2063_v46 = vsel %vm663_vm1, %v7004_v32, 0.0  ;;  %v4037_v32 = vld [vmem:[%s10206_s1 + $0x7b8] sm:$0xff] }
 0x1ea   :  { %11007 = vst [vmem:[#allocation363_spill] sm:$0xff] %v7251_v28  ;;  %v7268_v28 = vsub.f32 %v4035_v38, %v6052_v31  ;;  %v2308_v38 = vsel %vm663_vm1, %v3517_v0, 0.0  ;;  %v11023_v0 = vld [vmem:[#allocation40_spill] sm:$0xff] }
 0x1eb   :  { %11008 = vst [vmem:[#allocation364_spill] sm:$0xff] %v7257_v62  ;;  %v7271_v62 = vpop.eup %3520  ;;  %3536 = vpow2.f32 %v1604_v27  ;;  %vm445_vm7 = vcmp.eq.s32.totalorder %v11023_v0, %v7180_v40 }
 0x1ec   :  { %11010 = vst [vmem:[#allocation365_spill] sm:$0xff] %v7260_v4  ;;  %v2307_v4 = vadd.f32 %v2306_v36, %v2305_v55  ;;  %v7276_v15 = vpop.eup %3522  ;;  %v7292_v55 = vsub.f32 %v4037_v32, %v6052_v31  ;;  %v4038_v36 = vld [vmem:[%s10206_s1 + $0x7c0] sm:$0xff]  ;;  %3538 = vpow2.f32 %v1606_v3  ;;  %v1800_v32 = vmul.f32 1.442695, %v6721_v48  ;;  %v11028_v3 = vld [vmem:[#allocation41_spill] sm:$0xff] }
 0x1ed   :  { %11012 = vst [vmem:[#allocation38_spill] sm:$0xff] %v7268_v28  ;;  %v3525_v28 = vpop.eup %3524  ;;  %v7298_v17 = vsub.f32 %v4038_v36, %v6052_v31  ;;  %3540 = vpow2.f32 %v1798_v57  ;;  %v2065_v36 = vsel %vm663_vm1, %v7027_v54, 0.0  ;;  %vm446_vm8 = vcmp.eq.s32.totalorder %v11028_v3, %v7180_v40  ;;  %v11030_v54 = vld [vmem:[#allocation202_spill] sm:$0xff] }
 0x1ee   :  { %11014 = vst [vmem:[#allocation366_spill] sm:$0xff] %v7271_v62  ;;  %v7301_v22 = vpop.eup %3526  ;;  %v2309_v27 = vadd.f32 %v2308_v38, %v2307_v4  ;;  %3542 = vpow2.f32 %v1608_v7  ;;  %v1614_v4 = vmul.f32 1.442695, %v11030_v54  ;;  %v2310_v57 = vsel %vm663_vm1, %v3525_v28, 0.0  ;;  %v11035_v28 = vld [vmem:[#allocation2_spill] sm:$0xff] }
 0x1ef   :  { %11015 = vst [vmem:[#allocation367_spill] sm:$0xff] %v7276_v15  ;;  %v1612_v15 = vmul.f32 1.442695, %v11024_v44  ;;  %v7307_v62 = vpop.eup %3528  ;;  %v7340_v7 = vsel %vm441_vm3, %v5695_v43, 0.0  ;;  %vm407_vm9 = vcmp.eq.s32.totalorder %v11035_v28, %v7180_v40  ;;  %v11040_v43 = vld [vmem:[#allocation4_spill] sm:$0xff] }
 0x1f0   :  { %11017 = vst [vmem:[#allocation39_spill] sm:$0xff] %v7284_v50  ;;  %v1610_v50 = vmul.f32 1.442695, %v11021_v63  ;;  %v7317_v63 = vpop.eup %3530  ;;  %vm409_vm12 = vcmp.eq.s32.totalorder %v11040_v43, %v7180_v40 }
 0x1f1   :  { %11019 = vst [vmem:[#allocation368_spill] sm:$0xff] %v7292_v55  ;;  %v2064_v55 = vadd.f32 %v2063_v46, %v2062_v52  ;;  %v4039_v46 = vld [vmem:[%s10206_s1 + $0x7c8] sm:$0xff]  ;;  %v3533_v38 = vpop.eup %3532 }
 0x1f2   :  { %11020 = vst [vmem:[#allocation369_spill] sm:$0xff] %v7298_v17  ;;  %v7315_v17 = vsel %vm440_vm2, %v5689_v30, 0.0  ;;  %v7325_v52 = vsub.f32 %v4039_v46, %v6052_v31  ;;  %v4040_v30 = vld [vmem:[%s10206_s1 + $0x7d0] sm:$0xff]  ;;  %3544 = vpow2.f32 %v1610_v50  ;;  %v7342_v46 = vpop.eup %3534  ;;  %v1802_v50 = vmul.f32 1.442695, %v6730_v13 }
 0x1f3   :  { %11022 = vst [vmem:[#allocation370_spill] sm:$0xff] %v7301_v22  ;;  %v7333_v44 = vsub.f32 %v4040_v30, %v6052_v31  ;;  %3546 = vpow2.f32 %v1612_v15  ;;  %v11037_v30 = vld [vmem:[#allocation204_spill] sm:$0xff]  ;;  %v7350_v54 = vpop.eup %3536  ;;  %v11039_v22 = vld [vmem:[#allocation3_spill] sm:$0xff]  ;;  %v7362_v15 = vsel %vm442_vm4, %v5701_v29, 0.0  ;;  %v11046_v29 = vld [vmem:[#allocation5_spill] sm:$0xff] }
 0x1f4   :  { %11025 = vst [vmem:[#allocation40_spill] sm:$0xff] %v7307_v62  ;;  %vm408_vm11 = vcmp.eq.s32.totalorder %v11039_v22, %v7180_v40  ;;  %3548 = vpow2.f32 %v1800_v32  ;;  %vm410_vm14 = vcmp.eq.s32.totalorder %v11046_v29, %v7180_v40  ;;  %v11053_v13 = vld [vmem:[#allocation8_spill] sm:$0xff] }
 0x1f5   :  { %11026 = vst [vmem:[#allocation371_spill] sm:$0xff] %v7315_v17  ;;  %3550 = vpow2.f32 %v1614_v4  ;;  %v11049_v4 = vld [vmem:[#allocation206_spill] sm:$0xff]  ;;  %vm413_vm3 = vcmp.eq.s32.totalorder %v11053_v13, %v7180_v40 }
 0x1f6   :  { %11027 = vst [vmem:[#allocation372_spill] sm:$0xff] %v7317_v63  ;;  %v11032_v63 = vld [vmem:[#allocation203_spill] sm:$0xff] }
 0x1f7   :  { %11029 = vst [vmem:[#allocation41_spill] sm:$0xff] %v7325_v52  ;;  %v1616_v62 = vmul.f32 1.442695, %v11032_v63  ;;  %v11036_v52 = vld [vmem:[#allocation42_spill] sm:$0xff]  ;;  %v2066_v63 = vadd.f32 %v2065_v36, %v2064_v55  ;;  %v7364_v55 = vpop.eup %3538  ;;  %v11043_v36 = vld [vmem:[#allocation43_spill] sm:$0xff] }
 0x1f8   :  { %11031 = vst [vmem:[#allocation373_spill] sm:$0xff] %v7333_v44  ;;  %vm447_vm10 = vcmp.eq.s32.totalorder %v11036_v52, %v7180_v40  ;;  %v1618_v44 = vmul.f32 1.442695, %v11037_v30  ;;  %vm448_vm13 = vcmp.eq.s32.totalorder %v11043_v36, %v7180_v40  ;;  %v4041_v30 = vld [vmem:[%s10206_s1 + $0x7d8] sm:$0xff] }
 0x1f9   :  { %11033 = vst [vmem:[#allocation374_spill] sm:$0xff] %v7340_v7  ;;  %v2311_v7 = vadd.f32 %v2310_v57, %v2309_v27  ;;  %v7372_v32 = vsub.f32 %v4041_v30, %v6052_v31  ;;  %v2312_v57 = vsel %vm663_vm1, %v3533_v38, 0.0  ;;  %3552 = vpow2.f32 %v1616_v62  ;;  %v11055_v62 = vld [vmem:[#allocation207_spill] sm:$0xff] }
 0x1fa   :  { %11034 = vst [vmem:[#allocation375_spill] sm:$0xff] %v7342_v46  ;;  %v2067_v46 = vsel %vm663_vm1, %v7036_v45, 0.0  ;;  %v11045_v45 = vld [vmem:[#allocation205_spill] sm:$0xff]  ;;  %v1622_v30 = vmul.f32 1.442695, %v11049_v4  ;;  %v7391_v38 = vsel %vm443_vm5, %v5707_v24, 0.0  ;;  %3554 = vpow2.f32 %v1618_v44 }
 0x1fb   :  { %11038 = vst [vmem:[#allocation2_spill] sm:$0xff] %v7350_v54  ;;  %v1620_v27 = vmul.f32 1.442695, %v11045_v45  ;;  %v3541_v54 = vpop.eup %3540  ;;  %v11052_v45 = vld [vmem:[#allocation7_spill] sm:$0xff]  ;;  %v1804_v4 = vmul.f32 1.442695, %v6736_v25  ;;  %v2068_v48 = vadd.f32 %v2067_v46, %v2066_v63  ;;  %3556 = vpow2.f32 %v1802_v50 }
 0x1fc   :  { %11041 = vst [vmem:[#allocation42_spill] sm:$0xff] %v7362_v15  ;;  %v4042_v15 = vld [vmem:[%s10206_s1 + $0x7e0] sm:$0xff]  ;;  %vm412_vm2 = vcmp.eq.s32.totalorder %v11052_v45, %v7180_v40  ;;  %v2069_v24 = vsel %vm663_vm1, %v7041_v9, 0.0  ;;  %v11059_v44 = vld [vmem:[#allocation45_spill] sm:$0xff]  ;;  %v4043_v63 = vld [vmem:[%s10206_s1 + $0x7e8] sm:$0xff]  ;;  %v2314_v50 = vsel %vm663_vm1, %v3541_v54, 0.0 }
 0x1fd   :  { %11042 = vst [vmem:[#allocation3_spill] sm:$0xff] %v7364_v55  ;;  %v11047_v55 = vld [vmem:[#allocation6_spill] sm:$0xff]  ;;  %v7384_v17 = vsub.f32 %v4042_v15, %v6052_v31  ;;  %v11054_v15 = vld [vmem:[#allocation44_spill] sm:$0xff]  ;;  %vm450_vm5 = vcmp.eq.s32.totalorder %v11059_v44, %v7180_v40  ;;  %v7421_v46 = vsub.f32 %v4043_v63, %v6052_v31  ;;  %3558 = vpow2.f32 %v1620_v27  ;;  %v11065_v27 = vld [vmem:[#allocation209_spill] sm:$0xff] }
 0x1fe   :  { %11044 = vst [vmem:[#allocation43_spill] sm:$0xff] %v7372_v32  ;;  %vm411_vm15 = vcmp.eq.s32.totalorder %v11047_v55, %v7180_v40  ;;  %v7393_v32 = vpop.eup %3542  ;;  %vm449_vm4 = vcmp.eq.s32.totalorder %v11054_v15, %v7180_v40  ;;  %v11061_v9 = vld [vmem:[#allocation208_spill] sm:$0xff]  ;;  %3560 = vpow2.f32 %v1622_v30  ;;  %v1628_v63 = vmul.f32 1.442695, %v11065_v27  ;;  %v11109_v55 = vld [vmem:[#allocation53_spill] sm:$0xff] }
 0x1ff   :  { %11048 = vst [vmem:[#allocation376_spill] sm:$0xff] %v7384_v17  ;;  %v1624_v17 = vmul.f32 1.442695, %v11055_v62  ;;  %v7403_v51 = vpop.eup %3544  ;;  %v7440_v54 = vsel %vm445_vm7, %v5720_v34, 0.0  ;;  %v1806_v30 = vmul.f32 1.442695, %v6742_v14 }
 0x200   :  { %11050 = vst [vmem:[#allocation377_spill] sm:$0xff] %v7391_v38  ;;  %v7411_v38 = vsel %vm444_vm6, %v5713_v26, 0.0  ;;  %v7413_v10 = vpop.eup %3546  ;;  %v11062_v26 = vld [vmem:[#allocation9_spill] sm:$0xff]  ;;  %v2071_v34 = vsel %vm663_vm1, %v7064_v41, 0.0 }
 0x201   :  { %11051 = vst [vmem:[#allocation378_spill] sm:$0xff] %v7393_v32  ;;  %v2313_v32 = vadd.f32 %v2312_v57, %v2311_v7  ;;  %v1626_v7 = vmul.f32 1.442695, %v11061_v9  ;;  %v3549_v57 = vpop.eup %3548  ;;  %vm414_vm6 = vcmp.eq.s32.totalorder %v11062_v26, %v7180_v40  ;;  %v11068_v9 = vld [vmem:[#allocation46_spill] sm:$0xff]  ;;  %3562 = vpow2.f32 %v1624_v17  ;;  %v11107_v26 = vld [vmem:[#allocation13_spill] sm:$0xff] }
 0x202   :  { %11056 = vst [vmem:[#allocation44_spill] sm:$0xff] %v7403_v51  ;;  %v4044_v51 = vld [vmem:[%s10206_s1 + $0x7f0] sm:$0xff]  ;;  %vm451_vm0 = vcmp.eq.s32.totalorder %v11068_v9, %v7180_v40  ;;  %3564 = vpow2.f32 %v1804_v4  ;;  %v11076_v4 = vld [vmem:[#allocation211_spill] sm:$0xff]  ;;  %v2316_v41 = vsel %vm663_vm1, %v3549_v57, 0.0 }
 0x203   :  { %11057 = vst [vmem:[#allocation379_spill] sm:$0xff] %v7411_v38  ;;  %v7433_v62 = vsub.f32 %v4044_v51, %v6052_v31  ;;  %v4045_v38 = vld [vmem:[%s10206_s1 + $0x7f8] sm:$0xff]  ;;  %3566 = vpow2.f32 %v1626_v7  ;;  %v7485_v7 = vsel %vm447_vm10, %v5732_v12, 0.0  ;;  %v11083_v57 = vld [vmem:[#allocation48_spill] sm:$0xff] }
 0x204   :  { %11058 = vst [vmem:[#allocation380_spill] sm:$0xff] %v7413_v10  ;;  %v11063_v10 = vld [vmem:[#allocation10_spill] sm:$0xff]  ;;  %v7450_v51 = vsub.f32 %v4045_v38, %v6052_v31  ;;  %v11073_v31 = vld [vmem:[#allocation47_spill] sm:$0xff]  ;;  %v7471_v38 = vmul.f32 1.442695, %v11076_v4  ;;  %3568 = vpow2.f32 %v1628_v63  ;;  %v11090_v4 = vld [vmem:[#allocation133_spill] sm:$0xff] }
 0x205   :  { %11060 = vst [vmem:[#allocation45_spill] sm:$0xff] %v7421_v46  ;;  %v7442_v46 = vpop.eup %3550  ;;  %vm452_vm7 = vcmp.eq.s32.totalorder %v11073_v31, %v7180_v40  ;;  %v1808_v63 = vmul.f32 1.442695, %v6749_v5  ;;  %3570 = vpow2.f32 %v1806_v30  ;;  %v2479_v30 = vsel %vm410_vm14, %v11090_v4, 0.0 }
 0x206   :  { %11064 = vst [vmem:[#allocation381_spill] sm:$0xff] %v7433_v62  ;;  %v2070_v62 = vadd.f32 %v2069_v24, %v2068_v48  ;;  %v7453_v27 = vpop.eup %3552  ;;  %v11074_v48 = vld [vmem:[#allocation210_spill] sm:$0xff]  ;;  %v11078_v24 = vld [vmem:[#allocation212_spill] sm:$0xff]  ;;  %v7536_v4 = vsel %vm449_vm4, %v5745_v20, 0.0  ;;  %v11098_v20 = vld [vmem:[#allocation11_spill] sm:$0xff]  ;;  %vm11103_vm14 = vcmp.eq.s32.totalorder %v11063_v10, %v7180_v40  ;;  %vm418_vm4 = vcmp.eq.s32.totalorder %v11107_v26, %v7180_v40 }
 0x207   :  { %11066 = vst [vmem:[#allocation382_spill] sm:$0xff] %v7440_v54  ;;  %v7461_v54 = vsel %vm446_vm8, %v5726_v42, 0.0  ;;  %v7463_v25 = vpop.eup %3554  ;;  %v7468_v17 = vmul.f32 1.442695, %v11074_v48  ;;  %v11080_v42 = vld [vmem:[#allocation130_spill] sm:$0xff]  ;;  %vm453_vm8 = vcmp.eq.s32.totalorder %v11083_v57, %v7180_v40  ;;  %v11093_v48 = vld [vmem:[#allocation136_spill] sm:$0xff]  ;;  %3572 = vpow2.f32 %v1808_v63 }
 0x208   :  { %11067 = vst [vmem:[#allocation383_spill] sm:$0xff] %v7442_v46  ;;  %v2315_v46 = vadd.f32 %v2314_v50, %v2313_v32  ;;  %v3557_v32 = vpop.eup %3556  ;;  %v7475_v50 = vmul.f32 1.442695, %v11078_v24 }
 0x209   :  { %11069 = vst [vmem:[#allocation46_spill] sm:$0xff] %v7450_v51 }
 0x20a   :  { %11070 = vst [vmem:[#allocation384_spill] sm:$0xff] %v7453_v27  ;;  %v7487_v27 = vpop.eup %3558  ;;  %v2317_v24 = vadd.f32 %v2316_v41, %v2315_v46 }
 0x20b   :  { %11071 = vst [vmem:[#allocation385_spill] sm:$0xff] %v7461_v54  ;;  %v7500_v12 = vpop.eup %3560 }
 0x20c   :  { %11072 = vst [vmem:[#allocation386_spill] sm:$0xff] %v7463_v25  ;;  %v2476_v25 = vsel %vm407_vm9, %v11080_v42, 0.0  ;;  %v11085_v42 = vld [vmem:[#allocation132_spill] sm:$0xff] }
 0x20d   :  { %11075 = vst [vmem:[#allocation47_spill] sm:$0xff] %v7468_v17  ;;  %v2478_v17 = vsel %vm409_vm12, %v11085_v42, 0.0  ;;  %v2318_v42 = vsel %vm663_vm1, %v3557_v32, 0.0  ;;  %v2482_v32 = vsel %vm413_vm3, %v11093_v48, 0.0  ;;  %v1810_v48 = vmul.f32 1.442695, %v6755_v11 }
 0x20e   :  { %11077 = vst [vmem:[#allocation387_spill] sm:$0xff] %v7471_v38  ;;  %v2072_v38 = vadd.f32 %v2071_v34, %v2070_v62  ;;  %v7508_v62 = vsel %vm448_vm13, %v5739_v8, 0.0  ;;  %v7510_v34 = vpop.eup %3562  ;;  %v2732_v8 = vsel %vm663_vm1, %v2476_v25, 0.0  ;;  %v2735_v63 = vsel %vm663_vm1, %v2478_v17, 0.0 }
 0x20f   :  { %11079 = vst [vmem:[#allocation388_spill] sm:$0xff] %v7475_v50  ;;  %v11084_v50 = vld [vmem:[#allocation131_spill] sm:$0xff]  ;;  %v3565_v41 = vpop.eup %3564  ;;  %3574 = vpow2.f32 %v1810_v48 }
 0x210   :  { %11081 = vst [vmem:[#allocation130_spill] sm:$0xff] %v7485_v7  ;;  %v2477_v51 = vsel %vm408_vm11, %v11084_v50, 0.0  ;;  %v11089_v50 = vld [vmem:[#allocation49_spill] sm:$0xff]  ;;  %v7539_v25 = vpop.eup %3566  ;;  %vm416_vm11 = vcmp.eq.s32.totalorder %v11098_v20, %v7180_v40  ;;  %v11144_v20 = vld [vmem:[#allocation167_spill] sm:$0xff] }
 0x211   :  { %11082 = vst [vmem:[#allocation389_spill] sm:$0xff] %v7487_v27  ;;  %v2073_v27 = vsel %vm663_vm1, %v7073_v60, 0.0  ;;  %vm454_vm9 = vcmp.eq.s32.totalorder %v11089_v50, %v7180_v40  ;;  %v11091_v60 = vld [vmem:[#allocation134_spill] sm:$0xff]  ;;  %v7549_v54 = vpop.eup %3568 }
 0x212   :  { %11086 = vst [vmem:[#allocation48_spill] sm:$0xff] %v7500_v12  ;;  %v2480_v46 = vsel %vm411_vm15, %v11091_v60, 0.0  ;;  %v11092_v12 = vld [vmem:[#allocation135_spill] sm:$0xff]  ;;  %v2733_v60 = vsel %vm663_vm1, %v2477_v51, 0.0  ;;  %v2074_v13 = vadd.f32 %v2073_v27, %v2072_v38  ;;  %v2075_v51 = vsel %vm663_vm1, %v7078_v56, 0.0 }
 0x213   :  { %11087 = vst [vmem:[#allocation131_spill] sm:$0xff] %v7508_v62  ;;  %v7544_v62 = vld [vmem:[%s10205_s0 + $0x1] ss:$0 sm:$0xff]  ;;  %v2734_v7 = vadd.f32 %v2733_v60, %v2732_v8  ;;  %v11100_v27 = vld [vmem:[#allocation51_spill] sm:$0xff]  ;;  %v2320_v38 = vsel %vm663_vm1, %v3565_v41, 0.0  ;;  %v11101_v8 = vld [vmem:[#allocation137_spill] sm:$0xff] }
 0x214   :  { %11088 = vst [vmem:[#allocation132_spill] sm:$0xff] %v7510_v34  ;;  %v2481_v34 = vsel %vm412_vm2, %v11092_v12, 0.0  ;;  %v11096_v12 = vld [vmem:[#allocation50_spill] sm:$0xff]  ;;  %vm456_vm12 = vcmp.eq.s32.totalorder %v11100_v27, %v7180_v40  ;;  %vm568_vm13 = vcmp.eq.s32.totalorder %v10992_v35, %v7544_v62  ;;  %v2483_v56 = vsel %vm414_vm6, %v11101_v8, 0.0  ;;  %v11104_v60 = vld [vmem:[#allocation12_spill] sm:$0xff] }
 0x215   :  { %11094 = vst [vmem:[#allocation49_spill] sm:$0xff] %v7536_v4  ;;  %vm455_vm10 = vcmp.eq.s32.totalorder %v11096_v12, %v7180_v40  ;;  %v7559_v4 = vsel %vm450_vm5, %v5751_v23, 0.0  ;;  %v2736_v17 = vadd.f32 %v2735_v63, %v2734_v7  ;;  %vm417_vm15 = vcmp.eq.s32.totalorder %v11104_v60, %v7180_v40 }
 0x216   :  { %11095 = vst [vmem:[#allocation133_spill] sm:$0xff] %v7539_v25  ;;  %v2319_v25 = vadd.f32 %v2318_v42, %v2317_v24  ;;  %v11102_v24 = vld [vmem:[#allocation138_spill] sm:$0xff]  ;;  %v3571_v42 = vpop.eup %3570  ;;  %v1814_v41 = vmul.f32 1.442695, %v6767_v49  ;;  %v7585_v8 = vsel %vm451_vm0, %v5757_v39, 0.0  ;;  %vm569_vm3 = vcmp.eq.s32.totalorder %v10999_v53, %v7544_v62 }
 0x217   :  { %11097 = vst [vmem:[#allocation134_spill] sm:$0xff] %v7549_v54  ;;  %v7575_v23 = vsel %vm11103_vm14, %v11102_v24, 0.0  ;;  %v1812_v54 = vmul.f32 1.442695, %v6761_v6  ;;  %v11106_v24 = vld [vmem:[#allocation52_spill] sm:$0xff]  ;;  %v2076_v63 = vadd.f32 %v2075_v51, %v2074_v13  ;;  %v2077_v39 = vsel %vm663_vm1, %v7101_v18, 0.0  ;;  %v3573_v48 = vpop.eup %3572 }
 0x218   :  { %11099 = vst [vmem:[#allocation135_spill] sm:$0xff] %v7559_v4  ;;  %v2737_v4 = vsel %vm663_vm1, %v2479_v30, 0.0  ;;  %vm457_vm2 = vcmp.eq.s32.totalorder %v11106_v24, %v7180_v40  ;;  %v1816_v7 = vmul.f32 1.442695, %v6773_v33  ;;  %v7601_v30 = vsel %vm452_vm7, %v5763_v58, 0.0  ;;  %v11110_v58 = vld [vmem:[#allocation14_spill] sm:$0xff] }
 0x219   :  { %11105 = vst [vmem:[#allocation136_spill] sm:$0xff] %v7585_v8  ;;  %v2738_v10 = vadd.f32 %v2737_v4, %v2736_v17  ;;  %v2321_v8 = vadd.f32 %v2320_v38, %v2319_v25  ;;  %v2739_v45 = vsel %vm663_vm1, %v2480_v46, 0.0  ;;  %vm458_vm0 = vcmp.eq.s32.totalorder %v11109_v55, %v7180_v40 }
 0x21a   :  { %11108 = vst [vmem:[#allocation50_spill] sm:$0xff] %v7601_v30  ;;  %vm570_vm5 = vcmp.eq.s32.totalorder %v11004_v1, %v7544_v62  ;;  %v7609_v13 = vmul.f32 1.442695, %v6782_v61  ;;  %v7612_v18 = vmul.f32 1.442695, %v6788_v47  ;;  %v2322_v4 = vsel %vm663_vm1, %v3571_v42, 0.0  ;;  %v3575_v61 = vpop.eup %3574 }
 0x21b   :  { %v2740_v25 = vadd.f32 %v2739_v45, %v2738_v10  ;;  %v7618_v46 = vmul.f32 1.442695, %v6794_v2  ;;  %v7621_v51 = vmul.f32 1.442695, %v6801_v16  ;;  %v7627_v38 = vsel %vm453_vm8, %v5769_v37, 0.0  ;;  %v11112_v42 = vld [vmem:[#allocation54_spill] sm:$0xff] }
 0x21c   :  { %11111 = vst [vmem:[#allocation51_spill] sm:$0xff] %v7627_v38  ;;  %v2741_v17 = vsel %vm663_vm1, %v2481_v34, 0.0  ;;  %vm459_vm7 = vcmp.eq.s32.totalorder %v11112_v42, %v7180_v40  ;;  %3576 = vpow2.f32 %v1812_v54  ;;  %v11113_v10 = vld [vmem:[#allocation305_spill] sm:$0xff]  ;;  %v2078_v30 = vadd.f32 %v2077_v39, %v2076_v63  ;;  %v11114_v2 = vld [vmem:[#allocation15_spill] sm:$0xff]  ;;  %v11118_v63 = vld [vmem:[#allocation306_spill] sm:$0xff] }
 0x21d   :  { %v7635_v45 = vmul.f32 1.442695, %v11113_v10  ;;  %v2742_v16 = vadd.f32 %v2741_v17, %v2740_v25  ;;  %vm420_vm6 = vcmp.eq.s32.totalorder %v11114_v2, %v7180_v40  ;;  %v2079_v37 = vsel %vm663_vm1, %v7110_v19, 0.0  ;;  %v11115_v34 = vld [vmem:[#allocation163_spill] sm:$0xff]  ;;  %v11120_v17 = vld [vmem:[#allocation16_spill] sm:$0xff] }
 0x21e   :  { %v2323_v38 = vadd.f32 %v2322_v4, %v2321_v8  ;;  %v7645_v47 = vsel %vm454_vm9, %v11115_v34, 0.0  ;;  %v2743_v54 = vsel %vm663_vm1, %v2482_v32, 0.0  ;;  %v11117_v10 = vld [vmem:[#allocation55_spill] sm:$0xff]  ;;  %v7653_v39 = vmul.f32 1.442695, %v11118_v63  ;;  %v11121_v32 = vld [vmem:[#allocation308_spill] sm:$0xff] }
 0x21f   :  { %11116 = vst [vmem:[#allocation137_spill] sm:$0xff] %v7645_v47  ;;  %v11119_v19 = vld [vmem:[#allocation307_spill] sm:$0xff]  ;;  %v2324_v4 = vsel %vm663_vm1, %v3573_v48, 0.0  ;;  %v2744_v25 = vadd.f32 %v2743_v54, %v2742_v16  ;;  %vm421_vm9 = vcmp.eq.s32.totalorder %v11120_v17, %v7180_v40  ;;  %3578 = vpow2.f32 %v1814_v41  ;;  %v11122_v47 = vld [vmem:[#allocation164_spill] sm:$0xff] }
 0x220   :  { %v7656_v8 = vmul.f32 1.442695, %v11119_v19  ;;  %v7662_v34 = vmul.f32 1.442695, %v11121_v32  ;;  %v7668_v33 = vsel %vm455_vm10, %v11122_v47, 0.0  ;;  %v2745_v63 = vsel %vm663_vm1, %v2483_v56, 0.0 }
 0x221   :  { %11123 = vst [vmem:[#allocation138_spill] sm:$0xff] %v7668_v33  ;;  %v11124_v19 = vld [vmem:[#allocation56_spill] sm:$0xff]  ;;  %vm573_vm8 = vcmp.eq.s32.totalorder %v11023_v0, %v7544_v62  ;;  %v2080_v16 = vadd.f32 %v2079_v37, %v2078_v30  ;;  %v11125_v48 = vld [vmem:[#allocation343_spill] sm:$0xff]  ;;  %v2746_v29 = vadd.f32 %v2745_v63, %v2744_v25  ;;  %v11127_v47 = vld [vmem:[#allocation17_spill] sm:$0xff]  ;;  %v2325_v56 = vadd.f32 %v2324_v4, %v2323_v38 }
 0x222   :  { %vm461_vm14 = vcmp.eq.s32.totalorder %v11124_v19, %v7180_v40  ;;  %v2081_v41 = vsel %vm663_vm1, %v11125_v48, 0.0  ;;  %v11126_v54 = vld [vmem:[#allocation139_spill] sm:$0xff]  ;;  %v11128_v33 = vld [vmem:[#allocation165_spill] sm:$0xff]  ;;  %v11130_v30 = vld [vmem:[#allocation266_spill] sm:$0xff]  ;;  %v2747_v48 = vsel %vm663_vm1, %v7575_v23, 0.0  ;;  %v3577_v63 = vpop.eup %3576  ;;  %vm574_vm10 = vcmp.eq.s32.totalorder %v11028_v3, %v7544_v62 }
 0x223   :  { %v2485_v32 = vsel %vm416_vm11, %v11126_v54, 0.0  ;;  %v7687_v49 = vsel %vm456_vm12, %v11128_v33, 0.0  ;;  %v7693_v37 = vsel %vm568_vm13, %v11130_v30, 0.0  ;;  %v11132_v25 = vld [vmem:[#allocation57_spill] sm:$0xff]  ;;  %v2326_v33 = vsel %vm663_vm1, %v3575_v61, 0.0  ;;  %v11134_v54 = vld [vmem:[#allocation140_spill] sm:$0xff] }
 0x224   :  { %11129 = vst [vmem:[#allocation52_spill] sm:$0xff] %v7687_v49  ;;  %vm462_vm11 = vcmp.eq.s32.totalorder %v11132_v25, %v7180_v40  ;;  %v11133_v38 = vld [vmem:[#allocation309_spill] sm:$0xff]  ;;  %v2486_v35 = vsel %vm417_vm15, %v11134_v54, 0.0  ;;  %v2748_v30 = vadd.f32 %v2747_v48, %v2746_v29  ;;  %v11135_v23 = vld [vmem:[#allocation18_spill] sm:$0xff]  ;;  %3580 = vpow2.f32 %v1816_v7  ;;  %v11141_v48 = vld [vmem:[#allocation347_spill] sm:$0xff] }
 0x225   :  { %11131 = vst [vmem:[#allocation53_spill] sm:$0xff] %v7693_v37  ;;  %v7702_v4 = vmul.f32 1.442695, %v11133_v38  ;;  %vm423_vm12 = vcmp.eq.s32.totalorder %v11135_v23, %v7180_v40  ;;  %v11136_v37 = vld [vmem:[#allocation166_spill] sm:$0xff]  ;;  %v11138_v38 = vld [vmem:[#allocation272_spill] sm:$0xff]  ;;  %v2749_v60 = vsel %vm663_vm1, %v2485_v32, 0.0  ;;  %vm575_vm15 = vcmp.eq.s32.totalorder %v11036_v52, %v7544_v62 }
 0x226   :  { %v7715_v49 = vsel %vm457_vm2, %v11136_v37, 0.0  ;;  %v7721_v61 = vsel %vm569_vm3, %v11138_v38, 0.0  ;;  %v11140_v29 = vld [vmem:[#allocation58_spill] sm:$0xff]  ;;  %v2082_v7 = vadd.f32 %v2081_v41, %v2080_v16  ;;  %v2083_v54 = vsel %vm663_vm1, %v11141_v48, 0.0  ;;  %v11142_v37 = vld [vmem:[#allocation141_spill] sm:$0xff]  ;;  %v3579_v38 = vpop.eup %3578  ;;  %v11146_v16 = vld [vmem:[#allocation279_spill] sm:$0xff] }
 0x227   :  { %11137 = vst [vmem:[#allocation54_spill] sm:$0xff] %v7715_v49  ;;  %vm463_vm13 = vcmp.eq.s32.totalorder %v11140_v29, %v7180_v40  ;;  %v2487_v49 = vsel %vm418_vm4, %v11142_v37, 0.0  ;;  %v2750_v53 = vadd.f32 %v2749_v60, %v2748_v30  ;;  %v2327_v32 = vadd.f32 %v2326_v33, %v2325_v56  ;;  %v11148_v60 = vld [vmem:[#allocation59_spill] sm:$0xff]  ;;  %v11149_v56 = vld [vmem:[#allocation310_spill] sm:$0xff] }
 0x228   :  { %11139 = vst [vmem:[#allocation163_spill] sm:$0xff] %v7721_v61  ;;  %v11143_v61 = vld [vmem:[#allocation19_spill] sm:$0xff]  ;;  %v7740_v6 = vsel %vm458_vm0, %v11144_v20, 0.0  ;;  %v7746_v41 = vsel %vm570_vm5, %v11146_v16, 0.0  ;;  %v2751_v48 = vsel %vm663_vm1, %v2486_v35, 0.0  ;;  %vm464_vm3 = vcmp.eq.s32.totalorder %v11148_v60, %v7180_v40  ;;  %v11150_v30 = vld [vmem:[#allocation142_spill] sm:$0xff] }
 0x229   :  { %vm424_vm2 = vcmp.eq.s32.totalorder %v11143_v61, %v7180_v40  ;;  %11145 = vst [vmem:[#allocation55_spill] sm:$0xff] %v7740_v6  ;;  %v7754_v33 = vmul.f32 1.442695, %v11149_v56  ;;  %v2328_v20 = vsel %vm663_vm1, %v3577_v63, 0.0  ;;  %vm11151_vm0 = vcmp.eq.s32.totalorder %v11110_v58, %v7180_v40  ;;  %v11152_v16 = vld [vmem:[#allocation20_spill] sm:$0xff]  ;;  %v11162_v58 = vld [vmem:[#allocation169_spill] sm:$0xff] }
 0x22a   :  { %11147 = vst [vmem:[#allocation164_spill] sm:$0xff] %v7746_v41  ;;  %v2488_v1 = vsel %vm11151_vm0, %v11150_v30, 0.0  ;;  %v2752_v37 = vadd.f32 %v2751_v48, %v2750_v53  ;;  %3582 = vpow2.f32 %v7609_v13  ;;  %v11153_v35 = vld [vmem:[#allocation168_spill] sm:$0xff]  ;;  %vm11156_vm4 = vcmp.eq.s32.totalorder %v11011_v21, %v7544_v62  ;;  %v11159_v48 = vld [vmem:[#allocation349_spill] sm:$0xff]  ;;  %v11196_v23 = vld [vmem:[#allocation147_spill] sm:$0xff] }
 0x22b   :  { %v7768_v41 = vsel %vm459_vm7, %v11153_v35, 0.0  ;;  %v11155_v6 = vld [vmem:[#allocation280_spill] sm:$0xff]  ;;  %v2753_v30 = vsel %vm663_vm1, %v2487_v49, 0.0  ;;  %v2084_v13 = vadd.f32 %v2083_v54, %v2082_v7  ;;  %v2085_v56 = vsel %vm663_vm1, %v11159_v48, 0.0  ;;  %v11160_v35 = vld [vmem:[#allocation143_spill] sm:$0xff]  ;;  %v11165_v7 = vld [vmem:[#allocation281_spill] sm:$0xff] }
 0x22c   :  { %11154 = vst [vmem:[#allocation56_spill] sm:$0xff] %v7768_v41  ;;  %v7774_v63 = vsel %vm11156_vm4, %v11155_v6, 0.0  ;;  %v11158_v53 = vld [vmem:[#allocation60_spill] sm:$0xff]  ;;  %v2489_v41 = vsel %vm420_vm6, %v11160_v35, 0.0  ;;  %v2754_v21 = vadd.f32 %v2753_v30, %v2752_v37  ;;  %v3581_v6 = vpop.eup %3580  ;;  %v2329_v49 = vadd.f32 %v2328_v20, %v2327_v32  ;;  %v11168_v37 = vld [vmem:[#allocation61_spill] sm:$0xff]  ;;  %v11169_v32 = vld [vmem:[#allocation311_spill] sm:$0xff] }
 0x22d   :  { %11157 = vst [vmem:[#allocation343_spill] sm:$0xff] %v7774_v63  ;;  %vm465_vm0 = vcmp.eq.s32.totalorder %v11158_v53, %v7180_v40  ;;  %v11161_v63 = vld [vmem:[#allocation21_spill] sm:$0xff]  ;;  %vm11163_vm4 = vcmp.eq.s32.totalorder %v11117_v10, %v7180_v40  ;;  %vm11166_vm5 = vcmp.eq.s32.totalorder %v11016_v59, %v7544_v62  ;;  %v2755_v48 = vsel %vm663_vm1, %v2488_v1, 0.0  ;;  %v11170_v30 = vld [vmem:[#allocation144_spill] sm:$0xff]  ;;  %v11172_v1 = vld [vmem:[#allocation170_spill] sm:$0xff] }
 0x22e   :  { %v7793_v26 = vsel %vm11163_vm4, %v11162_v58, 0.0  ;;  %v7799_v54 = vsel %vm11166_vm5, %v11165_v7, 0.0  ;;  %vm466_vm6 = vcmp.eq.s32.totalorder %v11168_v37, %v7180_v40  ;;  %vm578_vm7 = vcmp.eq.s32.totalorder %v11059_v44, %v7544_v62  ;;  %v11171_v7 = vld [vmem:[#allocation22_spill] sm:$0xff]  ;;  %v11218_v61 = vld [vmem:[#allocation175_spill] sm:$0xff] }
 0x22f   :  { %11164 = vst [vmem:[#allocation139_spill] sm:$0xff] %v7793_v26  ;;  %v7807_v20 = vmul.f32 1.442695, %v11169_v32  ;;  %v2330_v58 = vsel %vm663_vm1, %v3579_v38, 0.0  ;;  %v2490_v59 = vsel %vm421_vm9, %v11170_v30, 0.0  ;;  %v2756_v35 = vadd.f32 %v2755_v48, %v2754_v21  ;;  %v11174_v26 = vld [vmem:[#allocation282_spill] sm:$0xff] }
 0x230   :  { %11167 = vst [vmem:[#allocation165_spill] sm:$0xff] %v7799_v54  ;;  %vm427_vm5 = vcmp.eq.s32.totalorder %v11171_v7, %v7180_v40  ;;  %3584 = vpow2.f32 %v7612_v18  ;;  %v7821_v54 = vsel %vm461_vm14, %v11172_v1, 0.0  ;;  %v7827_v38 = vsel %vm573_vm8, %v11174_v26, 0.0  ;;  %v11176_v21 = vld [vmem:[#allocation62_spill] sm:$0xff]  ;;  %v11178_v1 = vld [vmem:[#allocation145_spill] sm:$0xff]  ;;  %v3583_v26 = vpop.eup %3582  ;;  %v11181_v32 = vld [vmem:[#allocation171_spill] sm:$0xff] }
 0x231   :  { %11173 = vst [vmem:[#allocation266_spill] sm:$0xff] %v7821_v54  ;;  %v2757_v30 = vsel %vm663_vm1, %v2489_v41, 0.0  ;;  %vm467_vm9 = vcmp.eq.s32.totalorder %v11176_v21, %v7180_v40  ;;  %vm579_vm4 = vcmp.eq.s32.totalorder %v11068_v9, %v7544_v62  ;;  %v2086_v18 = vadd.f32 %v2085_v56, %v2084_v13  ;;  %v11177_v48 = vld [vmem:[#allocation350_spill] sm:$0xff]  ;;  %v11183_v56 = vld [vmem:[#allocation283_spill] sm:$0xff] }
 0x232   :  { %11175 = vst [vmem:[#allocation57_spill] sm:$0xff] %v7827_v38  ;;  %v2087_v17 = vsel %vm663_vm1, %v11177_v48, 0.0  ;;  %vm11179_vm14 = vcmp.eq.s32.totalorder %v11127_v47, %v7180_v40  ;;  %v2758_v0 = vadd.f32 %v2757_v30, %v2756_v35  ;;  %v11180_v38 = vld [vmem:[#allocation23_spill] sm:$0xff]  ;;  %v2331_v41 = vadd.f32 %v2330_v58, %v2329_v49  ;;  %v11186_v49 = vld [vmem:[#allocation312_spill] sm:$0xff]  ;;  %v11187_v30 = vld [vmem:[#allocation146_spill] sm:$0xff] }
 0x233   :  { %v2491_v54 = vsel %vm11179_vm14, %v11178_v1, 0.0  ;;  %v7846_v2 = vsel %vm462_vm11, %v11181_v32, 0.0  ;;  %v7852_v13 = vsel %vm574_vm10, %v11183_v56, 0.0  ;;  %v2759_v48 = vsel %vm663_vm1, %v2490_v59, 0.0  ;;  %v11185_v35 = vld [vmem:[#allocation63_spill] sm:$0xff]  ;;  %v11188_v56 = vld [vmem:[#allocation24_spill] sm:$0xff] }
 0x234   :  { %11182 = vst [vmem:[#allocation140_spill] sm:$0xff] %v7846_v2  ;;  %vm468_vm14 = vcmp.eq.s32.totalorder %v11185_v35, %v7180_v40  ;;  %vm580_vm8 = vcmp.eq.s32.totalorder %v11073_v31, %v7544_v62  ;;  %v7860_v58 = vmul.f32 1.442695, %v11186_v49  ;;  %v2332_v32 = vsel %vm663_vm1, %v3581_v6, 0.0  ;;  %v11189_v59 = vld [vmem:[#allocation172_spill] sm:$0xff]  ;;  %v11198_v49 = vld [vmem:[#allocation173_spill] sm:$0xff] }
 0x235   :  { %11184 = vst [vmem:[#allocation166_spill] sm:$0xff] %v7852_v13  ;;  %v2492_v3 = vsel %vm423_vm12, %v11187_v30, 0.0  ;;  %v2760_v1 = vadd.f32 %v2759_v48, %v2758_v0  ;;  %3586 = vpow2.f32 %v7618_v46  ;;  %v7874_v13 = vsel %vm463_vm13, %v11189_v59, 0.0  ;;  %v11191_v2 = vld [vmem:[#allocation284_spill] sm:$0xff]  ;;  %v11193_v0 = vld [vmem:[#allocation25_spill] sm:$0xff]  ;;  %v11195_v59 = vld [vmem:[#allocation354_spill] sm:$0xff] }
 0x236   :  { %11190 = vst [vmem:[#allocation272_spill] sm:$0xff] %v7874_v13  ;;  %v7880_v6 = vsel %vm575_vm15, %v11191_v2, 0.0  ;;  %v2761_v30 = vsel %vm663_vm1, %v2491_v54, 0.0  ;;  %vm430_vm11 = vcmp.eq.s32.totalorder %v11193_v0, %v7180_v40  ;;  %v11194_v48 = vld [vmem:[#allocation64_spill] sm:$0xff]  ;;  %vm581_vm10 = vcmp.eq.s32.totalorder %v11083_v57, %v7544_v62  ;;  %v3585_v54 = vpop.eup %3584  ;;  %v11253_v0 = vld [vmem:[#allocation179_spill] sm:$0xff] }
 0x237   :  { %11192 = vst [vmem:[#allocation58_spill] sm:$0xff] %v7880_v6  ;;  %vm469_vm12 = vcmp.eq.s32.totalorder %v11194_v48, %v7180_v40  ;;  %v2088_v46 = vadd.f32 %v2087_v17, %v2086_v18  ;;  %v2089_v13 = vsel %vm663_vm1, %v11195_v59, 0.0  ;;  %v2493_v2 = vsel %vm424_vm2, %v11196_v23, 0.0  ;;  %v11197_v6 = vld [vmem:[#allocation26_spill] sm:$0xff]  ;;  %v11200_v17 = vld [vmem:[#allocation285_spill] sm:$0xff] }
 0x238   :  { %v2762_v52 = vadd.f32 %v2761_v30, %v2760_v1  ;;  %v2333_v47 = vadd.f32 %v2332_v32, %v2331_v41  ;;  %v7901_v43 = vsel %vm464_vm3, %v11198_v49, 0.0  ;;  %vm11201_vm15 = vcmp.eq.s32.totalorder %v11043_v36, %v7544_v62  ;;  %v11203_v1 = vld [vmem:[#allocation65_spill] sm:$0xff]  ;;  %v11205_v30 = vld [vmem:[#allocation148_spill] sm:$0xff] }
 0x239   :  { %11199 = vst [vmem:[#allocation347_spill] sm:$0xff] %v7901_v43  ;;  %v7907_v18 = vsel %vm11201_vm15, %v11200_v17, 0.0  ;;  %v2763_v23 = vsel %vm663_vm1, %v2492_v3, 0.0  ;;  %vm470_vm2 = vcmp.eq.s32.totalorder %v11203_v1, %v7180_v40  ;;  %v11204_v41 = vld [vmem:[#allocation313_spill] sm:$0xff]  ;;  %v2334_v49 = vsel %vm663_vm1, %v3583_v26, 0.0  ;;  %v11207_v17 = vld [vmem:[#allocation27_spill] sm:$0xff] }
 0x23a   :  { %11202 = vst [vmem:[#allocation141_spill] sm:$0xff] %v7907_v18  ;;  %v7915_v32 = vmul.f32 1.442695, %v11204_v41  ;;  %vm11206_vm3 = vcmp.eq.s32.totalorder %v11152_v16, %v7180_v40  ;;  %v2764_v59 = vadd.f32 %v2763_v23, %v2762_v52  ;;  %3588 = vpow2.f32 %v7621_v51  ;;  %v11208_v3 = vld [vmem:[#allocation174_spill] sm:$0xff]  ;;  %v11214_v23 = vld [vmem:[#allocation356_spill] sm:$0xff] }
 0x23b   :  { %v2494_v36 = vsel %vm11206_vm3, %v11205_v30, 0.0  ;;  %v7929_v18 = vsel %vm465_vm0, %v11208_v3, 0.0  ;;  %v11210_v43 = vld [vmem:[#allocation286_spill] sm:$0xff]  ;;  %vm11211_vm13 = vcmp.eq.s32.totalorder %v11054_v15, %v7544_v62  ;;  %v2765_v30 = vsel %vm663_vm1, %v2493_v2, 0.0  ;;  %v11215_v3 = vld [vmem:[#allocation149_spill] sm:$0xff] }
 0x23c   :  { %11209 = vst [vmem:[#allocation167_spill] sm:$0xff] %v7929_v18  ;;  %v7935_v26 = vsel %vm11211_vm13, %v11210_v43, 0.0  ;;  %v11213_v52 = vld [vmem:[#allocation66_spill] sm:$0xff]  ;;  %vm583_vm15 = vcmp.eq.s32.totalorder %v11096_v12, %v7544_v62  ;;  %v2090_v51 = vadd.f32 %v2089_v13, %v2088_v46  ;;  %v2091_v16 = vsel %vm663_vm1, %v11214_v23, 0.0  ;;  %v3587_v43 = vpop.eup %3586  ;;  %v11220_v13 = vld [vmem:[#allocation287_spill] sm:$0xff] }
 0x23d   :  { %11212 = vst [vmem:[#allocation279_spill] sm:$0xff] %v7935_v26  ;;  %vm471_vm3 = vcmp.eq.s32.totalorder %v11213_v52, %v7180_v40  ;;  %vm11216_vm0 = vcmp.eq.s32.totalorder %v11161_v63, %v7180_v40  ;;  %v2766_v15 = vadd.f32 %v2765_v30, %v2764_v59  ;;  %v11217_v26 = vld [vmem:[#allocation28_spill] sm:$0xff]  ;;  %v2335_v2 = vadd.f32 %v2334_v49, %v2333_v47  ;;  %v11222_v59 = vld [vmem:[#allocation67_spill] sm:$0xff]  ;;  %v11223_v47 = vld [vmem:[#allocation314_spill] sm:$0xff] }
 0x23e   :  { %v2495_v18 = vsel %vm11216_vm0, %v11215_v3, 0.0  ;;  %v7954_v41 = vsel %vm466_vm6, %v11218_v61, 0.0  ;;  %v7960_v46 = vsel %vm578_vm7, %v11220_v13, 0.0  ;;  %v2767_v23 = vsel %vm663_vm1, %v2494_v36, 0.0  ;;  %v11224_v30 = vld [vmem:[#allocation150_spill] sm:$0xff]  ;;  %v11225_v13 = vld [vmem:[#allocation29_spill] sm:$0xff] }
 0x23f   :  { %11219 = vst [vmem:[#allocation59_spill] sm:$0xff] %v7954_v41  ;;  %vm472_vm0 = vcmp.eq.s32.totalorder %v11222_v59, %v7180_v40  ;;  %vm584_vm13 = vcmp.eq.s32.totalorder %v11100_v27, %v7544_v62  ;;  %v7968_v49 = vmul.f32 1.442695, %v11223_v47  ;;  %v2336_v61 = vsel %vm663_vm1, %v3585_v54, 0.0  ;;  %v11226_v36 = vld [vmem:[#allocation176_spill] sm:$0xff]  ;;  %v11235_v63 = vld [vmem:[#allocation177_spill] sm:$0xff] }
 0x240   :  { %11221 = vst [vmem:[#allocation142_spill] sm:$0xff] %v7960_v46  ;;  %v2496_v44 = vsel %vm427_vm5, %v11224_v30, 0.0  ;;  %v2768_v3 = vadd.f32 %v2767_v23, %v2766_v15  ;;  %vm434_vm7 = vcmp.eq.s32.totalorder %v11225_v13, %v7180_v40  ;;  %3590 = vpow2.f32 %v7635_v45  ;;  %v11228_v41 = vld [vmem:[#allocation288_spill] sm:$0xff]  ;;  %v11231_v23 = vld [vmem:[#allocation357_spill] sm:$0xff]  ;;  %v11282_v13 = vld [vmem:[#allocation74_spill] sm:$0xff] }
 0x241   :  { %v7982_v46 = vsel %vm467_vm9, %v11226_v36, 0.0  ;;  %v7988_v54 = vsel %vm579_vm4, %v11228_v41, 0.0  ;;  %v2769_v30 = vsel %vm663_vm1, %v2495_v18, 0.0  ;;  %v11230_v15 = vld [vmem:[#allocation68_spill] sm:$0xff]  ;;  %vm585_vm5 = vcmp.eq.s32.totalorder %v11106_v24, %v7544_v62  ;;  %v11232_v36 = vld [vmem:[#allocation151_spill] sm:$0xff]  ;;  %v3589_v41 = vpop.eup %3588 }
 0x242   :  { %11227 = vst [vmem:[#allocation168_spill] sm:$0xff] %v7982_v46  ;;  %vm473_vm6 = vcmp.eq.s32.totalorder %v11230_v15, %v7180_v40  ;;  %v2092_v45 = vadd.f32 %v2091_v16, %v2090_v51  ;;  %v2093_v7 = vsel %vm663_vm1, %v11231_v23, 0.0  ;;  %vm11233_vm9 = vcmp.eq.s32.totalorder %v11180_v38, %v7180_v40  ;;  %v11237_v16 = vld [vmem:[#allocation289_spill] sm:$0xff]  ;;  %v11429_v38 = vld [vmem:[#allocation200_spill] sm:$0xff] }
 0x243   :  { %11229 = vst [vmem:[#allocation280_spill] sm:$0xff] %v7988_v54  ;;  %v2497_v46 = vsel %vm11233_vm9, %v11232_v36, 0.0  ;;  %v2770_v9 = vadd.f32 %v2769_v30, %v2768_v3  ;;  %v11234_v54 = vld [vmem:[#allocation30_spill] sm:$0xff]  ;;  %v2337_v18 = vadd.f32 %v2336_v61, %v2335_v2  ;;  %v8007_v47 = vsel %vm468_vm14, %v11235_v63, 0.0  ;;  %v11239_v3 = vld [vmem:[#allocation69_spill] sm:$0xff]  ;;  %v11240_v63 = vld [vmem:[#allocation152_spill] sm:$0xff] }
 0x244   :  { %11236 = vst [vmem:[#allocation60_spill] sm:$0xff] %v8007_v47  ;;  %v8013_v51 = vsel %vm580_vm8, %v11237_v16, 0.0  ;;  %v2771_v23 = vsel %vm663_vm1, %v2496_v44, 0.0  ;;  %vm474_vm9 = vcmp.eq.s32.totalorder %v11239_v3, %v7180_v40  ;;  %vm586_vm4 = vcmp.eq.s32.totalorder %v11109_v55, %v7544_v62  ;;  %v11242_v30 = vld [vmem:[#allocation31_spill] sm:$0xff]  ;;  %v11243_v44 = vld [vmem:[#allocation153_spill] sm:$0xff]  ;;  %v11244_v16 = vld [vmem:[#allocation178_spill] sm:$0xff] }
 0x245   :  { %11238 = vst [vmem:[#allocation349_spill] sm:$0xff] %v8013_v51  ;;  %3592 = vpow2.f32 %v7653_v39  ;;  %v2338_v2 = vsel %vm663_vm1, %v3587_v43, 0.0  ;;  %vm11241_vm14 = vcmp.eq.s32.totalorder %v11188_v56, %v7180_v40  ;;  %v2772_v31 = vadd.f32 %v2771_v23, %v2770_v9  ;;  %v11246_v43 = vld [vmem:[#allocation290_spill] sm:$0xff]  ;;  %v11249_v51 = vld [vmem:[#allocation360_spill] sm:$0xff] }
 0x246   :  { %v2498_v61 = vsel %vm11241_vm14, %v11240_v63, 0.0  ;;  %vm436_vm8 = vcmp.eq.s32.totalorder %v11242_v30, %v7180_v40  ;;  %v2499_v36 = vsel %vm430_vm11, %v11243_v44, 0.0  ;;  %v8036_v39 = vsel %vm469_vm12, %v11244_v16, 0.0  ;;  %v11248_v23 = vld [vmem:[#allocation70_spill] sm:$0xff]  ;;  %v11304_v30 = vld [vmem:[#allocation297_spill] sm:$0xff] }
 0x247   :  { %11245 = vst [vmem:[#allocation143_spill] sm:$0xff] %v8036_v39  ;;  %v8042_v63 = vsel %vm581_vm10, %v11246_v43, 0.0  ;;  %v2773_v9 = vsel %vm663_vm1, %v2497_v46, 0.0  ;;  %vm475_vm14 = vcmp.eq.s32.totalorder %v11248_v23, %v7180_v40  ;;  %v2094_v44 = vadd.f32 %v2093_v7, %v2092_v45  ;;  %v11250_v16 = vld [vmem:[#allocation154_spill] sm:$0xff]  ;;  %v3591_v43 = vpop.eup %3590  ;;  %v11255_v7 = vld [vmem:[#allocation291_spill] sm:$0xff] }
 0x248   :  { %11247 = vst [vmem:[#allocation169_spill] sm:$0xff] %v8042_v63  ;;  %v2095_v47 = vsel %vm663_vm1, %v11249_v51, 0.0  ;;  %vm11251_vm12 = vcmp.eq.s32.totalorder %v11197_v6, %v7180_v40  ;;  %v2774_v57 = vadd.f32 %v2773_v9, %v2772_v31  ;;  %v11252_v63 = vld [vmem:[#allocation32_spill] sm:$0xff]  ;;  %v2339_v46 = vadd.f32 %v2338_v2, %v2337_v18  ;;  %v11258_v31 = vld [vmem:[#allocation71_spill] sm:$0xff] }
 0x249   :  { %v2500_v39 = vsel %vm11251_vm12, %v11250_v16, 0.0  ;;  %v8061_v56 = vsel %vm470_vm2, %v11253_v0, 0.0  ;;  %vm11256_vm11 = vcmp.eq.s32.totalorder %v11089_v50, %v7544_v62  ;;  %v2775_v51 = vsel %vm663_vm1, %v2498_v61, 0.0  ;;  %v11259_v2 = vld [vmem:[#allocation155_spill] sm:$0xff]  ;;  %v11261_v16 = vld [vmem:[#allocation33_spill] sm:$0xff]  ;;  %v11262_v61 = vld [vmem:[#allocation180_spill] sm:$0xff] }
 0x24a   :  { %11254 = vst [vmem:[#allocation281_spill] sm:$0xff] %v8061_v56  ;;  %v8067_v45 = vsel %vm11256_vm11, %v11255_v7, 0.0  ;;  %vm476_vm12 = vcmp.eq.s32.totalorder %v11258_v31, %v7180_v40  ;;  %vm588_vm10 = vcmp.eq.s32.totalorder %v11117_v10, %v7544_v62  ;;  %v2340_v18 = vsel %vm663_vm1, %v3589_v41, 0.0  ;;  %v11264_v41 = vld [vmem:[#allocation292_spill] sm:$0xff]  ;;  %v11271_v56 = vld [vmem:[#allocation181_spill] sm:$0xff]  ;;  %v11417_v6 = vld [vmem:[#allocation15_spill] sm:$0xff] }
 0x24b   :  { %11257 = vst [vmem:[#allocation61_spill] sm:$0xff] %v8067_v45  ;;  %vm11260_vm2 = vcmp.eq.s32.totalorder %v11207_v17, %v7180_v40  ;;  %v2776_v9 = vadd.f32 %v2775_v51, %v2774_v57  ;;  %v2777_v50 = vsel %vm663_vm1, %v2499_v36, 0.0  ;;  %3594 = vpow2.f32 %v7656_v8  ;;  %v3593_v36 = vpop.eup %3592  ;;  %v11266_v51 = vld [vmem:[#allocation72_spill] sm:$0xff] }
 0x24c   :  { %v2501_v0 = vsel %vm11260_vm2, %v11259_v2, 0.0  ;;  %v8087_v7 = vsel %vm471_vm3, %v11262_v61, 0.0  ;;  %v8093_v45 = vsel %vm583_vm15, %v11264_v41, 0.0  ;;  %v2779_v57 = vsel %vm663_vm1, %v2500_v39, 0.0  ;;  %v11267_v2 = vld [vmem:[#allocation361_spill] sm:$0xff] }
 0x24d   :  { %11263 = vst [vmem:[#allocation144_spill] sm:$0xff] %v8087_v7  ;;  %vm477_vm2 = vcmp.eq.s32.totalorder %v11266_v51, %v7180_v40  ;;  %vm589_vm11 = vcmp.eq.s32.totalorder %v11124_v19, %v7544_v62  ;;  %v2096_v8 = vadd.f32 %v2095_v47, %v2094_v44  ;;  %v2097_v61 = vsel %vm663_vm1, %v11267_v2, 0.0  ;;  %v11268_v7 = vld [vmem:[#allocation156_spill] sm:$0xff]  ;;  %v11273_v47 = vld [vmem:[#allocation293_spill] sm:$0xff] }
 0x24e   :  { %11265 = vst [vmem:[#allocation170_spill] sm:$0xff] %v8093_v45  ;;  %vm11269_vm3 = vcmp.eq.s32.totalorder %v11217_v26, %v7180_v40  ;;  %v2778_v41 = vadd.f32 %v2777_v50, %v2776_v9  ;;  %v11270_v45 = vld [vmem:[#allocation34_spill] sm:$0xff]  ;;  %v2341_v39 = vadd.f32 %v2340_v18, %v2339_v46  ;;  %v8112_v17 = vsel %vm472_vm0, %v11271_v56, 0.0  ;;  %v11275_v9 = vld [vmem:[#allocation73_spill] sm:$0xff]  ;;  %v11276_v46 = vld [vmem:[#allocation315_spill] sm:$0xff] }
 0x24f   :  { %v2502_v12 = vsel %vm11269_vm3, %v11268_v7, 0.0  ;;  %11272 = vst [vmem:[#allocation282_spill] sm:$0xff] %v8112_v17  ;;  %v8118_v44 = vsel %vm584_vm13, %v11273_v47, 0.0  ;;  %v2781_v2 = vsel %vm663_vm1, %v2501_v0, 0.0  ;;  %vm478_vm3 = vcmp.eq.s32.totalorder %v11275_v9, %v7180_v40  ;;  %v11277_v50 = vld [vmem:[#allocation157_spill] sm:$0xff]  ;;  %v11278_v0 = vld [vmem:[#allocation182_spill] sm:$0xff] }
 0x250   :  { %11274 = vst [vmem:[#allocation62_spill] sm:$0xff] %v8118_v44  ;;  %vm590_vm15 = vcmp.eq.s32.totalorder %v11132_v25, %v7544_v62  ;;  %v8126_v18 = vmul.f32 1.442695, %v11276_v46  ;;  %v2342_v56 = vsel %vm663_vm1, %v3591_v43, 0.0  ;;  %v2503_v27 = vsel %vm434_vm7, %v11277_v50, 0.0  ;;  %v11280_v44 = vld [vmem:[#allocation294_spill] sm:$0xff] }
 0x251   :  { %v2780_v7 = vadd.f32 %v2779_v57, %v2778_v41  ;;  %3596 = vpow2.f32 %v7662_v34  ;;  %v8138_v47 = vsel %vm473_vm6, %v11278_v0, 0.0  ;;  %v8144_v17 = vsel %vm585_vm5, %v11280_v44, 0.0  ;;  %v11283_v57 = vld [vmem:[#allocation362_spill] sm:$0xff]  ;;  %v3595_v44 = vpop.eup %3594  ;;  %v11288_v26 = vld [vmem:[#allocation295_spill] sm:$0xff] }
 0x252   :  { %11279 = vst [vmem:[#allocation350_spill] sm:$0xff] %v8138_v47  ;;  %v2783_v43 = vsel %vm663_vm1, %v2502_v12, 0.0  ;;  %vm479_vm13 = vcmp.eq.s32.totalorder %v11282_v13, %v7180_v40  ;;  %vm591_vm0 = vcmp.eq.s32.totalorder %v11140_v29, %v7544_v62  ;;  %v2098_v34 = vadd.f32 %v2097_v61, %v2096_v8  ;;  %v11284_v50 = vld [vmem:[#allocation158_spill] sm:$0xff]  ;;  %v11286_v47 = vld [vmem:[#allocation183_spill] sm:$0xff]  ;;  %v11327_v29 = vld [vmem:[#allocation4_spill] sm:$0xff] }
 0x253   :  { %11281 = vst [vmem:[#allocation145_spill] sm:$0xff] %v8144_v17  ;;  %v2099_v41 = vsel %vm663_vm1, %v11283_v57, 0.0  ;;  %vm11285_vm7 = vcmp.eq.s32.totalorder %v11234_v54, %v7180_v40  ;;  %v2782_v24 = vadd.f32 %v2781_v2, %v2780_v7  ;;  %v2343_v17 = vadd.f32 %v2342_v56, %v2341_v39  ;;  %v11290_v57 = vld [vmem:[#allocation75_spill] sm:$0xff]  ;;  %v11291_v39 = vld [vmem:[#allocation316_spill] sm:$0xff]  ;;  %v11416_v54 = vld [vmem:[#allocation14_spill] sm:$0xff] }
 0x254   :  { %v2504_v0 = vsel %vm11285_vm7, %v11284_v50, 0.0  ;;  %v8161_v12 = vsel %vm474_vm9, %v11286_v47, 0.0  ;;  %v8167_v8 = vsel %vm586_vm4, %v11288_v26, 0.0  ;;  %v2785_v61 = vsel %vm663_vm1, %v2503_v27, 0.0  ;;  %v11292_v7 = vld [vmem:[#allocation159_spill] sm:$0xff]  ;;  %v11293_v27 = vld [vmem:[#allocation184_spill] sm:$0xff] }
 0x255   :  { %11287 = vst [vmem:[#allocation171_spill] sm:$0xff] %v8161_v12  ;;  %vm480_vm6 = vcmp.eq.s32.totalorder %v11290_v57, %v7180_v40  ;;  %vm592_vm5 = vcmp.eq.s32.totalorder %v11148_v60, %v7544_v62  ;;  %v8175_v2 = vmul.f32 1.442695, %v11291_v39  ;;  %v2344_v56 = vsel %vm663_vm1, %v3593_v36, 0.0  ;;  %v11295_v50 = vld [vmem:[#allocation296_spill] sm:$0xff]  ;;  %v11335_v60 = vld [vmem:[#allocation190_spill] sm:$0xff] }
 0x256   :  { %11289 = vst [vmem:[#allocation283_spill] sm:$0xff] %v8167_v8  ;;  %v2505_v55 = vsel %vm436_vm8, %v11292_v7, 0.0  ;;  %v2784_v26 = vadd.f32 %v2783_v43, %v2782_v24  ;;  %3598 = vpow2.f32 %v7702_v4  ;;  %v8187_v47 = vsel %vm475_vm14, %v11293_v27, 0.0  ;;  %v11298_v12 = vld [vmem:[#allocation76_spill] sm:$0xff]  ;;  %v11299_v43 = vld [vmem:[#allocation365_spill] sm:$0xff]  ;;  %v11457_v46 = vld [vmem:[#allocation202_spill] sm:$0xff] }
 0x257   :  { %11294 = vst [vmem:[#allocation63_spill] sm:$0xff] %v8187_v47  ;;  %vm11296_vm4 = vcmp.eq.s32.totalorder %v11112_v42, %v7544_v62  ;;  %v2787_v36 = vsel %vm663_vm1, %v2504_v0, 0.0  ;;  %vm481_vm9 = vcmp.eq.s32.totalorder %v11298_v12, %v7180_v40  ;;  %vm593_vm8 = vcmp.eq.s32.totalorder %v11158_v53, %v7544_v62  ;;  %v11300_v7 = vld [vmem:[#allocation160_spill] sm:$0xff]  ;;  %v11302_v47 = vld [vmem:[#allocation185_spill] sm:$0xff] }
 0x258   :  { %v8193_v8 = vsel %vm11296_vm4, %v11295_v50, 0.0  ;;  %v2100_v4 = vadd.f32 %v2099_v41, %v2098_v34  ;;  %v2101_v24 = vsel %vm663_vm1, %v11299_v43, 0.0  ;;  %vm11301_vm14 = vcmp.eq.s32.totalorder %v11252_v63, %v7180_v40  ;;  %v3597_v50 = vpop.eup %3596  ;;  %v11306_v43 = vld [vmem:[#allocation77_spill] sm:$0xff]  ;;  %v11412_v63 = vld [vmem:[#allocation12_spill] sm:$0xff] }
 0x259   :  { %11297 = vst [vmem:[#allocation146_spill] sm:$0xff] %v8193_v8  ;;  %v2506_v27 = vsel %vm11301_vm14, %v11300_v7, 0.0  ;;  %v2786_v42 = vadd.f32 %v2785_v61, %v2784_v26  ;;  %v2345_v8 = vadd.f32 %v2344_v56, %v2343_v17  ;;  %v8210_v0 = vsel %vm476_vm12, %v11302_v47, 0.0  ;;  %v11307_v17 = vld [vmem:[#allocation317_spill] sm:$0xff]  ;;  %v11456_v39 = vld [vmem:[#allocation108_spill] sm:$0xff] }
 0x25a   :  { %11303 = vst [vmem:[#allocation172_spill] sm:$0xff] %v8210_v0  ;;  %v8216_v34 = vsel %vm588_vm10, %v11304_v30, 0.0  ;;  %v2789_v41 = vsel %vm663_vm1, %v2505_v55, 0.0  ;;  %vm482_vm7 = vcmp.eq.s32.totalorder %v11306_v43, %v7180_v40  ;;  %vm594_vm4 = vcmp.eq.s32.totalorder %v11168_v37, %v7544_v62  ;;  %v11308_v26 = vld [vmem:[#allocation161_spill] sm:$0xff]  ;;  %v11310_v55 = vld [vmem:[#allocation186_spill] sm:$0xff] }
 0x25b   :  { %11305 = vst [vmem:[#allocation284_spill] sm:$0xff] %v8216_v34  ;;  %v8224_v61 = vmul.f32 1.442695, %v11307_v17  ;;  %v2346_v56 = vsel %vm663_vm1, %v3595_v44, 0.0  ;;  %vm11309_vm12 = vcmp.eq.s32.totalorder %v11261_v16, %v7180_v40  ;;  %v2788_v30 = vadd.f32 %v2787_v36, %v2786_v42  ;;  %v11313_v34 = vld [vmem:[#allocation78_spill] sm:$0xff]  ;;  %v11455_v17 = vld [vmem:[#allocation107_spill] sm:$0xff] }
 0x25c   :  { %v2507_v10 = vsel %vm11309_vm12, %v11308_v26, 0.0  ;;  %3600 = vpow2.f32 %v7754_v33  ;;  %v8236_v47 = vsel %vm477_vm2, %v11310_v55, 0.0  ;;  %v8242_v7 = vsel %vm589_vm11, %v6742_v14, 0.0  ;;  %v11314_v36 = vld [vmem:[#allocation366_spill] sm:$0xff]  ;;  %v3599_v14 = vpop.eup %3598 }
 0x25d   :  { %11311 = vst [vmem:[#allocation64_spill] sm:$0xff] %v8236_v47  ;;  %v2791_v44 = vsel %vm663_vm1, %v2506_v27, 0.0  ;;  %vm483_vm10 = vcmp.eq.s32.totalorder %v11313_v34, %v7180_v40  ;;  %vm595_vm14 = vcmp.eq.s32.totalorder %v11176_v21, %v7544_v62  ;;  %v2102_v33 = vadd.f32 %v2101_v24, %v2100_v4  ;;  %v11315_v26 = vld [vmem:[#allocation162_spill] sm:$0xff]  ;;  %v11356_v47 = vld [vmem:[#allocation377_spill] sm:$0xff] }
 0x25e   :  { %11312 = vst [vmem:[#allocation354_spill] sm:$0xff] %v8242_v7  ;;  %v2103_v42 = vsel %vm663_vm1, %v11314_v36, 0.0  ;;  %vm11316_vm2 = vcmp.eq.s32.totalorder %v11270_v45, %v7180_v40  ;;  %v2790_v19 = vadd.f32 %v2789_v41, %v2788_v30  ;;  %vm535_vm11 = vcmp.eq.s32.totalorder %v11035_v28, %v7544_v62  ;;  %v11317_v7 = vld [vmem:[#allocation187_spill] sm:$0xff]  ;;  %v8275_v30 = vld [vmem:[%s10205_s0] ss:$0 sm:$0xff]  ;;  %v11359_v21 = vld [vmem:[#allocation217_spill] sm:$0xff] }
 0x25f   :  { %v2508_v55 = vsel %vm11316_vm2, %v11315_v26, 0.0  ;;  %vm536_vm12 = vcmp.eq.s32.totalorder %v11039_v22, %v7544_v62  ;;  %v2347_v27 = vadd.f32 %v2346_v56, %v2345_v8  ;;  %v8263_v4 = vsel %vm478_vm3, %v11317_v7, 0.0  ;;  %v11320_v8 = vld [vmem:[#allocation79_spill] sm:$0xff]  ;;  %v11321_v56 = vld [vmem:[#allocation318_spill] sm:$0xff]  ;;  %v11361_v45 = vld [vmem:[#allocation193_spill] sm:$0xff] }
 0x260   :  { %11318 = vst [vmem:[#allocation147_spill] sm:$0xff] %v8263_v4  ;;  %v8269_v24 = vsel %vm590_vm15, %v6749_v5, 0.0  ;;  %v2793_v41 = vsel %vm663_vm1, %v2507_v10, 0.0  ;;  %vm484_vm2 = vcmp.eq.s32.totalorder %v11320_v8, %v8275_v30  ;;  %3602 = vpow2.f32 %v7807_v20  ;;  %v11322_v10 = vld [vmem:[#allocation188_spill] sm:$0xff]  ;;  %v11363_v28 = vld [vmem:[#allocation302_spill] sm:$0xff]  ;;  %v11366_v22 = vld [vmem:[#allocation379_spill] sm:$0xff] }
 0x261   :  { %11319 = vst [vmem:[#allocation173_spill] sm:$0xff] %v8269_v24  ;;  %v8283_v7 = vmul.f32 1.442695, %v11321_v56  ;;  %v2348_v5 = vsel %vm663_vm1, %v3597_v50, 0.0  ;;  %v2792_v25 = vadd.f32 %v2791_v44, %v2790_v19  ;;  %3604 = vpow2.f32 %v7860_v58  ;;  %v11325_v24 = vld [vmem:[#allocation80_spill] sm:$0xff]  ;;  %v11326_v50 = vld [vmem:[#allocation367_spill] sm:$0xff] }
 0x262   :  { %v8291_v36 = vsel %vm479_vm13, %v11322_v10, 0.0  ;;  %v8297_v26 = vsel %vm591_vm0, %v6755_v11, 0.0  ;;  %v2795_v20 = vsel %vm663_vm1, %v2508_v55, 0.0  ;;  %vm485_vm15 = vcmp.eq.s32.totalorder %v11325_v24, %v8275_v30  ;;  %v3601_v10 = vpop.eup %3600  ;;  %v11345_v4 = vld [vmem:[#allocation300_spill] sm:$0xff] }
 0x263   :  { %11323 = vst [vmem:[#allocation285_spill] sm:$0xff] %v8291_v36  ;;  %vm597_vm3 = vcmp.eq.s32.totalorder %v11194_v48, %v7544_v62  ;;  %3606 = vpow2.f32 %v7915_v32  ;;  %v2104_v58 = vadd.f32 %v2103_v42, %v2102_v33  ;;  %v2105_v44 = vsel %vm663_vm1, %v11326_v50, 0.0  ;;  %v11330_v36 = vld [vmem:[#allocation298_spill] sm:$0xff]  ;;  %v11332_v33 = vld [vmem:[#allocation371_spill] sm:$0xff] }
 0x264   :  { %11324 = vst [vmem:[#allocation65_spill] sm:$0xff] %v8297_v26  ;;  %v2794_v19 = vadd.f32 %v2793_v41, %v2792_v25  ;;  %v2349_v11 = vadd.f32 %v2348_v5, %v2347_v27  ;;  %v11328_v26 = vld [vmem:[#allocation189_spill] sm:$0xff]  ;;  %v8319_v32 = vsel %vm592_vm5, %v11330_v36, 0.0  ;;  %v2797_v42 = vsel %vm663_vm1, %v11332_v33, 0.0  ;;  %v11334_v27 = vld [vmem:[#allocation319_spill] sm:$0xff] }
 0x265   :  { %v8313_v55 = vsel %vm480_vm6, %v11328_v26, 0.0  ;;  %11331 = vst [vmem:[#allocation174_spill] sm:$0xff] %v8319_v32  ;;  %v11333_v41 = vld [vmem:[#allocation81_spill] sm:$0xff]  ;;  %vm598_vm13 = vcmp.eq.s32.totalorder %v11203_v1, %v7544_v62  ;;  %3608 = vpow2.f32 %v7968_v49  ;;  %v8329_v5 = vmul.f32 1.442695, %v11334_v27  ;;  %v11337_v50 = vld [vmem:[#allocation299_spill] sm:$0xff] }
 0x266   :  { %11329 = vst [vmem:[#allocation148_spill] sm:$0xff] %v8313_v55  ;;  %vm486_vm0 = vcmp.eq.s32.totalorder %v11333_v41, %v8275_v30  ;;  %v2350_v25 = vsel %vm663_vm1, %v3599_v14, 0.0  ;;  %v2796_v26 = vadd.f32 %v2795_v20, %v2794_v19  ;;  %3610 = vpow2.f32 %v8126_v18  ;;  %v11339_v49 = vld [vmem:[#allocation374_spill] sm:$0xff]  ;;  %v3603_v55 = vpop.eup %3602  ;;  %v11442_v27 = vld [vmem:[#allocation101_spill] sm:$0xff] }
 0x267   :  { %v8337_v36 = vsel %vm481_vm9, %v11335_v60, 0.0  ;;  %v8343_v33 = vsel %vm593_vm8, %v11337_v50, 0.0  ;;  %v2799_v32 = vsel %vm663_vm1, %v11339_v49, 0.0  ;;  %v11340_v14 = vld [vmem:[#allocation82_spill] sm:$0xff]  ;;  %vm599_vm5 = vcmp.eq.s32.totalorder %v11213_v52, %v7544_v62  ;;  %v3605_v53 = vpop.eup %3604  ;;  %v11342_v50 = vld [vmem:[#allocation5_spill] sm:$0xff]  ;;  %v11343_v49 = vld [vmem:[#allocation191_spill] sm:$0xff] }
 0x268   :  { %11336 = vst [vmem:[#allocation286_spill] sm:$0xff] %v8337_v36  ;;  %vm487_vm6 = vcmp.eq.s32.totalorder %v11340_v14, %v8275_v30  ;;  %3612 = vpow2.f32 %v8175_v2  ;;  %v2106_v18 = vadd.f32 %v2105_v44, %v2104_v58  ;;  %v11341_v20 = vld [vmem:[#allocation370_spill] sm:$0xff]  ;;  %v2798_v60 = vadd.f32 %v2797_v42, %v2796_v26  ;;  %v11348_v26 = vld [vmem:[#allocation83_spill] sm:$0xff] }
 0x269   :  { %11338 = vst [vmem:[#allocation66_spill] sm:$0xff] %v8343_v33  ;;  %v2107_v19 = vsel %vm663_vm1, %v11341_v20, 0.0  ;;  %v2351_v33 = vadd.f32 %v2350_v25, %v2349_v11  ;;  %v8360_v36 = vsel %vm482_vm7, %v11343_v49, 0.0  ;;  %v8366_v2 = vsel %vm594_vm4, %v11345_v4, 0.0  ;;  %v11347_v58 = vld [vmem:[#allocation42_spill] sm:$0xff]  ;;  %v8370_v42 = vpop.eup %3606  ;;  %v11349_v11 = vld [vmem:[#allocation320_spill] sm:$0xff] }
 0x26a   :  { %11344 = vst [vmem:[#allocation356_spill] sm:$0xff] %v8360_v36  ;;  %v2801_v44 = vsel %vm663_vm1, %v11347_v58, 0.0  ;;  %vm488_vm8 = vcmp.eq.s32.totalorder %v11348_v26, %v8275_v30  ;;  %vm600_vm9 = vcmp.eq.s32.totalorder %v11222_v59, %v7544_v62  ;;  %3614 = vpow2.f32 %v8224_v61  ;;  %v11351_v20 = vld [vmem:[#allocation40_spill] sm:$0xff]  ;;  %v11354_v36 = vld [vmem:[#allocation301_spill] sm:$0xff]  ;;  %v11392_v52 = vld [vmem:[#allocation219_spill] sm:$0xff] }
 0x26b   :  { %11346 = vst [vmem:[#allocation149_spill] sm:$0xff] %v8366_v2  ;;  %v8378_v25 = vmul.f32 1.442695, %v11349_v11  ;;  %v2352_v37 = vsel %vm663_vm1, %v3601_v10, 0.0  ;;  %v2800_v4 = vadd.f32 %v2799_v32, %v2798_v60  ;;  %v2109_v49 = vsel %vm663_vm1, %v11351_v20, 0.0  ;;  %v11352_v58 = vld [vmem:[#allocation192_spill] sm:$0xff]  ;;  %v8397_v10 = vpop.eup %3608 }
 0x26c   :  { %v8387_v2 = vsel %vm483_vm10, %v11352_v58, 0.0  ;;  %v8393_v61 = vsel %vm595_vm14, %v11354_v36, 0.0  ;;  %v2803_v0 = vsel %vm663_vm1, %v11356_v47, 0.0  ;;  %v11357_v32 = vld [vmem:[#allocation84_spill] sm:$0xff]  ;;  %vm601_vm4 = vcmp.eq.s32.totalorder %v11230_v15, %v7544_v62  ;;  %v8411_v58 = vpop.eup %3610  ;;  %v11403_v59 = vld [vmem:[#allocation10_spill] sm:$0xff]  ;;  %v11413_v15 = vld [vmem:[#allocation3_spill] sm:$0xff] }
 0x26d   :  { %11350 = vst [vmem:[#allocation175_spill] sm:$0xff] %v8378_v25  ;;  %vm489_vm7 = vcmp.eq.s32.totalorder %v11357_v32, %v8275_v30  ;;  %v2108_v40 = vadd.f32 %v2107_v19, %v2106_v18  ;;  %v11358_v60 = vld [vmem:[#allocation216_spill] sm:$0xff]  ;;  %v2605_v36 = vsel %vm536_vm12, %v11359_v21, 0.0  ;;  %v2802_v47 = vadd.f32 %v2801_v44, %v2800_v4  ;;  %v11369_v21 = vld [vmem:[#allocation194_spill] sm:$0xff]  ;;  %v11440_v25 = vld [vmem:[#allocation99_spill] sm:$0xff] }
 0x26e   :  { %11353 = vst [vmem:[#allocation287_spill] sm:$0xff] %v8387_v2  ;;  %v2604_v20 = vsel %vm535_vm11, %v11358_v60, 0.0  ;;  %v2353_v2 = vadd.f32 %v2352_v37, %v2351_v33  ;;  %v8419_v18 = vsel %vm484_vm2, %v11361_v45, 0.0  ;;  %vm11364_vm14 = vcmp.eq.s32.totalorder %v11185_v35, %v7544_v62  ;;  %v8429_v4 = vpop.eup %3612  ;;  %v11367_v60 = vld [vmem:[#allocation85_spill] sm:$0xff]  ;;  %v11368_v37 = vld [vmem:[#allocation382_spill] sm:$0xff]  ;;  %v11441_v11 = vld [vmem:[#allocation100_spill] sm:$0xff] }
 0x26f   :  { %11355 = vst [vmem:[#allocation67_spill] sm:$0xff] %v8393_v61  ;;  %v11360_v61 = vld [vmem:[#allocation6_spill] sm:$0xff]  ;;  %v8425_v19 = vsel %vm11364_vm14, %v11363_v28, 0.0  ;;  %v2805_v44 = vsel %vm663_vm1, %v11366_v22, 0.0  ;;  %vm490_vm11 = vcmp.eq.s32.totalorder %v11367_v60, %v8275_v30  ;;  %vm602_vm12 = vcmp.eq.s32.totalorder %v11239_v3, %v7544_v62  ;;  %v11371_v22 = vld [vmem:[#allocation303_spill] sm:$0xff] }
 0x270   :  { %vm539_vm10 = vcmp.eq.s32.totalorder %v11360_v61, %v7544_v62  ;;  %11362 = vst [vmem:[#allocation150_spill] sm:$0xff] %v8419_v18  ;;  %3616 = vpow2.f32 %v8283_v7  ;;  %v2354_v45 = vsel %vm663_vm1, %v3603_v55, 0.0  ;;  %v2804_v33 = vadd.f32 %v2803_v0, %v2802_v47  ;;  %v8453_v0 = vpop.eup %3614  ;;  %v11373_v47 = vld [vmem:[#allocation86_spill] sm:$0xff] }
 0x271   :  { %11365 = vst [vmem:[#allocation176_spill] sm:$0xff] %v8425_v19  ;;  %v2807_v35 = vsel %vm663_vm1, %v11368_v37, 0.0  ;;  %v8443_v28 = vsel %vm485_vm15, %v11369_v21, 0.0  ;;  %v8449_v19 = vsel %vm597_vm3, %v11371_v22, 0.0  ;;  %v2993_v7 = vsel %vm663_vm1, %v2604_v20, 0.0  ;;  %v11374_v21 = vld [vmem:[#allocation372_spill] sm:$0xff] }
 0x272   :  { %11370 = vst [vmem:[#allocation288_spill] sm:$0xff] %v8443_v28  ;;  %v2994_v55 = vsel %vm663_vm1, %v2605_v36, 0.0  ;;  %vm491_vm2 = vcmp.eq.s32.totalorder %v11373_v47, %v8275_v30  ;;  %vm603_vm14 = vcmp.eq.s32.totalorder %v11248_v23, %v7544_v62  ;;  %v2110_v37 = vadd.f32 %v2109_v49, %v2108_v40  ;;  %v11375_v18 = vld [vmem:[#allocation218_spill] sm:$0xff]  ;;  %v11377_v36 = vld [vmem:[#allocation7_spill] sm:$0xff]  ;;  %v11380_v49 = vld [vmem:[#allocation304_spill] sm:$0xff] }
 0x273   :  { %11372 = vst [vmem:[#allocation68_spill] sm:$0xff] %v8449_v19  ;;  %v2111_v28 = vsel %vm663_vm1, %v11374_v21, 0.0  ;;  %vm11376_vm3 = vcmp.eq.s32.totalorder %v11327_v29, %v7544_v62  ;;  %v2806_v20 = vadd.f32 %v2805_v44, %v2804_v33  ;;  %v2355_v22 = vadd.f32 %v2354_v45, %v2353_v2  ;;  %v11378_v19 = vld [vmem:[#allocation195_spill] sm:$0xff]  ;;  %v11382_v21 = vld [vmem:[#allocation385_spill] sm:$0xff]  ;;  %v11384_v45 = vld [vmem:[#allocation196_spill] sm:$0xff] }
 0x274   :  { %v2606_v48 = vsel %vm11376_vm3, %v11375_v18, 0.0  ;;  %v8471_v16 = vsel %vm486_vm0, %v11378_v19, 0.0  ;;  %v8477_v40 = vsel %vm598_vm13, %v11380_v49, 0.0  ;;  %v2809_v29 = vsel %vm663_vm1, %v11382_v21, 0.0  ;;  %v11383_v18 = vld [vmem:[#allocation87_spill] sm:$0xff]  ;;  %v11386_v33 = vld [vmem:[#allocation305_spill] sm:$0xff] }
 0x275   :  { %11379 = vst [vmem:[#allocation357_spill] sm:$0xff] %v8471_v16  ;;  %vm492_vm3 = vcmp.eq.s32.totalorder %v11383_v18, %v8275_v30  ;;  %3618 = vpow2.f32 %v8329_v5  ;;  %v2356_v2 = vsel %vm663_vm1, %v3605_v53, 0.0  ;;  %v2808_v19 = vadd.f32 %v2807_v35, %v2806_v20  ;;  %v11388_v21 = vld [vmem:[#allocation130_spill] sm:$0xff]  ;;  %v11390_v35 = vld [vmem:[#allocation88_spill] sm:$0xff]  ;;  %v11407_v16 = vld [vmem:[#allocation307_spill] sm:$0xff] }
 0x276   :  { %11381 = vst [vmem:[#allocation151_spill] sm:$0xff] %v8477_v40  ;;  %v2995_v44 = vadd.f32 %v2994_v55, %v2993_v7  ;;  %v8491_v1 = vsel %vm487_vm6, %v11384_v45, 0.0  ;;  %v8497_v49 = vsel %vm599_vm5, %v11386_v33, 0.0  ;;  %v2811_v40 = vsel %vm663_vm1, %v11388_v21, 0.0  ;;  %v8502_v53 = vpop.eup %3616  ;;  %v11391_v55 = vld [vmem:[#allocation375_spill] sm:$0xff]  ;;  %v11395_v21 = vld [vmem:[#allocation9_spill] sm:$0xff] }
 0x277   :  { %11385 = vst [vmem:[#allocation177_spill] sm:$0xff] %v8491_v1  ;;  %v2996_v5 = vsel %vm663_vm1, %v2606_v48, 0.0  ;;  %vm493_vm13 = vcmp.eq.s32.totalorder %v11390_v35, %v8275_v30  ;;  %vm605_vm0 = vcmp.eq.s32.totalorder %v11266_v51, %v7544_v62  ;;  %v2112_v7 = vadd.f32 %v2111_v28, %v2110_v37  ;;  %v11394_v48 = vld [vmem:[#allocation8_spill] sm:$0xff]  ;;  %v11396_v1 = vld [vmem:[#allocation197_spill] sm:$0xff]  ;;  %v11398_v37 = vld [vmem:[#allocation306_spill] sm:$0xff] }
 0x278   :  { %11387 = vst [vmem:[#allocation289_spill] sm:$0xff] %v8497_v49  ;;  %v2113_v20 = vsel %vm663_vm1, %v11391_v55, 0.0  ;;  %vm11393_vm6 = vcmp.eq.s32.totalorder %v11342_v50, %v7544_v62  ;;  %v2810_v33 = vadd.f32 %v2809_v29, %v2808_v19  ;;  %vm541_vm5 = vcmp.eq.s32.totalorder %v11394_v48, %v7544_v62  ;;  %v11400_v29 = vld [vmem:[#allocation131_spill] sm:$0xff]  ;;  %v11401_v55 = vld [vmem:[#allocation89_spill] sm:$0xff] }
 0x279   :  { %11389 = vst [vmem:[#allocation69_spill] sm:$0xff] %v8502_v53  ;;  %v2607_v45 = vsel %vm11393_vm6, %v11392_v52, 0.0  ;;  %v2357_v49 = vadd.f32 %v2356_v2, %v2355_v22  ;;  %v8522_v28 = vsel %vm488_vm8, %v11396_v1, 0.0  ;;  %v8528_v50 = vsel %vm600_vm9, %v11398_v37, 0.0  ;;  %v11402_v22 = vld [vmem:[#allocation2_spill] sm:$0xff]  ;;  %v11404_v37 = vld [vmem:[#allocation11_spill] sm:$0xff] }
 0x27a   :  { %11397 = vst [vmem:[#allocation152_spill] sm:$0xff] %v8522_v28  ;;  %v2813_v19 = vsel %vm663_vm1, %v11400_v29, 0.0  ;;  %vm494_vm6 = vcmp.eq.s32.totalorder %v11401_v55, %v8275_v30  ;;  %vm606_vm15 = vcmp.eq.s32.totalorder %v11275_v9, %v7544_v62  ;;  %v2115_v2 = vsel %vm663_vm1, %v11402_v22, 0.0  ;;  %v11405_v29 = vld [vmem:[#allocation198_spill] sm:$0xff]  ;;  %v11431_v53 = vld [vmem:[#allocation309_spill] sm:$0xff] }
 0x27b   :  { %11399 = vst [vmem:[#allocation153_spill] sm:$0xff] %v8528_v50  ;;  %v2358_v1 = vsel %vm663_vm1, %v8370_v42, 0.0  ;;  %v2812_v52 = vadd.f32 %v2811_v40, %v2810_v33  ;;  %v2997_v28 = vadd.f32 %v2996_v5, %v2995_v44  ;;  %v8548_v50 = vsel %vm489_vm7, %v11405_v29, 0.0  ;;  %v11409_v42 = vld [vmem:[#allocation49_spill] sm:$0xff]  ;;  %v8559_v5 = vpop.eup %3618  ;;  %v11411_v33 = vld [vmem:[#allocation90_spill] sm:$0xff] }
 0x27c   :  { %11406 = vst [vmem:[#allocation178_spill] sm:$0xff] %v8548_v50  ;;  %v8554_v22 = vsel %vm601_vm4, %v11407_v16, 0.0  ;;  %v2815_v40 = vsel %vm663_vm1, %v11409_v42, 0.0  ;;  %v2998_v44 = vsel %vm663_vm1, %v2607_v45, 0.0  ;;  %vm607_vm9 = vcmp.eq.s32.totalorder %v11282_v13, %v7544_v62  ;;  %v11415_v50 = vld [vmem:[#allocation13_spill] sm:$0xff] }
 0x27d   :  { %11408 = vst [vmem:[#allocation290_spill] sm:$0xff] %v8554_v22  ;;  %v2114_v29 = vadd.f32 %v2113_v20, %v2112_v7  ;;  %v2117_v16 = vsel %vm663_vm1, %v11413_v15, 0.0  ;;  %v11414_v22 = vld [vmem:[#allocation220_spill] sm:$0xff]  ;;  %v2814_v42 = vadd.f32 %v2813_v19, %v2812_v52  ;;  %vm546_vm4 = vcmp.eq.s32.totalorder %v11415_v50, %v7544_v62  ;;  %v11418_v7 = vld [vmem:[#allocation199_spill] sm:$0xff] }
 0x27e   :  { %11410 = vst [vmem:[#allocation70_spill] sm:$0xff] %v8559_v5  ;;  %v2608_v45 = vsel %vm539_vm10, %v11414_v22, 0.0  ;;  %vm547_vm8 = vcmp.eq.s32.totalorder %v11416_v54, %v7544_v62  ;;  %v2359_v5 = vadd.f32 %v2358_v1, %v2357_v49  ;;  %v8583_v20 = vsel %vm490_vm11, %v11418_v7, 0.0  ;;  %v11420_v15 = vld [vmem:[#allocation308_spill] sm:$0xff]  ;;  %v11422_v19 = vld [vmem:[#allocation135_spill] sm:$0xff]  ;;  %v11424_v49 = vld [vmem:[#allocation378_spill] sm:$0xff] }
 0x27f   :  { %11419 = vst [vmem:[#allocation360_spill] sm:$0xff] %v8583_v20  ;;  %v8589_v61 = vsel %vm602_vm12, %v11420_v15, 0.0  ;;  %v2817_v52 = vsel %vm663_vm1, %v11422_v19, 0.0  ;;  %v11423_v22 = vld [vmem:[#allocation91_spill] sm:$0xff]  ;;  %vm608_vm7 = vcmp.eq.s32.totalorder %v11290_v57, %v7544_v62  ;;  %v8599_v1 = vsel %vm663_vm1, %v11424_v49, 0.0  ;;  %v11426_v15 = vld [vmem:[#allocation92_spill] sm:$0xff] }
 0x280   :  { %11421 = vst [vmem:[#allocation154_spill] sm:$0xff] %v8589_v61  ;;  %v2360_v7 = vsel %vm663_vm1, %v8397_v10, 0.0  ;;  %v2816_v20 = vadd.f32 %v2815_v40, %v2814_v42  ;;  %v2999_v3 = vadd.f32 %v2998_v44, %v2997_v28  ;;  %v11427_v19 = vld [vmem:[#allocation93_spill] sm:$0xff]  ;;  %v11428_v61 = vld [vmem:[#allocation94_spill] sm:$0xff]  ;;  %v8613_v49 = vsel %vm491_vm2, %v11429_v38, 0.0  ;;  %v11433_v28 = vld [vmem:[#allocation136_spill] sm:$0xff] }
 0x281   :  { %11425 = vst [vmem:[#allocation179_spill] sm:$0xff] %v8599_v1  ;;  %v8619_v10 = vsel %vm603_vm14, %v11431_v53, 0.0  ;;  %v2819_v40 = vsel %vm663_vm1, %v11433_v28, 0.0  ;;  %v3000_v44 = vsel %vm663_vm1, %v2608_v45, 0.0  ;;  %v11434_v42 = vld [vmem:[#allocation95_spill] sm:$0xff]  ;;  %v11435_v1 = vld [vmem:[#allocation96_spill] sm:$0xff]  ;;  %v2116_v23 = vadd.f32 %v2115_v2, %v2114_v29 }
 0x282   :  { %11430 = vst [vmem:[#allocation291_spill] sm:$0xff] %v8613_v49  ;;  %v11436_v38 = vld [vmem:[#allocation97_spill] sm:$0xff]  ;;  %v11437_v49 = vld [vmem:[#allocation98_spill] sm:$0xff]  ;;  %v2362_v53 = vsel %vm663_vm1, %v8411_v58, 0.0  ;;  %vm11439_vm14 = vcmp.eq.s32.totalorder %v11377_v36, %v7544_v62  ;;  %v2818_v28 = vadd.f32 %v2817_v52, %v2816_v20  ;;  %v2361_v56 = vadd.f32 %v2360_v7, %v2359_v5  ;;  %v11450_v5 = vld [vmem:[#allocation103_spill] sm:$0xff] }
 0x283   :  { %11432 = vst [vmem:[#allocation71_spill] sm:$0xff] %v8619_v10  ;;  %vm503_vm11 = vcmp.eq.s32.totalorder %v11437_v49, %v8275_v30  ;;  %v11438_v10 = vld [vmem:[#allocation221_spill] sm:$0xff]  ;;  %v11445_v29 = vld [vmem:[#allocation310_spill] sm:$0xff]  ;;  %v11451_v7 = vld [vmem:[#allocation104_spill] sm:$0xff]  ;;  %v8701_v51 = vadd.f32 %v2117_v16, %v2116_v23 }
 0x284   :  { %v2609_v45 = vsel %vm11439_vm14, %v11438_v10, 0.0  ;;  %v11443_v2 = vld [vmem:[#allocation201_spill] sm:$0xff]  ;;  %vm11446_vm14 = vcmp.eq.s32.totalorder %v11258_v31, %v7544_v62  ;;  %v11448_v20 = vld [vmem:[#allocation50_spill] sm:$0xff]  ;;  %v2364_v31 = vsel %vm663_vm1, %v8429_v4, 0.0  ;;  %v8682_v4 = vsel %vm493_vm13, %v11457_v46, 0.0  ;;  %v11472_v16 = vld [vmem:[#allocation115_spill] sm:$0xff] }
 0x285   :  { %v8648_v58 = vsel %vm492_vm3, %v11443_v2, 0.0  ;;  %v8654_v36 = vsel %vm11446_vm14, %v11445_v29, 0.0  ;;  %v2821_v52 = vsel %vm663_vm1, %v11448_v20, 0.0  ;;  %v11449_v10 = vld [vmem:[#allocation102_spill] sm:$0xff]  ;;  %v11452_v2 = vld [vmem:[#allocation105_spill] sm:$0xff]  ;;  %v8670_v29 = vsel %vm663_vm1, %v8453_v0, 0.0 }
 0x286   :  { %11444 = vst [vmem:[#allocation155_spill] sm:$0xff] %v8648_v58  ;;  %vm507_vm12 = vcmp.eq.s32.totalorder %v11449_v10, %v8275_v30  ;;  %vm510_vm3 = vcmp.eq.s32.totalorder %v11452_v2, %v8275_v30  ;;  %v2820_v20 = vadd.f32 %v2819_v40, %v2818_v28  ;;  %v11454_v58 = vld [vmem:[#allocation106_spill] sm:$0xff]  ;;  %v11459_v2 = vld [vmem:[#allocation311_spill] sm:$0xff]  ;;  %v11462_v28 = vld [vmem:[#allocation109_spill] sm:$0xff]  ;;  %v2363_v23 = vadd.f32 %v2362_v53, %v2361_v56 }
 0x287   :  { %11447 = vst [vmem:[#allocation180_spill] sm:$0xff] %v8654_v36  ;;  %v3001_v36 = vadd.f32 %v3000_v44, %v2999_v3  ;;  %v8688_v0 = vsel %vm605_vm0, %v11459_v2, 0.0  ;;  %v11461_v3 = vld [vmem:[#allocation51_spill] sm:$0xff]  ;;  %v3002_v44 = vsel %vm663_vm1, %v2609_v45, 0.0  ;;  %vm514_vm10 = vcmp.eq.s32.totalorder %v11462_v28, %v8275_v30  ;;  %v11467_v2 = vld [vmem:[#allocation222_spill] sm:$0xff]  ;;  %v11487_v53 = vld [vmem:[#allocation121_spill] sm:$0xff] }
 0x288   :  { %11453 = vst [vmem:[#allocation292_spill] sm:$0xff] %v8670_v29  ;;  %v2823_v40 = vsel %vm663_vm1, %v11461_v3, 0.0  ;;  %v2610_v3 = vsel %vm541_vm5, %v11467_v2, 0.0  ;;  %v11468_v45 = vld [vmem:[#allocation223_spill] sm:$0xff]  ;;  %vm11469_vm0 = vcmp.eq.s32.totalorder %v11395_v21, %v7544_v62  ;;  %v2822_v28 = vadd.f32 %v2821_v52, %v2820_v20  ;;  %v11470_v29 = vld [vmem:[#allocation113_spill] sm:$0xff]  ;;  %v11471_v46 = vld [vmem:[#allocation114_spill] sm:$0xff] }
 0x289   :  { %11458 = vst [vmem:[#allocation72_spill] sm:$0xff] %v8682_v4  ;;  %v11465_v4 = vld [vmem:[#allocation112_spill] sm:$0xff]  ;;  %vm518_vm2 = vcmp.eq.s32.totalorder %v11470_v29, %v8275_v30  ;;  %v11477_v52 = vld [vmem:[#allocation137_spill] sm:$0xff]  ;;  %vm11485_vm13 = vcmp.eq.s32.totalorder %v11404_v37, %v7544_v62  ;;  %v3003_v56 = vadd.f32 %v3002_v44, %v3001_v36  ;;  %v11492_v37 = vld [vmem:[#allocation226_spill] sm:$0xff]  ;;  %v8810_v54 = vadd.f32 %v2364_v31, %v2363_v23 }
 0x28a   :  { %11460 = vst [vmem:[#allocation361_spill] sm:$0xff] %v8688_v0  ;;  %v2611_v0 = vsel %vm11469_vm0, %v11468_v45, 0.0  ;;  %v11475_v2 = vld [vmem:[#allocation312_spill] sm:$0xff]  ;;  %v2825_v20 = vsel %vm663_vm1, %v11477_v52, 0.0  ;;  %v8831_v31 = vld [vmem:[%s10205_s0 + $0x1] ss:$0 sm:$0xff] }
 0x28b   :  { %11466 = vst [vmem:[#allocation156_spill] sm:$0xff] %v8701_v51  ;;  %v11473_v51 = vld [vmem:[#allocation203_spill] sm:$0xff]  ;;  %v8727_v21 = vsel %vm606_vm15, %v11475_v2, 0.0  ;;  %v11478_v45 = vld [vmem:[#allocation116_spill] sm:$0xff]  ;;  %vm11483_vm15 = vcmp.eq.s32.totalorder %v11403_v59, %v7544_v62  ;;  %v11484_v2 = vld [vmem:[#allocation225_spill] sm:$0xff] }
 0x28c   :  { %v8721_v48 = vsel %vm494_vm6, %v11473_v51, 0.0  ;;  %11476 = vst [vmem:[#allocation293_spill] sm:$0xff] %v8727_v21  ;;  %vm521_vm5 = vcmp.eq.s32.totalorder %v11478_v45, %v8275_v30  ;;  %v8749_v52 = vsel %vm11485_vm13, %v11484_v2, 0.0  ;;  %v2824_v21 = vadd.f32 %v2823_v40, %v2822_v28  ;;  %v11486_v45 = vld [vmem:[#allocation120_spill] sm:$0xff]  ;;  %v11488_v51 = vld [vmem:[#allocation122_spill] sm:$0xff]  ;;  %v11495_v40 = vld [vmem:[#allocation313_spill] sm:$0xff] }
 0x28d   :  { %11474 = vst [vmem:[#allocation181_spill] sm:$0xff] %v8721_v48  ;;  %v11482_v48 = vld [vmem:[#allocation224_spill] sm:$0xff]  ;;  %vm525_vm14 = vcmp.eq.s32.totalorder %v11486_v45, %v8275_v30  ;;  %vm11493_vm13 = vcmp.eq.s32.totalorder %v11412_v63, %v7544_v62  ;;  %v8773_v44 = vsel %vm607_vm9, %v11495_v40, 0.0  ;;  %v3004_v28 = vsel %vm663_vm1, %v2610_v3, 0.0  ;;  %v11497_v2 = vld [vmem:[#allocation123_spill] sm:$0xff] }
 0x28e   :  { %v8743_v9 = vsel %vm11483_vm15, %v11482_v48, 0.0  ;;  %v11489_v59 = vld [vmem:[#allocation204_spill] sm:$0xff]  ;;  %vm11490_vm15 = vcmp.eq.s32.totalorder %v11411_v33, %v8275_v30  ;;  %v8767_v36 = vsel %vm11493_vm13, %v11492_v37, 0.0  ;;  %11496 = vst [vmem:[#allocation182_spill] sm:$0xff] %v8773_v44  ;;  %vm528_vm0 = vcmp.eq.s32.totalorder %v11497_v2, %v8275_v30  ;;  %v11501_v37 = vld [vmem:[#allocation227_spill] sm:$0xff]  ;;  %v11504_v44 = vld [vmem:[#allocation229_spill] sm:$0xff] }
 0x28f   :  { %v8761_v48 = vsel %vm11490_vm15, %v11489_v59, 0.0  ;;  %11494 = vst [vmem:[#allocation157_spill] sm:$0xff] %v8767_v36  ;;  %v11498_v59 = vld [vmem:[#allocation124_spill] sm:$0xff]  ;;  %v8788_v13 = vsel %vm546_vm4, %v11501_v37, 0.0  ;;  %vm11505_vm9 = vcmp.eq.s32.totalorder %v11417_v6, %v7544_v62  ;;  %v11508_v63 = vld [vmem:[#allocation127_spill] sm:$0xff]  ;;  %v11510_v37 = vld [vmem:[#allocation129_spill] sm:$0xff]  ;;  %vm11520_vm4 = vcmp.eq.s32.totalorder %v11426_v15, %v8275_v30 }
 0x290   :  { %11491 = vst [vmem:[#allocation73_spill] sm:$0xff] %v8761_v48  ;;  %vm529_vm15 = vcmp.eq.s32.totalorder %v11498_v59, %v8275_v30  ;;  %v11502_v40 = vld [vmem:[#allocation228_spill] sm:$0xff]  ;;  %v8800_v36 = vsel %vm11505_vm9, %v11504_v44, 0.0  ;;  %v8802_v48 = vadd.f32 %v2825_v20, %v2824_v21  ;;  %v11515_v44 = vld [vmem:[#allocation314_spill] sm:$0xff]  ;;  %vm609_vm9 = vcmp.eq.s32.totalorder %v11298_v12, %v8831_v31  ;;  %v11522_v23 = vld [vmem:[#allocation207_spill] sm:$0xff] }
 0x291   :  { %v8794_v3 = vsel %vm547_vm8, %v11502_v40, 0.0  ;;  %11506 = vst [vmem:[#allocation74_spill] sm:$0xff] %v8800_v36  ;;  %v11509_v50 = vld [vmem:[#allocation128_spill] sm:$0xff]  ;;  %v11512_v40 = vld [vmem:[#allocation205_spill] sm:$0xff]  ;;  %vm11513_vm8 = vcmp.eq.s32.totalorder %v11423_v22, %v8275_v30  ;;  %v8822_v21 = vsel %vm608_vm7, %v11515_v44, 0.0  ;;  %v11517_v20 = vld [vmem:[#allocation138_spill] sm:$0xff]  ;;  %vm11523_vm13 = vcmp.eq.s32.totalorder %v11427_v19, %v8275_v30 }
 0x292   :  { %11503 = vst [vmem:[#allocation294_spill] sm:$0xff] %v8794_v3  ;;  %v8816_v6 = vsel %vm11513_vm8, %v11512_v40, 0.0  ;;  %v8826_v36 = vsel %vm663_vm1, %v11517_v20, 0.0  ;;  %v11519_v62 = vld [vmem:[#allocation206_spill] sm:$0xff]  ;;  %v8851_v40 = vsel %vm11523_vm13, %v11522_v23, 0.0  ;;  %v11525_v44 = vld [vmem:[#allocation208_spill] sm:$0xff]  ;;  %vm11526_vm8 = vcmp.eq.s32.totalorder %v11428_v61, %v8275_v30 }
 0x293   :  { %11507 = vst [vmem:[#allocation362_spill] sm:$0xff] %v8802_v48  ;;  %v8845_v57 = vsel %vm11520_vm4, %v11519_v62, 0.0  ;;  %v8857_v20 = vsel %vm11526_vm8, %v11525_v44, 0.0  ;;  %v11528_v62 = vld [vmem:[#allocation209_spill] sm:$0xff]  ;;  %vm11529_vm13 = vcmp.eq.s32.totalorder %v11434_v42, %v8275_v30  ;;  %vm11532_vm8 = vcmp.eq.s32.totalorder %v11435_v1, %v8275_v30  ;;  %v11601_v3 = vld [vmem:[#allocation267_spill] sm:$0xff] }
 0x294   :  { %11511 = vst [vmem:[#allocation158_spill] sm:$0xff] %v8810_v54  ;;  %v8869_v23 = vsel %vm11529_vm13, %v11528_v62, 0.0  ;;  %vm11535_vm7 = vcmp.eq.s32.totalorder %v11436_v38, %v8275_v30  ;;  %vm616_vm13 = vcmp.eq.s32.totalorder %v11348_v26, %v8831_v31  ;;  %vm11546_vm6 = vcmp.eq.s32.totalorder %v11442_v27, %v8275_v30  ;;  %v11644_v12 = vld [vmem:[#allocation319_spill] sm:$0xff]  ;;  %v11665_v26 = vld [vmem:[#allocation326_spill] sm:$0xff] }
 0x295   :  { %11514 = vst [vmem:[#allocation183_spill] sm:$0xff] %v8816_v6  ;;  %vm620_vm4 = vcmp.eq.s32.totalorder %v11383_v18, %v8831_v31 }
 0x296   :  { %11516 = vst [vmem:[#allocation295_spill] sm:$0xff] %v8822_v21  ;;  %v3005_v21 = vadd.f32 %v3004_v28, %v3003_v56  ;;  %v11534_v28 = vld [vmem:[#allocation211_spill] sm:$0xff] }
 0x297   :  { %11518 = vst [vmem:[#allocation75_spill] sm:$0xff] %v8826_v36  ;;  %v8881_v44 = vsel %vm11535_vm7, %v11534_v28, 0.0  ;;  %vm11540_vm7 = vcmp.eq.s32.totalorder %v11440_v25, %v8275_v30  ;;  %v11579_v36 = vld [vmem:[#allocation258_spill] sm:$0xff] }
 0x298   :  { %11521 = vst [vmem:[#allocation159_spill] sm:$0xff] %v8845_v57 }
 0x299   :  { %11524 = vst [vmem:[#allocation184_spill] sm:$0xff] %v8851_v40  ;;  %v11531_v40 = vld [vmem:[#allocation210_spill] sm:$0xff] }
 0x29a   :  { %11527 = vst [vmem:[#allocation296_spill] sm:$0xff] %v8857_v20  ;;  %v8875_v56 = vsel %vm11532_vm8, %v11531_v40, 0.0  ;;  %v11537_v20 = vld [vmem:[#allocation212_spill] sm:$0xff]  ;;  %v11539_v40 = vld [vmem:[#allocation213_spill] sm:$0xff]  ;;  %vm11566_vm8 = vcmp.eq.s32.totalorder %v11456_v39, %v8275_v30 }
 0x29b   :  { %11530 = vst [vmem:[#allocation76_spill] sm:$0xff] %v8869_v23  ;;  %v8887_v57 = vsel %vm503_vm11, %v11537_v20, 0.0  ;;  %v8901_v62 = vsel %vm11540_vm7, %v11539_v40, 0.0  ;;  %v11542_v20 = vld [vmem:[#allocation214_spill] sm:$0xff]  ;;  %vm11543_vm11 = vcmp.eq.s32.totalorder %v11441_v11, %v8275_v30  ;;  %v11550_v23 = vld [vmem:[#allocation241_spill] sm:$0xff]  ;;  %vm641_vm7 = vcmp.eq.s32.totalorder %v11456_v39, %v8831_v31 }
 0x29c   :  { %11533 = vst [vmem:[#allocation365_spill] sm:$0xff] %v8875_v56  ;;  %v8907_v28 = vsel %vm11543_vm11, %v11542_v20, 0.0  ;;  %v3006_v56 = vsel %vm663_vm1, %v2611_v0, 0.0  ;;  %vm11554_vm11 = vcmp.eq.s32.totalorder %v11451_v7, %v8275_v30  ;;  %v11557_v20 = vld [vmem:[#allocation105_spill] sm:$0xff] }
 0x29d   :  { %11536 = vst [vmem:[#allocation160_spill] sm:$0xff] %v8881_v44 }
 0x29e   :  { %11538 = vst [vmem:[#allocation185_spill] sm:$0xff] %v8887_v57  ;;  %v11545_v57 = vld [vmem:[#allocation215_spill] sm:$0xff] }
 0x29f   :  { %11541 = vst [vmem:[#allocation297_spill] sm:$0xff] %v8901_v62  ;;  %v8913_v44 = vsel %vm11546_vm6, %v11545_v57, 0.0  ;;  %v11548_v62 = vld [vmem:[#allocation240_spill] sm:$0xff]  ;;  %vm11551_vm6 = vcmp.eq.s32.totalorder %v11450_v5, %v8275_v30  ;;  %v11556_v57 = vld [vmem:[#allocation245_spill] sm:$0xff]  ;;  %v11602_v5 = vld [vmem:[#allocation119_spill] sm:$0xff] }
 0x2a0   :  { %11544 = vst [vmem:[#allocation77_spill] sm:$0xff] %v8907_v28  ;;  %v8926_v28 = vsel %vm507_vm12, %v11548_v62, 0.0  ;;  %v8932_v0 = vsel %vm11551_vm6, %v11550_v23, 0.0  ;;  %v8944_v40 = vsel %vm510_vm3, %v11556_v57, 0.0  ;;  %vm623_vm12 = vcmp.eq.s32.totalorder %v11411_v33, %v8831_v31  ;;  %v11565_v57 = vld [vmem:[#allocation252_spill] sm:$0xff]  ;;  %v11576_v62 = vld [vmem:[#allocation111_spill] sm:$0xff] }
 0x2a1   :  { %11547 = vst [vmem:[#allocation161_spill] sm:$0xff] %v8913_v44  ;;  %v11553_v44 = vld [vmem:[#allocation244_spill] sm:$0xff]  ;;  %vm11563_vm3 = vcmp.eq.s32.totalorder %v11455_v17, %v8275_v30  ;;  %v3008_v23 = vsel %vm663_vm1, %v8743_v9, 0.0  ;;  %vm11580_vm6 = vcmp.eq.s32.totalorder %v11465_v4, %v8275_v30  ;;  %v11684_v33 = vld [vmem:[#allocation333_spill] sm:$0xff] }
 0x2a2   :  { %11549 = vst [vmem:[#allocation186_spill] sm:$0xff] %v8926_v28  ;;  %v8938_v6 = vsel %vm11554_vm11, %v11553_v44, 0.0  ;;  %vm11560_vm11 = vcmp.eq.s32.totalorder %v11454_v58, %v8275_v30  ;;  %v11562_v28 = vld [vmem:[#allocation249_spill] sm:$0xff]  ;;  %v8970_v44 = vsel %vm11566_vm8, %v11565_v57, 0.0  ;;  %v11571_v57 = vld [vmem:[#allocation255_spill] sm:$0xff]  ;;  %v9002_v48 = vsel %vm11580_vm6, %v11579_v36, 0.0 }
 0x2a3   :  { %11552 = vst [vmem:[#allocation78_spill] sm:$0xff] %v8932_v0  ;;  %v11559_v0 = vld [vmem:[#allocation248_spill] sm:$0xff]  ;;  %vm11585_vm6 = vcmp.eq.s32.totalorder %v11471_v46, %v8275_v30  ;;  %v11587_v36 = vld [vmem:[#allocation262_spill] sm:$0xff] }
 0x2a4   :  { %11555 = vst [vmem:[#allocation366_spill] sm:$0xff] %v8938_v6  ;;  %v8958_v6 = vsel %vm11560_vm11, %v11559_v0, 0.0  ;;  %v11575_v0 = vld [vmem:[#allocation256_spill] sm:$0xff]  ;;  %vm631_vm11 = vcmp.eq.s32.totalorder %v11437_v49, %v8831_v31 }
 0x2a5   :  { %11558 = vst [vmem:[#allocation162_spill] sm:$0xff] %v8944_v40  ;;  %v8964_v40 = vsel %vm11563_vm3, %v11562_v28, 0.0  ;;  %vm11577_vm3 = vcmp.eq.s32.totalorder %v11576_v62, %v8275_v30 }
 0x2a6   :  { %11561 = vst [vmem:[#allocation187_spill] sm:$0xff] %v8958_v6  ;;  %v11568_v6 = vld [vmem:[#allocation253_spill] sm:$0xff]  ;;  %v8996_v54 = vsel %vm11577_vm3, %v11575_v0, 0.0  ;;  %vm11588_vm3 = vcmp.eq.s32.totalorder %v11472_v16, %v8275_v30 }
 0x2a7   :  { %11564 = vst [vmem:[#allocation79_spill] sm:$0xff] %v8964_v40  ;;  %v8984_v28 = vsel %vm514_vm10, %v11568_v6, 0.0  ;;  %vm630_vm10 = vcmp.eq.s32.totalorder %v11436_v38, %v8831_v31  ;;  %v9028_v0 = vsel %vm11588_vm3, %v11587_v36, 0.0  ;;  %v11594_v6 = vld [vmem:[#allocation117_spill] sm:$0xff]  ;;  %v11703_v38 = vld [vmem:[#allocation16_spill] sm:$0xff] }
 0x2a8   :  { %11567 = vst [vmem:[#allocation188_spill] sm:$0xff] %v8970_v44  ;;  %v11572_v44 = vld [vmem:[#allocation110_spill] sm:$0xff] }
 0x2a9   :  { %11570 = vst [vmem:[#allocation80_spill] sm:$0xff] %v8984_v28  ;;  %vm11573_vm8 = vcmp.eq.s32.totalorder %v11572_v44, %v8275_v30  ;;  %v11584_v28 = vld [vmem:[#allocation260_spill] sm:$0xff]  ;;  %v11622_v44 = vld [vmem:[#allocation126_spill] sm:$0xff] }
 0x2aa   :  { %v8990_v9 = vsel %vm11573_vm8, %v11571_v57, 0.0  ;;  %11578 = vst [vmem:[#allocation4_spill] sm:$0xff] %v8996_v54  ;;  %v3007_v57 = vadd.f32 %v3006_v56, %v3005_v21  ;;  %v11597_v56 = vld [vmem:[#allocation265_spill] sm:$0xff]  ;;  %vm11603_vm8 = vcmp.eq.s32.totalorder %v11602_v5, %v8275_v30 }
 0x2ab   :  { %11574 = vst [vmem:[#allocation367_spill] sm:$0xff] %v8990_v9  ;;  %v11582_v9 = vld [vmem:[#allocation259_spill] sm:$0xff]  ;;  %v9058_v10 = vsel %vm11603_vm8, %v11601_v3, 0.0  ;;  %vm11608_vm8 = vcmp.eq.s32.totalorder %v11487_v53, %v8275_v30  ;;  %v11610_v3 = vld [vmem:[#allocation270_spill] sm:$0xff] }
 0x2ac   :  { %11581 = vst [vmem:[#allocation189_spill] sm:$0xff] %v9002_v48  ;;  %v9016_v54 = vsel %vm518_vm2, %v11582_v9, 0.0  ;;  %v9022_v48 = vsel %vm11585_vm6, %v11584_v28, 0.0  ;;  %v11591_v9 = vld [vmem:[#allocation116_spill] sm:$0xff]  ;;  %vm11595_vm6 = vcmp.eq.s32.totalorder %v11594_v6, %v8275_v30  ;;  %vm638_vm2 = vcmp.eq.s32.totalorder %v11557_v20, %v8831_v31 }
 0x2ad   :  { %11583 = vst [vmem:[#allocation298_spill] sm:$0xff] %v9016_v54  ;;  %v11590_v54 = vld [vmem:[#allocation263_spill] sm:$0xff]  ;;  %v11593_v28 = vld [vmem:[#allocation264_spill] sm:$0xff] }
 0x2ae   :  { %11586 = vst [vmem:[#allocation371_spill] sm:$0xff] %v9022_v48  ;;  %v9040_v48 = vsel %vm521_vm5, %v11590_v54, 0.0  ;;  %v9046_v21 = vsel %vm11595_vm6, %v11593_v28, 0.0  ;;  %vm637_vm5 = vcmp.eq.s32.totalorder %v11451_v7, %v8831_v31  ;;  %v3010_v28 = vsel %vm663_vm1, %v8749_v52, 0.0  ;;  %v11621_v54 = vld [vmem:[#allocation275_spill] sm:$0xff]  ;;  %v11726_v7 = vld [vmem:[#allocation18_spill] sm:$0xff] }
 0x2af   :  { %11589 = vst [vmem:[#allocation81_spill] sm:$0xff] %v9028_v0  ;;  %v11598_v0 = vld [vmem:[#allocation118_spill] sm:$0xff]  ;;  %vm11632_vm6 = vcmp.eq.s32.totalorder %v11510_v37, %v8275_v30 }
 0x2b0   :  { %11592 = vst [vmem:[#allocation190_spill] sm:$0xff] %v9040_v48  ;;  %vm11599_vm3 = vcmp.eq.s32.totalorder %v11598_v0, %v8275_v30  ;;  %v11607_v48 = vld [vmem:[#allocation269_spill] sm:$0xff] }
 0x2b1   :  { %11596 = vst [vmem:[#allocation299_spill] sm:$0xff] %v9046_v21  ;;  %v9052_v36 = vsel %vm11599_vm3, %v11597_v56, 0.0  ;;  %v11605_v21 = vld [vmem:[#allocation268_spill] sm:$0xff]  ;;  %vm11611_vm3 = vcmp.eq.s32.totalorder %v11488_v51, %v8275_v30 }
 0x2b2   :  { %11600 = vst [vmem:[#allocation374_spill] sm:$0xff] %v9052_v36  ;;  %v9072_v36 = vsel %vm525_vm14, %v11605_v21, 0.0  ;;  %v9084_v56 = vsel %vm11611_vm3, %v11610_v3, 0.0  ;;  %v11615_v3 = vld [vmem:[#allocation273_spill] sm:$0xff]  ;;  %vm11623_vm3 = vcmp.eq.s32.totalorder %v11622_v44, %v8275_v30  ;;  %vm662_vm14 = vcmp.eq.s32.totalorder %v11510_v37, %v8831_v31  ;;  %v11801_v37 = vld [vmem:[#allocation158_spill] sm:$0xff] }
 0x2b3   :  { %11604 = vst [vmem:[#allocation82_spill] sm:$0xff] %v9058_v10  ;;  %v9078_v10 = vsel %vm11608_vm8, %v11607_v48, 0.0  ;;  %v9104_v52 = vsel %vm529_vm15, %v11615_v3, 0.0  ;;  %v11618_v48 = vld [vmem:[#allocation125_spill] sm:$0xff]  ;;  %v9116_v40 = vsel %vm11623_vm3, %v11621_v54, 0.0  ;;  %vm11629_vm3 = vcmp.eq.s32.totalorder %v11509_v50, %v8275_v30 }
 0x2b4   :  { %11606 = vst [vmem:[#allocation370_spill] sm:$0xff] %v9072_v36  ;;  %v11613_v36 = vld [vmem:[#allocation271_spill] sm:$0xff]  ;;  %vm11619_vm8 = vcmp.eq.s32.totalorder %v11618_v48, %v8275_v30  ;;  %v11628_v54 = vld [vmem:[#allocation277_spill] sm:$0xff]  ;;  %v3009_v3 = vadd.f32 %v3008_v23, %v3007_v57  ;;  %vm11642_vm15 = vcmp.eq.s32.totalorder %v11320_v8, %v8831_v31 }
 0x2b5   :  { %11609 = vst [vmem:[#allocation5_spill] sm:$0xff] %v9078_v10  ;;  %v9098_v10 = vsel %vm528_vm0, %v11613_v36, 0.0  ;;  %vm644_vm0 = vcmp.eq.s32.totalorder %v11576_v62, %v8831_v31  ;;  %v11638_v57 = vld [vmem:[#allocation317_spill] sm:$0xff]  ;;  %v11712_v36 = vld [vmem:[#allocation103_spill] sm:$0xff] }
 0x2b6   :  { %11612 = vst [vmem:[#allocation191_spill] sm:$0xff] %v9084_v56  ;;  %v11617_v56 = vld [vmem:[#allocation274_spill] sm:$0xff]  ;;  %v11749_v62 = vld [vmem:[#allocation19_spill] sm:$0xff] }
 0x2b7   :  { %11614 = vst [vmem:[#allocation300_spill] sm:$0xff] %v9098_v10  ;;  %v9110_v21 = vsel %vm11619_vm8, %v11617_v56, 0.0  ;;  %vm11626_vm8 = vcmp.eq.s32.totalorder %v11508_v63, %v8275_v30  ;;  %v11631_v56 = vld [vmem:[#allocation278_spill] sm:$0xff] }
 0x2b8   :  { %11616 = vst [vmem:[#allocation42_spill] sm:$0xff] %v9104_v52  ;;  %v11625_v52 = vld [vmem:[#allocation276_spill] sm:$0xff]  ;;  %v9142_v10 = vsel %vm11632_vm6, %v11631_v56, 0.0  ;;  %vm11636_vm6 = vcmp.eq.s32.totalorder %v11306_v43, %v8831_v31  ;;  %v11641_v56 = vld [vmem:[#allocation318_spill] sm:$0xff] }
 0x2b9   :  { %11620 = vst [vmem:[#allocation83_spill] sm:$0xff] %v9110_v21  ;;  %v9130_v21 = vsel %vm11626_vm8, %v11625_v52, 0.0  ;;  %v11634_v52 = vld [vmem:[#allocation315_spill] sm:$0xff]  ;;  %v11647_v43 = vld [vmem:[#allocation320_spill] sm:$0xff]  ;;  %vm11651_vm8 = vcmp.eq.s32.totalorder %v11340_v14, %v8831_v31 }
 0x2ba   :  { %11624 = vst [vmem:[#allocation40_spill] sm:$0xff] %v9116_v40  ;;  %v9136_v40 = vsel %vm11629_vm3, %v11628_v54, 0.0  ;;  %v9154_v54 = vsel %vm609_vm9, %v11634_v52, 0.0  ;;  %vm11639_vm3 = vcmp.eq.s32.totalorder %v11313_v34, %v8831_v31  ;;  %vm651_vm9 = vcmp.eq.s32.totalorder %v11598_v0, %v8831_v31  ;;  %v11653_v52 = vld [vmem:[#allocation157_spill] sm:$0xff]  ;;  %v11656_v14 = vld [vmem:[#allocation323_spill] sm:$0xff]  ;;  %v11770_v0 = vld [vmem:[#allocation20_spill] sm:$0xff] }
 0x2bb   :  { %11627 = vst [vmem:[#allocation192_spill] sm:$0xff] %v9130_v21  ;;  %v9166_v23 = vsel %vm11639_vm3, %v11638_v57, 0.0  ;;  %vm11645_vm3 = vcmp.eq.s32.totalorder %v11325_v24, %v8831_v31  ;;  %v3012_v57 = vsel %vm663_vm1, %v11653_v52, 0.0  ;;  %v11654_v24 = vld [vmem:[#allocation322_spill] sm:$0xff]  ;;  %v11662_v21 = vld [vmem:[#allocation325_spill] sm:$0xff] }
 0x2bc   :  { %11630 = vst [vmem:[#allocation301_spill] sm:$0xff] %v9136_v40  ;;  %v11635_v40 = vld [vmem:[#allocation316_spill] sm:$0xff]  ;;  %v9186_v34 = vsel %vm11645_vm3, %v11644_v12, 0.0  ;;  %vm659_vm3 = vcmp.eq.s32.totalorder %v11622_v44, %v8831_v31 }
 0x2bd   :  { %11633 = vst [vmem:[#allocation377_spill] sm:$0xff] %v9142_v10  ;;  %v9160_v30 = vsel %vm11636_vm6, %v11635_v40, 0.0  ;;  %v9172_v10 = vsel %vm11642_vm15, %v11641_v56, 0.0  ;;  %vm11648_vm15 = vcmp.eq.s32.totalorder %v11333_v41, %v8831_v31  ;;  %v11650_v40 = vld [vmem:[#allocation321_spill] sm:$0xff]  ;;  %v9212_v41 = vsel %vm616_vm13, %v11654_v24, 0.0 }
 0x2be   :  { %11637 = vst [vmem:[#allocation84_spill] sm:$0xff] %v9160_v30  ;;  %v9192_v8 = vsel %vm11648_vm15, %v11647_v43, 0.0  ;;  %v9198_v56 = vsel %vm11651_vm8, %v11650_v40, 0.0  ;;  %vm11657_vm8 = vcmp.eq.s32.totalorder %v11357_v32, %v8831_v31  ;;  %v11659_v43 = vld [vmem:[#allocation324_spill] sm:$0xff]  ;;  %vm11660_vm15 = vcmp.eq.s32.totalorder %v11367_v60, %v8831_v31  ;;  %v11667_v60 = vld [vmem:[#allocation327_spill] sm:$0xff] }
 0x2bf   :  { %11640 = vst [vmem:[#allocation216_spill] sm:$0xff] %v9166_v23  ;;  %v9218_v12 = vsel %vm11657_vm8, %v11656_v14, 0.0  ;;  %v9224_v52 = vsel %vm11660_vm15, %v11659_v43, 0.0  ;;  %vm11663_vm6 = vcmp.eq.s32.totalorder %v11373_v47, %v8831_v31  ;;  %vm658_vm13 = vcmp.eq.s32.totalorder %v11618_v48, %v8831_v31  ;;  %v11738_v30 = vld [vmem:[#allocation355_spill] sm:$0xff]  ;;  %v11790_v48 = vld [vmem:[#allocation21_spill] sm:$0xff] }
 0x2c0   :  { %11643 = vst [vmem:[#allocation217_spill] sm:$0xff] %v9172_v10  ;;  %vm660_vm8 = vcmp.eq.s32.totalorder %v11508_v63, %v8831_v31  ;;  %v9244_v32 = vsel %vm620_vm4, %v11665_v26, 0.0  ;;  %vm11671_vm15 = vcmp.eq.s32.totalorder %v11401_v55, %v8831_v31  ;;  %vm11676_vm4 = vcmp.eq.s32.totalorder %v11423_v22, %v8831_v31  ;;  %v11687_v22 = vld [vmem:[#allocation334_spill] sm:$0xff] }
 0x2c1   :  { %11646 = vst [vmem:[#allocation6_spill] sm:$0xff] %v9186_v34  ;;  %v11716_v34 = vld [vmem:[#allocation344_spill] sm:$0xff]  ;;  %v11734_v10 = vld [vmem:[#allocation110_spill] sm:$0xff]  ;;  %v9400_v39 = vsel %vm644_vm0, %v11738_v30, 0.0  ;;  %vm552_vm0 = vcmp.eq.s32.totalorder %v11749_v62, %v8831_v31  ;;  %v1858_v44 = vmul.f32 1.442695, %v11650_v40 }
 0x2c2   :  { %11649 = vst [vmem:[#allocation193_spill] sm:$0xff] %v9192_v8  ;;  %v11715_v8 = vld [vmem:[#allocation17_spill] sm:$0xff]  ;;  %v11799_v40 = vld [vmem:[#allocation156_spill] sm:$0xff]  ;;  %v11819_v62 = vld [vmem:[#allocation234_spill] sm:$0xff] }
 0x2c3   :  { %11652 = vst [vmem:[#allocation302_spill] sm:$0xff] %v9198_v56  ;;  %v9230_v56 = vsel %vm11663_vm6, %v11662_v21, 0.0  ;;  %vm11668_vm6 = vcmp.eq.s32.totalorder %v11390_v35, %v8831_v31 }
 0x2c4   :  { %11655 = vst [vmem:[#allocation379_spill] sm:$0xff] %v9212_v41  ;;  %v9250_v47 = vsel %vm11668_vm6, %v11667_v60, 0.0  ;;  %v11673_v41 = vld [vmem:[#allocation329_spill] sm:$0xff]  ;;  %vm11679_vm6 = vcmp.eq.s32.totalorder %v11426_v15, %v8831_v31  ;;  %v11690_v15 = vld [vmem:[#allocation335_spill] sm:$0xff] }
 0x2c5   :  { %11658 = vst [vmem:[#allocation85_spill] sm:$0xff] %v9218_v12  ;;  %v3011_v12 = vadd.f32 %v3010_v28, %v3009_v3  ;;  %v9264_v18 = vsel %vm623_vm12, %v11673_v41, 0.0  ;;  %v11681_v3 = vld [vmem:[#allocation332_spill] sm:$0xff]  ;;  %vm11685_vm12 = vcmp.eq.s32.totalorder %v11428_v61, %v8831_v31 }
 0x2c6   :  { %11661 = vst [vmem:[#allocation382_spill] sm:$0xff] %v9224_v52 }
 0x2c7   :  { %11664 = vst [vmem:[#allocation194_spill] sm:$0xff] %v9230_v56  ;;  %v11670_v56 = vld [vmem:[#allocation328_spill] sm:$0xff] }
 0x2c8   :  { %11666 = vst [vmem:[#allocation303_spill] sm:$0xff] %v9244_v32  ;;  %v9256_v52 = vsel %vm11671_vm15, %v11670_v56, 0.0  ;;  %v11675_v32 = vld [vmem:[#allocation330_spill] sm:$0xff]  ;;  %vm11682_vm15 = vcmp.eq.s32.totalorder %v11427_v19, %v8831_v31  ;;  %v3014_v19 = vsel %vm663_vm1, %v8788_v13, 0.0 }
 0x2c9   :  { %11669 = vst [vmem:[#allocation86_spill] sm:$0xff] %v9250_v47  ;;  %v9270_v35 = vsel %vm11676_vm4, %v11675_v32, 0.0  ;;  %v11678_v47 = vld [vmem:[#allocation331_spill] sm:$0xff]  ;;  %v9282_v28 = vsel %vm11682_vm15, %v11681_v3, 0.0  ;;  %vm11688_vm4 = vcmp.eq.s32.totalorder %v11434_v42, %v8831_v31  ;;  %vm11698_vm15 = vcmp.eq.s32.totalorder %v11440_v25, %v8831_v31 }
 0x2ca   :  { %11672 = vst [vmem:[#allocation372_spill] sm:$0xff] %v9256_v52  ;;  %v9276_v55 = vsel %vm11679_vm6, %v11678_v47, 0.0  ;;  %vm11691_vm6 = vcmp.eq.s32.totalorder %v11435_v1, %v8831_v31  ;;  %v11708_v52 = vld [vmem:[#allocation102_spill] sm:$0xff] }
 0x2cb   :  { %11674 = vst [vmem:[#allocation218_spill] sm:$0xff] %v9264_v18  ;;  %v9288_v18 = vsel %vm11685_vm12, %v11684_v33, 0.0  ;;  %vm11701_vm12 = vcmp.eq.s32.totalorder %v11441_v11, %v8831_v31 }
 0x2cc   :  { %11677 = vst [vmem:[#allocation7_spill] sm:$0xff] %v9270_v35  ;;  %v9294_v35 = vsel %vm11688_vm4, %v11687_v22, 0.0  ;;  %vm11709_vm4 = vcmp.eq.s32.totalorder %v11708_v52, %v8831_v31 }
 0x2cd   :  { %11680 = vst [vmem:[#allocation195_spill] sm:$0xff] %v9276_v55  ;;  %v9300_v55 = vsel %vm11691_vm6, %v11690_v15, 0.0  ;;  %vm11713_vm6 = vcmp.eq.s32.totalorder %v11712_v36, %v8831_v31 }
 0x2ce   :  { %11683 = vst [vmem:[#allocation304_spill] sm:$0xff] %v9282_v28  ;;  %v11693_v28 = vld [vmem:[#allocation336_spill] sm:$0xff] }
 0x2cf   :  { %11686 = vst [vmem:[#allocation385_spill] sm:$0xff] %v9288_v18  ;;  %v9308_v61 = vsel %vm630_vm10, %v11693_v28, 0.0  ;;  %v11695_v18 = vld [vmem:[#allocation337_spill] sm:$0xff]  ;;  %vm549_vm10 = vcmp.eq.s32.totalorder %v11703_v38, %v8831_v31 }
 0x2d0   :  { %11689 = vst [vmem:[#allocation87_spill] sm:$0xff] %v9294_v35  ;;  %v9314_v42 = vsel %vm631_vm11, %v11695_v18, 0.0  ;;  %v11697_v35 = vld [vmem:[#allocation338_spill] sm:$0xff]  ;;  %vm11705_vm11 = vcmp.eq.s32.totalorder %v11442_v27, %v8831_v31  ;;  %v9354_v27 = vsel %vm637_vm5, %v11716_v34, 0.0  ;;  %vm551_vm5 = vcmp.eq.s32.totalorder %v11726_v7, %v8831_v31 }
 0x2d1   :  { %11692 = vst [vmem:[#allocation196_spill] sm:$0xff] %v9300_v55  ;;  %v9320_v1 = vsel %vm11698_vm15, %v11697_v35, 0.0  ;;  %v11700_v55 = vld [vmem:[#allocation339_spill] sm:$0xff]  ;;  %vm550_vm15 = vcmp.eq.s32.totalorder %v11715_v8, %v8831_v31 }
 0x2d2   :  { %11694 = vst [vmem:[#allocation305_spill] sm:$0xff] %v9308_v61  ;;  %v9326_v13 = vsel %vm11701_vm12, %v11700_v55, 0.0  ;;  %v11704_v61 = vld [vmem:[#allocation340_spill] sm:$0xff]  ;;  %vm11721_vm12 = vcmp.eq.s32.totalorder %v11454_v58, %v8831_v31 }
 0x2d3   :  { %11696 = vst [vmem:[#allocation130_spill] sm:$0xff] %v9314_v42  ;;  %v9334_v49 = vsel %vm11705_vm11, %v11704_v61, 0.0  ;;  %v11707_v42 = vld [vmem:[#allocation341_spill] sm:$0xff]  ;;  %vm11724_vm11 = vcmp.eq.s32.totalorder %v11455_v17, %v8831_v31 }
 0x2d4   :  { %11699 = vst [vmem:[#allocation88_spill] sm:$0xff] %v9320_v1  ;;  %v9340_v25 = vsel %vm11709_vm4, %v11707_v42, 0.0  ;;  %v11711_v1 = vld [vmem:[#allocation342_spill] sm:$0xff]  ;;  %vm11735_vm4 = vcmp.eq.s32.totalorder %v11734_v10, %v8831_v31 }
 0x2d5   :  { %11702 = vst [vmem:[#allocation375_spill] sm:$0xff] %v9326_v13  ;;  %v9346_v11 = vsel %vm11713_vm6, %v11711_v1, 0.0  ;;  %v3013_v13 = vadd.f32 %v3012_v57, %v3011_v12  ;;  %v11723_v57 = vld [vmem:[#allocation348_spill] sm:$0xff]  ;;  %vm11744_vm6 = vcmp.eq.s32.totalorder %v11470_v29, %v8831_v31 }
 0x2d6   :  { %11706 = vst [vmem:[#allocation219_spill] sm:$0xff] %v9334_v49  ;;  %v11718_v49 = vld [vmem:[#allocation345_spill] sm:$0xff]  ;;  %v9372_v12 = vsel %vm11724_vm11, %v11723_v57, 0.0  ;;  %vm11751_vm11 = vcmp.eq.s32.totalorder %v11472_v16, %v8831_v31 }
 0x2d7   :  { %11710 = vst [vmem:[#allocation8_spill] sm:$0xff] %v9340_v25  ;;  %v9360_v52 = vsel %vm638_vm2, %v11718_v49, 0.0  ;;  %v11720_v25 = vld [vmem:[#allocation346_spill] sm:$0xff] }
 0x2d8   :  { %11714 = vst [vmem:[#allocation9_spill] sm:$0xff] %v9346_v11  ;;  %v9366_v36 = vsel %vm11721_vm12, %v11720_v25, 0.0  ;;  %v11730_v11 = vld [vmem:[#allocation109_spill] sm:$0xff]  ;;  %vm11747_vm12 = vcmp.eq.s32.totalorder %v11471_v46, %v8831_v31 }
 0x2d9   :  { %11717 = vst [vmem:[#allocation197_spill] sm:$0xff] %v9354_v27  ;;  %v11727_v27 = vld [vmem:[#allocation351_spill] sm:$0xff]  ;;  %vm11731_vm2 = vcmp.eq.s32.totalorder %v11730_v11, %v8831_v31 }
 0x2da   :  { %11719 = vst [vmem:[#allocation306_spill] sm:$0xff] %v9360_v52  ;;  %v9380_v20 = vsel %vm641_vm7, %v11727_v27, 0.0  ;;  %v11729_v52 = vld [vmem:[#allocation352_spill] sm:$0xff]  ;;  %vm11741_vm7 = vcmp.eq.s32.totalorder %v11465_v4, %v8831_v31 }
 0x2db   :  { %11722 = vst [vmem:[#allocation131_spill] sm:$0xff] %v9366_v36  ;;  %v9386_v58 = vsel %vm11731_vm2, %v11729_v52, 0.0  ;;  %v11733_v36 = vld [vmem:[#allocation353_spill] sm:$0xff]  ;;  %vm11754_vm2 = vcmp.eq.s32.totalorder %v11591_v9, %v8831_v31 }
 0x2dc   :  { %11725 = vst [vmem:[#allocation89_spill] sm:$0xff] %v9372_v12  ;;  %v9392_v17 = vsel %vm11735_vm4, %v11733_v36, 0.0  ;;  %v11737_v12 = vld [vmem:[#allocation294_spill] sm:$0xff]  ;;  %vm11757_vm4 = vcmp.eq.s32.totalorder %v11594_v6, %v8831_v31 }
 0x2dd   :  { %11728 = vst [vmem:[#allocation2_spill] sm:$0xff] %v9380_v20  ;;  %v3016_v23 = vsel %vm663_vm1, %v11737_v12, 0.0  ;;  %v11740_v20 = vld [vmem:[#allocation35_spill] sm:$0xff] }
 0x2de   :  { %11732 = vst [vmem:[#allocation10_spill] sm:$0xff] %v9386_v58  ;;  %v9406_v11 = vsel %vm11741_vm7, %v11740_v20, 0.0  ;;  %v11743_v58 = vld [vmem:[#allocation358_spill] sm:$0xff]  ;;  %vm11762_vm7 = vcmp.eq.s32.totalorder %v11602_v5, %v8831_v31 }
 0x2df   :  { %11736 = vst [vmem:[#allocation11_spill] sm:$0xff] %v9392_v17  ;;  %v9412_v10 = vsel %vm11744_vm6, %v11743_v58, 0.0  ;;  %v11746_v17 = vld [vmem:[#allocation359_spill] sm:$0xff]  ;;  %vm11765_vm6 = vcmp.eq.s32.totalorder %v11486_v45, %v8831_v31  ;;  %v11817_v58 = vld [vmem:[#allocation25_spill] sm:$0xff] }
 0x2e0   :  { %11739 = vst [vmem:[#allocation198_spill] sm:$0xff] %v9400_v39  ;;  %v9418_v12 = vsel %vm11747_vm12, %v11746_v17, 0.0  ;;  %v11750_v39 = vld [vmem:[#allocation36_spill] sm:$0xff]  ;;  %vm11768_vm12 = vcmp.eq.s32.totalorder %v11487_v53, %v8831_v31 }
 0x2e1   :  { %11742 = vst [vmem:[#allocation307_spill] sm:$0xff] %v9406_v11  ;;  %v9426_v4 = vsel %vm11751_vm11, %v11750_v39, 0.0  ;;  %v11753_v11 = vld [vmem:[#allocation37_spill] sm:$0xff]  ;;  %v11759_v17 = vld [vmem:[#allocation364_spill] sm:$0xff]  ;;  %vm11772_vm11 = vcmp.eq.s32.totalorder %v11488_v51, %v8831_v31 }
 0x2e2   :  { %11745 = vst [vmem:[#allocation49_spill] sm:$0xff] %v9412_v10  ;;  %v9432_v29 = vsel %vm11754_vm2, %v11753_v11, 0.0  ;;  %v11756_v10 = vld [vmem:[#allocation363_spill] sm:$0xff]  ;;  %v9444_v16 = vsel %vm651_vm9, %v11759_v17, 0.0  ;;  %vm553_vm9 = vcmp.eq.s32.totalorder %v11770_v0, %v8831_v31  ;;  %vm11775_vm2 = vcmp.eq.s32.totalorder %v11497_v2, %v8831_v31  ;;  %v11815_v39 = vld [vmem:[#allocation233_spill] sm:$0xff] }
 0x2e3   :  { %11748 = vst [vmem:[#allocation90_spill] sm:$0xff] %v9418_v12  ;;  %v9438_v46 = vsel %vm11757_vm4, %v11756_v10, 0.0  ;;  %v3015_v12 = vadd.f32 %v3014_v19, %v3013_v13  ;;  %v11771_v13 = vld [vmem:[#allocation369_spill] sm:$0xff]  ;;  %vm11778_vm4 = vcmp.eq.s32.totalorder %v11498_v59, %v8831_v31  ;;  %v11807_v17 = vld [vmem:[#allocation55_spill] sm:$0xff]  ;;  %v2621_v7 = vsel %vm552_vm0, %v11815_v39, 0.0 }
 0x2e4   :  { %11752 = vst [vmem:[#allocation12_spill] sm:$0xff] %v9426_v4  ;;  %v11761_v4 = vld [vmem:[#allocation38_spill] sm:$0xff]  ;;  %v9470_v5 = vsel %vm11772_vm11, %v11771_v13, 0.0  ;;  %v2622_v39 = vsel %vm553_vm9, %v11819_v62, 0.0 }
 0x2e5   :  { %11755 = vst [vmem:[#allocation3_spill] sm:$0xff] %v9432_v29  ;;  %v9450_v9 = vsel %vm11762_vm7, %v11761_v4, 0.0  ;;  %v11764_v29 = vld [vmem:[#allocation39_spill] sm:$0xff]  ;;  %vm11788_vm7 = vcmp.eq.s32.totalorder %v11509_v50, %v8831_v31  ;;  %v1860_v50 = vmul.f32 1.442695, %v11654_v24  ;;  %v11803_v4 = vld [vmem:[#allocation74_spill] sm:$0xff] }
 0x2e6   :  { %11758 = vst [vmem:[#allocation220_spill] sm:$0xff] %v9438_v46  ;;  %v9456_v6 = vsel %vm11765_vm6, %v11764_v29, 0.0  ;;  %v11767_v46 = vld [vmem:[#allocation368_spill] sm:$0xff] }
 0x2e7   :  { %11760 = vst [vmem:[#allocation13_spill] sm:$0xff] %v9444_v16  ;;  %v9462_v19 = vsel %vm11768_vm12, %v11767_v46, 0.0  ;;  %v11781_v46 = vld [vmem:[#allocation43_spill] sm:$0xff] }
 0x2e8   :  { %11763 = vst [vmem:[#allocation14_spill] sm:$0xff] %v9450_v9  ;;  %v11774_v9 = vld [vmem:[#allocation41_spill] sm:$0xff]  ;;  %v9490_v51 = vsel %vm658_vm13, %v11781_v46, 0.0  ;;  %vm554_vm13 = vcmp.eq.s32.totalorder %v11790_v48, %v8831_v31  ;;  %v11796_v46 = vld [vmem:[#allocation175_spill] sm:$0xff] }
 0x2e9   :  { %11766 = vst [vmem:[#allocation15_spill] sm:$0xff] %v9456_v6  ;;  %v9476_v45 = vsel %vm11775_vm2, %v11774_v9, 0.0  ;;  %v11777_v6 = vld [vmem:[#allocation373_spill] sm:$0xff]  ;;  %v11800_v9 = vld [vmem:[#allocation179_spill] sm:$0xff] }
 0x2ea   :  { %11769 = vst [vmem:[#allocation199_spill] sm:$0xff] %v9462_v19  ;;  %v9482_v53 = vsel %vm11778_vm4, %v11777_v6, 0.0  ;;  %v11780_v19 = vld [vmem:[#allocation52_spill] sm:$0xff]  ;;  %v3017_v6 = vadd.f32 %v3016_v23, %v3015_v12  ;;  %v2120_v13 = vadd.f32 %v11800_v9, %v11799_v40  ;;  %v11806_v23 = vld [vmem:[#allocation230_spill] sm:$0xff]  ;;  %v2833_v9 = vsel %vm663_vm1, %v11807_v17, 0.0 }
 0x2eb   :  { %11773 = vst [vmem:[#allocation308_spill] sm:$0xff] %v9470_v5  ;;  %v2829_v16 = vsel %vm663_vm1, %v11780_v19, 0.0  ;;  %v11783_v5 = vld [vmem:[#allocation376_spill] sm:$0xff]  ;;  %v2618_v12 = vsel %vm549_vm10, %v11806_v23, 0.0  ;;  %vm558_vm10 = vcmp.eq.s32.totalorder %v11817_v58, %v8831_v31 }
 0x2ec   :  { %11776 = vst [vmem:[#allocation135_spill] sm:$0xff] %v9476_v45  ;;  %v9496_v2 = vsel %vm659_vm3, %v11783_v5, 0.0  ;;  %v11785_v45 = vld [vmem:[#allocation45_spill] sm:$0xff]  ;;  %v11813_v23 = vld [vmem:[#allocation56_spill] sm:$0xff] }
 0x2ed   :  { %11779 = vst [vmem:[#allocation91_spill] sm:$0xff] %v9482_v53  ;;  %v9502_v59 = vsel %vm660_vm8, %v11785_v45, 0.0  ;;  %v11787_v53 = vld [vmem:[#allocation381_spill] sm:$0xff]  ;;  %v11795_v45 = vld [vmem:[#allocation75_spill] sm:$0xff] }
 0x2ee   :  { %11782 = vst [vmem:[#allocation378_spill] sm:$0xff] %v9490_v51  ;;  %v9508_v19 = vsel %vm11788_vm7, %v11787_v53, 0.0  ;;  %v11791_v51 = vld [vmem:[#allocation47_spill] sm:$0xff]  ;;  %vm12062_vm7 = vcmask 122880  }
 0x2ef   :  { %11784 = vst [vmem:[#allocation92_spill] sm:$0xff] %v9496_v2  ;;  %3620 = vpow2.f32 %v11791_v51  ;;  %v11792_v2 = vld [vmem:[#allocation46_spill] sm:$0xff] }
 0x2f0   :  { %11786 = vst [vmem:[#allocation93_spill] sm:$0xff] %v9502_v59  ;;  %v9518_v63 = vsel %vm662_vm14, %v11792_v2, 0.0  ;;  %v11794_v59 = vld [vmem:[#allocation362_spill] sm:$0xff]  ;;  %3622 = vpow2.f32 %v11796_v46  ;;  %v11802_v2 = vld [vmem:[#allocation292_spill] sm:$0xff] }
 0x2f1   :  { %11789 = vst [vmem:[#allocation94_spill] sm:$0xff] %v9508_v19  ;;  %v2828_v5 = vadd.f32 %v11795_v45, %v11794_v59  ;;  %v11797_v19 = vld [vmem:[#allocation54_spill] sm:$0xff]  ;;  %v3018_v45 = vsel %vm663_vm1, %v11803_v4, 0.0  ;;  %v11804_v46 = vld [vmem:[#allocation44_spill] sm:$0xff]  ;;  %v11805_v59 = vld [vmem:[#allocation69_spill] sm:$0xff]  ;;  %3624 = vpow2.f32 %v1858_v44  ;;  %v2835_v44 = vsel %vm663_vm1, %v11813_v23, 0.0 }
 0x2f2   :  { %11793 = vst [vmem:[#allocation200_spill] sm:$0xff] %v9518_v63  ;;  %v2831_v53 = vsel %vm663_vm1, %v11797_v19, 0.0  ;;  %v11798_v51 = vld [vmem:[#allocation22_spill] sm:$0xff]  ;;  %v2367_v63 = vadd.f32 %v11802_v2, %v11801_v37  ;;  %v2121_v24 = vsel %vm663_vm1, %v11804_v46, 0.0  ;;  %v2368_v19 = vsel %vm663_vm1, %v11805_v59, 0.0  ;;  %v11808_v2 = vld [vmem:[#allocation23_spill] sm:$0xff] }
 0x2f3   :  { %vm555_vm3 = vcmp.eq.s32.totalorder %v11798_v51, %v8831_v31  ;;  %v2830_v29 = vadd.f32 %v2829_v16, %v2828_v5  ;;  %vm556_vm14 = vcmp.eq.s32.totalorder %v11808_v2, %v8831_v31  ;;  %v11809_v16 = vld [vmem:[#allocation380_spill] sm:$0xff]  ;;  %v11810_v5 = vld [vmem:[#allocation231_spill] sm:$0xff]  ;;  %v11811_v46 = vld [vmem:[#allocation70_spill] sm:$0xff]  ;;  %v3019_v10 = vadd.f32 %v3018_v45, %v3017_v6 }
 0x2f4   :  { %v2123_v4 = vsel %vm663_vm1, %v11809_v16, 0.0  ;;  %v2619_v40 = vsel %vm550_vm15, %v11810_v5, 0.0  ;;  %v2370_v38 = vsel %vm663_vm1, %v11811_v46, 0.0  ;;  %v11812_v59 = vld [vmem:[#allocation232_spill] sm:$0xff]  ;;  %v2122_v8 = vadd.f32 %v2121_v24, %v2120_v13 }
 0x2f5   :  { %v2832_v37 = vadd.f32 %v2831_v53, %v2830_v29  ;;  %v2620_v17 = vsel %vm551_vm5, %v11812_v59, 0.0  ;;  %v9560_v11 = vpop.eup %3620  ;;  %v11814_v16 = vld [vmem:[#allocation24_spill] sm:$0xff]  ;;  %v2369_v5 = vadd.f32 %v2368_v19, %v2367_v63  ;;  %v3020_v53 = vsel %vm663_vm1, %v2618_v12, 0.0  ;;  %v11816_v59 = vld [vmem:[#allocation139_spill] sm:$0xff] }
 0x2f6   :  { %vm557_vm8 = vcmp.eq.s32.totalorder %v11814_v16, %v8831_v31  ;;  %v3623_v46 = vpop.eup %3622  ;;  %v2837_v23 = vsel %vm663_vm1, %v11816_v59, 0.0  ;;  %v3021_v6 = vadd.f32 %v3020_v53, %v3019_v10  ;;  %v3022_v45 = vsel %vm663_vm1, %v2619_v40, 0.0  ;;  %v11818_v19 = vld [vmem:[#allocation383_spill] sm:$0xff]  ;;  %v11820_v10 = vld [vmem:[#allocation266_spill] sm:$0xff] }
 0x2f7   :  { %v2834_v29 = vadd.f32 %v2833_v9, %v2832_v37  ;;  %3626 = vpow2.f32 %v1860_v50  ;;  %v1862_v13 = vmul.f32 1.442695, %v11656_v14  ;;  %v3024_v24 = vsel %vm663_vm1, %v2620_v17, 0.0  ;;  %v3625_v37 = vpop.eup %3624  ;;  %v11821_v50 = vld [vmem:[#allocation26_spill] sm:$0xff]  ;;  %v11822_v59 = vld [vmem:[#allocation235_spill] sm:$0xff] }
 0x2f8   :  { %v2125_v12 = vsel %vm663_vm1, %v11818_v19, 0.0  ;;  %v2839_v9 = vsel %vm663_vm1, %v11820_v10, 0.0  ;;  %v3023_v40 = vadd.f32 %v3022_v45, %v3021_v6  ;;  %vm559_vm15 = vcmp.eq.s32.totalorder %v11821_v50, %v8831_v31  ;;  %v11823_v19 = vld [vmem:[#allocation140_spill] sm:$0xff]  ;;  %v11824_v45 = vld [vmem:[#allocation27_spill] sm:$0xff] }
 0x2f9   :  { %v2836_v63 = vadd.f32 %v2835_v44, %v2834_v29  ;;  %v2124_v14 = vadd.f32 %v2123_v4, %v2122_v8  ;;  %v2371_v44 = vadd.f32 %v2370_v38, %v2369_v5  ;;  %v3026_v17 = vsel %vm663_vm1, %v2621_v7, 0.0  ;;  %v11825_v5 = vld [vmem:[#allocation384_spill] sm:$0xff] }
 0x2fa   :  { %v2372_v53 = vsel %vm663_vm1, %v3623_v46, 0.0  ;;  %v2623_v0 = vsel %vm554_vm13, %v11822_v59, 0.0  ;;  %v2841_v62 = vsel %vm663_vm1, %v11823_v19, 0.0  ;;  %v3025_v6 = vadd.f32 %v3024_v24, %v3023_v40  ;;  %v11826_v7 = vld [vmem:[#allocation236_spill] sm:$0xff]  ;;  %v11829_v59 = vld [vmem:[#allocation237_spill] sm:$0xff]  ;;  %v11830_v19 = vld [vmem:[#allocation347_spill] sm:$0xff] }
 0x2fb   :  { %v2838_v29 = vadd.f32 %v2837_v23, %v2836_v63  ;;  %vm560_vm5 = vcmp.eq.s32.totalorder %v11824_v45, %v8831_v31  ;;  %3628 = vpow2.f32 %v1862_v13  ;;  %v1864_v4 = vmul.f32 1.442695, %v11659_v43  ;;  %v11827_v23 = vld [vmem:[#allocation272_spill] sm:$0xff]  ;;  %vm12069_vm13 = vmmov %vm12062_vm7 }
 0x2fc   :  { %v3028_v8 = vsel %vm663_vm1, %v2622_v39, 0.0  ;;  %v2127_v46 = vsel %vm663_vm1, %v11825_v5, 0.0  ;;  %v2624_v48 = vsel %vm555_vm3, %v11826_v7, 0.0  ;;  %v2843_v63 = vsel %vm663_vm1, %v11827_v23, 0.0  ;;  %v11828_v13 = vld [vmem:[#allocation28_spill] sm:$0xff] }
 0x2fd   :  { %v2840_v38 = vadd.f32 %v2839_v9, %v2838_v29  ;;  %v3027_v24 = vadd.f32 %v3026_v17, %v3025_v6  ;;  %v3627_v10 = vpop.eup %3626  ;;  %vm561_vm0 = vcmp.eq.s32.totalorder %v11828_v13, %v8831_v31  ;;  %v2126_v43 = vadd.f32 %v2125_v12, %v2124_v14  ;;  %v11831_v6 = vld [vmem:[#allocation29_spill] sm:$0xff] }
 0x2fe   :  { %v2373_v9 = vadd.f32 %v2372_v53, %v2371_v44  ;;  %v3030_v39 = vsel %vm663_vm1, %v2623_v0, 0.0  ;;  %v2374_v29 = vsel %vm663_vm1, %v3625_v37, 0.0  ;;  %v2625_v51 = vsel %vm556_vm14, %v11829_v59, 0.0  ;;  %v11832_v53 = vld [vmem:[#allocation386_spill] sm:$0xff]  ;;  %v11837_v59 = vld [vmem:[#allocation59_spill] sm:$0xff] }
 0x2ff   :  { %v2842_v40 = vadd.f32 %v2841_v62, %v2840_v38  ;;  %v2845_v5 = vsel %vm663_vm1, %v11830_v19, 0.0  ;;  %v3029_v17 = vadd.f32 %v3028_v8, %v3027_v24  ;;  %vm562_vm6 = vcmp.eq.s32.totalorder %v11831_v6, %v8831_v31  ;;  %v11833_v0 = vld [vmem:[#allocation238_spill] sm:$0xff]  ;;  %v11834_v62 = vld [vmem:[#allocation167_spill] sm:$0xff]  ;;  %v11854_v6 = vld [vmem:[#allocation144_spill] sm:$0xff] }
 0x300   :  { %3630 = vpow2.f32 %v1864_v4  ;;  %v1866_v12 = vmul.f32 1.442695, %v11662_v21  ;;  %v3032_v44 = vsel %vm663_vm1, %v2624_v48, 0.0  ;;  %v2129_v37 = vsel %vm663_vm1, %v11832_v53, 0.0  ;;  %v11835_v4 = vld [vmem:[#allocation30_spill] sm:$0xff] }
 0x301   :  { %v2844_v14 = vadd.f32 %v2843_v63, %v2842_v40  ;;  %v2626_v2 = vsel %vm557_vm8, %v11833_v0, 0.0  ;;  %v2847_v38 = vsel %vm663_vm1, %v11834_v62, 0.0  ;;  %v3031_v8 = vadd.f32 %v3030_v39, %v3029_v17  ;;  %v3629_v7 = vpop.eup %3628  ;;  %v11836_v40 = vld [vmem:[#allocation239_spill] sm:$0xff] }
 0x302   :  { %vm563_vm12 = vcmp.eq.s32.totalorder %v11835_v4, %v8831_v31  ;;  %v2128_v21 = vadd.f32 %v2127_v46, %v2126_v43  ;;  %v2375_v23 = vadd.f32 %v2374_v29, %v2373_v9  ;;  %v3034_v48 = vsel %vm663_vm1, %v2625_v51, 0.0  ;;  %v11838_v17 = vld [vmem:[#allocation31_spill] sm:$0xff]  ;;  %v11839_v29 = vld [vmem:[#allocation389_spill] sm:$0xff]  ;;  %v11840_v51 = vld [vmem:[#allocation242_spill] sm:$0xff] }
 0x303   :  { %v2846_v63 = vadd.f32 %v2845_v5, %v2844_v14  ;;  %v2376_v24 = vsel %vm663_vm1, %v3627_v10, 0.0  ;;  %v2627_v16 = vsel %vm558_vm10, %v11836_v40, 0.0  ;;  %v2849_v19 = vsel %vm663_vm1, %v11837_v59, 0.0  ;;  %v11841_v5 = vld [vmem:[#allocation168_spill] sm:$0xff]  ;;  %v11845_v59 = vld [vmem:[#allocation33_spill] sm:$0xff] }
 0x304   :  { %v3033_v39 = vadd.f32 %v3032_v44, %v3031_v8  ;;  %vm564_vm9 = vcmp.eq.s32.totalorder %v11838_v17, %v8831_v31  ;;  %3632 = vpow2.f32 %v1866_v12  ;;  %v1868_v46 = vmul.f32 1.442695, %v11665_v26  ;;  %v11842_v12 = vld [vmem:[#allocation32_spill] sm:$0xff]  ;;  %v11843_v8 = vld [vmem:[#allocation243_spill] sm:$0xff]  ;;  %v11859_v17 = vld [vmem:[#allocation350_spill] sm:$0xff] }
 0x305   :  { %v2848_v43 = vadd.f32 %v2847_v38, %v2846_v63  ;;  %v3036_v9 = vsel %vm663_vm1, %v2626_v2, 0.0  ;;  %v2131_v10 = vsel %vm663_vm1, %v11839_v29, 0.0  ;;  %v2628_v58 = vsel %vm559_vm15, %v11840_v51, 0.0  ;;  %v11844_v63 = vld [vmem:[#allocation60_spill] sm:$0xff] }
 0x306   :  { %v2851_v14 = vsel %vm663_vm1, %v11841_v5, 0.0  ;;  %v3035_v44 = vadd.f32 %v3034_v48, %v3033_v39  ;;  %v3631_v53 = vpop.eup %3630  ;;  %vm565_vm11 = vcmp.eq.s32.totalorder %v11842_v12, %v8831_v31  ;;  %v2130_v26 = vadd.f32 %v2129_v37, %v2128_v21 }
 0x307   :  { %v2377_v0 = vadd.f32 %v2376_v24, %v2375_v23  ;;  %v2850_v62 = vadd.f32 %v2849_v19, %v2848_v43  ;;  %v3038_v2 = vsel %vm663_vm1, %v2627_v16, 0.0  ;;  %v2378_v38 = vsel %vm663_vm1, %v3629_v7, 0.0  ;;  %v11846_v24 = vld [vmem:[#allocation48_spill] sm:$0xff]  ;;  %v11847_v16 = vld [vmem:[#allocation246_spill] sm:$0xff]  ;;  %v11848_v19 = vld [vmem:[#allocation143_spill] sm:$0xff] }
 0x308   :  { %v2629_v50 = vsel %vm560_vm5, %v11843_v8, 0.0  ;;  %v2853_v40 = vsel %vm663_vm1, %v11844_v63, 0.0  ;;  %v3037_v48 = vadd.f32 %v3036_v9, %v3035_v44  ;;  %vm566_vm2 = vcmp.eq.s32.totalorder %v11845_v59, %v8831_v31  ;;  %v11851_v44 = vld [vmem:[#allocation281_spill] sm:$0xff] }
 0x309   :  { %3634 = vpow2.f32 %v1868_v46  ;;  %v1870_v37 = vmul.f32 1.442695, %v11667_v60  ;;  %v2852_v21 = vadd.f32 %v2851_v14, %v2850_v62  ;;  %v3040_v23 = vsel %vm663_vm1, %v2628_v58, 0.0  ;;  %v11849_v46 = vld [vmem:[#allocation34_spill] sm:$0xff]  ;;  %v11850_v14 = vld [vmem:[#allocation247_spill] sm:$0xff] }
 0x30a   :  { %v2133_v7 = vsel %vm663_vm1, %v11846_v24, 0.0  ;;  %v2630_v45 = vsel %vm561_vm0, %v11847_v16, 0.0  ;;  %v2855_v39 = vsel %vm663_vm1, %v11848_v19, 0.0  ;;  %v3039_v43 = vadd.f32 %v3038_v2, %v3037_v48  ;;  %v3633_v9 = vpop.eup %3632  ;;  %v11855_v16 = vld [vmem:[#allocation251_spill] sm:$0xff]  ;;  %v11856_v19 = vld [vmem:[#allocation282_spill] sm:$0xff] }
 0x30b   :  { %vm567_vm4 = vcmp.eq.s32.totalorder %v11849_v46, %v8831_v31  ;;  %v2132_v60 = vadd.f32 %v2131_v10, %v2130_v26  ;;  %v2379_v29 = vadd.f32 %v2378_v38, %v2377_v0  ;;  %v2854_v51 = vadd.f32 %v2853_v40, %v2852_v21  ;;  %v11852_v26 = vld [vmem:[#allocation132_spill] sm:$0xff]  ;;  %v11853_v38 = vld [vmem:[#allocation250_spill] sm:$0xff] }
 0x30c   :  { %v3042_v58 = vsel %vm663_vm1, %v2629_v50, 0.0  ;;  %v2380_v5 = vsel %vm663_vm1, %v3631_v53, 0.0  ;;  %v2631_v13 = vsel %vm562_vm6, %v11850_v14, 0.0  ;;  %v2857_v62 = vsel %vm663_vm1, %v11851_v44, 0.0  ;;  %v11867_v46 = vld [vmem:[#allocation388_spill] sm:$0xff] }
 0x30d   :  { %v3041_v2 = vadd.f32 %v3040_v23, %v3039_v43  ;;  %3636 = vpow2.f32 %v1870_v37  ;;  %v1872_v8 = vmul.f32 1.442695, %v11670_v56  ;;  %v2856_v63 = vadd.f32 %v2855_v39, %v2854_v51 }
 0x30e   :  { %v3044_v10 = vsel %vm663_vm1, %v2630_v45, 0.0  ;;  %v2135_v0 = vsel %vm663_vm1, %v11852_v26, 0.0  ;;  %v2632_v53 = vsel %vm563_vm12, %v11853_v38, 0.0  ;;  %v2859_v50 = vsel %vm663_vm1, %v11854_v6, 0.0  ;;  %v11861_v26 = vld [vmem:[#allocation171_spill] sm:$0xff] }
 0x30f   :  { %v3043_v40 = vadd.f32 %v3042_v58, %v3041_v2  ;;  %v3635_v48 = vpop.eup %3634  ;;  %v2134_v21 = vadd.f32 %v2133_v7, %v2132_v60  ;;  %v2381_v37 = vadd.f32 %v2380_v5, %v2379_v29  ;;  %v2858_v23 = vadd.f32 %v2857_v62, %v2856_v63  ;;  %v11857_v60 = vld [vmem:[#allocation133_spill] sm:$0xff]  ;;  %v11858_v58 = vld [vmem:[#allocation254_spill] sm:$0xff] }
 0x310   :  { %v3046_v56 = vsel %vm663_vm1, %v2631_v13, 0.0  ;;  %v2382_v24 = vsel %vm663_vm1, %v3633_v9, 0.0  ;;  %v2633_v45 = vsel %vm564_vm9, %v11855_v16, 0.0  ;;  %v2861_v4 = vsel %vm663_vm1, %v11856_v19, 0.0  ;;  %v11860_v63 = vld [vmem:[#allocation257_spill] sm:$0xff] }
 0x311   :  { %v3045_v39 = vadd.f32 %v3044_v10, %v3043_v40  ;;  %3638 = vpow2.f32 %v1872_v8  ;;  %v1874_v43 = vmul.f32 1.442695, %v11673_v41  ;;  %v2860_v51 = vadd.f32 %v2859_v50, %v2858_v23  ;;  %v11863_v40 = vld [vmem:[#allocation261_spill] sm:$0xff] }
 0x312   :  { %v3048_v7 = vsel %vm663_vm1, %v2632_v53, 0.0  ;;  %v2137_v29 = vsel %vm663_vm1, %v11857_v60, 0.0  ;;  %v2634_v9 = vsel %vm565_vm11, %v11858_v58, 0.0  ;;  %v2863_v5 = vsel %vm663_vm1, %v11859_v17, 0.0  ;;  %v11862_v53 = vld [vmem:[#allocation387_spill] sm:$0xff] }
 0x313   :  { %v3047_v14 = vadd.f32 %v3046_v56, %v3045_v39  ;;  %v3637_v13 = vpop.eup %3636  ;;  %v2136_v44 = vadd.f32 %v2135_v0, %v2134_v21  ;;  %v2383_v62 = vadd.f32 %v2382_v24, %v2381_v37  ;;  %v2862_v2 = vadd.f32 %v2861_v4, %v2860_v51  ;;  %v11864_v21 = vld [vmem:[#allocation63_spill] sm:$0xff]  ;;  %v11866_v39 = vld [vmem:[#allocation172_spill] sm:$0xff]  ;;  %v11868_v51 = vld [vmem:[#allocation213_spill] sm:$0xff] }
 0x314   :  { %v3050_v41 = vsel %vm663_vm1, %v2633_v45, 0.0  ;;  %v2384_v8 = vsel %vm663_vm1, %v3635_v48, 0.0  ;;  %v2635_v10 = vsel %vm566_vm2, %v11860_v63, 0.0  ;;  %v2865_v12 = vsel %vm663_vm1, %v11861_v26, 0.0  ;;  %v11871_v26 = vld [vmem:[#allocation147_spill] sm:$0xff] }
 0x315   :  { %v3049_v38 = vadd.f32 %v3048_v7, %v3047_v14  ;;  %3640 = vpow2.f32 %v11862_v53  ;;  %v1876_v6 = vmul.f32 1.442695, %v11675_v32  ;;  %v2864_v0 = vadd.f32 %v2863_v5, %v2862_v2  ;;  %v11865_v32 = vld [vmem:[#allocation134_spill] sm:$0xff]  ;;  %v11870_v2 = vld [vmem:[#allocation53_spill] sm:$0xff] }
 0x316   :  { %v3052_v50 = vsel %vm663_vm1, %v2634_v9, 0.0  ;;  %3642 = vpow2.f32 %v1874_v43  ;;  %v2636_v48 = vsel %vm567_vm4, %v11863_v40, 0.0  ;;  %v2867_v59 = vsel %vm663_vm1, %v11864_v21, 0.0  ;;  %v11869_v9 = vld [vmem:[#allocation64_spill] sm:$0xff] }
 0x317   :  { %v3051_v37 = vadd.f32 %v3050_v41, %v3049_v38  ;;  %v3639_v23 = vpop.eup %3638  ;;  %v2138_v56 = vadd.f32 %v2137_v29, %v2136_v44  ;;  %v2385_v24 = vadd.f32 %v2384_v8, %v2383_v62  ;;  %v2866_v16 = vadd.f32 %v2865_v12, %v2864_v0  ;;  %v11872_v38 = vld [vmem:[#allocation214_spill] sm:$0xff]  ;;  %v11873_v0 = vld [vmem:[#allocation163_spill] sm:$0xff] }
 0x318   :  { %v3054_v45 = vsel %vm663_vm1, %v2635_v10, 0.0  ;;  %v2139_v19 = vsel %vm663_vm1, %v11865_v32, 0.0  ;;  %v2386_v4 = vsel %vm663_vm1, %v3637_v13, 0.0  ;;  %v2869_v43 = vsel %vm663_vm1, %v11866_v39, 0.0 }
 0x319   :  { %v3053_v31 = vadd.f32 %v3052_v50, %v3051_v37  ;;  %3644 = vpow2.f32 %v11867_v46  ;;  %v1636_v7 = vmul.f32 1.442695, %v11868_v51  ;;  %v2868_v60 = vadd.f32 %v2867_v59, %v2866_v16  ;;  %v11878_v51 = vld [vmem:[#allocation343_spill] sm:$0xff] }
 0x31a   :  { %v3056_v29 = vsel %vm663_vm1, %v2636_v48, 0.0  ;;  %3646 = vpow2.f32 %v1876_v6  ;;  %v1878_v58 = vmul.f32 1.442695, %v11678_v47  ;;  %v2871_v17 = vsel %vm663_vm1, %v11869_v9, 0.0  ;;  %v11874_v48 = vld [vmem:[#allocation285_spill] sm:$0xff] }
 0x31b   :  { %v3055_v5 = vadd.f32 %v3054_v45, %v3053_v31  ;;  %v3641_v14 = vpop.eup %3640  ;;  %v2140_v13 = vadd.f32 %v2139_v19, %v2138_v56  ;;  %v2387_v44 = vadd.f32 %v2386_v4, %v2385_v24  ;;  %v2870_v62 = vadd.f32 %v2869_v43, %v2868_v60  ;;  %v11875_v24 = vld [vmem:[#allocation164_spill] sm:$0xff]  ;;  %v11877_v43 = vld [vmem:[#allocation215_spill] sm:$0xff] }
 0x31c   :  { %v3058_v41 = vsel %vm663_vm1, %v11870_v2, 0.0  ;;  %v3643_v8 = vpop.eup %3642  ;;  %v2141_v63 = vsel %vm663_vm1, %v9560_v11, 0.0  ;;  %v2388_v10 = vsel %vm663_vm1, %v3639_v23, 0.0  ;;  %v2873_v47 = vsel %vm663_vm1, %v11871_v26, 0.0  ;;  %v11876_v4 = vld [vmem:[#allocation148_spill] sm:$0xff] }
 0x31d   :  { %v3057_v12 = vadd.f32 %v3056_v29, %v3055_v5  ;;  %3648 = vpow2.f32 %v1636_v7  ;;  %v1638_v53 = vmul.f32 1.442695, %v11872_v38  ;;  %v2872_v6 = vadd.f32 %v2871_v17, %v2870_v62  ;;  %v11879_v29 = vld [vmem:[#allocation286_spill] sm:$0xff]  ;;  %v11882_v26 = vld [vmem:[#allocation240_spill] sm:$0xff]  ;;  %v11883_v38 = vld [vmem:[#allocation57_spill] sm:$0xff] }
 0x31e   :  { %v3060_v50 = vsel %vm663_vm1, %v11873_v0, 0.0  ;;  %3650 = vpow2.f32 %v1878_v58  ;;  %v1880_v40 = vmul.f32 1.442695, %v11681_v3  ;;  %v2875_v21 = vsel %vm663_vm1, %v11874_v48, 0.0  ;;  %v11884_v0 = vld [vmem:[#allocation287_spill] sm:$0xff] }
 0x31f   :  { %v3059_v11 = vadd.f32 %v3058_v41, %v3057_v12  ;;  %v3645_v59 = vpop.eup %3644  ;;  %v2142_v37 = vadd.f32 %v2141_v63, %v2140_v13  ;;  %v2389_v23 = vadd.f32 %v2388_v10, %v2387_v44  ;;  %v2874_v56 = vadd.f32 %v2873_v47, %v2872_v6  ;;  %v11880_v44 = vld [vmem:[#allocation165_spill] sm:$0xff]  ;;  %v11881_v63 = vld [vmem:[#allocation356_spill] sm:$0xff] }
 0x320   :  { %v3062_v16 = vsel %vm663_vm1, %v11875_v24, 0.0  ;;  %v3647_v45 = vpop.eup %3646  ;;  %v2143_v32 = vsel %vm663_vm1, %v3641_v14, 0.0  ;;  %v2390_v19 = vsel %vm663_vm1, %v3643_v8, 0.0  ;;  %v2877_v39 = vsel %vm663_vm1, %v11876_v4, 0.0 }
 0x321   :  { %v3061_v3 = vadd.f32 %v3060_v50, %v3059_v11  ;;  %3652 = vpow2.f32 %v1638_v53  ;;  %v1640_v31 = vmul.f32 1.442695, %v11877_v43  ;;  %v2876_v46 = vadd.f32 %v2875_v21, %v2874_v56 }
 0x322   :  { %v3064_v7 = vsel %vm663_vm1, %v11878_v51, 0.0  ;;  %3654 = vpow2.f32 %v1880_v40  ;;  %v1882_v60 = vmul.f32 1.442695, %v11684_v33  ;;  %v2879_v58 = vsel %vm663_vm1, %v11879_v29, 0.0 }
 0x323   :  { %v3063_v9 = vadd.f32 %v3062_v16, %v3061_v3  ;;  %v3649_v17 = vpop.eup %3648  ;;  %v2144_v5 = vadd.f32 %v2143_v32, %v2142_v37  ;;  %v2391_v14 = vadd.f32 %v2390_v19, %v2389_v23  ;;  %v2878_v13 = vadd.f32 %v2877_v39, %v2876_v46  ;;  %v11885_v37 = vld [vmem:[#allocation166_spill] sm:$0xff]  ;;  %v11887_v19 = vld [vmem:[#allocation241_spill] sm:$0xff]  ;;  %v11889_v46 = vld [vmem:[#allocation288_spill] sm:$0xff] }
 0x324   :  { %v3066_v62 = vsel %vm663_vm1, %v11880_v44, 0.0  ;;  %v3651_v2 = vpop.eup %3650  ;;  %v2145_v41 = vsel %vm663_vm1, %v3645_v59, 0.0  ;;  %v2392_v8 = vsel %vm663_vm1, %v3647_v45, 0.0  ;;  %v2881_v10 = vsel %vm663_vm1, %v11881_v63, 0.0  ;;  %v11886_v45 = vld [vmem:[#allocation150_spill] sm:$0xff] }
 0x325   :  { %v3065_v33 = vadd.f32 %v3064_v7, %v3063_v9  ;;  %3656 = vpow2.f32 %v1640_v31  ;;  %v1642_v47 = vmul.f32 1.442695, %v11882_v26  ;;  %v2880_v12 = vadd.f32 %v2879_v58, %v2878_v13  ;;  %v11888_v3 = vld [vmem:[#allocation58_spill] sm:$0xff] }
 0x326   :  { %v3068_v53 = vsel %vm663_vm1, %v11883_v38, 0.0  ;;  %3658 = vpow2.f32 %v1882_v60  ;;  %v1884_v6 = vmul.f32 1.442695, %v11687_v22  ;;  %v2883_v50 = vsel %vm663_vm1, %v11884_v0, 0.0 }
 0x327   :  { %v3067_v40 = vadd.f32 %v3066_v62, %v3065_v33  ;;  %v3653_v48 = vpop.eup %3652  ;;  %v2146_v21 = vadd.f32 %v2145_v41, %v2144_v5  ;;  %v2393_v11 = vadd.f32 %v2392_v8, %v2391_v14  ;;  %v2882_v59 = vadd.f32 %v2881_v10, %v2880_v12  ;;  %v11891_v62 = vld [vmem:[#allocation357_spill] sm:$0xff]  ;;  %v11892_v41 = vld [vmem:[#allocation244_spill] sm:$0xff]  ;;  %v11893_v10 = vld [vmem:[#allocation279_spill] sm:$0xff] }
 0x328   :  { %v3070_v23 = vsel %vm663_vm1, %v11885_v37, 0.0  ;;  %v3655_v56 = vpop.eup %3654  ;;  %v2147_v24 = vsel %vm663_vm1, %v3649_v17, 0.0  ;;  %v2394_v16 = vsel %vm663_vm1, %v3651_v2, 0.0  ;;  %v2885_v32 = vsel %vm663_vm1, %v11886_v45, 0.0  ;;  %v11890_v17 = vld [vmem:[#allocation141_spill] sm:$0xff]  ;;  %v11896_v37 = vld [vmem:[#allocation152_spill] sm:$0xff] }
 0x329   :  { %v3069_v22 = vadd.f32 %v3068_v53, %v3067_v40  ;;  %3660 = vpow2.f32 %v1642_v47  ;;  %v1644_v4 = vmul.f32 1.442695, %v11887_v19  ;;  %v2884_v39 = vadd.f32 %v2883_v50, %v2882_v59  ;;  %v11894_v47 = vld [vmem:[#allocation177_spill] sm:$0xff]  ;;  %v11895_v40 = vld [vmem:[#allocation142_spill] sm:$0xff]  ;;  %v11898_v45 = vld [vmem:[#allocation280_spill] sm:$0xff] }
 0x32a   :  { %v3072_v43 = vsel %vm663_vm1, %v11888_v3, 0.0  ;;  %3662 = vpow2.f32 %v1884_v6  ;;  %v1886_v31 = vmul.f32 1.442695, %v11690_v15  ;;  %v2887_v51 = vsel %vm663_vm1, %v11889_v46, 0.0  ;;  %v11899_v19 = vld [vmem:[#allocation178_spill] sm:$0xff] }
 0x32b   :  { %v3071_v7 = vadd.f32 %v3070_v23, %v3069_v22  ;;  %v3657_v60 = vpop.eup %3656  ;;  %v2148_v29 = vadd.f32 %v2147_v24, %v2146_v21  ;;  %v2395_v58 = vadd.f32 %v2394_v16, %v2393_v11  ;;  %v2886_v9 = vadd.f32 %v2885_v32, %v2884_v39 }
 0x32c   :  { %v3074_v5 = vsel %vm663_vm1, %v11890_v17, 0.0  ;;  %v3659_v14 = vpop.eup %3658  ;;  %v2149_v13 = vsel %vm663_vm1, %v3653_v48, 0.0  ;;  %v2396_v44 = vsel %vm663_vm1, %v3655_v56, 0.0  ;;  %v2889_v2 = vsel %vm663_vm1, %v11891_v62, 0.0  ;;  %v11897_v56 = vld [vmem:[#allocation245_spill] sm:$0xff] }
 0x32d   :  { %v3073_v15 = vadd.f32 %v3072_v43, %v3071_v7  ;;  %3664 = vpow2.f32 %v1644_v4  ;;  %v1646_v8 = vmul.f32 1.442695, %v11892_v41  ;;  %v2888_v63 = vadd.f32 %v2887_v51, %v2886_v9  ;;  %v11900_v51 = vld [vmem:[#allocation349_spill] sm:$0xff]  ;;  %v11901_v9 = vld [vmem:[#allocation360_spill] sm:$0xff] }
 0x32e   :  { %v3076_v33 = vsel %vm663_vm1, %v11893_v10, 0.0  ;;  %3666 = vpow2.f32 %v1886_v31  ;;  %v1888_v26 = vmul.f32 1.442695, %v11693_v28  ;;  %v2891_v12 = vsel %vm663_vm1, %v11894_v47, 0.0  ;;  %v11905_v47 = vld [vmem:[#allocation61_spill] sm:$0xff] }
 0x32f   :  { %v3075_v38 = vadd.f32 %v3074_v5, %v3073_v15  ;;  %v3661_v53 = vpop.eup %3660  ;;  %v2150_v6 = vadd.f32 %v2149_v13, %v2148_v29  ;;  %v2397_v0 = vadd.f32 %v2396_v44, %v2395_v58  ;;  %v2890_v50 = vadd.f32 %v2889_v2, %v2888_v63  ;;  %v11902_v5 = vld [vmem:[#allocation248_spill] sm:$0xff]  ;;  %v11903_v44 = vld [vmem:[#allocation169_spill] sm:$0xff]  ;;  %v11904_v15 = vld [vmem:[#allocation291_spill] sm:$0xff] }
 0x330   :  { %v3078_v48 = vsel %vm663_vm1, %v11895_v40, 0.0  ;;  %v3663_v21 = vpop.eup %3662  ;;  %v2151_v11 = vsel %vm663_vm1, %v3657_v60, 0.0  ;;  %v2398_v59 = vsel %vm663_vm1, %v3659_v14, 0.0  ;;  %v2893_v23 = vsel %vm663_vm1, %v11896_v37, 0.0  ;;  %v11907_v40 = vld [vmem:[#allocation249_spill] sm:$0xff] }
 0x331   :  { %v3077_v28 = vadd.f32 %v3076_v33, %v3075_v38  ;;  %3668 = vpow2.f32 %v1646_v8  ;;  %v1648_v24 = vmul.f32 1.442695, %v11897_v56  ;;  %v2892_v16 = vadd.f32 %v2891_v12, %v2890_v50 }
 0x332   :  { %v3080_v32 = vsel %vm663_vm1, %v11898_v45, 0.0  ;;  %3670 = vpow2.f32 %v1888_v26  ;;  %v1890_v22 = vmul.f32 1.442695, %v11695_v18  ;;  %v2895_v4 = vsel %vm663_vm1, %v11899_v19, 0.0 }
 0x333   :  { %v3079_v39 = vadd.f32 %v3078_v48, %v3077_v28  ;;  %v3665_v3 = vpop.eup %3664  ;;  %v2152_v43 = vadd.f32 %v2151_v11, %v2150_v6  ;;  %v2399_v31 = vadd.f32 %v2398_v59, %v2397_v0  ;;  %v2894_v46 = vadd.f32 %v2893_v23, %v2892_v16  ;;  %v11906_v0 = vld [vmem:[#allocation155_spill] sm:$0xff]  ;;  %v11908_v11 = vld [vmem:[#allocation170_spill] sm:$0xff]  ;;  %v11909_v23 = vld [vmem:[#allocation72_spill] sm:$0xff] }
 0x334   :  { %v3082_v7 = vsel %vm663_vm1, %v11900_v51, 0.0  ;;  %v3667_v60 = vpop.eup %3666  ;;  %v2153_v29 = vsel %vm663_vm1, %v3661_v53, 0.0  ;;  %v2400_v58 = vsel %vm663_vm1, %v3663_v21, 0.0  ;;  %v2897_v17 = vsel %vm663_vm1, %v11901_v9, 0.0  ;;  %v11914_v9 = vld [vmem:[#allocation73_spill] sm:$0xff] }
 0x335   :  { %v3081_v18 = vadd.f32 %v3080_v32, %v3079_v39  ;;  %3672 = vpow2.f32 %v1648_v24  ;;  %v1650_v14 = vmul.f32 1.442695, %v11902_v5  ;;  %v2896_v13 = vadd.f32 %v2895_v4, %v2894_v46  ;;  %v11912_v46 = vld [vmem:[#allocation252_spill] sm:$0xff] }
 0x336   :  { %v3084_v62 = vsel %vm663_vm1, %v11903_v44, 0.0  ;;  %3674 = vpow2.f32 %v1890_v22  ;;  %v1892_v2 = vmul.f32 1.442695, %v11697_v35  ;;  %v2899_v41 = vsel %vm663_vm1, %v11904_v15, 0.0  ;;  %v11910_v22 = vld [vmem:[#allocation62_spill] sm:$0xff] }
 0x337   :  { %v3083_v8 = vadd.f32 %v3082_v7, %v3081_v18  ;;  %v3669_v63 = vpop.eup %3668  ;;  %v2154_v10 = vadd.f32 %v2153_v29, %v2152_v43  ;;  %v2401_v33 = vadd.f32 %v2400_v58, %v2399_v31  ;;  %v2898_v26 = vadd.f32 %v2897_v17, %v2896_v13  ;;  %v11911_v43 = vld [vmem:[#allocation181_spill] sm:$0xff] }
 0x338   :  { %v3086_v12 = vsel %vm663_vm1, %v11905_v47, 0.0  ;;  %v3671_v38 = vpop.eup %3670  ;;  %v2155_v53 = vsel %vm663_vm1, %v3665_v3, 0.0  ;;  %v2402_v6 = vsel %vm663_vm1, %v3667_v60, 0.0  ;;  %v2901_v50 = vsel %vm663_vm1, %v11906_v0, 0.0  ;;  %v11913_v60 = vld [vmem:[#allocation145_spill] sm:$0xff] }
 0x339   :  { %v3085_v35 = vadd.f32 %v3084_v62, %v3083_v8  ;;  %3676 = vpow2.f32 %v1650_v14  ;;  %v1652_v48 = vmul.f32 1.442695, %v11907_v40  ;;  %v2900_v21 = vadd.f32 %v2899_v41, %v2898_v26  ;;  %v11915_v62 = vld [vmem:[#allocation283_spill] sm:$0xff] }
 0x33a   :  { %v3088_v59 = vsel %vm663_vm1, %v11908_v11, 0.0  ;;  %3678 = vpow2.f32 %v1892_v2  ;;  %v1894_v37 = vmul.f32 1.442695, %v11700_v55  ;;  %v2903_v28 = vsel %vm663_vm1, %v11909_v23, 0.0  ;;  %v11920_v11 = vld [vmem:[#allocation284_spill] sm:$0xff] }
 0x33b   :  { %v3087_v56 = vadd.f32 %v3086_v12, %v3085_v35  ;;  %v3673_v24 = vpop.eup %3672  ;;  %v2156_v16 = vadd.f32 %v2155_v53, %v2154_v10  ;;  %v2403_v45 = vadd.f32 %v2402_v6, %v2401_v33  ;;  %v2902_v32 = vadd.f32 %v2901_v50, %v2900_v21  ;;  %v11917_v33 = vld [vmem:[#allocation253_spill] sm:$0xff]  ;;  %v11918_v12 = vld [vmem:[#allocation146_spill] sm:$0xff]  ;;  %v11919_v6 = vld [vmem:[#allocation159_spill] sm:$0xff] }
 0x33c   :  { %v3090_v19 = vsel %vm663_vm1, %v11910_v22, 0.0  ;;  %v3675_v4 = vpop.eup %3674  ;;  %v2157_v39 = vsel %vm663_vm1, %v3669_v63, 0.0  ;;  %v2404_v3 = vsel %vm663_vm1, %v3671_v38, 0.0  ;;  %v2905_v31 = vsel %vm663_vm1, %v11911_v43, 0.0  ;;  %v11916_v63 = vld [vmem:[#allocation183_spill] sm:$0xff]  ;;  %v11923_v22 = vld [vmem:[#allocation354_spill] sm:$0xff] }
 0x33d   :  { %v3089_v55 = vadd.f32 %v3088_v59, %v3087_v56  ;;  %3680 = vpow2.f32 %v1652_v48  ;;  %v1654_v51 = vmul.f32 1.442695, %v11912_v46  ;;  %v2904_v7 = vadd.f32 %v2903_v28, %v2902_v32  ;;  %v11921_v56 = vld [vmem:[#allocation184_spill] sm:$0xff] }
 0x33e   :  { %v3092_v29 = vsel %vm663_vm1, %v11913_v60, 0.0  ;;  %3682 = vpow2.f32 %v1894_v37  ;;  %v1896_v58 = vmul.f32 1.442695, %v11704_v61  ;;  %v2907_v17 = vsel %vm663_vm1, %v11914_v9, 0.0 }
 0x33f   :  { %v3091_v18 = vadd.f32 %v3090_v19, %v3089_v55  ;;  %v3677_v5 = vpop.eup %3676  ;;  %v2158_v14 = vadd.f32 %v2157_v39, %v2156_v16  ;;  %v2405_v13 = vadd.f32 %v2404_v3, %v2403_v45  ;;  %v2906_v44 = vadd.f32 %v2905_v31, %v2904_v7  ;;  %v11922_v16 = vld [vmem:[#allocation255_spill] sm:$0xff]  ;;  %v11924_v39 = vld [vmem:[#allocation296_spill] sm:$0xff]  ;;  %v11925_v7 = vld [vmem:[#allocation173_spill] sm:$0xff] }
 0x340   :  { %v3094_v2 = vsel %vm663_vm1, %v11915_v62, 0.0  ;;  %v3679_v15 = vpop.eup %3678  ;;  %v2159_v41 = vsel %vm663_vm1, %v3673_v24, 0.0  ;;  %v2406_v8 = vsel %vm663_vm1, %v3675_v4, 0.0  ;;  %v2909_v10 = vsel %vm663_vm1, %v11916_v63, 0.0 }
 0x341   :  { %v3093_v61 = vadd.f32 %v3092_v29, %v3091_v18  ;;  %3684 = vpow2.f32 %v1654_v51  ;;  %v1656_v26 = vmul.f32 1.442695, %v11917_v33  ;;  %v2908_v47 = vadd.f32 %v2907_v17, %v2906_v44  ;;  %v11926_v17 = vld [vmem:[#allocation76_spill] sm:$0xff]  ;;  %v11928_v44 = vld [vmem:[#allocation65_spill] sm:$0xff] }
 0x342   :  { %v3096_v38 = vsel %vm663_vm1, %v11918_v12, 0.0  ;;  %3686 = vpow2.f32 %v1896_v58  ;;  %v1898_v53 = vmul.f32 1.442695, %v11707_v42  ;;  %v2911_v0 = vsel %vm663_vm1, %v11919_v6, 0.0  ;;  %v11931_v6 = vld [vmem:[#allocation160_spill] sm:$0xff] }
 0x343   :  { %v3095_v50 = vadd.f32 %v3094_v2, %v3093_v61  ;;  %v3681_v35 = vpop.eup %3680  ;;  %v2160_v40 = vadd.f32 %v2159_v41, %v2158_v14  ;;  %v2407_v48 = vadd.f32 %v2406_v8, %v2405_v13  ;;  %v2910_v21 = vadd.f32 %v2909_v10, %v2908_v47 }
 0x344   :  { %v3098_v59 = vsel %vm663_vm1, %v11920_v11, 0.0  ;;  %v3683_v37 = vpop.eup %3682  ;;  %v2161_v23 = vsel %vm663_vm1, %v3677_v5, 0.0  ;;  %v2408_v28 = vsel %vm663_vm1, %v3679_v15, 0.0  ;;  %v2913_v24 = vsel %vm663_vm1, %v11921_v56, 0.0  ;;  %v11927_v5 = vld [vmem:[#allocation256_spill] sm:$0xff]  ;;  %v11929_v15 = vld [vmem:[#allocation365_spill] sm:$0xff] }
 0x345   :  { %v3097_v42 = vadd.f32 %v3096_v38, %v3095_v50  ;;  %3688 = vpow2.f32 %v1656_v26  ;;  %v1658_v45 = vmul.f32 1.442695, %v11922_v16  ;;  %v2912_v32 = vadd.f32 %v2911_v0, %v2910_v21  ;;  %v11930_v26 = vld [vmem:[#allocation174_spill] sm:$0xff]  ;;  %v11935_v16 = vld [vmem:[#allocation149_spill] sm:$0xff] }
 0x346   :  { %v3100_v19 = vsel %vm663_vm1, %v11923_v22, 0.0  ;;  %3690 = vpow2.f32 %v1898_v53  ;;  %v1900_v4 = vmul.f32 1.442695, %v11711_v1  ;;  %v2915_v3 = vsel %vm663_vm1, %v11924_v39, 0.0  ;;  %v11932_v50 = vld [vmem:[#allocation258_spill] sm:$0xff] }
 0x347   :  { %v3099_v43 = vadd.f32 %v3098_v59, %v3097_v42  ;;  %v3685_v31 = vpop.eup %3684  ;;  %v2162_v55 = vadd.f32 %v2161_v23, %v2160_v40  ;;  %v2409_v46 = vadd.f32 %v2408_v28, %v2407_v48  ;;  %v2914_v51 = vadd.f32 %v2913_v24, %v2912_v32  ;;  %v11933_v48 = vld [vmem:[#allocation66_spill] sm:$0xff]  ;;  %v11934_v59 = vld [vmem:[#allocation185_spill] sm:$0xff] }
 0x348   :  { %v3102_v60 = vsel %vm663_vm1, %v11925_v7, 0.0  ;;  %v3687_v29 = vpop.eup %3686  ;;  %v2163_v58 = vsel %vm663_vm1, %v3681_v35, 0.0  ;;  %v2410_v9 = vsel %vm663_vm1, %v3683_v37, 0.0  ;;  %v2917_v18 = vsel %vm663_vm1, %v11926_v17, 0.0  ;;  %v11939_v7 = vld [vmem:[#allocation77_spill] sm:$0xff] }
 0x349   :  { %v3101_v1 = vadd.f32 %v3100_v19, %v3099_v43  ;;  %3692 = vpow2.f32 %v1658_v45  ;;  %v1660_v14 = vmul.f32 1.442695, %v11927_v5  ;;  %v2916_v13 = vadd.f32 %v2915_v3, %v2914_v51  ;;  %v11937_v3 = vld [vmem:[#allocation259_spill] sm:$0xff] }
 0x34a   :  { %v3104_v62 = vsel %vm663_vm1, %v11928_v44, 0.0  ;;  %3694 = vpow2.f32 %v1900_v4  ;;  %v1902_v2 = vmul.f32 1.442695, %v11716_v34  ;;  %v2919_v41 = vsel %vm663_vm1, %v11929_v15, 0.0  ;;  %v11936_v4 = vld [vmem:[#allocation297_spill] sm:$0xff]  ;;  %v11942_v15 = vld [vmem:[#allocation260_spill] sm:$0xff] }
 0x34b   :  { %v3103_v8 = vadd.f32 %v3102_v60, %v3101_v1  ;;  %v3689_v63 = vpop.eup %3688  ;;  %v2164_v10 = vadd.f32 %v2163_v58, %v2162_v55  ;;  %v2411_v61 = vadd.f32 %v2410_v9, %v2409_v46  ;;  %v2918_v33 = vadd.f32 %v2917_v18, %v2916_v13  ;;  %v11938_v55 = vld [vmem:[#allocation67_spill] sm:$0xff]  ;;  %v11940_v1 = vld [vmem:[#allocation176_spill] sm:$0xff] }
 0x34c   :  { %v3106_v47 = vsel %vm663_vm1, %v11930_v26, 0.0  ;;  %v3691_v12 = vpop.eup %3690  ;;  %v2165_v38 = vsel %vm663_vm1, %v3685_v31, 0.0  ;;  %v2412_v53 = vsel %vm663_vm1, %v3687_v29, 0.0  ;;  %v2921_v0 = vsel %vm663_vm1, %v11931_v6, 0.0 }
 0x34d   :  { %v3105_v34 = vadd.f32 %v3104_v62, %v3103_v8  ;;  %3696 = vpow2.f32 %v1660_v14  ;;  %v1662_v35 = vmul.f32 1.442695, %v11932_v50  ;;  %v2920_v40 = vadd.f32 %v2919_v41, %v2918_v33  ;;  %v11941_v62 = vld [vmem:[#allocation161_spill] sm:$0xff]  ;;  %v11944_v33 = vld [vmem:[#allocation186_spill] sm:$0xff] }
 0x34e   :  { %v3108_v21 = vsel %vm663_vm1, %v11933_v48, 0.0  ;;  %3698 = vpow2.f32 %v1902_v2  ;;  %v1904_v11 = vmul.f32 1.442695, %v11718_v49  ;;  %v2923_v37 = vsel %vm663_vm1, %v11934_v59, 0.0  ;;  %v11946_v48 = vld [vmem:[#allocation78_spill] sm:$0xff] }
 0x34f   :  { %v3107_v23 = vadd.f32 %v3106_v47, %v3105_v34  ;;  %v3693_v28 = vpop.eup %3692  ;;  %v2166_v56 = vadd.f32 %v2165_v38, %v2164_v10  ;;  %v2413_v24 = vadd.f32 %v2412_v53, %v2411_v61  ;;  %v2922_v42 = vadd.f32 %v2921_v0, %v2920_v40  ;;  %v11945_v0 = vld [vmem:[#allocation151_spill] sm:$0xff] }
 0x350   :  { %v3110_v45 = vsel %vm663_vm1, %v11935_v16, 0.0  ;;  %v3695_v32 = vpop.eup %3694  ;;  %v2167_v22 = vsel %vm663_vm1, %v3689_v63, 0.0  ;;  %v2414_v19 = vsel %vm663_vm1, %v3691_v12, 0.0  ;;  %v2925_v39 = vsel %vm663_vm1, %v11936_v4, 0.0  ;;  %v11943_v63 = vld [vmem:[#allocation68_spill] sm:$0xff]  ;;  %v11950_v4 = vld [vmem:[#allocation153_spill] sm:$0xff] }
 0x351   :  { %v3109_v49 = vadd.f32 %v3108_v21, %v3107_v23  ;;  %3700 = vpow2.f32 %v1662_v35  ;;  %v1664_v43 = vmul.f32 1.442695, %v11937_v3  ;;  %v2924_v31 = vadd.f32 %v2923_v37, %v2922_v42  ;;  %v11948_v23 = vld [vmem:[#allocation289_spill] sm:$0xff] }
 0x352   :  { %v3112_v46 = vsel %vm663_vm1, %v11938_v55, 0.0  ;;  %3702 = vpow2.f32 %v1904_v11  ;;  %v1906_v51 = vmul.f32 1.442695, %v11720_v25  ;;  %v2927_v60 = vsel %vm663_vm1, %v11939_v7, 0.0  ;;  %v11947_v11 = vld [vmem:[#allocation262_spill] sm:$0xff] }
 0x353   :  { %v3111_v29 = vadd.f32 %v3110_v45, %v3109_v49  ;;  %v3697_v58 = vpop.eup %3696  ;;  %v2168_v9 = vadd.f32 %v2167_v22, %v2166_v56  ;;  %v2415_v17 = vadd.f32 %v2414_v19, %v2413_v24  ;;  %v2926_v18 = vadd.f32 %v2925_v39, %v2924_v31  ;;  %v11949_v24 = vld [vmem:[#allocation366_spill] sm:$0xff] }
 0x354   :  { %v3114_v5 = vsel %vm663_vm1, %v11940_v1, 0.0  ;;  %v3699_v14 = vpop.eup %3698  ;;  %v2169_v13 = vsel %vm663_vm1, %v3693_v28, 0.0  ;;  %v2416_v44 = vsel %vm663_vm1, %v3695_v32, 0.0  ;;  %v2929_v2 = vsel %vm663_vm1, %v11941_v62, 0.0  ;;  %v11951_v31 = vld [vmem:[#allocation162_spill] sm:$0xff] }
 0x355   :  { %v3113_v25 = vadd.f32 %v3112_v46, %v3111_v29  ;;  %3704 = vpow2.f32 %v1664_v43  ;;  %v1666_v41 = vmul.f32 1.442695, %v11942_v15  ;;  %v2928_v8 = vadd.f32 %v2927_v60, %v2926_v18  ;;  %v11952_v46 = vld [vmem:[#allocation263_spill] sm:$0xff]  ;;  %v11953_v60 = vld [vmem:[#allocation290_spill] sm:$0xff] }
 0x356   :  { %v3116_v10 = vsel %vm663_vm1, %v11943_v63, 0.0  ;;  %3706 = vpow2.f32 %v1906_v51  ;;  %v1908_v61 = vmul.f32 1.442695, %v11723_v57  ;;  %v2931_v26 = vsel %vm663_vm1, %v11944_v33, 0.0  ;;  %v11957_v63 = vld [vmem:[#allocation264_spill] sm:$0xff]  ;;  %v11958_v33 = vld [vmem:[#allocation71_spill] sm:$0xff] }
 0x357   :  { %v3115_v47 = vadd.f32 %v3114_v5, %v3113_v25  ;;  %v3701_v12 = vpop.eup %3700  ;;  %v2170_v38 = vadd.f32 %v2169_v13, %v2168_v9  ;;  %v2417_v53 = vadd.f32 %v2416_v44, %v2415_v17  ;;  %v2930_v6 = vadd.f32 %v2929_v2, %v2928_v8  ;;  %v11954_v9 = vld [vmem:[#allocation187_spill] sm:$0xff]  ;;  %v11955_v44 = vld [vmem:[#allocation154_spill] sm:$0xff] }
 0x358   :  { %v3118_v34 = vsel %vm663_vm1, %v11945_v0, 0.0  ;;  %v3703_v50 = vpop.eup %3702  ;;  %v2171_v35 = vsel %vm663_vm1, %v3697_v58, 0.0  ;;  %v2418_v40 = vsel %vm663_vm1, %v3699_v14, 0.0  ;;  %v2933_v21 = vsel %vm663_vm1, %v11946_v48, 0.0 }
 0x359   :  { %v3117_v57 = vadd.f32 %v3116_v10, %v3115_v47  ;;  %3708 = vpow2.f32 %v1666_v41  ;;  %v1668_v59 = vmul.f32 1.442695, %v11947_v11  ;;  %v2932_v37 = vadd.f32 %v2931_v26, %v2930_v6  ;;  %v11956_v41 = vld [vmem:[#allocation79_spill] sm:$0xff]  ;;  %v11961_v11 = vld [vmem:[#allocation80_spill] sm:$0xff] }
 0x35a   :  { %v3120_v28 = vsel %vm663_vm1, %v11948_v23, 0.0  ;;  %3710 = vpow2.f32 %v1908_v61  ;;  %v1910_v56 = vmul.f32 1.442695, %v11727_v27  ;;  %v2935_v42 = vsel %vm663_vm1, %v11949_v24, 0.0 }
 0x35b   :  { %v3119_v16 = vadd.f32 %v3118_v34, %v3117_v57  ;;  %v3705_v45 = vpop.eup %3704  ;;  %v2172_v32 = vadd.f32 %v2171_v35, %v2170_v38  ;;  %v2419_v22 = vadd.f32 %v2418_v40, %v2417_v53  ;;  %v2934_v19 = vadd.f32 %v2933_v21, %v2932_v37  ;;  %v11960_v35 = vld [vmem:[#allocation180_spill] sm:$0xff]  ;;  %v11962_v37 = vld [vmem:[#allocation265_spill] sm:$0xff] }
 0x35c   :  { %v3122_v39 = vsel %vm663_vm1, %v11950_v4, 0.0  ;;  %v3707_v49 = vpop.eup %3706  ;;  %v2173_v3 = vsel %vm663_vm1, %v3701_v12, 0.0  ;;  %v2420_v43 = vsel %vm663_vm1, %v3703_v50, 0.0  ;;  %v2937_v55 = vsel %vm663_vm1, %v11951_v31, 0.0  ;;  %v11959_v12 = vld [vmem:[#allocation188_spill] sm:$0xff] }
 0x35d   :  { %v3121_v27 = vadd.f32 %v3120_v28, %v3119_v16  ;;  %3712 = vpow2.f32 %v1668_v59  ;;  %v1670_v51 = vmul.f32 1.442695, %v11952_v46  ;;  %v2936_v7 = vadd.f32 %v2935_v42, %v2934_v19  ;;  %v11964_v16 = vld [vmem:[#allocation367_spill] sm:$0xff] }
 0x35e   :  { %v3124_v29 = vsel %vm663_vm1, %v11953_v60, 0.0  ;;  %3714 = vpow2.f32 %v1910_v56  ;;  %v1912_v58 = vmul.f32 1.442695, %v11729_v52  ;;  %v2939_v17 = vsel %vm663_vm1, %v11954_v9, 0.0  ;;  %v11963_v56 = vld [vmem:[#allocation361_spill] sm:$0xff] }
 0x35f   :  { %v3123_v18 = vadd.f32 %v3122_v39, %v3121_v27  ;;  %v3709_v1 = vpop.eup %3708  ;;  %v2174_v5 = vadd.f32 %v2173_v3, %v2172_v32  ;;  %v2421_v14 = vadd.f32 %v2420_v43, %v2419_v22  ;;  %v2938_v13 = vadd.f32 %v2937_v55, %v2936_v7  ;;  %v11966_v27 = vld [vmem:[#allocation4_spill] sm:$0xff] }
 0x360   :  { %v3126_v62 = vsel %vm663_vm1, %v11955_v44, 0.0  ;;  %v3711_v2 = vpop.eup %3710  ;;  %v2175_v25 = vsel %vm663_vm1, %v3705_v45, 0.0  ;;  %v2422_v15 = vsel %vm663_vm1, %v3707_v49, 0.0  ;;  %v2941_v8 = vsel %vm663_vm1, %v11956_v41, 0.0  ;;  %v11965_v49 = vld [vmem:[#allocation293_spill] sm:$0xff] }
 0x361   :  { %v3125_v52 = vadd.f32 %v3124_v29, %v3123_v18  ;;  %3716 = vpow2.f32 %v1670_v51  ;;  %v1672_v10 = vmul.f32 1.442695, %v11957_v63  ;;  %v2940_v61 = vadd.f32 %v2939_v17, %v2938_v13  ;;  %v11967_v51 = vld [vmem:[#allocation267_spill] sm:$0xff]  ;;  %v11968_v29 = vld [vmem:[#allocation182_spill] sm:$0xff]  ;;  %v11969_v17 = vld [vmem:[#allocation189_spill] sm:$0xff] }
 0x362   :  { %v3128_v26 = vsel %vm663_vm1, %v11958_v33, 0.0  ;;  %3718 = vpow2.f32 %v1912_v58  ;;  %v1914_v47 = vmul.f32 1.442695, %v11733_v36  ;;  %v2943_v38 = vsel %vm663_vm1, %v11959_v12, 0.0  ;;  %v11972_v63 = vld [vmem:[#allocation268_spill] sm:$0xff]  ;;  %v11974_v12 = vld [vmem:[#allocation371_spill] sm:$0xff] }
 0x363   :  { %v3127_v53 = vadd.f32 %v3126_v62, %v3125_v52  ;;  %v3713_v6 = vpop.eup %3712  ;;  %v2176_v0 = vadd.f32 %v2175_v25, %v2174_v5  ;;  %v2423_v34 = vadd.f32 %v2422_v15, %v2421_v14  ;;  %v2942_v50 = vadd.f32 %v2941_v8, %v2940_v61  ;;  %v11970_v62 = vld [vmem:[#allocation295_spill] sm:$0xff]  ;;  %v11971_v8 = vld [vmem:[#allocation298_spill] sm:$0xff] }
 0x364   :  { %v3130_v40 = vsel %vm663_vm1, %v11960_v35, 0.0  ;;  %v3715_v48 = vpop.eup %3714  ;;  %v2177_v21 = vsel %vm663_vm1, %v3709_v1, 0.0  ;;  %v2424_v57 = vsel %vm663_vm1, %v3711_v2, 0.0  ;;  %v2945_v59 = vsel %vm663_vm1, %v11961_v11, 0.0  ;;  %v11975_v35 = vld [vmem:[#allocation84_spill] sm:$0xff] }
 0x365   :  { %v3129_v36 = vadd.f32 %v3128_v26, %v3127_v53  ;;  %3720 = vpow2.f32 %v1672_v10  ;;  %v1674_v23 = vmul.f32 1.442695, %v11962_v37  ;;  %v2944_v28 = vadd.f32 %v2943_v38, %v2942_v50  ;;  %v11973_v26 = vld [vmem:[#allocation358_spill] sm:$0xff] }
 0x366   :  { %v3132_v24 = vsel %vm663_vm1, %v11963_v56, 0.0  ;;  %3722 = vpow2.f32 %v1914_v47  ;;  %v1916_v42 = vmul.f32 1.442695, %v11738_v30  ;;  %v2947_v45 = vsel %vm663_vm1, %v11964_v16, 0.0  ;;  %v11980_v16 = vld [vmem:[#allocation190_spill] sm:$0xff] }
 0x367   :  { %v3131_v32 = vadd.f32 %v3130_v40, %v3129_v36  ;;  %v3717_v22 = vpop.eup %3716  ;;  %v2178_v19 = vadd.f32 %v2177_v21, %v2176_v0  ;;  %v2425_v4 = vadd.f32 %v2424_v57, %v2423_v34  ;;  %v2946_v39 = vadd.f32 %v2945_v59, %v2944_v28  ;;  %v11977_v36 = vld [vmem:[#allocation269_spill] sm:$0xff]  ;;  %v11978_v28 = vld [vmem:[#allocation216_spill] sm:$0xff] }
 0x368   :  { %v3134_v3 = vsel %vm663_vm1, %v11965_v49, 0.0  ;;  %v3719_v43 = vpop.eup %3718  ;;  %v2179_v31 = vsel %vm663_vm1, %v3713_v6, 0.0  ;;  %v2426_v55 = vsel %vm663_vm1, %v3715_v48, 0.0  ;;  %v2949_v46 = vsel %vm663_vm1, %v11966_v27, 0.0  ;;  %v11981_v49 = vld [vmem:[#allocation217_spill] sm:$0xff]  ;;  %v11982_v27 = vld [vmem:[#allocation299_spill] sm:$0xff] }
 0x369   :  { %v3133_v30 = vadd.f32 %v3132_v24, %v3131_v32  ;;  %3724 = vpow2.f32 %v1674_v23  ;;  %v1676_v7 = vmul.f32 1.442695, %v11967_v51  ;;  %v2948_v60 = vadd.f32 %v2947_v45, %v2946_v39  ;;  %v11979_v24 = vld [vmem:[#allocation359_spill] sm:$0xff]  ;;  %v11983_v51 = vld [vmem:[#allocation270_spill] sm:$0xff] }
 0x36a   :  { %v3136_v58 = vsel %vm663_vm1, %v11968_v29, 0.0  ;;  %3726 = vpow2.f32 %v1916_v42  ;;  %v1918_v9 = vmul.f32 1.442695, %v11740_v20  ;;  %v2951_v18 = vsel %vm663_vm1, %v11969_v17, 0.0  ;;  %v11984_v29 = vld [vmem:[#allocation6_spill] sm:$0xff] }
 0x36b   :  { %v3135_v1 = vadd.f32 %v3134_v3, %v3133_v30  ;;  %v3721_v5 = vpop.eup %3720  ;;  %v2180_v14 = vadd.f32 %v2179_v31, %v2178_v19  ;;  %v2427_v13 = vadd.f32 %v2426_v55, %v2425_v4  ;;  %v2950_v44 = vadd.f32 %v2949_v46, %v2948_v60 }
 0x36c   :  { %v3138_v2 = vsel %vm663_vm1, %v11970_v62, 0.0  ;;  %v3723_v25 = vpop.eup %3722  ;;  %v2181_v15 = vsel %vm663_vm1, %v3717_v22, 0.0  ;;  %v2428_v41 = vsel %vm663_vm1, %v3719_v43, 0.0  ;;  %v2953_v52 = vsel %vm663_vm1, %v11971_v8, 0.0 }
 0x36d   :  { %v3137_v20 = vadd.f32 %v3136_v58, %v3135_v1  ;;  %3728 = vpow2.f32 %v1676_v7  ;;  %v1678_v10 = vmul.f32 1.442695, %v11972_v63  ;;  %v2952_v61 = vadd.f32 %v2951_v18, %v2950_v44  ;;  %v11986_v18 = vld [vmem:[#allocation374_spill] sm:$0xff] }
 0x36e   :  { %v3140_v33 = vsel %vm663_vm1, %v9154_v54, 0.0  ;;  %3730 = vpow2.f32 %v1918_v9  ;;  %v1920_v47 = vmul.f32 1.442695, %v11973_v26  ;;  %v2955_v38 = vsel %vm663_vm1, %v11974_v12, 0.0  ;;  %v11976_v54 = vld [vmem:[#allocation81_spill] sm:$0xff]  ;;  %v11985_v9 = vld [vmem:[#allocation36_spill] sm:$0xff] }
 0x36f   :  { %v3139_v53 = vadd.f32 %v3138_v2, %v3137_v20  ;;  %v3725_v6 = vpop.eup %3724  ;;  %v2182_v0 = vadd.f32 %v2181_v15, %v2180_v14  ;;  %v2429_v34 = vadd.f32 %v2428_v41, %v2427_v13  ;;  %v2954_v50 = vadd.f32 %v2953_v52, %v2952_v61  ;;  %v11987_v2 = vld [vmem:[#allocation193_spill] sm:$0xff]  ;;  %v11988_v52 = vld [vmem:[#allocation82_spill] sm:$0xff] }
 0x370   :  { %v3142_v40 = vsel %vm663_vm1, %v11975_v35, 0.0  ;;  %v3727_v48 = vpop.eup %3726  ;;  %v2183_v21 = vsel %vm663_vm1, %v3721_v5, 0.0  ;;  %v2430_v57 = vsel %vm663_vm1, %v3723_v25, 0.0  ;;  %v2957_v11 = vsel %vm663_vm1, %v11976_v54, 0.0  ;;  %v11990_v26 = vld [vmem:[#allocation302_spill] sm:$0xff]  ;;  %v11991_v12 = vld [vmem:[#allocation37_spill] sm:$0xff] }
 0x371   :  { %v3141_v59 = vadd.f32 %v3140_v33, %v3139_v53  ;;  %3732 = vpow2.f32 %v1678_v10  ;;  %v1680_v37 = vmul.f32 1.442695, %v11977_v36  ;;  %v2956_v23 = vadd.f32 %v2955_v38, %v2954_v50  ;;  %v11989_v10 = vld [vmem:[#allocation271_spill] sm:$0xff]  ;;  %v11992_v53 = vld [vmem:[#allocation370_spill] sm:$0xff] }
 0x372   :  { %v3144_v56 = vsel %vm663_vm1, %v11978_v28, 0.0  ;;  %3734 = vpow2.f32 %v1920_v47  ;;  %v1922_v42 = vmul.f32 1.442695, %v11979_v24  ;;  %v2959_v45 = vsel %vm663_vm1, %v11980_v16, 0.0  ;;  %v11996_v24 = vld [vmem:[#allocation85_spill] sm:$0xff]  ;;  %v11997_v16 = vld [vmem:[#allocation363_spill] sm:$0xff] }
 0x373   :  { %v3143_v32 = vadd.f32 %v3142_v40, %v3141_v59  ;;  %v3729_v22 = vpop.eup %3728  ;;  %v2184_v19 = vadd.f32 %v2183_v21, %v2182_v0  ;;  %v2431_v4 = vadd.f32 %v2430_v57, %v2429_v34  ;;  %v2958_v39 = vadd.f32 %v2957_v11, %v2956_v23  ;;  %v11994_v59 = vld [vmem:[#allocation5_spill] sm:$0xff] }
 0x374   :  { %v3146_v3 = vsel %vm663_vm1, %v11981_v49, 0.0  ;;  %v3731_v43 = vpop.eup %3730  ;;  %v2185_v31 = vsel %vm663_vm1, %v3725_v6, 0.0  ;;  %v2432_v55 = vsel %vm663_vm1, %v3727_v48, 0.0  ;;  %v2961_v46 = vsel %vm663_vm1, %v11982_v27, 0.0  ;;  %v11993_v48 = vld [vmem:[#allocation379_spill] sm:$0xff]  ;;  %v11995_v23 = vld [vmem:[#allocation273_spill] sm:$0xff] }
 0x375   :  { %v3145_v30 = vadd.f32 %v3144_v56, %v3143_v32  ;;  %3736 = vpow2.f32 %v1680_v37  ;;  %v1682_v7 = vmul.f32 1.442695, %v11983_v51  ;;  %v2960_v60 = vadd.f32 %v2959_v45, %v2958_v39  ;;  %v11998_v32 = vld [vmem:[#allocation191_spill] sm:$0xff] }
 0x376   :  { %v3148_v58 = vsel %vm663_vm1, %v11984_v29, 0.0  ;;  %3738 = vpow2.f32 %v1922_v42  ;;  %v1924_v17 = vmul.f32 1.442695, %v11985_v9  ;;  %v2963_v1 = vsel %vm663_vm1, %v11986_v18, 0.0  ;;  %v12002_v9 = vld [vmem:[#allocation194_spill] sm:$0xff]  ;;  %v12003_v18 = vld [vmem:[#allocation364_spill] sm:$0xff] }
 0x377   :  { %v3147_v5 = vadd.f32 %v3146_v3, %v3145_v30  ;;  %v3733_v14 = vpop.eup %3732  ;;  %v2186_v13 = vadd.f32 %v2185_v31, %v2184_v19  ;;  %v2433_v44 = vadd.f32 %v2432_v55, %v2431_v4  ;;  %v2962_v62 = vadd.f32 %v2961_v46, %v2960_v60  ;;  %v12000_v30 = vld [vmem:[#allocation300_spill] sm:$0xff]  ;;  %v12001_v60 = vld [vmem:[#allocation274_spill] sm:$0xff] }
 0x378   :  { %v3150_v25 = vsel %vm663_vm1, %v11987_v2, 0.0  ;;  %v3735_v15 = vpop.eup %3734  ;;  %v2187_v41 = vsel %vm663_vm1, %v3729_v22, 0.0  ;;  %v2434_v8 = vsel %vm663_vm1, %v3731_v43, 0.0  ;;  %v2965_v20 = vsel %vm663_vm1, %v11988_v52, 0.0  ;;  %v11999_v43 = vld [vmem:[#allocation382_spill] sm:$0xff] }
 0x379   :  { %v3149_v63 = vadd.f32 %v3148_v58, %v3147_v5  ;;  %3740 = vpow2.f32 %v1682_v7  ;;  %v1684_v61 = vmul.f32 1.442695, %v11989_v10  ;;  %v2964_v33 = vadd.f32 %v2963_v1, %v2962_v62  ;;  %v12004_v5 = vld [vmem:[#allocation42_spill] sm:$0xff] }
 0x37a   :  { %v3152_v47 = vsel %vm663_vm1, %v11990_v26, 0.0  ;;  %3742 = vpow2.f32 %v1924_v17  ;;  %v1926_v38 = vmul.f32 1.442695, %v11991_v12  ;;  %v2967_v6 = vsel %vm663_vm1, %v11992_v53, 0.0  ;;  %v12008_v12 = vld [vmem:[#allocation86_spill] sm:$0xff] }
 0x37b   :  { %v3151_v0 = vadd.f32 %v3150_v25, %v3149_v63  ;;  %v3737_v34 = vpop.eup %3736  ;;  %v2188_v50 = vadd.f32 %v2187_v41, %v2186_v13  ;;  %v2435_v35 = vadd.f32 %v2434_v8, %v2433_v44  ;;  %v2966_v40 = vadd.f32 %v2965_v20, %v2964_v33  ;;  %v12006_v63 = vld [vmem:[#allocation83_spill] sm:$0xff]  ;;  %v12009_v53 = vld [vmem:[#allocation38_spill] sm:$0xff] }
 0x37c   :  { %v3154_v21 = vsel %vm663_vm1, %v11993_v48, 0.0  ;;  %v3739_v57 = vpop.eup %3738  ;;  %v2189_v54 = vsel %vm663_vm1, %v3733_v14, 0.0  ;;  %v2436_v11 = vsel %vm663_vm1, %v3735_v15, 0.0  ;;  %v2969_v36 = vsel %vm663_vm1, %v11994_v59, 0.0  ;;  %v12005_v15 = vld [vmem:[#allocation303_spill] sm:$0xff] }
 0x37d   :  { %v3153_v37 = vadd.f32 %v3152_v47, %v3151_v0  ;;  %3744 = vpow2.f32 %v1684_v61  ;;  %v1686_v28 = vmul.f32 1.442695, %v11995_v23  ;;  %v2968_v56 = vadd.f32 %v2967_v6, %v2966_v40  ;;  %v12007_v33 = vld [vmem:[#allocation275_spill] sm:$0xff]  ;;  %v12010_v0 = vld [vmem:[#allocation40_spill] sm:$0xff] }
 0x37e   :  { %v3156_v42 = vsel %vm663_vm1, %v11996_v24, 0.0  ;;  %3746 = vpow2.f32 %v1926_v38  ;;  %v1928_v45 = vmul.f32 1.442695, %v11997_v16  ;;  %v2971_v22 = vsel %vm663_vm1, %v11998_v32, 0.0  ;;  %v12014_v16 = vld [vmem:[#allocation218_spill] sm:$0xff]  ;;  %v12015_v32 = vld [vmem:[#allocation39_spill] sm:$0xff] }
 0x37f   :  { %v3155_v19 = vadd.f32 %v3154_v21, %v3153_v37  ;;  %v3741_v4 = vpop.eup %3740  ;;  %v2190_v39 = vadd.f32 %v2189_v54, %v2188_v50  ;;  %v2437_v49 = vadd.f32 %v2436_v11, %v2435_v35  ;;  %v2970_v3 = vadd.f32 %v2969_v36, %v2968_v56  ;;  %v12012_v37 = vld [vmem:[#allocation192_spill] sm:$0xff] }
 0x380   :  { %v3158_v31 = vsel %vm663_vm1, %v11999_v43, 0.0  ;;  %v3743_v55 = vpop.eup %3742  ;;  %v2191_v27 = vsel %vm663_vm1, %v3737_v34, 0.0  ;;  %v2438_v46 = vsel %vm663_vm1, %v3739_v57, 0.0  ;;  %v2973_v51 = vsel %vm663_vm1, %v12000_v30, 0.0  ;;  %v12011_v57 = vld [vmem:[#allocation372_spill] sm:$0xff] }
 0x381   :  { %v3157_v7 = vadd.f32 %v3156_v42, %v3155_v19  ;;  %3748 = vpow2.f32 %v1686_v28  ;;  %v1688_v29 = vmul.f32 1.442695, %v12001_v60  ;;  %v2972_v58 = vadd.f32 %v2971_v22, %v2970_v3  ;;  %v12013_v56 = vld [vmem:[#allocation276_spill] sm:$0xff]  ;;  %v12016_v19 = vld [vmem:[#allocation301_spill] sm:$0xff] }
 0x382   :  { %v3160_v17 = vsel %vm663_vm1, %v12002_v9, 0.0  ;;  %3750 = vpow2.f32 %v1928_v45  ;;  %v1930_v1 = vmul.f32 1.442695, %v12003_v18  ;;  %v2975_v14 = vsel %vm663_vm1, %v12004_v5, 0.0  ;;  %v12019_v9 = vld [vmem:[#allocation195_spill] sm:$0xff]  ;;  %v12020_v18 = vld [vmem:[#allocation277_spill] sm:$0xff] }
 0x383   :  { %v3159_v13 = vadd.f32 %v3158_v31, %v3157_v7  ;;  %v3745_v44 = vpop.eup %3744  ;;  %v2192_v62 = vadd.f32 %v2191_v27, %v2190_v39  ;;  %v2439_v2 = vadd.f32 %v2438_v46, %v2437_v49  ;;  %v2974_v25 = vadd.f32 %v2973_v51, %v2972_v58  ;;  %v12018_v7 = vld [vmem:[#allocation377_spill] sm:$0xff]  ;;  %v12021_v5 = vld [vmem:[#allocation368_spill] sm:$0xff] }
 0x384   :  { %v3162_v41 = vsel %vm663_vm1, %v12005_v15, 0.0  ;;  %v3747_v8 = vpop.eup %3746  ;;  %v2193_v52 = vsel %vm663_vm1, %v3741_v4, 0.0  ;;  %v2440_v20 = vsel %vm663_vm1, %v3743_v55, 0.0  ;;  %v2977_v10 = vsel %vm663_vm1, %v12006_v63, 0.0  ;;  %v12017_v55 = vld [vmem:[#allocation7_spill] sm:$0xff]  ;;  %v12022_v15 = vld [vmem:[#allocation304_spill] sm:$0xff] }
 0x385   :  { %v3161_v61 = vadd.f32 %v3160_v17, %v3159_v13  ;;  %3752 = vpow2.f32 %v1688_v29  ;;  %v1690_v26 = vmul.f32 1.442695, %v12007_v33  ;;  %v2976_v47 = vadd.f32 %v2975_v14, %v2974_v25  ;;  %v12024_v33 = vld [vmem:[#allocation278_spill] sm:$0xff] }
 0x386   :  { %v3164_v38 = vsel %vm663_vm1, %v12008_v12, 0.0  ;;  %3754 = vpow2.f32 %v1930_v1  ;;  %v1932_v6 = vmul.f32 1.442695, %v12009_v53  ;;  %v2979_v34 = vsel %vm663_vm1, %v12010_v0, 0.0 }
 0x387   :  { %v3163_v50 = vadd.f32 %v3162_v41, %v3161_v61  ;;  %v3749_v35 = vpop.eup %3748  ;;  %v2194_v40 = vadd.f32 %v2193_v52, %v2192_v62  ;;  %v2441_v48 = vadd.f32 %v2440_v20, %v2439_v2  ;;  %v2978_v21 = vadd.f32 %v2977_v10, %v2976_v47  ;;  %v12023_v10 = vld [vmem:[#allocation385_spill] sm:$0xff] }
 0x388   :  { %v3166_v54 = vsel %vm663_vm1, %v12011_v57, 0.0  ;;  %v3751_v11 = vpop.eup %3750  ;;  %v2195_v59 = vsel %vm663_vm1, %v3745_v44, 0.0  ;;  %v2442_v36 = vsel %vm663_vm1, %v3747_v8, 0.0  ;;  %v2981_v23 = vsel %vm663_vm1, %v12012_v37, 0.0  ;;  %v12025_v47 = vld [vmem:[#allocation369_spill] sm:$0xff]  ;;  %v12027_v57 = vld [vmem:[#allocation196_spill] sm:$0xff] }
 0x389   :  { %v3165_v28 = vadd.f32 %v3164_v38, %v3163_v50  ;;  %3756 = vpow2.f32 %v1690_v26  ;;  %v1692_v24 = vmul.f32 1.442695, %v12013_v56  ;;  %v2980_v42 = vadd.f32 %v2979_v34, %v2978_v21  ;;  %v12026_v34 = vld [vmem:[#allocation87_spill] sm:$0xff] }
 0x38a   :  { %v3168_v45 = vsel %vm663_vm1, %v12014_v16, 0.0  ;;  %3758 = vpow2.f32 %v1932_v6  ;;  %v1934_v22 = vmul.f32 1.442695, %v12015_v32  ;;  %v2983_v4 = vsel %vm663_vm1, %v12016_v19, 0.0 }
 0x38b   :  { %v3167_v39 = vadd.f32 %v3166_v54, %v3165_v28  ;;  %v3753_v49 = vpop.eup %3752  ;;  %v2196_v3 = vadd.f32 %v2195_v59, %v2194_v40  ;;  %v2443_v43 = vadd.f32 %v2442_v36, %v2441_v48  ;;  %v2982_v31 = vadd.f32 %v2981_v23, %v2980_v42  ;;  %v12029_v28 = vld [vmem:[#allocation305_spill] sm:$0xff] }
 0x38c   :  { %v3170_v27 = vsel %vm663_vm1, %v12017_v55, 0.0  ;;  %v3755_v46 = vpop.eup %3754  ;;  %v2197_v30 = vsel %vm663_vm1, %v3749_v35, 0.0  ;;  %v2444_v51 = vsel %vm663_vm1, %v3751_v11, 0.0  ;;  %v2985_v60 = vsel %vm663_vm1, %v12018_v7, 0.0  ;;  %v12028_v11 = vld [vmem:[#allocation41_spill] sm:$0xff] }
 0x38d   :  { %v3169_v29 = vadd.f32 %v3168_v45, %v3167_v39  ;;  %3760 = vpow2.f32 %v1692_v24  ;;  %v2984_v58 = vadd.f32 %v2983_v4, %v2982_v31  ;;  %v3172_v17 = vsel %vm663_vm1, %v12019_v9, 0.0  ;;  %v12031_v4 = vld [vmem:[#allocation373_spill] sm:$0xff]  ;;  %v12032_v31 = vld [vmem:[#allocation88_spill] sm:$0xff] }
 0x38e   :  { %v1694_v1 = vmul.f32 1.442695, %v12020_v18  ;;  %3762 = vpow2.f32 %v1934_v22  ;;  %v1936_v14 = vmul.f32 1.442695, %v12021_v5  ;;  %v2198_v62 = vadd.f32 %v2197_v30, %v2196_v3  ;;  %v12030_v22 = vld [vmem:[#allocation130_spill] sm:$0xff]  ;;  %v12035_v5 = vld [vmem:[#allocation219_spill] sm:$0xff] }
 0x38f   :  { %v3171_v13 = vadd.f32 %v3170_v27, %v3169_v29  ;;  %v3757_v44 = vpop.eup %3756  ;;  %v2445_v2 = vadd.f32 %v2444_v51, %v2443_v43  ;;  %v10086_v25 = vadd.f32 %v2985_v60, %v2984_v58  ;;  %v3174_v41 = vsel %vm663_vm1, %v12022_v15, 0.0  ;;  %v12033_v60 = vld [vmem:[#allocation375_spill] sm:$0xff]  ;;  %v12036_v15 = vld [vmem:[#allocation8_spill] sm:$0xff] }
 0x390   :  { %v3759_v8 = vpop.eup %3758  ;;  %v2199_v52 = vsel %vm663_vm1, %v3753_v49, 0.0  ;;  %v2446_v20 = vsel %vm663_vm1, %v3755_v46, 0.0  ;;  %v3176_v61 = vsel %vm663_vm1, %v12023_v10, 0.0  ;;  %3764 = vpow2.f32 %v1694_v1  ;;  %v12034_v58 = vld [vmem:[#allocation43_spill] sm:$0xff] }
 0x391   :  { %v3173_v63 = vadd.f32 %v3172_v17, %v3171_v13  ;;  %v1696_v26 = vmul.f32 1.442695, %v12024_v33  ;;  %v1938_v12 = vmul.f32 1.442695, %v12025_v47  ;;  %3766 = vpow2.f32 %v1936_v14 }
 0x392   :  { %v2200_v6 = vadd.f32 %v2199_v52, %v2198_v62  ;;  %v2447_v0 = vadd.f32 %v2446_v20, %v2445_v2  ;;  %v3178_v50 = vsel %vm663_vm1, %v12026_v34, 0.0  ;;  %v2201_v40 = vsel %vm663_vm1, %v3757_v44, 0.0 }
 0x393   :  { %v3175_v38 = vadd.f32 %v3174_v41, %v3173_v63  ;;  %v3761_v53 = vpop.eup %3760  ;;  %v2448_v48 = vsel %vm663_vm1, %v3759_v8, 0.0  ;;  %v3180_v54 = vsel %vm663_vm1, %v12027_v57, 0.0  ;;  %3768 = vpow2.f32 %v1696_v26  ;;  %v12037_v8 = vld [vmem:[#allocation376_spill] sm:$0xff] }
 0x394   :  { %v3763_v35 = vpop.eup %3762  ;;  %v1940_v59 = vmul.f32 1.442695, %v12028_v11  ;;  %3770 = vpow2.f32 %v1938_v12  ;;  %v2202_v37 = vadd.f32 %v2201_v40, %v2200_v6  ;;  %v2449_v23 = vadd.f32 %v2448_v48, %v2447_v0  ;;  %v12040_v6 = vld [vmem:[#allocation45_spill] sm:$0xff]  ;;  %v12041_v40 = vld [vmem:[#allocation306_spill] sm:$0xff]  ;;  %v12042_v11 = vld [vmem:[#allocation131_spill] sm:$0xff] }
 0x395   :  { %v3177_v21 = vadd.f32 %v3176_v61, %v3175_v38  ;;  %v3182_v56 = vsel %vm663_vm1, %v12029_v28, 0.0  ;;  %v2203_v42 = vsel %vm663_vm1, %v3761_v53, 0.0  ;;  %v2450_v16 = vsel %vm663_vm1, %v3763_v35, 0.0  ;;  %v12038_v61 = vld [vmem:[#allocation9_spill] sm:$0xff] }
 0x396   :  { %v3765_v24 = vpop.eup %3764  ;;  %v3184_v19 = vsel %vm663_vm1, %v12030_v22, 0.0  ;;  %v1942_v39 = vmul.f32 1.442695, %v12031_v4  ;;  %3772 = vpow2.f32 %v1940_v59  ;;  %v2204_v3 = vadd.f32 %v2203_v42, %v2202_v37  ;;  %v12039_v38 = vld [vmem:[#allocation197_spill] sm:$0xff]  ;;  %v12045_v22 = vld [vmem:[#allocation2_spill] sm:$0xff] }
 0x397   :  { %v3179_v36 = vadd.f32 %v3178_v50, %v3177_v21  ;;  %v3767_v32 = vpop.eup %3766  ;;  %v2451_v43 = vadd.f32 %v2450_v16, %v2449_v23  ;;  %v3186_v55 = vsel %vm663_vm1, %v12032_v31, 0.0  ;;  %v2205_v46 = vsel %vm663_vm1, %v3765_v24, 0.0  ;;  %v12044_v24 = vld [vmem:[#allocation89_spill] sm:$0xff]  ;;  %v12046_v4 = vld [vmem:[#allocation46_spill] sm:$0xff] }
 0x398   :  { %v2452_v30 = vsel %vm663_vm1, %v3767_v32, 0.0  ;;  %v3188_v29 = vsel %vm663_vm1, %v12033_v60, 0.0  ;;  %v1944_v9 = vmul.f32 1.442695, %v12034_v58  ;;  %3774 = vpow2.f32 %v1942_v39  ;;  %v12047_v31 = vld [vmem:[#allocation10_spill] sm:$0xff] }
 0x399   :  { %v3181_v45 = vadd.f32 %v3180_v54, %v3179_v36  ;;  %v3769_v27 = vpop.eup %3768  ;;  %v2206_v18 = vadd.f32 %v2205_v46, %v2204_v3  ;;  %v2453_v1 = vadd.f32 %v2452_v30, %v2451_v43  ;;  %v3190_v14 = vsel %vm663_vm1, %v12035_v5, 0.0  ;;  %v12043_v36 = vld [vmem:[#allocation381_spill] sm:$0xff] }
 0x39a   :  { %v3771_v7 = vpop.eup %3770  ;;  %v2207_v13 = vsel %vm663_vm1, %v3769_v27, 0.0  ;;  %v3192_v41 = vsel %vm663_vm1, %v12036_v15, 0.0  ;;  %v1946_v52 = vmul.f32 1.442695, %v12037_v8  ;;  %3776 = vpow2.f32 %v1944_v9  ;;  %v12051_v8 = vld [vmem:[#allocation49_spill] sm:$0xff] }
 0x39b   :  { %v3183_v49 = vadd.f32 %v3182_v56, %v3181_v45  ;;  %v2454_v44 = vsel %vm663_vm1, %v3771_v7, 0.0  ;;  %v2208_v63 = vadd.f32 %v2207_v13, %v2206_v18  ;;  %v3194_v33 = vsel %vm663_vm1, %v12038_v61, 0.0  ;;  %v12048_v7 = vld [vmem:[#allocation11_spill] sm:$0xff] }
 0x39c   :  { %v3773_v2 = vpop.eup %3772  ;;  %v2455_v10 = vadd.f32 %v2454_v44, %v2453_v1  ;;  %v3196_v53 = vsel %vm663_vm1, %v12039_v38, 0.0  ;;  %v1948_v0 = vmul.f32 1.442695, %v12040_v6  ;;  %3778 = vpow2.f32 %v1946_v52  ;;  %v12050_v44 = vld [vmem:[#allocation307_spill] sm:$0xff]  ;;  %v12053_v38 = vld [vmem:[#allocation12_spill] sm:$0xff] }
 0x39d   :  { %v3185_v51 = vadd.f32 %v3184_v19, %v3183_v49  ;;  %v2456_v26 = vsel %vm663_vm1, %v3773_v2, 0.0  ;;  %v2209_v50 = vrot.slane %v2208_v63, 4  ;;  %v3198_v48 = vsel %vm663_vm1, %v12041_v40, 0.0 }
 0x39e   :  { %v3775_v12 = vpop.eup %3774  ;;  %v2457_v35 = vadd.f32 %v2456_v26, %v2455_v10  ;;  %v3200_v59 = vsel %vm663_vm1, %v12042_v11, 0.0  ;;  %v1950_v37 = vmul.f32 1.442695, %v12043_v36  ;;  %3780 = vpow2.f32 %v1948_v0 }
 0x39f   :  { %v3187_v17 = vadd.f32 %v3186_v55, %v3185_v51  ;;  %v2458_v21 = vsel %vm663_vm1, %v3775_v12, 0.0  ;;  %v2210_v28 = vadd.f32 %v2209_v50, %v2208_v63  ;;  %v3202_v42 = vsel %vm663_vm1, %v12044_v24, 0.0  ;;  %v12054_v50 = vld [vmem:[#allocation3_spill] sm:$0xff] }
 0x3a0   :  { %v3777_v54 = vpop.eup %3776  ;;  %v2459_v56 = vadd.f32 %v2458_v21, %v2457_v35  ;;  %v3204_v19 = vsel %vm663_vm1, %v12045_v22, 0.0  ;;  %v1952_v39 = vmul.f32 1.442695, %v12046_v4  ;;  %3782 = vpow2.f32 %v1950_v37  ;;  %v12055_v21 = vld [vmem:[#allocation220_spill] sm:$0xff] }
 0x3a1   :  { %v3189_v62 = vadd.f32 %v3188_v29, %v3187_v17  ;;  %v2460_v16 = vsel %vm663_vm1, %v3777_v54, 0.0  ;;  %v2211_v3 = vrot.slane %v2210_v28, 2  ;;  %v3206_v55 = vsel %vm663_vm1, %v12047_v31, 0.0  ;;  %v12049_v17 = vld [vmem:[#allocation198_spill] sm:$0xff] }
 0x3a2   :  { %v3779_v32 = vpop.eup %3778  ;;  %v2461_v43 = vadd.f32 %v2460_v16, %v2459_v56  ;;  %v2987_v46 = vrot.slane %v10086_v25, 4  ;;  %v3208_v60 = vsel %vm663_vm1, %v12048_v7, 0.0  ;;  %3784 = vpow2.f32 %v1952_v39  ;;  %v12059_v39 = vld [vmem:[#allocation199_spill] sm:$0xff] }
 0x3a3   :  { %v3191_v20 = vadd.f32 %v3190_v14, %v3189_v62  ;;  %v2462_v27 = vsel %vm663_vm1, %v3779_v32, 0.0  ;;  %v2212_v58 = vadd.f32 %v2211_v3, %v2210_v28  ;;  %v3210_v18 = vsel %vm663_vm1, %v12049_v17, 0.0  ;;  %v12057_v28 = vld [vmem:[#allocation14_spill] sm:$0xff]  ;;  %v12061_v7 = vld [vmem:[#allocation135_spill] sm:$0xff] }
 0x3a4   :  { %v3781_v51 = vpop.eup %3780  ;;  %v2463_v9 = vadd.f32 %v2462_v27, %v2461_v43  ;;  %v2988_v5 = vadd.f32 %v2987_v46, %v10086_v25  ;;  %v3212_v62 = vsel %vm663_vm1, %v12050_v44, 0.0  ;;  %v3214_v52 = vsel %vm663_vm1, %v12051_v8, 0.0  ;;  %v3254_v3 = vld [vmem:[%s10204_s2] sm:$0x1] }
 0x3a5   :  { %v3193_v47 = vadd.f32 %v3192_v41, %v3191_v20  ;;  %v2464_v1 = vsel %vm663_vm1, %v3781_v51, 0.0  ;;  %v2213_v15 = vrot.slane %v2212_v58, 1  ;;  %v3220_v35 = vsel %vm663_vm1, %v12054_v50, 0.0 }
 0x3a6   :  { %v3783_v13 = vpop.eup %3782  ;;  %v2465_v41 = vadd.f32 %v2464_v1, %v2463_v9  ;;  %v2989_v63 = vrot.slane %v2988_v5, 2  ;;  %v3226_v56 = vsel %vm663_vm1, %v12057_v28, 0.0  ;;  %v12064_v1 = vld [vmem:[#allocation378_spill] sm:$0xff] }
 0x3a7   :  { %v3195_v34 = vadd.f32 %v3194_v33, %v3193_v47  ;;  %v2466_v20 = vsel %vm663_vm1, %v3783_v13, 0.0  ;;  %v12052_v33 = vld [vmem:[#allocation90_spill] sm:$0xff]  ;;  %v2214_v47 = vadd.f32 %v2213_v15, %v2212_v58  ;;  %v12063_v58 = vld [vmem:[#allocation91_spill] sm:$0xff]  ;;  %v12065_v13 = vld [vmem:[#allocation92_spill] sm:$0xff] }
 0x3a8   :  { %v3785_v61 = vpop.eup %3784  ;;  %v3216_v26 = vsel %vm663_vm1, %v12052_v33, 0.0  ;;  %v2467_v12 = vadd.f32 %v2466_v20, %v2465_v41  ;;  %v2990_v0 = vadd.f32 %v2989_v63, %v2988_v5  ;;  %v3236_v9 = vsel %vm663_vm1, %v12063_v58, 0.0  ;;  %v12066_v15 = vld [vmem:[#allocation93_spill] sm:$0xff] }
 0x3a9   :  { %v3197_v57 = vadd.f32 %v3196_v53, %v3195_v34  ;;  %v3218_v53 = vsel %vm663_vm1, %v12053_v38, 0.0  ;;  %v2468_v6 = vsel %vm663_vm1, %v3785_v61, 0.0  ;;  %3786 = vlog2.f32 %v2214_v47  ;;  %v12068_v61 = vld [vmem:[#allocation200_spill] sm:$0xff] }
 0x3aa   :  { %v2991_v54 = vrot.slane %v2990_v0, 1  ;;  %v3238_v5 = vsel %vm663_vm1, %v12064_v1, 0.0  ;;  %v3240_v44 = vsel %vm663_vm1, %v12065_v13, 0.0  ;;  %v3242_v41 = vsel %vm663_vm1, %v12066_v15, 0.0 }
 0x3ab   :  { %v3199_v23 = vadd.f32 %v3198_v48, %v3197_v57  ;;  %v2469_v48 = vadd.f32 %v2468_v6, %v2467_v12  ;;  %v3222_v57 = vsel %vm663_vm1, %v12055_v21, 0.0  ;;  %v3246_v33 = vsel %vm663_vm1, %v12068_v61, 0.0 }
 0x3ac   :  { %v2992_v24 = vadd.f32 %v2991_v54, %v2990_v0 }
 0x3ad   :  { %v3201_v45 = vadd.f32 %v3200_v59, %v3199_v23  ;;  %v12056_v59 = vld [vmem:[#allocation13_spill] sm:$0xff]  ;;  %v2470_v23 = vrot.slane %v2469_v48, 4 }
 0x3ae   :  { %v3224_v36 = vsel %vm663_vm1, %v12056_v59, 0.0 }
 0x3af   :  { %v3203_v49 = vadd.f32 %v3202_v42, %v3201_v45  ;;  %v3787_v16 = vpop.eup %3786  ;;  %v12058_v45 = vld [vmem:[#allocation15_spill] sm:$0xff]  ;;  %v2471_v4 = vadd.f32 %v2470_v23, %v2469_v48 }
 0x3b0   :  { %v3228_v32 = vsel %vm663_vm1, %v12058_v45, 0.0 }
 0x3b1   :  { %v3205_v30 = vadd.f32 %v3204_v19, %v3203_v49  ;;  %v3257_v19 = vmul.f32 0.6931472, %v3787_v16  ;;  %v3230_v49 = vsel %vm663_vm1, %v12059_v39, 0.0  ;;  %v2472_v51 = vrot.slane %v2471_v4, 2 }
 0x3b3   :  { %v3207_v29 = vadd.f32 %v3206_v55, %v3205_v30  ;;  %v3260_v31 = vsub.f32 %v3257_v19, %v2992_v24  ;;  %v12060_v55 = vld [vmem:[#allocation308_spill] sm:$0xff] }
 0x3b4   :  { %v3232_v27 = vsel %vm663_vm1, %v12060_v55, 0.0 }
 0x3b5   :  { %v3209_v14 = vadd.f32 %v3208_v60, %v3207_v29  ;;  %v3262_v30 = vadd.f32 %v3260_v31, %v3254_v3  ;;  %v3234_v60 = vsel %vm663_vm1, %v12061_v7, 0.0 }
 0x3b7   :  { %v3211_v2 = vadd.f32 %v3210_v18, %v3209_v14  ;;  %3265 = vst.msk [vmem:[%s10204_s2] sm:$0x1] %vm12062_vm7, %v3262_v30  ;;  %v2473_v18 = vadd.f32 %v2472_v51, %v2471_v4 }
 0x3b9   :  { %v3213_v10 = vadd.f32 %v3212_v62, %v3211_v2  ;;  %v2474_v2 = vrot.slane %v2473_v18, 1 }
 0x3bb   :  { %v3215_v25 = vadd.f32 %v3214_v52, %v3213_v10  ;;  %v12067_v52 = vld [vmem:[#allocation94_spill] sm:$0xff]  ;;  %v2475_v10 = vadd.f32 %v2474_v2, %v2473_v18 }
 0x3bc   :  { %v3244_v20 = vsel %vm663_vm1, %v12067_v52, 0.0 }
 0x3bd   :  { %v3217_v34 = vadd.f32 %v3216_v26, %v3215_v25  ;;  %3788 = vlog2.f32 %v2475_v10 }
 0x3bf   :  { %v3219_v40 = vadd.f32 %v3218_v53, %v3217_v34 }
 0x3c1   :  { %v3221_v11 = vadd.f32 %v3220_v35, %v3219_v40  ;;  %v3255_v35 = vld [vmem:[%s10204_s2 + $0x1] sm:$0x1] }
 0x3c3   :  { %v3223_v37 = vadd.f32 %v3222_v57, %v3221_v11  ;;  %v3789_v53 = vpop.eup %3788 }
 0x3c4   :  { %v3259_v34 = vmul.f32 0.6931472, %v3789_v53 }
 0x3c5   :  { %v3225_v42 = vadd.f32 %v3224_v36, %v3223_v37 }
 0x3c7   :  { %v3227_v22 = vadd.f32 %v3226_v56, %v3225_v42 }
 0x3c9   :  { %v3229_v43 = vadd.f32 %v3228_v32, %v3227_v22 }
 0x3cb   :  { %v3231_v46 = vadd.f32 %v3230_v49, %v3229_v43 }
 0x3cd   :  { %v3233_v29 = vadd.f32 %v3232_v27, %v3231_v46 }
 0x3cf   :  { %v3235_v17 = vadd.f32 %v3234_v60, %v3233_v29 }
 0x3d1   :  { %v3237_v14 = vadd.f32 %v3236_v9, %v3235_v17 }
 0x3d3   :  { %v3239_v62 = vadd.f32 %v3238_v5, %v3237_v14 }
 0x3d5   :  { %v3241_v8 = vadd.f32 %v3240_v44, %v3239_v62 }
 0x3d7   :  { %v3243_v63 = vadd.f32 %v3242_v41, %v3241_v8 }
 0x3d9   :  { %v3245_v26 = vadd.f32 %v3244_v20, %v3243_v63 }
 0x3db   :  { %v3247_v25 = vadd.f32 %v3246_v33, %v3245_v26 }
 0x3dd   :  { %v3248_v47 = vrot.slane %v3247_v25, 4 }
 0x3df   :  { %v3249_v12 = vadd.f32 %v3248_v47, %v3247_v25 }
 0x3e1   :  { %v3250_v38 = vrot.slane %v3249_v12, 2 }
 0x3e3   :  { %v3251_v6 = vadd.f32 %v3250_v38, %v3249_v12 }
 0x3e5   :  { %v3252_v0 = vrot.slane %v3251_v6, 1 }
 0x3e7   :  { %v3253_v50 = vadd.f32 %v3252_v0, %v3251_v6 }
 0x3e9   :  { %v3261_v40 = vsub.f32 %v3259_v34, %v3253_v50 }
 0x3eb   :  { %v3263_v48 = vadd.f32 %v3261_v40, %v3255_v35 }
 0x3ed   :  { %3266 = vst.msk [vmem:[%s10204_s2 + $0x1] sm:$0x1] %vm12069_vm13, %v3263_v48 }

</bundles_post_ra>
